<compile_context>
chip_gen: v7x
topology: tpu7x:2x2x1
jax: 0.10.0
libtpu: 0.0.40
codegen_flags: <defaults>
</compile_context>

<pallas_src>
import functools

import jax
import jax.numpy as jnp
from jax.experimental import pallas as pl
from jax.experimental.pallas import tpu as pltpu


# ----------------------------------------------------------------------------
# Fused kernel: coarse MLP + conv1 split + per-point MLP + residual (one batch / step)
# ----------------------------------------------------------------------------
def _make_pcn_kernel(feat_dim, n_particles):
    F, N = feat_dim, n_particles
    bf16, f32 = jnp.bfloat16, jnp.float32

    def kernel(x_ref, xcol_ref,
               w1_ref, b1_ref, w2_ref, b2_ref, w3_ref, b3_ref,
               wc1p_ref, wc1g_ref, bc1_ref, wc2_ref, bc2_ref, wc3_ref, bc3_ref,
               o_ref, coarse_scr):
        # ---- coarse MLP: x -> relu(fc1) -> relu(fc2) -> fc3 (feat-major flat row) ----
        x = x_ref[0]                                                     # (1, L) f32
        h = jnp.dot(x.astype(bf16), w1_ref[...],
                    preferred_element_type=f32) + b1_ref[...]
        h = jnp.maximum(h, 0.0)
        h = jnp.dot(h.astype(bf16), w2_ref[...],
                    preferred_element_type=f32) + b2_ref[...]
        h = jnp.maximum(h, 0.0)
        coarse_flat = jnp.dot(h.astype(bf16), w3_ref[...],
                              preferred_element_type=f32) + b3_ref[...]  # (1, F*N)
        # Re-lay the feat-major flat row into a (F, N) tile: F lane-aligned slice stores
        # (N is a multiple of 128, so each slice is lane-tile aligned).
        for f in range(F):
            coarse_scr[f:f + 1, :] = coarse_flat[:, f * N:(f + 1) * N]
        coarse = coarse_scr[...]                                         # (F, N) f32

        # ---- conv1 global term (point-invariant): (512, L) @ (L, 1) + b1 ----
        g1 = jnp.dot(wc1g_ref[...], xcol_ref[0].astype(bf16),
                     preferred_element_type=f32) + bc1_ref[...]          # (512, 1)

        # ---- per-point MLP (the 1x1 convs), feat-major: points on the lane axis ----
        a = jnp.dot(wc1p_ref[...], coarse.astype(bf16),
                    preferred_element_type=f32) + g1                     # (512, N)
        a = jnp.maximum(a, 0.0)                                          # relu(conv1)
        a = jnp.dot(wc2_ref[...], a.astype(bf16),
                    preferred_element_type=f32) + bc2_ref[...]           # (512, N)
        a = jnp.maximum(a, 0.0)                                          # relu(conv2)
        fine = (jnp.dot(wc3_ref[...], a.astype(bf16),
                        preferred_element_type=f32)
                + bc3_ref[...] + coarse)                                 # (F, N) + residual
        o_ref[0] = fine.astype(o_ref.dtype)

    return kernel


# ----------------------------------------------------------------------------
# Parameters (PyTorch layout) and one-time kernel-layout preparation
# ----------------------------------------------------------------------------
def init_pcn_params(key, feat_dim, latent_dim, n_particles, dtype=jnp.float32):
    """PyTorch-layout params with PyTorch-default U[-1/sqrt(fan_in)] init."""
    def linear(k, out_f, in_f):
        kw, kb = jax.random.split(k)
        bound = 1.0 / (in_f ** 0.5)
        w = jax.random.uniform(kw, (out_f, in_f), minval=-bound, maxval=bound, dtype=dtype)
        b = jax.random.uniform(kb, (out_f,), minval=-bound, maxval=bound, dtype=dtype)
        return w, b

    keys = jax.random.split(key, 6)
    p = {}
    p['fc1_w'], p['fc1_b'] = linear(keys[0], 1024, latent_dim)
    p['fc2_w'], p['fc2_b'] = linear(keys[1], 1024, 1024)
    p['fc3_w'], p['fc3_b'] = linear(keys[2], n_particles * feat_dim, 1024)
    p['conv1_w'], p['conv1_b'] = linear(keys[3], 512, feat_dim + latent_dim)  # k=1 squeezed
    p['conv2_w'], p['conv2_b'] = linear(keys[4], 512, 512)
    p['conv3_w'], p['conv3_b'] = linear(keys[5], feat_dim, 512)
    return p


def prepare_kernel_params(p, feat_dim, latent_dim, n_particles):
    """One-time layout plumbing: transposes, conv1 split, bf16 weight storage."""
    F = feat_dim
    bf16 = jnp.bfloat16
    kp = {}
    kp['w_fc1'] = p['fc1_w'].T.astype(bf16)           # (L, 1024)
    kp['b_fc1'] = p['fc1_b'].reshape(1, -1)
    kp['w_fc2'] = p['fc2_w'].T.astype(bf16)           # (1024, 1024)
    kp['b_fc2'] = p['fc2_b'].reshape(1, -1)
    kp['w_fc3'] = p['fc3_w'].T.astype(bf16)           # (1024, N*F) native feat-major cols
    kp['b_fc3'] = p['fc3_b'].reshape(1, -1)
    # Split 1x1 conv1 into point part (coarse channels) and global part (x channels).
    kp['w_c1p'] = p['conv1_w'][:, :F].astype(bf16)    # (512, F)   -> W @ act orientation
    kp['w_c1g'] = p['conv1_w'][:, F:].astype(bf16)    # (512, L)
    kp['b_c1'] = p['conv1_b'].reshape(-1, 1)          # (512, 1) column
    kp['w_c2'] = p['conv2_w'].astype(bf16)            # (512, 512)
    kp['b_c2'] = p['conv2_b'].reshape(-1, 1)          # (512, 1)
    kp['w_c3'] = p['conv3_w'].astype(bf16)            # (F, 512)
    kp['b_c3'] = p['conv3_b'].reshape(-1, 1)          # (F, 1)
    return kp


# ----------------------------------------------------------------------------
# Forward pass (single fused pallas_call, gridded over batch)
# ----------------------------------------------------------------------------
def pcn_decoder_forward(kp, x, *, feat_dim, latent_dim, n_particles):
    F, L, N = feat_dim, latent_dim, n_particles
    if x.ndim == 1:                 # mirrors the torch `x.view(1, -1)` path
        x = x.reshape(1, -1)
    B = x.shape[0]
    HID = kp['w_fc2'].shape[0]      # 1024
    C1 = kp['w_c2'].shape[0]        # 512

    x_row = x.reshape(B, 1, L)      # fc-path operand (row layout)
    x_col = x.reshape(B, L, 1)      # conv1-global operand (column layout; avoids in-kernel transpose)

    flops = 2 * B * (L * HID + HID * HID + HID * N * F
                     + C1 * L + C1 * F * N + C1 * C1 * N + F * C1 * N)
    bytes_accessed = (2 * (L * HID + HID * HID + HID * N * F
                           + C1 * F + C1 * L + C1 * C1 + F * C1)      # bf16 weights
                      + 4 * (2 * HID + N * F + 2 * C1 + F)            # f32 biases
                      + 4 * (2 * B * L + B * F * N))                  # f32 I/O

    const2 = lambda b: (0, 0)
    fine_fm = pl.pallas_call(
        _make_pcn_kernel(F, N),
        out_shape=jax.ShapeDtypeStruct((B, F, N), jnp.float32),
        grid=(B,),
        in_specs=[
            pl.BlockSpec((1, 1, L), lambda b: (b, 0, 0)),   # x (row)
            pl.BlockSpec((1, L, 1), lambda b: (b, 0, 0)),   # x (column)
            pl.BlockSpec((L, HID), const2),                 # fc1 W    (resident)
            pl.BlockSpec((1, HID), const2),                 # fc1 b
            pl.BlockSpec((HID, HID), const2),               # fc2 W    (resident)
            pl.BlockSpec((1, HID), const2),                 # fc2 b
            pl.BlockSpec((HID, N * F), const2),             # fc3 W    (resident, feat-major)
            pl.BlockSpec((1, N * F), const2),               # fc3 b
            pl.BlockSpec((C1, F), const2),                  # conv1 W, coarse part
            pl.BlockSpec((C1, L), const2),                  # conv1 W, global part
            pl.BlockSpec((C1, 1), const2),                  # conv1 b (column)
            pl.BlockSpec((C1, C1), const2),                 # conv2 W  (resident)
            pl.BlockSpec((C1, 1), const2),                  # conv2 b (column)
            pl.BlockSpec((F, C1), const2),                  # conv3 W
            pl.BlockSpec((F, 1), const2),                   # conv3 b (column)
        ],
        out_specs=pl.BlockSpec((1, F, N), lambda b: (b, 0, 0)),
        scratch_shapes=[pltpu.VMEM((F, N), jnp.float32)],
        compiler_params=pltpu.CompilerParams(
            dimension_semantics=("parallel",),
            vmem_limit_bytes=32 * 1024 * 1024),
        cost_estimate=pl.CostEstimate(flops=flops, transcendentals=0,
                                      bytes_accessed=bytes_accessed),
    )(x_row, x_col,
      kp['w_fc1'], kp['b_fc1'], kp['w_fc2'], kp['b_fc2'], kp['w_fc3'], kp['b_fc3'],
      kp['w_c1p'], kp['w_c1g'], kp['b_c1'], kp['w_c2'], kp['b_c2'],
      kp['w_c3'], kp['b_c3'])

    # Cheap 12 KB layout fix-up in the wrapper: (B, F, N) -> (B, N, F), then the
    # trailing .squeeze() matches the torch module (only changes rank when B == 1).
    return jnp.squeeze(jnp.transpose(fine_fm, (0, 2, 1)))


# ----------------------------------------------------------------------------
# Pure-JAX reference that mirrors the PyTorch forward exactly (f32, HIGHEST precision)
# ----------------------------------------------------------------------------
def pcn_decoder_ref(p, x, *, feat_dim, n_particles):
    hp = jax.lax.Precision.HIGHEST
    if x.ndim == 1:
        x = x.reshape(1, -1)
    h = jnp.maximum(jnp.dot(x, p['fc1_w'].T, precision=hp) + p['fc1_b'], 0.0)
    h = jnp.maximum(jnp.dot(h, p['fc2_w'].T, precision=hp) + p['fc2_b'], 0.0)
    coarse = (jnp.dot(h, p['fc3_w'].T, precision=hp) + p['fc3_b']
              ).reshape(-1, feat_dim, n_particles)
    B = coarse.shape[0]
    global_feat = jnp.broadcast_to(x[:, :, None], (B, x.shape[1], n_particles))
    feat = jnp.concatenate([coarse, global_feat], axis=1)
    a = jnp.maximum(jnp.einsum('oc,bcn->bon', p['conv1_w'], feat, precision=hp)
                    + p['conv1_b'][None, :, None], 0.0)
    a = jnp.maximum(jnp.einsum('oc,bcn->bon', p['conv2_w'], a, precision=hp)
                    + p['conv2_b'][None, :, None], 0.0)
    fine = (jnp.einsum('oc,bcn->bon', p['conv3_w'], a, precision=hp)
            + p['conv3_b'][None, :, None] + coarse)
    return jnp.squeeze(jnp.transpose(fine, (0, 2, 1)))


if __name__ == "__main__":
    key = jax.random.PRNGKey(0)
    feat_dim, latent_dim, n_particles, batch = 3, 128, 512, 2

    kinit, kx = jax.random.split(key)
    params = init_pcn_params(kinit, feat_dim, latent_dim, n_particles)
    kparams = prepare_kernel_params(params, feat_dim, latent_dim, n_particles)
    x = jax.random.normal(kx, (batch, latent_dim), dtype=jnp.float32)

    fwd = jax.jit(functools.partial(pcn_decoder_forward, feat_dim=feat_dim,
                                    latent_dim=latent_dim, n_particles=n_particles))
    out = jax.block_until_ready(fwd(kparams, x))

    ref = pcn_decoder_ref(params, x, feat_dim=feat_dim, n_particles=n_particles)
    assert out.shape == (batch, n_particles, feat_dim), out.shape
    max_err = float(jnp.max(jnp.abs(out - ref)))
    # bf16 weight streaming is a deliberate perf tradeoff (review item); tolerance is
    # loosened vs the f32 HIGHEST-precision reference.  A structural bug (wrong conv1
    # split, wrong fc3 layout, missing residual) shows errors of O(0.1+).
    assert jnp.allclose(out, ref, atol=5e-2, rtol=5e-2), max_err

    print("KERNEL_OK")
</pallas_src>

<mosaic_0001>
module attributes {stable_mosaic.version = 11 : i64} {
  func.func @kernel(%arg0: i32, %arg1: memref<1x1x128xf32, #tpu.memory_space<vmem>>, %arg2: memref<1x128x1xf32, #tpu.memory_space<vmem>>, %arg3: memref<128x1024xbf16, #tpu.memory_space<vmem>>, %arg4: memref<1x1024xf32, #tpu.memory_space<vmem>>, %arg5: memref<1024x1024xbf16, #tpu.memory_space<vmem>>, %arg6: memref<1x1024xf32, #tpu.memory_space<vmem>>, %arg7: memref<1024x1536xbf16, #tpu.memory_space<vmem>>, %arg8: memref<1x1536xf32, #tpu.memory_space<vmem>>, %arg9: memref<512x3xbf16, #tpu.memory_space<vmem>>, %arg10: memref<512x128xbf16, #tpu.memory_space<vmem>>, %arg11: memref<512x1xf32, #tpu.memory_space<vmem>>, %arg12: memref<512x512xbf16, #tpu.memory_space<vmem>>, %arg13: memref<512x1xf32, #tpu.memory_space<vmem>>, %arg14: memref<3x512xbf16, #tpu.memory_space<vmem>>, %arg15: memref<3x1xf32, #tpu.memory_space<vmem>>, %arg16: memref<1x3x512xf32, #tpu.memory_space<vmem>>, %arg17: memref<3x512xf32, #tpu.memory_space<vmem>>) attributes {dimension_semantics = [#tpu.dimension_semantics<parallel>], iteration_bounds = array<i64: 2>, scalar_prefetch = 0 : i64, scratch_operands = 1 : i64, tpu.core_type = #tpu.core_type<tc>, window_params = [{transform_indices = @transform_0, window_bounds = array<i64: 1, 1, 128>}, {transform_indices = @transform_1, window_bounds = array<i64: 1, 128, 1>}, {pipeline_mode = #tpu.pipeline_mode<synchronous>, transform_indices = @transform_2, window_bounds = array<i64: 128, 1024>}, {pipeline_mode = #tpu.pipeline_mode<synchronous>, transform_indices = @transform_3, window_bounds = array<i64: 1, 1024>}, {pipeline_mode = #tpu.pipeline_mode<synchronous>, transform_indices = @transform_4, window_bounds = array<i64: 1024, 1024>}, {pipeline_mode = #tpu.pipeline_mode<synchronous>, transform_indices = @transform_5, window_bounds = array<i64: 1, 1024>}, {pipeline_mode = #tpu.pipeline_mode<synchronous>, transform_indices = @transform_6, window_bounds = array<i64: 1024, 1536>}, {pipeline_mode = #tpu.pipeline_mode<synchronous>, transform_indices = @transform_7, window_bounds = array<i64: 1, 1536>}, {pipeline_mode = #tpu.pipeline_mode<synchronous>, transform_indices = @transform_8, window_bounds = array<i64: 512, 3>}, {pipeline_mode = #tpu.pipeline_mode<synchronous>, transform_indices = @transform_9, window_bounds = array<i64: 512, 128>}, {pipeline_mode = #tpu.pipeline_mode<synchronous>, transform_indices = @transform_10, window_bounds = array<i64: 512, 1>}, {pipeline_mode = #tpu.pipeline_mode<synchronous>, transform_indices = @transform_11, window_bounds = array<i64: 512, 512>}, {pipeline_mode = #tpu.pipeline_mode<synchronous>, transform_indices = @transform_12, window_bounds = array<i64: 512, 1>}, {pipeline_mode = #tpu.pipeline_mode<synchronous>, transform_indices = @transform_13, window_bounds = array<i64: 3, 512>}, {pipeline_mode = #tpu.pipeline_mode<synchronous>, transform_indices = @transform_14, window_bounds = array<i64: 3, 1>}, {transform_indices = @transform_15, window_bounds = array<i64: 1, 3, 512>}]} {
    %c0 = arith.constant 0 : index
    %c0_0 = arith.constant 0 : index
    %c0_1 = arith.constant 0 : index
    %0 = vector.load %arg1[%c0, %c0_0, %c0_1] : memref<1x1x128xf32, #tpu.memory_space<vmem>>, vector<1x1x128xf32>
    %1 = vector.shape_cast %0 : vector<1x1x128xf32> to vector<1x128xf32>
    %2 = arith.truncf %1 : vector<1x128xf32> to vector<1x128xbf16>
    %c0_2 = arith.constant 0 : index
    %c0_3 = arith.constant 0 : index
    %3 = vector.load %arg3[%c0_2, %c0_3] : memref<128x1024xbf16, #tpu.memory_space<vmem>>, vector<128x1024xbf16>
    %cst = arith.constant dense<0.000000e+00> : vector<1x1024xf32>
    %4 = tpu.matmul %2, %3, %cst {dimension_numbers = #tpu.dot_dimension_numbers<[1], [0], [0], [1], [0, 0, 1, 1], [], []>} : vector<1x128xbf16>, vector<128x1024xbf16>, vector<1x1024xf32> -> vector<1x1024xf32>
    %c0_4 = arith.constant 0 : index
    %c0_5 = arith.constant 0 : index
    %5 = vector.load %arg4[%c0_4, %c0_5] : memref<1x1024xf32, #tpu.memory_space<vmem>>, vector<1x1024xf32>
    %6 = arith.addf %4, %5 : vector<1x1024xf32>
    %cst_6 = arith.constant 0.000000e+00 : f32
    %7 = vector.broadcast %cst_6 : f32 to vector<1x1024xf32>
    %8 = arith.maximumf %6, %7 : vector<1x1024xf32>
    %9 = arith.truncf %8 : vector<1x1024xf32> to vector<1x1024xbf16>
    %c0_7 = arith.constant 0 : index
    %c0_8 = arith.constant 0 : index
    %10 = vector.load %arg5[%c0_7, %c0_8] : memref<1024x1024xbf16, #tpu.memory_space<vmem>>, vector<1024x1024xbf16>
    %cst_9 = arith.constant dense<0.000000e+00> : vector<1x1024xf32>
    %11 = tpu.matmul %9, %10, %cst_9 {dimension_numbers = #tpu.dot_dimension_numbers<[1], [0], [0], [1], [0, 0, 1, 1], [], []>} : vector<1x1024xbf16>, vector<1024x1024xbf16>, vector<1x1024xf32> -> vector<1x1024xf32>
    %c0_10 = arith.constant 0 : index
    %c0_11 = arith.constant 0 : index
    %12 = vector.load %arg6[%c0_10, %c0_11] : memref<1x1024xf32, #tpu.memory_space<vmem>>, vector<1x1024xf32>
    %13 = arith.addf %11, %12 : vector<1x1024xf32>
    %cst_12 = arith.constant 0.000000e+00 : f32
    %14 = vector.broadcast %cst_12 : f32 to vector<1x1024xf32>
    %15 = arith.maximumf %13, %14 : vector<1x1024xf32>
    %16 = arith.truncf %15 : vector<1x1024xf32> to vector<1x1024xbf16>
    %c0_13 = arith.constant 0 : index
    %c0_14 = arith.constant 0 : index
    %17 = vector.load %arg7[%c0_13, %c0_14] : memref<1024x1536xbf16, #tpu.memory_space<vmem>>, vector<1024x1536xbf16>
    %cst_15 = arith.constant dense<0.000000e+00> : vector<1x1536xf32>
    %18 = tpu.matmul %16, %17, %cst_15 {dimension_numbers = #tpu.dot_dimension_numbers<[1], [0], [0], [1], [0, 0, 1, 1], [], []>} : vector<1x1024xbf16>, vector<1024x1536xbf16>, vector<1x1536xf32> -> vector<1x1536xf32>
    %c0_16 = arith.constant 0 : index
    %c0_17 = arith.constant 0 : index
    %19 = vector.load %arg8[%c0_16, %c0_17] : memref<1x1536xf32, #tpu.memory_space<vmem>>, vector<1x1536xf32>
    %20 = arith.addf %18, %19 : vector<1x1536xf32>
    %21 = vector.extract_strided_slice %20 {offsets = [0, 0], sizes = [1, 512], strides = [1, 1]} : vector<1x1536xf32> to vector<1x512xf32>
    %c0_18 = arith.constant 0 : index
    %c0_19 = arith.constant 0 : index
    %22 = vector.load %arg17[%c0_18, %c0_19] : memref<3x512xf32, #tpu.memory_space<vmem>>, vector<1x512xf32>
    tpu.vector_store %arg17[%c0_18, %c0_19], %21 {strides = array<i32>} : memref<3x512xf32, #tpu.memory_space<vmem>>, vector<1x512xf32>,
    %23 = vector.extract_strided_slice %20 {offsets = [0, 512], sizes = [1, 512], strides = [1, 1]} : vector<1x1536xf32> to vector<1x512xf32>
    %c1 = arith.constant 1 : index
    %c0_20 = arith.constant 0 : index
    %24 = vector.load %arg17[%c1, %c0_20] : memref<3x512xf32, #tpu.memory_space<vmem>>, vector<1x512xf32>
    tpu.vector_store %arg17[%c1, %c0_20], %23 {strides = array<i32>} : memref<3x512xf32, #tpu.memory_space<vmem>>, vector<1x512xf32>,
    %25 = vector.extract_strided_slice %20 {offsets = [0, 1024], sizes = [1, 512], strides = [1, 1]} : vector<1x1536xf32> to vector<1x512xf32>
    %c2 = arith.constant 2 : index
    %c0_21 = arith.constant 0 : index
    %26 = vector.load %arg17[%c2, %c0_21] : memref<3x512xf32, #tpu.memory_space<vmem>>, vector<1x512xf32>
    tpu.vector_store %arg17[%c2, %c0_21], %25 {strides = array<i32>} : memref<3x512xf32, #tpu.memory_space<vmem>>, vector<1x512xf32>,
    %c0_22 = arith.constant 0 : index
    %c0_23 = arith.constant 0 : index
    %27 = vector.load %arg17[%c0_22, %c0_23] : memref<3x512xf32, #tpu.memory_space<vmem>>, vector<3x512xf32>
    %c0_24 = arith.constant 0 : index
    %c0_25 = arith.constant 0 : index
    %28 = vector.load %arg10[%c0_24, %c0_25] : memref<512x128xbf16, #tpu.memory_space<vmem>>, vector<512x128xbf16>
    %c0_26 = arith.constant 0 : index
    %c0_27 = arith.constant 0 : index
    %c0_28 = arith.constant 0 : index
    %29 = vector.load %arg2[%c0_26, %c0_27, %c0_28] : memref<1x128x1xf32, #tpu.memory_space<vmem>>, vector<1x128x1xf32>
    %30 = vector.shape_cast %29 : vector<1x128x1xf32> to vector<128x1xf32>
    %31 = arith.truncf %30 : vector<128x1xf32> to vector<128x1xbf16>
    %cst_29 = arith.constant dense<0.000000e+00> : vector<512x1xf32>
    %32 = tpu.matmul %28, %31, %cst_29 {dimension_numbers = #tpu.dot_dimension_numbers<[1], [0], [0], [1], [0, 0, 1, 1], [], []>} : vector<512x128xbf16>, vector<128x1xbf16>, vector<512x1xf32> -> vector<512x1xf32>
    %c0_30 = arith.constant 0 : index
    %c0_31 = arith.constant 0 : index
    %33 = vector.load %arg11[%c0_30, %c0_31] : memref<512x1xf32, #tpu.memory_space<vmem>>, vector<512x1xf32>
    %34 = arith.addf %32, %33 : vector<512x1xf32>
    %c0_32 = arith.constant 0 : index
    %c0_33 = arith.constant 0 : index
    %35 = vector.load %arg9[%c0_32, %c0_33] : memref<512x3xbf16, #tpu.memory_space<vmem>>, vector<512x3xbf16>
    %36 = arith.truncf %27 : vector<3x512xf32> to vector<3x512xbf16>
    %cst_34 = arith.constant dense<0.000000e+00> : vector<512x512xf32>
    %37 = tpu.matmul %35, %36, %cst_34 {dimension_numbers = #tpu.dot_dimension_numbers<[1], [0], [0], [1], [0, 0, 1, 1], [], []>} : vector<512x3xbf16>, vector<3x512xbf16>, vector<512x512xf32> -> vector<512x512xf32>
    %38 = vector.broadcast %34 : vector<512x1xf32> to vector<512x512xf32>
    %39 = arith.addf %37, %38 : vector<512x512xf32>
    %cst_35 = arith.constant 0.000000e+00 : f32
    %40 = vector.broadcast %cst_35 : f32 to vector<512x512xf32>
    %41 = arith.maximumf %39, %40 : vector<512x512xf32>
    %c0_36 = arith.constant 0 : index
    %c0_37 = arith.constant 0 : index
    %42 = vector.load %arg12[%c0_36, %c0_37] : memref<512x512xbf16, #tpu.memory_space<vmem>>, vector<512x512xbf16>
    %43 = arith.truncf %41 : vector<512x512xf32> to vector<512x512xbf16>
    %cst_38 = arith.constant dense<0.000000e+00> : vector<512x512xf32>
    %44 = tpu.matmul %42, %43, %cst_38 {dimension_numbers = #tpu.dot_dimension_numbers<[1], [0], [0], [1], [0, 0, 1, 1], [], []>} : vector<512x512xbf16>, vector<512x512xbf16>, vector<512x512xf32> -> vector<512x512xf32>
    %c0_39 = arith.constant 0 : index
    %c0_40 = arith.constant 0 : index
    %45 = vector.load %arg13[%c0_39, %c0_40] : memref<512x1xf32, #tpu.memory_space<vmem>>, vector<512x1xf32>
    %46 = vector.broadcast %45 : vector<512x1xf32> to vector<512x512xf32>
    %47 = arith.addf %44, %46 : vector<512x512xf32>
    %cst_41 = arith.constant 0.000000e+00 : f32
    %48 = vector.broadcast %cst_41 : f32 to vector<512x512xf32>
    %49 = arith.maximumf %47, %48 : vector<512x512xf32>
    %c0_42 = arith.constant 0 : index
    %c0_43 = arith.constant 0 : index
    %50 = vector.load %arg14[%c0_42, %c0_43] : memref<3x512xbf16, #tpu.memory_space<vmem>>, vector<3x512xbf16>
    %51 = arith.truncf %49 : vector<512x512xf32> to vector<512x512xbf16>
    %cst_44 = arith.constant dense<0.000000e+00> : vector<3x512xf32>
    %52 = tpu.matmul %50, %51, %cst_44 {dimension_numbers = #tpu.dot_dimension_numbers<[1], [0], [0], [1], [0, 0, 1, 1], [], []>} : vector<3x512xbf16>, vector<512x512xbf16>, vector<3x512xf32> -> vector<3x512xf32>
    %c0_45 = arith.constant 0 : index
    %c0_46 = arith.constant 0 : index
    %53 = vector.load %arg15[%c0_45, %c0_46] : memref<3x1xf32, #tpu.memory_space<vmem>>, vector<3x1xf32>
    %54 = vector.broadcast %53 : vector<3x1xf32> to vector<3x512xf32>
    %55 = arith.addf %52, %54 : vector<3x512xf32>
    %56 = arith.addf %55, %27 : vector<3x512xf32>
    %c0_47 = arith.constant 0 : index
    %c0_48 = arith.constant 0 : index
    %c0_49 = arith.constant 0 : index
    %57 = vector.load %arg16[%c0_47, %c0_48, %c0_49] : memref<1x3x512xf32, #tpu.memory_space<vmem>>, vector<1x3x512xf32>
    %58 = vector.shape_cast %57 : vector<1x3x512xf32> to vector<3x512xf32>
    %59 = vector.shape_cast %56 : vector<3x512xf32> to vector<1x3x512xf32>
    tpu.vector_store %arg16[%c0_47, %c0_48, %c0_49], %59 {strides = array<i32>} : memref<1x3x512xf32, #tpu.memory_space<vmem>>, vector<1x3x512xf32>,
    return
  }
  func.func @transform_0(%arg0: i32) -> (i32, i32, i32) {
    %c0_i32 = arith.constant 0 : i32
    %c0_i32_0 = arith.constant 0 : i32
    %c0_i32_1 = arith.constant 0 : i32
    return %arg0, %c0_i32, %c0_i32_0 : i32, i32, i32
  }
  func.func @transform_1(%arg0: i32) -> (i32, i32, i32) {
    %c0_i32 = arith.constant 0 : i32
    %c0_i32_0 = arith.constant 0 : i32
    %c0_i32_1 = arith.constant 0 : i32
    return %arg0, %c0_i32, %c0_i32_0 : i32, i32, i32
  }
  func.func @transform_2(%arg0: i32) -> (i32, i32) {
    %c0_i32 = arith.constant 0 : i32
    %c0_i32_0 = arith.constant 0 : i32
    %c0_i32_1 = arith.constant 0 : i32
    return %c0_i32, %c0_i32_0 : i32, i32
  }
  func.func @transform_3(%arg0: i32) -> (i32, i32) {
    %c0_i32 = arith.constant 0 : i32
    %c0_i32_0 = arith.constant 0 : i32
    %c0_i32_1 = arith.constant 0 : i32
    return %c0_i32, %c0_i32_0 : i32, i32
  }
  func.func @transform_4(%arg0: i32) -> (i32, i32) {
    %c0_i32 = arith.constant 0 : i32
    %c0_i32_0 = arith.constant 0 : i32
    %c0_i32_1 = arith.constant 0 : i32
    return %c0_i32, %c0_i32_0 : i32, i32
  }
  func.func @transform_5(%arg0: i32) -> (i32, i32) {
    %c0_i32 = arith.constant 0 : i32
    %c0_i32_0 = arith.constant 0 : i32
    %c0_i32_1 = arith.constant 0 : i32
    return %c0_i32, %c0_i32_0 : i32, i32
  }
  func.func @transform_6(%arg0: i32) -> (i32, i32) {
    %c0_i32 = arith.constant 0 : i32
    %c0_i32_0 = arith.constant 0 : i32
    %c0_i32_1 = arith.constant 0 : i32
    return %c0_i32, %c0_i32_0 : i32, i32
  }
  func.func @transform_7(%arg0: i32) -> (i32, i32) {
    %c0_i32 = arith.constant 0 : i32
    %c0_i32_0 = arith.constant 0 : i32
    %c0_i32_1 = arith.constant 0 : i32
    return %c0_i32, %c0_i32_0 : i32, i32
  }
  func.func @transform_8(%arg0: i32) -> (i32, i32) {
    %c0_i32 = arith.constant 0 : i32
    %c0_i32_0 = arith.constant 0 : i32
    %c0_i32_1 = arith.constant 0 : i32
    return %c0_i32, %c0_i32_0 : i32, i32
  }
  func.func @transform_9(%arg0: i32) -> (i32, i32) {
    %c0_i32 = arith.constant 0 : i32
    %c0_i32_0 = arith.constant 0 : i32
    %c0_i32_1 = arith.constant 0 : i32
    return %c0_i32, %c0_i32_0 : i32, i32
  }
  func.func @transform_10(%arg0: i32) -> (i32, i32) {
    %c0_i32 = arith.constant 0 : i32
    %c0_i32_0 = arith.constant 0 : i32
    %c0_i32_1 = arith.constant 0 : i32
    return %c0_i32, %c0_i32_0 : i32, i32
  }
  func.func @transform_11(%arg0: i32) -> (i32, i32) {
    %c0_i32 = arith.constant 0 : i32
    %c0_i32_0 = arith.constant 0 : i32
    %c0_i32_1 = arith.constant 0 : i32
    return %c0_i32, %c0_i32_0 : i32, i32
  }
  func.func @transform_12(%arg0: i32) -> (i32, i32) {
    %c0_i32 = arith.constant 0 : i32
    %c0_i32_0 = arith.constant 0 : i32
    %c0_i32_1 = arith.constant 0 : i32
    return %c0_i32, %c0_i32_0 : i32, i32
  }
  func.func @transform_13(%arg0: i32) -> (i32, i32) {
    %c0_i32 = arith.constant 0 : i32
    %c0_i32_0 = arith.constant 0 : i32
    %c0_i32_1 = arith.constant 0 : i32
    return %c0_i32, %c0_i32_0 : i32, i32
  }
  func.func @transform_14(%arg0: i32) -> (i32, i32) {
    %c0_i32 = arith.constant 0 : i32
    %c0_i32_0 = arith.constant 0 : i32
    %c0_i32_1 = arith.constant 0 : i32
    return %c0_i32, %c0_i32_0 : i32, i32
  }
  func.func @transform_15(%arg0: i32) -> (i32, i32, i32) {
    %c0_i32 = arith.constant 0 : i32
    %c0_i32_0 = arith.constant 0 : i32
    %c0_i32_1 = arith.constant 0 : i32
    return %arg0, %c0_i32, %c0_i32_0 : i32, i32, i32
  }
}

</mosaic_0001>

<bundles_post_ra>
// kernel: pcn_decoder_forward.1
= control target key start
LH: loop header
LB: loop body
LE: loop exit
PB: predicated region body
PF: predicated region fallthrough
CT: control target
= control target key end

     0   :  { %s22466_s0 = inlined_call_operand.hbm [shape: f32[2,1,128], index: 0, kind: input, shape index: {}]   ;;  %s22467_s1 = inlined_call_operand.vmem [shape: f32[2,128,1], index: 1, kind: input, shape index: {}]   ;;  %s22468_s2 = inlined_call_operand.hbm [shape: bf16[128,1024], index: 2, kind: input, shape index: {}]   ;;  %s22469_s3 = inlined_call_operand.hbm [shape: f32[1,1024], index: 3, kind: input, shape index: {}]   ;;  %s22470_s4 = inlined_call_operand.hbm [shape: bf16[1024,1024], index: 4, kind: input, shape index: {}]   ;;  %s22471_s5 = inlined_call_operand.hbm [shape: f32[1,1024], index: 5, kind: input, shape index: {}]   ;;  %s22472_s6 = inlined_call_operand.hbm [shape: bf16[1024,1536], index: 6, kind: input, shape index: {}]   ;;  %s22473_s7 = inlined_call_operand.hbm [shape: f32[1,1536], index: 7, kind: input, shape index: {}]   ;;  %s22474_s8 = inlined_call_operand.vmem [shape: bf16[512,3], index: 8, kind: input, shape index: {}]   ;;  %s22475_s9 = inlined_call_operand.hbm [shape: bf16[512,128], index: 9, kind: input, shape index: {}]   ;;  %s22476_s10 = inlined_call_operand.vmem [shape: f32[512,1], index: 10, kind: input, shape index: {}]   ;;  %s22477_s11 = inlined_call_operand.hbm [shape: bf16[512,512], index: 11, kind: input, shape index: {}]   ;;  %s22478_s12 = inlined_call_operand.vmem [shape: f32[512,1], index: 12, kind: input, shape index: {}]   ;;  %s22479_s13 = inlined_call_operand.hbm [shape: bf16[3,512], index: 13, kind: input, shape index: {}]   ;;  %s22480_s14 = inlined_call_operand.vmem [shape: f32[3,1], index: 14, kind: input, shape index: {}]   ;;  %s22481_s15 = inlined_call_operand.vmem [shape: f32[2,3,512], index: 15, kind: output, shape index: {}]  }
   0x1   :  { %22490 = sst [smem:[#allocation28_spill]] %s22467_s1 }
   0x2   :  { %22491 = sst [smem:[#allocation29_spill]] %s22474_s8 }
   0x3   :  { %22492 = sst [smem:[#allocation30_spill]] %s22476_s10 }
   0x4   :  { %22493 = sst [smem:[#allocation31_spill]] %s22478_s12 }
   0x5   :  { %22494 = sst [smem:[#allocation32_spill]] %s22480_s14 }
   0x6   :  { %22495 = sst [smem:[#allocation33_spill]] %s22481_s15 }
   0x7   :  { %20 = vsyncpa [#allocation4], 0 }
   0x8   :  { %22 = vsyncpa [#allocation4 + $0x1], 0 }
   0x9   :  { %23 = vsyncpa [#allocation6], 0 }
   0xa   :  { %24 = vsyncpa [#allocation9], 0 }
   0xb   :  { %25 = vsyncpa [#allocation12], 0 }
   0xc   :  { %26 = vsyncpa [#allocation15], 0 }
   0xd   :  { %27 = vsyncpa [#allocation18], 0  ;;  %s20911_s18 = smov 0   ;;  %s20913_s19 = smov 0  }
   0xe   :  { %s20915_s20 = smov 0   ;;  %s20917_s21 = smov 0  }
   0xf LB: > { %s20809_s22 = smov [#allocation5]   ;;  %s20932_s24 = sadd.s32 4294967295, %s20807_s21   ;;  %s20807_s21 = sphi %s20917_s21, %s22530_s21   ;;  %s20803_s20 = sphi %s20915_s20, %s22529_s20   ;;  %s20799_s19 = sphi %s20913_s19, %s22528_s19   ;;  %s20795_s18 = sphi %s20911_s18, %s22527_s18  }
  0x10   : > { %s401_s23 = sshll.u32 %s20809_s22, 4  ;;  %p16509_p0 = scmp.ge.s32.totalorder %s20807_s21, 1  ;;  %s20937_s23 = int_to_ptr.vmem [resolvable:$true] %s401_s23 }
  0x11   : > { %p22486_p1 = scmp.eq.s32.totalorder %s20932_s24, 0  ;;  %p389_p2 = scmp.lt.s32.totalorder %s20807_s21, 3 }
  0x12   : > { %s20810_s26 = smov [#allocation8]   ;;  %s20811_s29 = smov [#allocation11]  }
  0x13   : > { %p20939_p3 = pnand %p16509_p0, %p389_p2  ;;  %s425_s27 = sshll.u32 %s20810_s26, 4  ;;  %s20951_s27 = int_to_ptr.vmem [resolvable:$true] %s425_s27 }
  0x14   : > { %s449_s30 = sshll.u32 %s20811_s29, 4  ;;  %s20471_s22 = scalar_lea.hbm %s22468_s2, 8192  ;;  %s20953_s30 = int_to_ptr.vmem [resolvable:$true] %s449_s30 }
  0x15   : > { %s22496_s25 = scalar_select %p20939_p3, 1, 0 }
  0x16   : > { %p18949_p4 = pneg %p20939_p3  ;;  %p20472_p6 = scmp.ne.s32.totalorder %s22468_s2, %s20471_s22 }
  0x17   : > { %22497 = sst [smem:[#allocation25_spill]] %s22496_s25  ;;  %p20478_p10 = scmp.lt.u32.totalorder %s20471_s22, %s22468_s2 }
  0x18   : > { %p20947_p5 = pnand %p18949_p4, %p22486_p1 }
  0x1a   : > { %p20963_p7 = pneg %p20947_p5 }
  0x1c   : > { %p20474_p8 = pnand %p20963_p7, %p20472_p6 }
  0x1e   : > { %p20475_p9 = pneg %p20474_p8 }
  0x20   : > { %p20480_p11 = pnand %p20478_p10, %p20475_p9 }
  0x22   : > { %20483 = shalt.err (!%p20480_p11)
}
  0x23   : > { %s20484_s14 = scalar_lea.vmem %s20937_s23, 8192  ;;  %p20492_p2 = scmp.lt.s32.totalorder %s20937_s23, %s20937_s23 }
  0x24   : > { %p20485_p12 = scmp.ne.s32.totalorder %s20937_s23, %s20484_s14  ;;  %p20493_p4 = scmp.lt.s32.totalorder %s20484_s14, %s20484_s14 }
  0x26   : > { %p20487_p13 = pnand %p20485_p12, %p20963_p7  ;;  %p20494_p6 = por %p20493_p4, %p20492_p2 }
  0x28   : > { %p20488_p0 = pneg %p20487_p13 }
  0x2a   : > { %p20495_p8 = pnand %p20494_p6, %p20488_p0 }
  0x2c   : > { %20498 = shalt.err (!%p20495_p8)
}
  0x2d   : > { %s20812_s15 = smov 512   ;;  %s20813_s12 = smov 32  }
  0x2e   : > { %18952 = dma.hbm_to_vmem [thread:$0]  (!%p20947_p5), %s22468_s2, 8192, %s20937_s23, [#allocation6], %s20812_s15, %s20812_s15, %s20813_s12  }
  0x2f   : > { %s20499_s10 = scalar_lea.hbm %s22470_s4, 65536 }
  0x30   : > { %p20500_p9 = scmp.ne.s32.totalorder %s22470_s4, %s20499_s10  ;;  %p20506_p12 = scmp.lt.u32.totalorder %s20499_s10, %s22470_s4 }
  0x32   : > { %p20502_p10 = pnand %p20500_p9, %p20963_p7 }
  0x34   : > { %p20503_p11 = pneg %p20502_p10 }
  0x36   : > { %p20508_p13 = pnand %p20506_p12, %p20503_p11 }
  0x38   : > { %20511 = shalt.err (!%p20508_p13)
}
  0x39   : > { %s20512_s23 = scalar_lea.vmem %s20951_s27, 65536  ;;  %p20520_p6 = scmp.lt.s32.totalorder %s20951_s27, %s20951_s27 }
  0x3a   : > { %p20513_p0 = scmp.ne.s32.totalorder %s20951_s27, %s20512_s23  ;;  %p20521_p8 = scmp.lt.s32.totalorder %s20512_s23, %s20512_s23 }
  0x3c   : > { %p20515_p2 = pnand %p20513_p0, %p20963_p7  ;;  %p20522_p9 = por %p20521_p8, %p20520_p6 }
  0x3e   : > { %p20516_p4 = pneg %p20515_p2 }
  0x40   : > { %p20523_p10 = pnand %p20522_p9, %p20516_p4 }
  0x42   : > { %20526 = shalt.err (!%p20523_p10)
}
  0x43   : > { %18958 = dma.hbm_to_vmem [thread:$0]  (!%p20947_p5), %s22470_s4, 65536, %s20951_s27, [#allocation9], %s20812_s15, %s20812_s15, %s20813_s12  }
  0x44   : > { %s20527_s16 = scalar_lea.hbm %s22472_s6, 98304 }
  0x45   : > { %p20528_p11 = scmp.ne.s32.totalorder %s22472_s6, %s20527_s16  ;;  %p20534_p0 = scmp.lt.u32.totalorder %s20527_s16, %s22472_s6 }
  0x47   : > { %p20530_p12 = pnand %p20528_p11, %p20963_p7 }
  0x49   : > { %p20531_p13 = pneg %p20530_p12 }
  0x4b   : > { %p20536_p2 = pnand %p20534_p0, %p20531_p13 }
  0x4d   : > { %20539 = shalt.err (!%p20536_p2)
}
  0x4e   : > { %s20540_s27 = scalar_lea.vmem %s20953_s30, 98304  ;;  %p20548_p9 = scmp.lt.s32.totalorder %s20953_s30, %s20953_s30 }
  0x4f   : > { %p20541_p4 = scmp.ne.s32.totalorder %s20953_s30, %s20540_s27  ;;  %p20549_p10 = scmp.lt.s32.totalorder %s20540_s27, %s20540_s27 }
  0x51   : > { %p20543_p6 = pnand %p20541_p4, %p20963_p7  ;;  %p20550_p11 = por %p20549_p10, %p20548_p9 }
  0x53   : > { %p20544_p8 = pneg %p20543_p6 }
  0x55   : > { %p20551_p12 = pnand %p20550_p11, %p20544_p8 }
  0x57   : > { %20554 = shalt.err (!%p20551_p12)
}
  0x58   : > { %s20814_s15 = smov 768   ;;  %s20815_s12 = smov 48  }
  0x59   : > { %18964 = dma.hbm_to_vmem [thread:$0]  (!%p20947_p5), %s22472_s6, 98304, %s20953_s30, [#allocation12], %s20814_s15, %s20814_s15, %s20815_s12  }
  0x5a   : > { %s20816_s8 = smov [#allocation14]   ;;  %s20555_s17 = scalar_lea.hbm %s22475_s9, 4096 }
  0x5b   : > { %s476_s10 = sshll.u32 %s20816_s8, 4  ;;  %p20556_p13 = scmp.ne.s32.totalorder %s22475_s9, %s20555_s17  ;;  %s477_s10 = int_to_ptr.vmem [resolvable:$true] %s476_s10 }
  0x5c   : > { %p20562_p4 = scmp.lt.u32.totalorder %s20555_s17, %s22475_s9 }
  0x5d   : > { %p20558_p0 = pnand %p20556_p13, %p20963_p7 }
  0x5f   : > { %p20559_p2 = pneg %p20558_p0 }
  0x61   : > { %p20564_p6 = pnand %p20562_p4, %p20559_p2 }
  0x63   : > { %20567 = shalt.err (!%p20564_p6)
}
  0x64   : > { %s20568_s30 = scalar_lea.vmem %s477_s10, 4096  ;;  %p20576_p11 = scmp.lt.s32.totalorder %s477_s10, %s477_s10 }
  0x65   : > { %p20569_p8 = scmp.ne.s32.totalorder %s477_s10, %s20568_s30  ;;  %p20577_p12 = scmp.lt.s32.totalorder %s20568_s30, %s20568_s30 }
  0x67   : > { %p20571_p9 = pnand %p20569_p8, %p20963_p7  ;;  %p20578_p1 = por %p20577_p12, %p20576_p11 }
  0x69   : > { %p20572_p10 = pneg %p20571_p9 }
  0x6b   : > { %p20579_p3 = pnand %p20578_p1, %p20572_p10 }
  0x6d   : > { %20582 = shalt.err (!%p20579_p3)
}
  0x6e   : > { %s20817_s15 = smov 64   ;;  %s20818_s12 = smov 4  }
  0x6f   : > { %18970 = dma.hbm_to_vmem [thread:$0]  (!%p20947_p5), %s22475_s9, 4096, %s477_s10, [#allocation15], %s20817_s15, %s20817_s15, %s20818_s12  }
  0x70   : > { %s20819_s8 = smov [#allocation7]   ;;  %s20820_s16 = smov [#allocation10]  }
  0x71   : > { %s415_s25 = sshll.u32 %s20819_s8, 4  ;;  %s439_s17 = sshll.u32 %s20820_s16, 4  ;;  %s416_s25 = int_to_ptr.vmem [resolvable:$true] %s415_s25  ;;  %s21048_s17 = int_to_ptr.vmem [resolvable:$true] %s439_s17 }
  0x72   : > { %s20583_s14 = scalar_lea.hbm %s22469_s3, 128 }
  0x73   : > { %p20584_p1 = scmp.ne.s32.totalorder %s22469_s3, %s20583_s14  ;;  %p20590_p0 = scmp.lt.u32.totalorder %s20583_s14, %s22469_s3 }
  0x75   : > { %p20586_p3 = pnand %p20584_p1, %p20963_p7 }
  0x77   : > { %p20587_p13 = pneg %p20586_p3 }
  0x79   : > { %p20592_p2 = pnand %p20590_p0, %p20587_p13 }
  0x7b   : > { %20595 = shalt.err (!%p20592_p2)
}
  0x7c   : > { %s20596_s15 = scalar_lea.vmem %s416_s25, 128  ;;  %p20604_p9 = scmp.lt.s32.totalorder %s416_s25, %s416_s25 }
  0x7d   : > { %p20597_p4 = scmp.ne.s32.totalorder %s416_s25, %s20596_s15  ;;  %p20605_p10 = scmp.lt.s32.totalorder %s20596_s15, %s20596_s15 }
  0x7f   : > { %p20599_p6 = pnand %p20597_p4, %p20963_p7  ;;  %p20606_p11 = por %p20605_p10, %p20604_p9 }
  0x81   : > { %p20600_p8 = pneg %p20599_p6 }
  0x83   : > { %p20607_p12 = pnand %p20606_p11, %p20600_p8 }
  0x85   : > { %20610 = shalt.err (!%p20607_p12)
}
  0x86   : > { %18955 = dma.hbm_to_vmem [thread:$0]  (!%p20947_p5), %s22469_s3, 128, %s416_s25, [#allocation6]  }
  0x87   : > { %s20611_s22 = scalar_lea.hbm %s22471_s5, 128 }
  0x88   : > { %p20612_p1 = scmp.ne.s32.totalorder %s22471_s5, %s20611_s22  ;;  %p20618_p0 = scmp.lt.u32.totalorder %s20611_s22, %s22471_s5 }
  0x8a   : > { %p20614_p3 = pnand %p20612_p1, %p20963_p7 }
  0x8c   : > { %p20615_p13 = pneg %p20614_p3 }
  0x8e   : > { %p20620_p2 = pnand %p20618_p0, %p20615_p13 }
  0x90   : > { %20623 = shalt.err (!%p20620_p2)
}
  0x91   : > { %s20624_s25 = scalar_lea.vmem %s21048_s17, 128  ;;  %p20632_p9 = scmp.lt.s32.totalorder %s21048_s17, %s21048_s17 }
  0x92   : > { %p20625_p4 = scmp.ne.s32.totalorder %s21048_s17, %s20624_s25  ;;  %p20633_p10 = scmp.lt.s32.totalorder %s20624_s25, %s20624_s25 }
  0x94   : > { %p20627_p6 = pnand %p20625_p4, %p20963_p7  ;;  %p20634_p11 = por %p20633_p10, %p20632_p9 }
  0x96   : > { %p20628_p8 = pneg %p20627_p6 }
  0x98   : > { %p20635_p12 = pnand %p20634_p11, %p20628_p8 }
  0x9a   : > { %20638 = shalt.err (!%p20635_p12)
}
  0x9b   : > { %18961 = dma.hbm_to_vmem [thread:$0]  (!%p20947_p5), %s22471_s5, 128, %s21048_s17, [#allocation9]  }
  0x9c   : > { %s20821_s15 = smov [#allocation13]   ;;  %s20822_s1 = smov [#allocation16]  }
  0x9d   : > { %s463_s12 = sshll.u32 %s20821_s15, 4  ;;  %s492_s8 = sshll.u32 %s20822_s1, 4  ;;  %s464_s12 = int_to_ptr.vmem [resolvable:$true] %s463_s12  ;;  %s21091_s8 = int_to_ptr.vmem [resolvable:$true] %s492_s8 }
  0x9e   : > { %s20639_s29 = scalar_lea.hbm %s22473_s7, 192 }
  0x9f   : > { %p20640_p1 = scmp.ne.s32.totalorder %s22473_s7, %s20639_s29  ;;  %p20646_p0 = scmp.lt.u32.totalorder %s20639_s29, %s22473_s7 }
  0xa1   : > { %p20642_p3 = pnand %p20640_p1, %p20963_p7 }
  0xa3   : > { %p20643_p13 = pneg %p20642_p3 }
  0xa5   : > { %p20648_p2 = pnand %p20646_p0, %p20643_p13 }
  0xa7   : > { %20651 = shalt.err (!%p20648_p2)
}
  0xa8   : > { %s20652_s25 = scalar_lea.vmem %s464_s12, 192  ;;  %p20660_p9 = scmp.lt.s32.totalorder %s464_s12, %s464_s12 }
  0xa9   : > { %p20653_p4 = scmp.ne.s32.totalorder %s464_s12, %s20652_s25  ;;  %p20661_p10 = scmp.lt.s32.totalorder %s20652_s25, %s20652_s25 }
  0xab   : > { %p20655_p6 = pnand %p20653_p4, %p20963_p7  ;;  %p20662_p11 = por %p20661_p10, %p20660_p9 }
  0xad   : > { %p20656_p8 = pneg %p20655_p6 }
  0xaf   : > { %p20663_p12 = pnand %p20662_p11, %p20656_p8 }
  0xb1   : > { %20666 = shalt.err (!%p20663_p12)
}
  0xb2   : > { %18967 = dma.hbm_to_vmem [thread:$0]  (!%p20947_p5), %s22473_s7, 192, %s464_s12, [#allocation12]  }
  0xb3   : > { %s20667_s16 = scalar_lea.hbm %s22477_s11, 16384 }
  0xb4   : > { %p20668_p1 = scmp.ne.s32.totalorder %s22477_s11, %s20667_s16  ;;  %p20674_p0 = scmp.lt.u32.totalorder %s20667_s16, %s22477_s11 }
  0xb6   : > { %p20670_p3 = pnand %p20668_p1, %p20963_p7 }
  0xb8   : > { %p20671_p13 = pneg %p20670_p3 }
  0xba   : > { %p20676_p2 = pnand %p20674_p0, %p20671_p13 }
  0xbc   : > { %20679 = shalt.err (!%p20676_p2)
}
  0xbd   : > { %s20680_s12 = scalar_lea.vmem %s21091_s8, 16384  ;;  %p20688_p9 = scmp.lt.s32.totalorder %s21091_s8, %s21091_s8 }
  0xbe   : > { %p20681_p4 = scmp.ne.s32.totalorder %s21091_s8, %s20680_s12  ;;  %p20689_p10 = scmp.lt.s32.totalorder %s20680_s12, %s20680_s12 }
  0xc0   : > { %p20683_p6 = pnand %p20681_p4, %p20963_p7  ;;  %p20690_p11 = por %p20689_p10, %p20688_p9 }
  0xc2   : > { %p20684_p8 = pneg %p20683_p6 }
  0xc4   : > { %p20691_p12 = pnand %p20690_p11, %p20684_p8 }
  0xc6   : > { %20694 = shalt.err (!%p20691_p12)
}
  0xc7   : > { %s20823_s30 = smov 256   ;;  %s20824_s17 = smov 16  }
  0xc8   : > { %18973 = dma.hbm_to_vmem [thread:$0]  (!%p20947_p5), %s22477_s11, 16384, %s21091_s8, [#allocation15], %s20823_s30, %s20823_s30, %s20824_s17  }
  0xc9   : > { %s20825_s10 = smov [#allocation17]   ;;  %s20695_s22 = scalar_lea.hbm %s22479_s13, 128 }
  0xca   : > { %s509_s15 = sshll.u32 %s20825_s10, 4  ;;  %p20696_p1 = scmp.ne.s32.totalorder %s22479_s13, %s20695_s22  ;;  %s510_s15 = int_to_ptr.vmem [resolvable:$true] %s509_s15 }
  0xcb   : > { %p20702_p0 = scmp.lt.u32.totalorder %s20695_s22, %s22479_s13 }
  0xcc   : > { %p20698_p3 = pnand %p20696_p1, %p20963_p7 }
  0xce   : > { %p20699_p13 = pneg %p20698_p3 }
  0xd0   : > { %p20704_p2 = pnand %p20702_p0, %p20699_p13 }
  0xd2   : > { %20707 = shalt.err (!%p20704_p2)
}
  0xd3   : > { %s20708_s8 = scalar_lea.vmem %s510_s15, 128  ;;  %p20716_p9 = scmp.lt.s32.totalorder %s510_s15, %s510_s15 }
  0xd4   : > { %p20709_p4 = scmp.ne.s32.totalorder %s510_s15, %s20708_s8  ;;  %p20717_p10 = scmp.lt.s32.totalorder %s20708_s8, %s20708_s8 }
  0xd6   : > { %p20711_p6 = pnand %p20709_p4, %p20963_p7  ;;  %p20718_p11 = por %p20717_p10, %p20716_p9 }
  0xd8   : > { %p20712_p8 = pneg %p20711_p6 }
  0xda   : > { %p20719_p12 = pnand %p20718_p11, %p20712_p8 }
  0xdc   : > { %20722 = shalt.err (!%p20719_p12)
}
  0xdd   : > { %18976 = dma.hbm_to_vmem [thread:$0]  (!%p20947_p5), %s22479_s13, 128, %s510_s15, [#allocation18]  }
  0xde   : > { %s21153_s26 = sadd.s32 1, %s20807_s21   ;;  %s40_s25 = sadd.s32 1, %s20803_s20 }
  0xdf   : > { %s37_s28 = ssub.s32 %s20807_s21, %s21153_s26  ;;  %p47_p1 = scmp.ne.s32.totalorder %s20803_s20, %s20799_s19 }
  0xe0   : > { %p38_p7 = scmp.eq.s32.totalorder %s37_s28, 0  ;;  %p48_p3 = scmp.eq.s32.totalorder %s20807_s21, 0 }
  0xe1   : > { %p53_p13 = scmp.ne.s32.totalorder %s20799_s19, %s20795_s18  ;;  %p22500_p2 = scmp.eq.s32.totalorder %s20932_s24, 0 }
  0xe2   : > { %s21164_s23 = scalar_select %p38_p7, %s20803_s20, %s40_s25  }
  0xe3   : > { %p49_p0 = por %p48_p3, %p47_p1  ;;  %p21168_p4 = por %p22500_p2, %p53_p13 }
  0xe4   : > { %p18990_p6 = scmp.lt.s32.totalorder %s20807_s21, 2  ;;  %s523_s1 = sand.u32 1, %s20803_s20  }
  0xe5   : > { %s16520_s15 = sshll.u32 %s20807_s21, 4  ;;  %s526_s16 = scalar_lea.vmem [#allocation3], %s523_s1 }
  0xe6   : > { %s533_s22 = sshll.u32 %s526_s16, 4  ;;  %s21178_s27 = scalar_lea.hbm %s22466_s0, %s16520_s15  ;;  %s21180_s22 = int_to_ptr.vmem [resolvable:$true] %s533_s22 }
  0xe7   : > { %p21182_p5 = pnand %p18990_p6, %p49_p0  ;;  %s524_s21 = scalar_lea.sflag [#allocation4], %s523_s1 }
  0xe8   : > { %s20723_s12 = scalar_lea.hbm %s21178_s27, 16  ;;  %s20728_s17 = scalar_lea.hbm %s22466_s0, 32 }
  0xe9   : > { %p20724_p8 = scmp.ne.s32.totalorder %s21178_s27, %s20723_s12  ;;  %p20725_p9 = pneg %p21182_p5 }
  0xea   : > { %p20729_p12 = scmp.lt.u32.totalorder %s21178_s27, %s22466_s0  ;;  %p20730_p7 = scmp.lt.u32.totalorder %s20728_s17, %s20723_s12 }
  0xeb   : > { %p20726_p10 = pnand %p20725_p9, %p20724_p8  ;;  %p20732_p3 = scmp.lt.u32.totalorder %s20723_s12, %s21178_s27 }
  0xec   : > { %p20731_p1 = por %p20730_p7, %p20729_p12 }
  0xed   : > { %p20727_p11 = pneg %p20726_p10 }
  0xee   : > { %p20733_p13 = por %p20732_p3, %p20731_p1 }
  0xf0   : > { %p20734_p0 = pnand %p20733_p13, %p20727_p11 }
  0xf2   : > { %20737 = shalt.err (!%p20734_p0)
}
  0xf3   : > { %s20738_s1 = scalar_lea.vmem %s21180_s22, 16  ;;  %s20826_s15 = smov [#allocation3]  }
  0xf4   : > { %p20739_p2 = scmp.ne.s32.totalorder %s21180_s22, %s20738_s1  ;;  %s20743_s16 = sshll.u32 %s20826_s15, 4  ;;  %s20744_s16 = int_to_ptr.vmem [resolvable:$false] %s20743_s16 }
  0xf5   : > { %s20745_s29 = scalar_lea.vmem %s20744_s16, 32  ;;  %p20746_p10 = scmp.lt.s32.totalorder %s21180_s22, %s20744_s16 }
  0xf6   : > { %p20741_p6 = pnand %p20739_p2, %p20725_p9  ;;  %p20747_p12 = scmp.lt.s32.totalorder %s20745_s29, %s20738_s1 }
  0xf8   : > { %p20742_p8 = pneg %p20741_p6  ;;  %p20748_p7 = por %p20747_p12, %p20746_p10 }
  0xfa   : > { %p20749_p1 = pnand %p20748_p7, %p20742_p8 }
  0xfc   : > { %20752 = shalt.err (!%p20749_p1)
}
  0xfd   : > { %18980 = dma.hbm_to_vmem [thread:$0]  (!%p21182_p5), %s21178_s27, 16, %s21180_s22, %s524_s21  }
  0xfe   : > { %s22503_s14 = sld [smem:[#allocation25_spill]] }
 0x104   : > { %p22504_p11 = scmp.ne.s32.totalorder %s22503_s14, 0 }
 0x106   : > { %550 = sbr.rel (%p22504_p11) target bundleno = 3390 (0xd3e), region = 80 }
 0x10d   : > { %s552_s12 = sand.u32 1, %s20799_s19  }
 0x10e   : > { %s553_s8 = scalar_lea.sflag [#allocation4], %s552_s12  ;;  %s21214_s30 = scalar_lea.vmem [#allocation3], %s552_s12 }
 0x10f   : > { %20770 = dma.done.wait (%p21168_p4), %s553_s8, 16  }
 0x110   : > { %20772 = vsyncadd (%p21168_p4), %s553_s8, 4294967280  ;;  %p22505_p9 = scmp.eq.s32.totalorder %s20932_s24, 0 }
 0x112   : > { %20774 = dma.done.wait (%p22505_p9), [#allocation6], 8320   ;;  %p22506_p3 = pmov %p22505_p9 }
 0x114   : > { %20776 = vsyncadd (%p22506_p3), [#allocation6], 4294958976  ;;  %p22507_p5 = pmov %p22506_p3 }
 0x115   : > { %p22508_p13 = pmov %p22506_p3 }
 0x116   : > { %20778 = dma.done.wait (%p22507_p5), [#allocation9], 65664  }
 0x117   : > { %20780 = vsyncadd (%p22508_p13), [#allocation9], 4294901632  ;;  %p22509_p0 = pmov %p22506_p3 }
 0x119   : > { %20782 = dma.done.wait (%p22509_p0), [#allocation12], 98496   ;;  %p22510_p2 = pmov %p22509_p0 }
 0x11a   : > { %p22511_p4 = pmov %p22509_p0 }
 0x11b   : > { %20784 = vsyncadd (%p22510_p2), [#allocation12], 4294868800 }
 0x11c   : > { %20786 = dma.done.wait (%p22511_p4), [#allocation15], 20480   ;;  %p22512_p6 = pmov %p22509_p0 }
 0x11d   : > { %p22513_p8 = pmov %p22509_p0 }
 0x11e   : > { %20788 = vsyncadd (%p22512_p6), [#allocation15], 4294946816 }
 0x11f   : > { %20790 = dma.done.wait (%p22513_p8), [#allocation18], 128   ;;  %p22514_p10 = pmov %p22509_p0 }
 0x120   : > { %v20827_v0 = vmov 0   ;;  %v655_v1 = vld [vmem:[#allocation5] sm:$0xff]  ;;  %v656_v14 = vld [vmem:[#allocation5 + $0x8] sm:$0xff]  ;;  %v657_v58 = vld [vmem:[#allocation5 + $0x10] sm:$0xff]  ;;  %p642_p12 = scmp.lt.s32.totalorder %s20932_s24, 1  ;;  %s22517_s18 = sld [smem:[#allocation28_spill]] }
 0x121   : > { %20792 = vsyncadd (%p22514_p10), [#allocation18], 4294967168  ;;  %1113 = vmatprep.mubr.bf16.mxu0 %v20827_v0  ;;  %1154 = vmatprep.mubr.bf16.mxu1 %v20827_v0  ;;  %v659_v2 = vld [vmem:[#allocation5 + $0x20] sm:$0xff]  ;;  %v660_v15 = vld [vmem:[#allocation5 + $0x28] sm:$0xff]  ;;  %vm12085_vm1 = vcmask 1040384   ;;  %vm12086_vm2 = vcmask 1041408  }
 0x122   : > { %19053 = vset.pattern.permute.xlu0 %v20827_v0  ;;  %19054 = vset.pattern.permute.xlu1 %v20827_v0  ;;  %v663_v3 = vld [vmem:[#allocation5 + $0x40] sm:$0xff]  ;;  %v16536_v4 = vcombine.high %v655_v1, %v659_v2  ;;  %v16535_v5 = vcombine.low %v655_v1, %v659_v2  ;;  %v664_v16 = vld [vmem:[#allocation5 + $0x48] sm:$0xff]  ;;  %v16538_v18 = vcombine.high %v656_v14, %v660_v15  ;;  %v661_v59 = vld [vmem:[#allocation5 + $0x30] sm:$0xff]  ;;  %s22532_s24 = smov (!%p642_p12, %s20932_s24), 1  ;;  %s22520_s25 = sld [smem:[#allocation29_spill]]  ;;  %vm11988_vm3 = vcmask 23552  }
 0x123   : > { %v667_v6 = vld [vmem:[#allocation5 + $0x60] sm:$0xff]  ;;  %v668_v17 = vld [vmem:[#allocation5 + $0x68] sm:$0xff]  ;;  %v16537_v19 = vcombine.low %v656_v14, %v660_v15  ;;  %v16540_v2 = vcombine.high %v657_v58, %v661_v59  ;;  %v677_v14 = vld [vmem:[#allocation5 + $0xb0] sm:$0xff]  ;;  %s18137_s10 = sshll.u32 %s22532_s24, 7  ;;  %s22521_s16 = sld [smem:[#allocation30_spill]] }
 0x124   : > { %v16544_v7 = vcombine.high %v663_v3, %v667_v6  ;;  %v671_v8 = vld [vmem:[#allocation5 + $0x80] sm:$0xff]  ;;  %1081 = vmatprep.subr.bf16.mxu0 %v16536_v4  ;;  %v16543_v10 = vcombine.low %v663_v3, %v667_v6  ;;  %v16546_v20 = vcombine.high %v664_v16, %v668_v17  ;;  %v672_v22 = vld [vmem:[#allocation5 + $0x88] sm:$0xff]  ;;  %1122 = vmatprep.subr.bf16.mxu1 %v16538_v18  ;;  %v665_v4 = vld [vmem:[#allocation5 + $0x50] sm:$0xff]  ;;  %s22522_s22 = sld [smem:[#allocation31_spill]]  ;;  %s18138_s17 = sshll.u32 %s22532_s24, 4 }
 0x125   : > { %v675_v9 = vld [vmem:[#allocation5 + $0xa0] sm:$0xff]  ;;  %1082 = vmatpush1.bf16.msra.mxu0 %v16535_v5  ;;  %v676_v23 = vld [vmem:[#allocation5 + $0xa8] sm:$0xff]  ;;  %1123 = vmatpush1.bf16.msra.mxu1 %v16537_v19  ;;  %v16545_v27 = vcombine.low %v664_v16, %v668_v17  ;;  %v669_v5 = vld [vmem:[#allocation5 + $0x70] sm:$0xff]  ;;  %s22525_s15 = sld [smem:[#allocation33_spill]] }
 0x126   : > { %1083 = vmatprep.subr.bf16.mxu0 %v16544_v7  ;;  %v16552_v11 = vcombine.high %v671_v8, %v675_v9  ;;  %v679_v12 = vld [vmem:[#allocation5 + $0xc0] sm:$0xff]  ;;  %v16551_v21 = vcombine.low %v671_v8, %v675_v9  ;;  %1124 = vmatprep.subr.bf16.mxu1 %v16546_v20  ;;  %v16554_v28 = vcombine.high %v672_v22, %v676_v23  ;;  %v680_v30 = vld [vmem:[#allocation5 + $0xc8] sm:$0xff]  ;;  %v658_v9 = vld [vmem:[#allocation5 + $0x18] sm:$0xff]  ;;  %s21491_s21 = scalar_lea.vmem %s22517_s18, %s18137_s10 }
 0x127   : > { %v683_v13 = vld [vmem:[#allocation5 + $0xe0] sm:$0xff]  ;;  %v684_v31 = vld [vmem:[#allocation5 + $0xe8] sm:$0xff]  ;;  %v16553_v35 = vcombine.low %v672_v22, %v676_v23  ;;  %v16539_v8 = vcombine.low %v657_v58, %v661_v59  ;;  %v16547_v16 = vcombine.low %v665_v4, %v669_v5  ;;  %v666_v17 = vld [vmem:[#allocation5 + $0x58] sm:$0xff] }
 0x128   : > { %v16560_v24 = vcombine.high %v679_v12, %v683_v13  ;;  %v687_v25 = vld [vmem:[#allocation5 + $0x100] sm:$0xff]  ;;  %v16559_v29 = vcombine.low %v679_v12, %v683_v13  ;;  %v16562_v36 = vcombine.high %v680_v30, %v684_v31  ;;  %v688_v38 = vld [vmem:[#allocation5 + $0x108] sm:$0xff]  ;;  %v16561_v43 = vcombine.low %v680_v30, %v684_v31  ;;  %v673_v13 = vld [vmem:[#allocation5 + $0x90] sm:$0xff] }
 0x129   : > { %1084 = vmatpush1.bf16.msra.mxu0 %v16543_v10  ;;  %v691_v26 = vld [vmem:[#allocation5 + $0x120] sm:$0xff]  ;;  %1125 = vmatpush1.bf16.msra.mxu1 %v16545_v27  ;;  %v692_v39 = vld [vmem:[#allocation5 + $0x128] sm:$0xff]  ;;  %v662_v10 = vld [vmem:[#allocation5 + $0x38] sm:$0xff]  ;;  %v16556_v19 = vcombine.high %v673_v13, %v677_v14 }
 0x12a   : > { %1085 = vmatprep.subr.bf16.mxu0 %v16552_v11  ;;  %v16568_v32 = vcombine.high %v687_v25, %v691_v26  ;;  %v695_v33 = vld [vmem:[#allocation5 + $0x140] sm:$0xff]  ;;  %1126 = vmatprep.subr.bf16.mxu1 %v16554_v28  ;;  %v16567_v37 = vcombine.low %v687_v25, %v691_v26  ;;  %v16570_v44 = vcombine.high %v688_v38, %v692_v39  ;;  %v696_v46 = vld [vmem:[#allocation5 + $0x148] sm:$0xff]  ;;  %v670_v18 = vld [vmem:[#allocation5 + $0x78] sm:$0xff] }
 0x12b   : > { %v699_v34 = vld [vmem:[#allocation5 + $0x160] sm:$0xff]  ;;  %v700_v47 = vld [vmem:[#allocation5 + $0x168] sm:$0xff]  ;;  %v16569_v51 = vcombine.low %v688_v38, %v692_v39  ;;  %v16548_v11 = vcombine.high %v665_v4, %v669_v5  ;;  %v16542_v15 = vcombine.high %v658_v9, %v662_v10  ;;  %v681_v20 = vld [vmem:[#allocation5 + $0xd0] sm:$0xff]  ;;  %v16541_v22 = vcombine.low %v658_v9, %v662_v10  ;;  %s651_s29 = scalar_lea.vmem %s22525_s15, %s18138_s17 }
 0x12c   : > { %v16576_v40 = vcombine.high %v695_v33, %v699_v34  ;;  %v703_v41 = vld [vmem:[#allocation5 + $0x180] sm:$0xff]  ;;  %v16575_v45 = vcombine.low %v695_v33, %v699_v34  ;;  %v16578_v52 = vcombine.high %v696_v46, %v700_v47  ;;  %v704_v54 = vld [vmem:[#allocation5 + $0x188] sm:$0xff]  ;;  %v16577_v57 = vcombine.low %v696_v46, %v700_v47  ;;  %v689_v25 = vld [vmem:[#allocation5 + $0x110] sm:$0xff] }
 0x12d   : > { %1086 = vmatpush1.bf16.msra.mxu0 %v16551_v21  ;;  %v707_v42 = vld [vmem:[#allocation5 + $0x1a0] sm:$0xff]  ;;  %1127 = vmatpush1.bf16.msra.mxu1 %v16553_v35  ;;  %v708_v55 = vld [vmem:[#allocation5 + $0x1a8] sm:$0xff]  ;;  %v685_v21 = vld [vmem:[#allocation5 + $0xf0] sm:$0xff]  ;;  %v16550_v23 = vcombine.high %v666_v17, %v670_v18  ;;  %v16549_v30 = vcombine.low %v666_v17, %v670_v18 }
 0x12e   : > { %1087 = vmatprep.subr.bf16.mxu0 %v16560_v24  ;;  %1128 = vmatprep.subr.bf16.mxu1 %v16562_v36  ;;  %v16584_v48 = vcombine.high %v703_v41, %v707_v42  ;;  %v711_v49 = vld [vmem:[#allocation5 + $0x1c0] sm:$0xff]  ;;  %v16583_v53 = vcombine.low %v703_v41, %v707_v42  ;;  %v16586_v60 = vcombine.high %v704_v54, %v708_v55  ;;  %v653_v62 = vld [vmem:[%s21214_s30] sm:$0x1]  ;;  %v693_v26 = vld [vmem:[#allocation5 + $0x130] sm:$0xff] }
 0x12f   : > { %v715_v50 = vld [vmem:[#allocation5 + $0x1e0] sm:$0xff]  ;;  %v712_v63 = vld [vmem:[#allocation5 + $0x1c8] sm:$0xff]  ;;  %v16585_v3 = vcombine.low %v704_v54, %v708_v55  ;;  %v21245_v6 = vpack.c.bf16 %v653_v62, %v653_v62  ;;  %v16555_v24 = vcombine.low %v673_v13, %v677_v14  ;;  %v674_v27 = vld [vmem:[#allocation5 + $0x98] sm:$0xff]  ;;  %v16563_v34 = vcombine.low %v681_v20, %v685_v21 }
 0x130   : > { %v16592_v56 = vcombine.high %v711_v49, %v715_v50  ;;  %v16591_v61 = vcombine.low %v711_v49, %v715_v50  ;;  %v716_v1 = vld [vmem:[#allocation5 + $0x1e8] sm:$0xff]  ;;  %v678_v28 = vld [vmem:[#allocation5 + $0xb8] sm:$0xff]  ;;  %v697_v35 = vld [vmem:[#allocation5 + $0x150] sm:$0xff]  ;;  %v16571_v42 = vcombine.low %v689_v25, %v693_v26 }
 0x131   : > { %1088 = vmatpush1.bf16.msra.mxu0 %v16559_v29  ;;  %1129 = vmatpush1.bf16.msra.mxu1 %v16561_v43  ;;  %v16594_v7 = vcombine.high %v712_v63, %v716_v1  ;;  %v16593_v12 = vcombine.low %v712_v63, %v716_v1  ;;  %v16564_v29 = vcombine.high %v681_v20, %v685_v21  ;;  %v682_v31 = vld [vmem:[#allocation5 + $0xd8] sm:$0xff]  ;;  %v701_v36 = vld [vmem:[#allocation5 + $0x170] sm:$0xff]  ;;  %v1261_v59 = vld [vmem:[#allocation8] sm:$0xff] }
 0x132   : > { %1089 = vmatprep.subr.bf16.mxu0 %v16568_v32  ;;  %1130 = vmatprep.subr.bf16.mxu1 %v16570_v44  ;;  %v686_v32 = vld [vmem:[#allocation5 + $0xf8] sm:$0xff]  ;;  %v16558_v33 = vcombine.high %v674_v27, %v678_v28  ;;  %v16557_v38 = vcombine.low %v674_v27, %v678_v28  ;;  %v705_v43 = vld [vmem:[#allocation5 + $0x190] sm:$0xff]  ;;  %v16579_v50 = vcombine.low %v697_v35, %v701_v36  ;;  %v1269_v4 = vld [vmem:[#allocation8 + $0x40] sm:$0xff] }
 0x133   : > { %v690_v39 = vld [vmem:[#allocation5 + $0x118] sm:$0xff]  ;;  %v16566_v41 = vcombine.high %v682_v31, %v686_v32  ;;  %v709_v44 = vld [vmem:[#allocation5 + $0x1b0] sm:$0xff]  ;;  %v16565_v46 = vcombine.low %v682_v31, %v686_v32  ;;  %v1273_v5 = vld [vmem:[#allocation8 + $0x60] sm:$0xff] }
 0x134   : > { %v698_v47 = vld [vmem:[#allocation5 + $0x158] sm:$0xff]  ;;  %v16587_v58 = vcombine.low %v705_v43, %v709_v44  ;;  %v1262_v9 = vld [vmem:[#allocation8 + $0x8] sm:$0xff]  ;;  %v1277_v13 = vld [vmem:[#allocation8 + $0x80] sm:$0xff]  ;;  %v16607_v20 = vcombine.low %v1269_v4, %v1273_v5 }
 0x135   : > { %1090 = vmatpush1.bf16.msra.mxu0 %v16567_v37  ;;  %1131 = vmatpush1.bf16.msra.mxu1 %v16569_v51  ;;  %v16572_v37 = vcombine.high %v689_v25, %v693_v26  ;;  %v713_v51 = vld [vmem:[#allocation5 + $0x1d0] sm:$0xff]  ;;  %v706_v55 = vld [vmem:[#allocation5 + $0x198] sm:$0xff]  ;;  %v1281_v14 = vld [vmem:[#allocation8 + $0xa0] sm:$0xff] }
 0x136   : > { %1091 = vmatprep.subr.bf16.mxu0 %v16576_v40  ;;  %1132 = vmatprep.subr.bf16.mxu1 %v16578_v52  ;;  %v694_v40 = vld [vmem:[#allocation5 + $0x138] sm:$0xff]  ;;  %v717_v52 = vld [vmem:[#allocation5 + $0x1f0] sm:$0xff]  ;;  %v1285_v21 = vld [vmem:[#allocation8 + $0xc0] sm:$0xff]  ;;  %v16615_v28 = vcombine.low %v1277_v13, %v1281_v14 }
 0x137   : > { %v16574_v49 = vcombine.high %v690_v39, %v694_v40  ;;  %v16573_v54 = vcombine.low %v690_v39, %v694_v40  ;;  %v714_v63 = vld [vmem:[#allocation5 + $0x1d8] sm:$0xff]  ;;  %v1266_v10 = vld [vmem:[#allocation8 + $0x28] sm:$0xff] }
 0x138   : > { %v718_v1 = vld [vmem:[#allocation5 + $0x1f8] sm:$0xff]  ;;  %v1270_v17 = vld [vmem:[#allocation8 + $0x48] sm:$0xff] }
 0x139   : > { %1092 = vmatpush1.bf16.msra.mxu0 %v16575_v45  ;;  %1133 = vmatpush1.bf16.msra.mxu1 %v16577_v57  ;;  %v16580_v45 = vcombine.high %v697_v35, %v701_v36  ;;  %v1274_v18 = vld [vmem:[#allocation8 + $0x68] sm:$0xff] }
 0x13a   : > { %1093 = vmatprep.subr.bf16.mxu0 %v16584_v48  ;;  %1134 = vmatprep.subr.bf16.mxu1 %v16586_v60  ;;  %v702_v48 = vld [vmem:[#allocation5 + $0x178] sm:$0xff]  ;;  %v1265_v60 = vld [vmem:[#allocation8 + $0x20] sm:$0xff]  ;;  %v1278_v25 = vld [vmem:[#allocation8 + $0x88] sm:$0xff]  ;;  %v16610_v27 = vcombine.high %v1270_v17, %v1274_v18  ;;  %v16609_v32 = vcombine.low %v1270_v17, %v1274_v18 }
 0x13b   : > { %v16582_v57 = vcombine.high %v698_v47, %v702_v48  ;;  %v16581_v62 = vcombine.low %v698_v47, %v702_v48  ;;  %v1282_v26 = vld [vmem:[#allocation8 + $0xa8] sm:$0xff] }
 0x13c   : > { %v16618_v35 = vcombine.high %v1278_v25, %v1282_v26  ;;  %v16617_v40 = vcombine.low %v1278_v25, %v1282_v26  ;;  %v1302_v48 = vld [vmem:[#allocation8 + $0x148] sm:$0xff] }
 0x13d   : > { %1094 = vmatpush1.bf16.msra.mxu0 %v16583_v53  ;;  %1135 = vmatpush1.bf16.msra.mxu1 %v16585_v3  ;;  %v16588_v53 = vcombine.high %v705_v43, %v709_v44  ;;  %v16595_v3 = vcombine.low %v713_v51, %v717_v52  ;;  %v1309_v44 = vld [vmem:[#allocation8 + $0x180] sm:$0xff]  ;;  %v1334_v18 = vld [vmem:[#allocation8 + $0x248] sm:$0xff] }
 0x13e   : > { %1095 = vmatprep.subr.bf16.mxu0 %v16592_v56  ;;  %1136 = vmatprep.subr.bf16.mxu1 %v16594_v7  ;;  %v710_v56 = vld [vmem:[#allocation5 + $0x1b8] sm:$0xff]  ;;  %v16600_v7 = vcombine.high %v1261_v59, %v1265_v60  ;;  %v1342_v26 = vld [vmem:[#allocation8 + $0x288] sm:$0xff] }
 0x141   : > { %1096 = vmatpush1.bf16.msra.mxu0 %v16591_v61  ;;  %1137 = vmatpush1.bf16.msra.mxu1 %v16593_v12  ;;  %v16596_v61 = vcombine.high %v713_v51, %v717_v52  ;;  %v16599_v12 = vcombine.low %v1261_v59, %v1265_v60  ;;  %v1317_v52 = vld [vmem:[#allocation8 + $0x1c0] sm:$0xff] }
 0x142   : > { %1163 = vmatprep.subr.bf16.mxu0 %v16540_v2  ;;  %1204 = vmatprep.subr.bf16.mxu1 %v16542_v15  ;;  %v16590_v2 = vcombine.high %v706_v55, %v710_v56  ;;  %v16608_v15 = vcombine.high %v1269_v4, %v1273_v5  ;;  %v1325_v60 = vld [vmem:[#allocation8 + $0x200] sm:$0xff] }
 0x143   : > { %v1333_v5 = vld [vmem:[#allocation8 + $0x240] sm:$0xff] }
 0x144   : > { %1114 = vmatmul.mubr.bf16.vlgmr.msra.gmra.mrb[0].mxu0 %v21245_v6  ;;  %1155 = vmatmul.mubr.bf16.vlgmr.msra.gmra.mrb[0].mxu1 %v21245_v6 }
 0x145   : > { %1164 = vmatpush1.bf16.msra.mxu0 %v16539_v8  ;;  %1195 = vmatprep.mubr.bf16.mxu0 %v20827_v0  ;;  %v16589_v8 = vcombine.low %v706_v55, %v710_v56  ;;  %v1310_v56 = vld [vmem:[#allocation8 + $0x188] sm:$0xff] }
 0x146   : > { %1165 = vmatprep.subr.bf16.mxu0 %v16548_v11  ;;  %1205 = vmatpush1.bf16.msra.mxu1 %v16541_v22  ;;  %v16598_v11 = vcombine.high %v714_v63, %v718_v1  ;;  %v1289_v22 = vld [vmem:[#allocation8 + $0xe0] sm:$0xff] }
 0x147   : > { %1236 = vmatprep.mubr.bf16.mxu1 %v20827_v0  ;;  %1206 = vmatprep.subr.bf16.mxu1 %v16550_v23  ;;  %v16616_v23 = vcombine.high %v1277_v13, %v1281_v14  ;;  %v16624_v31 = vcombine.high %v1285_v21, %v1289_v22  ;;  %v16623_v36 = vcombine.low %v1285_v21, %v1289_v22  ;;  %v1341_v14 = vld [vmem:[#allocation8 + $0x280] sm:$0xff] }
 0x148   : > { %v1349_v22 = vld [vmem:[#allocation8 + $0x2c0] sm:$0xff] }
 0x149   : > { %1166 = vmatpush1.bf16.msra.mxu0 %v16547_v16  ;;  %v16597_v16 = vcombine.low %v714_v63, %v718_v1  ;;  %v1318_v1 = vld [vmem:[#allocation8 + $0x1c8] sm:$0xff] }
 0x14a   : > { %1167 = vmatprep.subr.bf16.mxu0 %v16556_v19  ;;  %1207 = vmatpush1.bf16.msra.mxu1 %v16549_v30  ;;  %v16602_v19 = vcombine.high %v1262_v9, %v1266_v10  ;;  %v1297_v30 = vld [vmem:[#allocation8 + $0x120] sm:$0xff] }
 0x14b   : > { %1208 = vmatprep.subr.bf16.mxu1 %v16558_v33  ;;  %v1286_v33 = vld [vmem:[#allocation8 + $0xc8] sm:$0xff] }
 0x14d   : > { %1168 = vmatpush1.bf16.msra.mxu0 %v16555_v24  ;;  %v16601_v24 = vcombine.low %v1262_v9, %v1266_v10  ;;  %v1326_v10 = vld [vmem:[#allocation8 + $0x208] sm:$0xff] }
 0x14e   : > { %1169 = vmatprep.subr.bf16.mxu0 %v16564_v29  ;;  %1209 = vmatpush1.bf16.msra.mxu1 %v16557_v38  ;;  %v1293_v29 = vld [vmem:[#allocation8 + $0x100] sm:$0xff] }
 0x14f   : > { %1210 = vmatprep.subr.bf16.mxu1 %v16566_v41  ;;  %v1305_v38 = vld [vmem:[#allocation8 + $0x160] sm:$0xff]  ;;  %v16632_v39 = vcombine.high %v1293_v29, %v1297_v30  ;;  %v1294_v41 = vld [vmem:[#allocation8 + $0x108] sm:$0xff]  ;;  %v16631_v43 = vcombine.low %v1293_v29, %v1297_v30 }
 0x150   : > { %v1357_v30 = vld [vmem:[#allocation8 + $0x300] sm:$0xff] }
 0x151   : > { %1170 = vmatpush1.bf16.msra.mxu0 %v16563_v34  ;;  %v1290_v34 = vld [vmem:[#allocation8 + $0xe8] sm:$0xff] }
 0x152   : > { %1171 = vmatprep.subr.bf16.mxu0 %v16572_v37  ;;  %1211 = vmatpush1.bf16.msra.mxu1 %v16565_v46  ;;  %v1301_v37 = vld [vmem:[#allocation8 + $0x140] sm:$0xff]  ;;  %v16625_v47 = vcombine.low %v1286_v33, %v1290_v34 }
 0x153   : > { %1212 = vmatprep.subr.bf16.mxu1 %v16574_v49  ;;  %v16640_v46 = vcombine.high %v1301_v37, %v1305_v38  ;;  %v1306_v49 = vld [vmem:[#allocation8 + $0x168] sm:$0xff]  ;;  %v16639_v51 = vcombine.low %v1301_v37, %v1305_v38  ;;  %v1365_v38 = vld [vmem:[#allocation8 + $0x340] sm:$0xff] }
 0x154   : > { %v16641_v63 = vcombine.low %v1302_v48, %v1306_v49 }
 0x155   : > { %1172 = vmatpush1.bf16.msra.mxu0 %v16571_v42  ;;  %v1298_v42 = vld [vmem:[#allocation8 + $0x128] sm:$0xff] }
 0x156   : > { %1173 = vmatprep.subr.bf16.mxu0 %v16580_v45  ;;  %1213 = vmatpush1.bf16.msra.mxu1 %v16573_v54  ;;  %v1313_v45 = vld [vmem:[#allocation8 + $0x1a0] sm:$0xff]  ;;  %v16633_v55 = vcombine.low %v1294_v41, %v1298_v42 }
 0x157   : > { %1214 = vmatprep.subr.bf16.mxu1 %v16582_v57  ;;  %v16648_v54 = vcombine.high %v1309_v44, %v1313_v45  ;;  %v1314_v57 = vld [vmem:[#allocation8 + $0x1a8] sm:$0xff]  ;;  %v16647_v59 = vcombine.low %v1309_v44, %v1313_v45 }
 0x158   : > { %v16649_v9 = vcombine.low %v1310_v56, %v1314_v57 }
 0x159   : > { %1174 = vmatpush1.bf16.msra.mxu0 %v16579_v50  ;;  %v16634_v50 = vcombine.high %v1294_v41, %v1298_v42  ;;  %v1358_v42 = vld [vmem:[#allocation8 + $0x308] sm:$0xff] }
 0x15a   : > { %1175 = vmatprep.subr.bf16.mxu0 %v16588_v53  ;;  %1215 = vmatpush1.bf16.msra.mxu1 %v16581_v62  ;;  %v1321_v53 = vld [vmem:[#allocation8 + $0x1e0] sm:$0xff] }
 0x15b   : > { %1216 = vmatprep.subr.bf16.mxu1 %v16590_v2  ;;  %v16656_v62 = vcombine.high %v1317_v52, %v1321_v53  ;;  %v1322_v2 = vld [vmem:[#allocation8 + $0x1e8] sm:$0xff]  ;;  %v16655_v4 = vcombine.low %v1317_v52, %v1321_v53 }
 0x15c   : > { %v16657_v17 = vcombine.low %v1318_v1, %v1322_v2  ;;  %v1370_v52 = vld [vmem:[#allocation8 + $0x368] sm:$0xff] }
 0x15d   : > { %1176 = vmatpush1.bf16.msra.mxu0 %v16587_v58  ;;  %v16642_v58 = vcombine.high %v1302_v48, %v1306_v49  ;;  %v1366_v48 = vld [vmem:[#allocation8 + $0x348] sm:$0xff]  ;;  %v1373_v49 = vld [vmem:[#allocation8 + $0x380] sm:$0xff] }
 0x15e   : > { %1177 = vmatprep.subr.bf16.mxu0 %v16596_v61  ;;  %1217 = vmatpush1.bf16.msra.mxu1 %v16589_v8  ;;  %v1329_v61 = vld [vmem:[#allocation8 + $0x220] sm:$0xff] }
 0x15f   : > { %1218 = vmatprep.subr.bf16.mxu1 %v16598_v11  ;;  %v16664_v8 = vcombine.high %v1325_v60, %v1329_v61  ;;  %v1330_v11 = vld [vmem:[#allocation8 + $0x228] sm:$0xff]  ;;  %v16663_v13 = vcombine.low %v1325_v60, %v1329_v61 }
 0x160   : > { %v16665_v25 = vcombine.low %v1326_v10, %v1330_v11  ;;  %v1378_v60 = vld [vmem:[#allocation8 + $0x3a8] sm:$0xff] }
 0x161   : > { %1178 = vmatpush1.bf16.msra.mxu0 %v16595_v3  ;;  %v16650_v3 = vcombine.high %v1310_v56, %v1314_v57  ;;  %v1374_v56 = vld [vmem:[#allocation8 + $0x388] sm:$0xff]  ;;  %v1381_v57 = vld [vmem:[#allocation8 + $0x3c0] sm:$0xff] }
 0x162   : > { %4375 = vmatprep.subr.bf16.mxu0 %v16600_v7  ;;  %1219 = vmatpush1.bf16.msra.mxu1 %v16597_v16  ;;  %v1337_v7 = vld [vmem:[#allocation8 + $0x260] sm:$0xff] }
 0x163   : > { %4539 = vmatprep.subr.bf16.mxu1 %v16602_v19  ;;  %v16672_v16 = vcombine.high %v1333_v5, %v1337_v7  ;;  %v1338_v19 = vld [vmem:[#allocation8 + $0x268] sm:$0xff]  ;;  %v16671_v21 = vcombine.low %v1333_v5, %v1337_v7 }
 0x164   : > { %1196 = vmatmul.mubr.bf16.vlgmr.msra.gmra.mrb[4].mxu0 %v21245_v6  ;;  %v1390_v5 = vld [vmem:[#allocation8 + $0x408] sm:$0xff] }
 0x165   : > { %4376 = vmatpush1.bf16.msra.mxu0 %v16599_v12  ;;  %1237 = vmatmul.mubr.bf16.vlgmr.msra.gmra.mrb[4].mxu1 %v21245_v6  ;;  %v16626_v6 = vcombine.high %v1286_v33, %v1290_v34  ;;  %v16658_v12 = vcombine.high %v1318_v1, %v1322_v2  ;;  %v16673_v33 = vcombine.low %v1334_v18, %v1338_v19  ;;  %v1350_v34 = vld [vmem:[#allocation8 + $0x2c8] sm:$0xff] }
 0x166   : > { %4377 = vmatprep.subr.bf16.mxu0 %v16608_v15  ;;  %4540 = vmatpush1.bf16.msra.mxu1 %v16601_v24  ;;  %v1345_v15 = vld [vmem:[#allocation8 + $0x2a0] sm:$0xff]  ;;  %v1386_v1 = vld [vmem:[#allocation8 + $0x3e8] sm:$0xff]  ;;  %v16714_v2 = vcombine.high %v1374_v56, %v1378_v60 }
 0x167   : > { %4541 = vmatprep.subr.bf16.mxu1 %v16610_v27  ;;  %v16680_v24 = vcombine.high %v1341_v14, %v1345_v15  ;;  %v1346_v27 = vld [vmem:[#allocation8 + $0x2a8] sm:$0xff]  ;;  %v16679_v29 = vcombine.low %v1341_v14, %v1345_v15 }
 0x168   : > { %v16681_v41 = vcombine.low %v1342_v26, %v1346_v27 }
 0x169   : > { %4378 = vmatpush1.bf16.msra.mxu0 %v16607_v20  ;;  %v16666_v20 = vcombine.high %v1326_v10, %v1330_v11 }
 0x16a   : > { %4379 = vmatprep.subr.bf16.mxu0 %v16616_v23  ;;  %4542 = vmatpush1.bf16.msra.mxu1 %v16609_v32  ;;  %v1353_v23 = vld [vmem:[#allocation8 + $0x2e0] sm:$0xff] }
 0x16b   : > { %4543 = vmatprep.subr.bf16.mxu1 %v16618_v35  ;;  %v16688_v32 = vcombine.high %v1349_v22, %v1353_v23  ;;  %v1354_v35 = vld [vmem:[#allocation8 + $0x2e8] sm:$0xff]  ;;  %v16687_v37 = vcombine.low %v1349_v22, %v1353_v23 }
 0x16d   : > { %4380 = vmatpush1.bf16.msra.mxu0 %v16615_v28  ;;  %v16674_v28 = vcombine.high %v1334_v18, %v1338_v19  ;;  %v21259_v19 = vld [vmem:[#allocation7] sm:$0xff] }
 0x16e   : > { %4381 = vmatprep.subr.bf16.mxu0 %v16624_v31  ;;  %4544 = vmatpush1.bf16.msra.mxu1 %v16617_v40  ;;  %v1361_v31 = vld [vmem:[#allocation8 + $0x320] sm:$0xff] }
 0x16f   : > { %4545 = vmatprep.subr.bf16.mxu1 %v16626_v6  ;;  %v16696_v40 = vcombine.high %v1357_v30, %v1361_v31  ;;  %v1362_v6 = vld [vmem:[#allocation8 + $0x328] sm:$0xff]  ;;  %v16695_v44 = vcombine.low %v1357_v30, %v1361_v31  ;;  %v1401_v30 = vld [vmem:[#allocation8 + $0x460] sm:$0xff] }
 0x170   : > { %v1398_v31 = vld [vmem:[#allocation8 + $0x448] sm:$0xff] }
 0x171   : > { %4382 = vmatpush1.bf16.msra.mxu0 %v16623_v36  ;;  %v16682_v36 = vcombine.high %v1342_v26, %v1346_v27 }
 0x172   : > { %4383 = vmatprep.subr.bf16.mxu0 %v16632_v39  ;;  %4546 = vmatpush1.bf16.msra.mxu1 %v16625_v47  ;;  %v1369_v39 = vld [vmem:[#allocation8 + $0x360] sm:$0xff]  ;;  %v16698_v47 = vcombine.high %v1358_v42, %v1362_v6 }
 0x173   : > { %4547 = vmatprep.subr.bf16.mxu1 %v16634_v50  ;;  %v16704_v45 = vcombine.high %v1365_v38, %v1369_v39  ;;  %v1377_v50 = vld [vmem:[#allocation8 + $0x3a0] sm:$0xff] }
 0x174   : > { %v16712_v53 = vcombine.high %v1373_v49, %v1377_v50 }
 0x175   : > { %4384 = vmatpush1.bf16.msra.mxu0 %v16631_v43  ;;  %v16690_v43 = vcombine.high %v1350_v34, %v1354_v35 }
 0x176   : > { %4385 = vmatprep.subr.bf16.mxu0 %v16640_v46  ;;  %4548 = vmatpush1.bf16.msra.mxu1 %v16633_v55  ;;  %v16689_v46 = vcombine.low %v1350_v34, %v1354_v35  ;;  %v16706_v55 = vcombine.high %v1366_v48, %v1370_v52  ;;  %v1402_v34 = vld [vmem:[#allocation8 + $0x468] sm:$0xff] }
 0x177   : > { %4549 = vmatprep.subr.bf16.mxu1 %v16642_v58  ;;  %v1385_v58 = vld [vmem:[#allocation8 + $0x3e0] sm:$0xff] }
 0x178   : > { %v16720_v61 = vcombine.high %v1381_v57, %v1385_v58  ;;  %v16719_v7 = vcombine.low %v1381_v57, %v1385_v58  ;;  %v1418_v57 = vld [vmem:[#allocation8 + $0x4e8] sm:$0xff] }
 0x179   : > { %4386 = vmatpush1.bf16.msra.mxu0 %v16639_v51  ;;  %v16703_v51 = vcombine.low %v1365_v38, %v1369_v39  ;;  %v1405_v38 = vld [vmem:[#allocation8 + $0x480] sm:$0xff] }
 0x17a   : > { %4387 = vmatprep.subr.bf16.mxu0 %v16648_v54  ;;  %4550 = vmatpush1.bf16.msra.mxu1 %v16641_v63  ;;  %v16697_v54 = vcombine.low %v1358_v42, %v1362_v6  ;;  %v1382_v63 = vld [vmem:[#allocation8 + $0x3c8] sm:$0xff]  ;;  %v1409_v39 = vld [vmem:[#allocation8 + $0x4a0] sm:$0xff] }
 0x17b   : > { %4551 = vmatprep.subr.bf16.mxu1 %v16650_v3  ;;  %v1389_v3 = vld [vmem:[#allocation8 + $0x400] sm:$0xff]  ;;  %v16721_v14 = vcombine.low %v1382_v63, %v1386_v1 }
 0x17d   : > { %4388 = vmatpush1.bf16.msra.mxu0 %v16647_v59  ;;  %v16711_v59 = vcombine.low %v1373_v49, %v1377_v50  ;;  %v16737_v50 = vcombine.low %v1398_v31, %v1402_v34 }
 0x17e   : > { %4389 = vmatprep.subr.bf16.mxu0 %v16656_v62  ;;  %4552 = vmatpush1.bf16.msra.mxu1 %v16649_v9  ;;  %v16705_v62 = vcombine.low %v1366_v48, %v1370_v52  ;;  %v1417_v52 = vld [vmem:[#allocation8 + $0x4e0] sm:$0xff] }
 0x17f   : > { %4553 = vmatprep.subr.bf16.mxu1 %v16658_v12  ;;  %v16713_v12 = vcombine.low %v1374_v56, %v1378_v60 }
 0x181   : > { %4390 = vmatpush1.bf16.msra.mxu0 %v16655_v4  ;;  %v1393_v4 = vld [vmem:[#allocation8 + $0x420] sm:$0xff] }
 0x182   : > { %4391 = vmatprep.subr.bf16.mxu0 %v16664_v8  ;;  %4554 = vmatpush1.bf16.msra.mxu1 %v16657_v17  ;;  %v1394_v8 = vld [vmem:[#allocation8 + $0x428] sm:$0xff]  ;;  %v16727_v9 = vcombine.low %v1389_v3, %v1393_v4  ;;  %v16728_v10 = vcombine.high %v1389_v3, %v1393_v4 }
 0x183   : > { %4555 = vmatprep.subr.bf16.mxu1 %v16666_v20  ;;  %v16729_v11 = vcombine.low %v1390_v5, %v1394_v8  ;;  %v16730_v15 = vcombine.high %v1390_v5, %v1394_v8  ;;  %v1426_v3 = vld [vmem:[#allocation8 + $0x528] sm:$0xff]  ;;  %v1433_v8 = vld [vmem:[#allocation8 + $0x560] sm:$0xff] }
 0x185   : > { %4392 = vmatpush1.bf16.msra.mxu0 %v16663_v13  ;;  %v16722_v13 = vcombine.high %v1382_v63, %v1386_v1  ;;  %v1422_v63 = vld [vmem:[#allocation8 + $0x508] sm:$0xff] }
 0x186   : > { %4393 = vmatprep.subr.bf16.mxu0 %v16672_v16  ;;  %4556 = vmatpush1.bf16.msra.mxu1 %v16665_v25  ;;  %v1041_v16 = vlaneseq }
 0x187   : > { %4557 = vmatprep.subr.bf16.mxu1 %v16674_v28 }
 0x188   : > { %v21254_v17 = vshrl.u32 %v1041_v16, 7  ;;  %vm21451_vm0 = vcmp.lt.s32.totalorder %v1041_v16, 512  ;;  %v19784_v16 = vld [vmem:[#allocation11 + $0x1578] ss:$48 sps:$4 sm:$0xff]  }
 0x189   : > { %4394 = vmatpush1.bf16.msra.mxu0 %v16671_v21 }
 0x18a   : > { %4395 = vmatprep.subr.bf16.mxu0 %v16680_v24  ;;  %4558 = vmatpush1.bf16.msra.mxu1 %v16673_v33  ;;  %v21257_v18 = vsub.s32 0, %v21254_v17  ;;  %v21262_v20 = vsub.s32 1, %v21254_v17  ;;  %v21269_v24 = vsub.s32 3, %v21254_v17 }
 0x18b   : > { %4559 = vmatprep.subr.bf16.mxu1 %v16682_v36 }
 0x18c   : > { %v1044_v21 = vrot.slane %v21259_v19, %v21257_v18  ;;  %v1048_v22 = vrot.slane %v21259_v19, %v21262_v20  ;;  %v1056_v36 = vrot.slane %v21259_v19, %v21269_v24 }
 0x18d   : > { %4396 = vmatpush1.bf16.msra.mxu0 %v16679_v29  ;;  %v1397_v29 = vld [vmem:[#allocation8 + $0x440] sm:$0xff] }
 0x18e   : > { %4397 = vmatprep.subr.bf16.mxu0 %v16688_v32  ;;  %4560 = vmatpush1.bf16.msra.mxu1 %v16681_v41  ;;  %v16736_v6 = vcombine.high %v1397_v29, %v1401_v30  ;;  %v16735_v49 = vcombine.low %v1397_v29, %v1401_v30  ;;  %v1445_v29 = vld [vmem:[#allocation8 + $0x5c0] sm:$0xff] }
 0x18f   : > { %4561 = vmatprep.subr.bf16.mxu1 %v16690_v43  ;;  %v16738_v43 = vcombine.high %v1398_v31, %v1402_v34  ;;  %v1449_v30 = vld [vmem:[#allocation8 + $0x5e0] sm:$0xff]  ;;  %v1446_v31 = vld [vmem:[#allocation8 + $0x5c8] sm:$0xff] }
 0x190   : > { %v1450_v34 = vld [vmem:[#allocation8 + $0x5e8] sm:$0xff] }
 0x191   : > { %4398 = vmatpush1.bf16.msra.mxu0 %v16687_v37 }
 0x192   : > { %4399 = vmatprep.subr.bf16.mxu0 %v16696_v40  ;;  %4562 = vmatpush1.bf16.msra.mxu1 %v16689_v46  ;;  %v1406_v40 = vld [vmem:[#allocation8 + $0x488] sm:$0xff] }
 0x193   : > { %4563 = vmatprep.subr.bf16.mxu1 %v16698_v47 }
 0x195   : > { %4400 = vmatpush1.bf16.msra.mxu0 %v16695_v44  ;;  %v1410_v44 = vld [vmem:[#allocation8 + $0x4a8] sm:$0xff] }
 0x196   : > { %4401 = vmatprep.subr.bf16.mxu0 %v16704_v45  ;;  %4564 = vmatpush1.bf16.msra.mxu1 %v16697_v54  ;;  %v16746_v56 = vcombine.high %v1406_v40, %v1410_v44  ;;  %v16745_v60 = vcombine.low %v1406_v40, %v1410_v44  ;;  %v1454_v40 = vld [vmem:[#allocation8 + $0x608] sm:$0xff] }
 0x197   : > { %4565 = vmatprep.subr.bf16.mxu1 %v16706_v55  ;;  %v16744_v55 = vcombine.high %v1405_v38, %v1409_v39  ;;  %v1458_v44 = vld [vmem:[#allocation8 + $0x628] sm:$0xff] }
 0x199   : > { %4402 = vmatpush1.bf16.msra.mxu0 %v16703_v51  ;;  %v1413_v51 = vld [vmem:[#allocation8 + $0x4c0] sm:$0xff] }
 0x19a   : > { %4403 = vmatprep.subr.bf16.mxu0 %v16712_v53  ;;  %4566 = vmatpush1.bf16.msra.mxu1 %v16705_v62  ;;  %v1414_v53 = vld [vmem:[#allocation8 + $0x4c8] sm:$0xff]  ;;  %v1425_v62 = vld [vmem:[#allocation8 + $0x520] sm:$0xff]  ;;  %v16752_v1 = vcombine.high %v1413_v51, %v1417_v52  ;;  %v16751_v4 = vcombine.low %v1413_v51, %v1417_v52 }
 0x19b   : > { %4567 = vmatprep.subr.bf16.mxu1 %v16714_v2  ;;  %v16754_v2 = vcombine.high %v1414_v53, %v1418_v57  ;;  %v16753_v5 = vcombine.low %v1414_v53, %v1418_v57  ;;  %v1462_v51 = vld [vmem:[#allocation8 + $0x648] sm:$0xff] }
 0x19d   : > { %4404 = vmatpush1.bf16.msra.mxu0 %v16711_v59  ;;  %v16743_v59 = vcombine.low %v1405_v38, %v1409_v39  ;;  %v1453_v38 = vld [vmem:[#allocation8 + $0x600] sm:$0xff] }
 0x19e   : > { %4405 = vmatprep.subr.bf16.mxu0 %v16720_v61  ;;  %4568 = vmatpush1.bf16.msra.mxu1 %v16713_v12  ;;  %v1421_v61 = vld [vmem:[#allocation8 + $0x500] sm:$0xff]  ;;  %v1434_v12 = vld [vmem:[#allocation8 + $0x568] sm:$0xff] }
 0x19f   : > { %4569 = vmatprep.subr.bf16.mxu1 %v16722_v13  ;;  %v16759_v13 = vcombine.low %v1421_v61, %v1425_v62  ;;  %v1457_v39 = vld [vmem:[#allocation8 + $0x620] sm:$0xff] }
 0x1a0   : > { %v16792_v53 = vcombine.high %v1453_v38, %v1457_v39  ;;  %v16791_v57 = vcombine.low %v1453_v38, %v1457_v39  ;;  %v21296_v38 = vsub.s32 2, %v21254_v17 }
 0x1a1   : > { %4406 = vmatpush1.bf16.msra.mxu0 %v16719_v7  ;;  %v1429_v7 = vld [vmem:[#allocation8 + $0x540] sm:$0xff] }
 0x1a2   : > { %4416 = vmatprep.subr.bf16.mxu0 %v16728_v10  ;;  %4570 = vmatpush1.bf16.msra.mxu1 %v16721_v14  ;;  %v16760_v10 = vcombine.high %v1421_v61, %v1425_v62  ;;  %v16761_v14 = vcombine.low %v1422_v63, %v1426_v3  ;;  %v1473_v61 = vld [vmem:[#allocation8 + $0x6a0] sm:$0xff]  ;;  %v1470_v62 = vld [vmem:[#allocation8 + $0x688] sm:$0xff] }
 0x1a3   : > { %4580 = vmatprep.subr.bf16.mxu1 %v16730_v15  ;;  %v1437_v15 = vld [vmem:[#allocation8 + $0x580] sm:$0xff] }
 0x217   : > { %v1115_v23 = vpop.f32.mrb[0].mxu0  ;;  %v21275_v41 = vpop.f32.mrb[0].mxu1 }
 0x218   : > { %v1116_v25 = vadd.f32 %v1115_v23, %v1044_v21  ;;  %v1117_v26 = vpop.f32.mrb[1].mxu0  ;;  %v1158_v45 = vpop.f32.mrb[1].mxu1  ;;  %v1441_v21 = vld [vmem:[#allocation8 + $0x5a0] sm:$0xff]  ;;  %v16768_v23 = vcombine.high %v1429_v7, %v1433_v8 }
 0x219   : > { %v1118_v27 = vadd.f32 %v1117_v26, %v1048_v22  ;;  %v1119_v28 = vpop.f32.mrb[2].mxu0  ;;  %v1159_v46 = vadd.f32 %v1158_v45, %v1056_v36  ;;  %v1160_v47 = vpop.f32.mrb[2].mxu1  ;;  %v1438_v22 = vld [vmem:[#allocation8 + $0x588] sm:$0xff] }
 0x21a   : > { %v1245_v32 = vmax.f32 %v1116_v25, 0.0  ;;  %v1120_v33 = vpop.f32.mrb[3].mxu0  ;;  %v1161_v48 = vpop.f32.mrb[3].mxu1  ;;  %v1442_v26 = vld [vmem:[#allocation8 + $0x5a8] sm:$0xff]  ;;  %v16783_v47 = vcombine.low %v1445_v29, %v1449_v30 }
 0x21b   : > { %v1246_v35 = vmax.f32 %v1118_v27, 0.0  ;;  %v1248_v54 = vmax.f32 %v1159_v46, 0.0  ;;  %v16767_v27 = vcombine.low %v1429_v7, %v1433_v8  ;;  %v16778_v33 = vcombine.high %v1438_v22, %v1442_v26  ;;  %v1481_v7 = vld [vmem:[#allocation8 + $0x6e0] sm:$0xff]  ;;  %v1478_v8 = vld [vmem:[#allocation8 + $0x6c8] sm:$0xff] }
 0x21c   : > { %v21277_v42 = vpack.c.bf16 %v1245_v32, %v1245_v32  ;;  %v16776_v32 = vcombine.high %v1437_v15, %v1441_v21  ;;  %v16777_v36 = vcombine.low %v1438_v22, %v1442_v26  ;;  %v16785_v48 = vcombine.low %v1446_v31, %v1450_v34 }
 0x21d   : > { %v21273_v37 = vpack.c.bf16 %v1246_v35, %v1246_v35  ;;  %v21283_v58 = vpack.c.bf16 %v1248_v54, %v1248_v54  ;;  %v16775_v35 = vcombine.low %v1437_v15, %v1441_v21  ;;  %v16794_v54 = vcombine.high %v1454_v40, %v1458_v44  ;;  %v1489_v15 = vld [vmem:[#allocation8 + $0x720] sm:$0xff]  ;;  %v1486_v21 = vld [vmem:[#allocation8 + $0x708] sm:$0xff] }
 0x21f   : > { %4407 = vmatprep.mubr.bf16.mxu0 %v21273_v37  ;;  %4571 = vmatprep.mubr.bf16.mxu1 %v21273_v37 }
 0x220   : > { %4408 = vmatmul.mubr.bf16.vlgmr.msra.gmra.mrb[8].mxu0 %v21277_v42  ;;  %4572 = vmatmul.mubr.bf16.vlgmr.msra.gmra.mrb[8].mxu1 %v21277_v42 }
 0x221   : > { %4417 = vmatpush1.bf16.msra.mxu0 %v16727_v9  ;;  %4581 = vmatpush1.bf16.msra.mxu1 %v16729_v11  ;;  %v1430_v9 = vld [vmem:[#allocation8 + $0x548] sm:$0xff]  ;;  %v16762_v11 = vcombine.high %v1422_v63, %v1426_v3 }
 0x222   : > { %4418 = vmatprep.subr.bf16.mxu0 %v16736_v6  ;;  %4582 = vmatprep.subr.bf16.mxu1 %v16738_v43  ;;  %v16770_v25 = vcombine.high %v1430_v9, %v1434_v12  ;;  %v16769_v28 = vcombine.low %v1430_v9, %v1434_v12  ;;  %v16784_v6 = vcombine.high %v1445_v29, %v1449_v30  ;;  %v1497_v29 = vld [vmem:[#allocation8 + $0x760] sm:$0xff]  ;;  %v1494_v30 = vld [vmem:[#allocation8 + $0x748] sm:$0xff] }
 0x223   : > { %4448 = vmatprep.mubr.bf16.mxu0 %v21283_v58  ;;  %4612 = vmatprep.mubr.bf16.mxu1 %v21283_v58  ;;  %v16786_v43 = vcombine.high %v1446_v31, %v1450_v34  ;;  %v1498_v34 = vld [vmem:[#allocation8 + $0x768] sm:$0xff] }
 0x225   : > { %4419 = vmatpush1.bf16.msra.mxu0 %v16735_v49  ;;  %4583 = vmatpush1.bf16.msra.mxu1 %v16737_v50  ;;  %v1461_v49 = vld [vmem:[#allocation8 + $0x640] sm:$0xff] }
 0x226   : > { %4420 = vmatprep.subr.bf16.mxu0 %v16744_v55  ;;  %4584 = vmatprep.subr.bf16.mxu1 %v16746_v56  ;;  %v1465_v50 = vld [vmem:[#allocation8 + $0x660] sm:$0xff]  ;;  %v1466_v55 = vld [vmem:[#allocation8 + $0x668] sm:$0xff] }
 0x227   : > { %v16800_v63 = vcombine.high %v1461_v49, %v1465_v50  ;;  %v16799_v3 = vcombine.low %v1461_v49, %v1465_v50  ;;  %v16834_v49 = vcombine.high %v1494_v30, %v1498_v34  ;;  %v1506_v50 = vld [vmem:[#allocation8 + $0x7a8] sm:$0xff] }
 0x229   : > { %4421 = vmatpush1.bf16.msra.mxu0 %v16743_v59  ;;  %4585 = vmatpush1.bf16.msra.mxu1 %v16745_v60  ;;  %v16793_v59 = vcombine.low %v1454_v40, %v1458_v44  ;;  %v1469_v60 = vld [vmem:[#allocation8 + $0x680] sm:$0xff] }
 0x22a   : > { %4422 = vmatprep.subr.bf16.mxu0 %v16752_v1  ;;  %4586 = vmatprep.subr.bf16.mxu1 %v16754_v2  ;;  %v16802_v1 = vcombine.high %v1462_v51, %v1466_v55  ;;  %v1474_v2 = vld [vmem:[#allocation8 + $0x6a8] sm:$0xff]  ;;  %v16808_v9 = vcombine.high %v1469_v60, %v1473_v61  ;;  %v16807_v12 = vcombine.low %v1469_v60, %v1473_v61  ;;  %v1505_v44 = vld [vmem:[#allocation8 + $0x7a0] sm:$0xff] }
 0x22b   : > { %v1514_v61 = vld [vmem:[#allocation8 + $0x7e8] sm:$0xff] }
 0x22d   : > { %4423 = vmatpush1.bf16.msra.mxu0 %v16751_v4  ;;  %4587 = vmatpush1.bf16.msra.mxu1 %v16753_v5  ;;  %v16801_v4 = vcombine.low %v1462_v51, %v1466_v55  ;;  %v1477_v5 = vld [vmem:[#allocation8 + $0x6c0] sm:$0xff]  ;;  %v21299_v51 = vsub.s32 5, %v21254_v17 }
 0x22e   : > { %4424 = vmatprep.subr.bf16.mxu0 %v16760_v10  ;;  %4588 = vmatprep.subr.bf16.mxu1 %v16762_v11  ;;  %v16810_v10 = vcombine.high %v1470_v62, %v1474_v2  ;;  %v1482_v11 = vld [vmem:[#allocation8 + $0x6e8] sm:$0xff]  ;;  %v16816_v22 = vcombine.high %v1477_v5, %v1481_v7  ;;  %v16815_v26 = vcombine.low %v1477_v5, %v1481_v7  ;;  %v1509_v55 = vld [vmem:[#allocation8 + $0x7c0] sm:$0xff] }
 0x22f   : > { %v1518_v5 = vld [vmem:[#allocation8 + $0x808] sm:$0xff] }
 0x231   : > { %4425 = vmatpush1.bf16.msra.mxu0 %v16759_v13  ;;  %4589 = vmatpush1.bf16.msra.mxu1 %v16761_v14  ;;  %v16809_v13 = vcombine.low %v1470_v62, %v1474_v2  ;;  %v1485_v14 = vld [vmem:[#allocation8 + $0x700] sm:$0xff]  ;;  %v1064_v62 = vrot.slane %v21259_v19, %v21299_v51 }
 0x232   : > { %4426 = vmatprep.subr.bf16.mxu0 %v16768_v23  ;;  %4590 = vmatprep.subr.bf16.mxu1 %v16770_v25  ;;  %v16818_v23 = vcombine.high %v1478_v8, %v1482_v11  ;;  %v1490_v25 = vld [vmem:[#allocation8 + $0x728] sm:$0xff]  ;;  %v16823_v40 = vcombine.low %v1485_v14, %v1489_v15 }
 0x235   : > { %4427 = vmatpush1.bf16.msra.mxu0 %v16767_v27  ;;  %4591 = vmatpush1.bf16.msra.mxu1 %v16769_v28  ;;  %v16817_v27 = vcombine.low %v1478_v8, %v1482_v11  ;;  %v1493_v28 = vld [vmem:[#allocation8 + $0x740] sm:$0xff] }
 0x236   : > { %4428 = vmatprep.subr.bf16.mxu0 %v16776_v32  ;;  %4592 = vmatprep.subr.bf16.mxu1 %v16778_v33  ;;  %v16824_v32 = vcombine.high %v1485_v14, %v1489_v15  ;;  %v16826_v33 = vcombine.high %v1486_v21, %v1490_v25  ;;  %v1526_v14 = vld [vmem:[#allocation8 + $0x848] sm:$0xff] }
 0x237   : > { %v21287_v45 = vpop.f32.mrb[4].mxu0 }
 0x238   : > { %v21289_v46 = vpop.f32.mrb[5].mxu0  ;;  %v21291_v31 = vpop.f32.mrb[4].mxu1 }
 0x239   : > { %4429 = vmatpush1.bf16.msra.mxu0 %v16775_v35  ;;  %4593 = vmatpush1.bf16.msra.mxu1 %v16777_v36  ;;  %v1201_v52 = vpop.f32.mrb[6].mxu0  ;;  %v21293_v35 = vpop.f32.mrb[5].mxu1 }
 0x23a   : > { %4430 = vmatprep.subr.bf16.mxu0 %v16784_v6  ;;  %4594 = vmatprep.subr.bf16.mxu1 %v16786_v43  ;;  %v1202_v56 = vpop.f32.mrb[7].mxu0  ;;  %v1242_v36 = vpop.f32.mrb[6].mxu1  ;;  %v16825_v6 = vcombine.low %v1486_v21, %v1490_v25  ;;  %v1501_v43 = vld [vmem:[#allocation8 + $0x780] sm:$0xff]  ;;  %v1052_v52 = vrot.slane %v21259_v19, %v21296_v38 }
 0x23b   : > { %v1243_v39 = vpop.f32.mrb[7].mxu1  ;;  %v1513_v56 = vld [vmem:[#allocation8 + $0x7e0] sm:$0xff] }
 0x23c   : > { %v16848_v7 = vcombine.high %v1509_v55, %v1513_v56  ;;  %v16847_v19 = vcombine.low %v1509_v55, %v1513_v56  ;;  %v1553_v55 = vld [vmem:[#allocation8 + $0x920] sm:$0xff]  ;;  %v1550_v56 = vld [vmem:[#allocation8 + $0x908] sm:$0xff] }
 0x23d   : > { %4431 = vmatpush1.bf16.msra.mxu0 %v16783_v47  ;;  %4595 = vmatpush1.bf16.msra.mxu1 %v16785_v48  ;;  %v1502_v47 = vld [vmem:[#allocation8 + $0x788] sm:$0xff]  ;;  %v16832_v48 = vcombine.high %v1493_v28, %v1497_v29 }
 0x23e   : > { %4432 = vmatprep.subr.bf16.mxu0 %v16792_v53  ;;  %4596 = vmatprep.subr.bf16.mxu1 %v16794_v54  ;;  %v16831_v53 = vcombine.low %v1493_v28, %v1497_v29  ;;  %v16833_v54 = vcombine.low %v1494_v30, %v1498_v34  ;;  %v16842_v60 = vcombine.high %v1502_v47, %v1506_v50  ;;  %v1537_v28 = vld [vmem:[#allocation8 + $0x8a0] sm:$0xff]  ;;  %v1534_v29 = vld [vmem:[#allocation8 + $0x888] sm:$0xff] }
 0x23f   : > { %v16841_v2 = vcombine.low %v1502_v47, %v1506_v50  ;;  %v1542_v47 = vld [vmem:[#allocation8 + $0x8c8] sm:$0xff] }
 0x241   : > { %4433 = vmatpush1.bf16.msra.mxu0 %v16791_v57  ;;  %4597 = vmatpush1.bf16.msra.mxu1 %v16793_v59  ;;  %v1510_v57 = vld [vmem:[#allocation8 + $0x7c8] sm:$0xff]  ;;  %v16840_v59 = vcombine.high %v1501_v43, %v1505_v44 }
 0x242   : > { %4434 = vmatprep.subr.bf16.mxu0 %v16800_v63  ;;  %4598 = vmatprep.subr.bf16.mxu1 %v16802_v1  ;;  %v1157_v63 = vadd.f32 %v21275_v41, %v1052_v52  ;;  %v16839_v1 = vcombine.low %v1501_v43, %v1505_v44  ;;  %v16850_v8 = vcombine.high %v1510_v57, %v1514_v61  ;;  %v1525_v41 = vld [vmem:[#allocation8 + $0x840] sm:$0xff] }
 0x243   : > { %v1541_v43 = vld [vmem:[#allocation8 + $0x8c0] sm:$0xff] }
 0x244   : > { %v1247_v11 = vmax.f32 %v1157_v63, 0.0  ;;  %v1545_v44 = vld [vmem:[#allocation8 + $0x8e0] sm:$0xff] }
 0x245   : > { %4435 = vmatpush1.bf16.msra.mxu0 %v16799_v3  ;;  %4599 = vmatpush1.bf16.msra.mxu1 %v16801_v4  ;;  %v1517_v3 = vld [vmem:[#allocation8 + $0x800] sm:$0xff]  ;;  %v16880_v52 = vcombine.high %v1541_v43, %v1545_v44 }
 0x246   : > { %4436 = vmatprep.subr.bf16.mxu0 %v16808_v9  ;;  %4600 = vmatprep.subr.bf16.mxu1 %v16810_v10  ;;  %v1521_v4 = vld [vmem:[#allocation8 + $0x820] sm:$0xff]  ;;  %v1522_v9 = vld [vmem:[#allocation8 + $0x828] sm:$0xff]  ;;  %v1200_v10 = vadd.f32 %v21289_v46, %v1064_v62  ;;  %v21307_v25 = vpack.c.bf16 %v1247_v11, %v1247_v11 }
 0x247   : > { %v16856_v15 = vcombine.high %v1517_v3, %v1521_v4  ;;  %v16858_v21 = vcombine.high %v1518_v5, %v1522_v9  ;;  %v16857_v46 = vcombine.low %v1518_v5, %v1522_v9  ;;  %v1557_v63 = vld [vmem:[#allocation8 + $0x940] sm:$0xff]  ;;  %v1566_v11 = vld [vmem:[#allocation8 + $0x988] sm:$0xff] }
 0x248   : > { %v1565_v9 = vld [vmem:[#allocation8 + $0x980] sm:$0xff] }
 0x249   : > { %4437 = vmatpush1.bf16.msra.mxu0 %v16807_v12  ;;  %4601 = vmatpush1.bf16.msra.mxu1 %v16809_v13  ;;  %v16849_v12 = vcombine.low %v1510_v57, %v1514_v61  ;;  %v1529_v13 = vld [vmem:[#allocation8 + $0x860] sm:$0xff]  ;;  %v1554_v57 = vld [vmem:[#allocation8 + $0x928] sm:$0xff] }
 0x24a   : > { %4438 = vmatprep.subr.bf16.mxu0 %v16816_v22  ;;  %4602 = vmatprep.subr.bf16.mxu1 %v16818_v23  ;;  %v1530_v22 = vld [vmem:[#allocation8 + $0x868] sm:$0xff]  ;;  %v1250_v23 = vmax.f32 %v1200_v10, 0.0  ;;  %v16864_v30 = vcombine.high %v1525_v41, %v1529_v13  ;;  %v16863_v36 = vcombine.low %v1525_v41, %v1529_v13  ;;  %v16890_v62 = vcombine.high %v1550_v56, %v1554_v57  ;;  %v1569_v10 = vld [vmem:[#allocation8 + $0x9a0] sm:$0xff] }
 0x24b   : > { %v16865_v39 = vcombine.low %v1526_v14, %v1530_v22  ;;  %v16889_v5 = vcombine.low %v1550_v56, %v1554_v57  ;;  %v16904_v13 = vcombine.high %v1565_v9, %v1569_v10  ;;  %v1598_v56 = vld [vmem:[#allocation8 + $0xa88] sm:$0xff] }
 0x24c   : > { %v21309_v34 = vpack.c.bf16 %v1250_v23, %v1250_v23  ;;  %v1578_v23 = vld [vmem:[#allocation8 + $0x9e8] sm:$0xff] }
 0x24d   : > { %4439 = vmatpush1.bf16.msra.mxu0 %v16815_v26  ;;  %4603 = vmatpush1.bf16.msra.mxu1 %v16817_v27  ;;  %v16855_v26 = vcombine.low %v1517_v3, %v1521_v4  ;;  %v1533_v27 = vld [vmem:[#allocation8 + $0x880] sm:$0xff]  ;;  %v1562_v3 = vld [vmem:[#allocation8 + $0x968] sm:$0xff] }
 0x24e   : > { %4440 = vmatprep.subr.bf16.mxu0 %v16824_v32  ;;  %4604 = vmatprep.subr.bf16.mxu1 %v16826_v33  ;;  %v16866_v32 = vcombine.high %v1526_v14, %v1530_v22  ;;  %v1538_v33 = vld [vmem:[#allocation8 + $0x8a8] sm:$0xff] }
 0x24f   : > { %v16873_v50 = vcombine.low %v1534_v29, %v1538_v33  ;;  %v1574_v22 = vld [vmem:[#allocation8 + $0x9c8] sm:$0xff] }
 0x250   : > { %v1602_v57 = vld [vmem:[#allocation8 + $0xaa8] sm:$0xff] }
 0x251   : > { %4441 = vmatpush1.bf16.msra.mxu0 %v16823_v40  ;;  %4605 = vmatpush1.bf16.msra.mxu1 %v16825_v6  ;;  %v16872_v40 = vcombine.high %v1533_v27, %v1537_v28  ;;  %v16874_v6 = vcombine.high %v1534_v29, %v1538_v33  ;;  %v1581_v29 = vld [vmem:[#allocation8 + $0xa00] sm:$0xff]  ;;  %v1586_v33 = vld [vmem:[#allocation8 + $0xa28] sm:$0xff] }
 0x252   : > { %4442 = vmatprep.subr.bf16.mxu0 %v16832_v48  ;;  %4606 = vmatprep.subr.bf16.mxu1 %v16834_v49  ;;  %v1546_v48 = vld [vmem:[#allocation8 + $0x8e8] sm:$0xff]  ;;  %v16871_v49 = vcombine.low %v1533_v27, %v1537_v28  ;;  %v16914_v28 = vcombine.high %v1574_v22, %v1578_v23 }
 0x255   : > { %4443 = vmatpush1.bf16.msra.mxu0 %v16831_v53  ;;  %4607 = vmatpush1.bf16.msra.mxu1 %v16833_v54  ;;  %v16882_v53 = vcombine.high %v1542_v47, %v1546_v48  ;;  %v1549_v54 = vld [vmem:[#allocation8 + $0x900] sm:$0xff] }
 0x256   : > { %4444 = vmatprep.subr.bf16.mxu0 %v16840_v59  ;;  %4608 = vmatprep.subr.bf16.mxu1 %v16842_v60  ;;  %v16879_v59 = vcombine.low %v1541_v43, %v1545_v44  ;;  %v16881_v60 = vcombine.low %v1542_v47, %v1546_v48  ;;  %v16888_v61 = vcombine.high %v1549_v54, %v1553_v55  ;;  %v1589_v43 = vld [vmem:[#allocation8 + $0xa40] sm:$0xff]  ;;  %v1590_v47 = vld [vmem:[#allocation8 + $0xa48] sm:$0xff] }
 0x257   : > { %v16887_v4 = vcombine.low %v1549_v54, %v1553_v55  ;;  %v1593_v44 = vld [vmem:[#allocation8 + $0xa60] sm:$0xff]  ;;  %v1594_v48 = vld [vmem:[#allocation8 + $0xa68] sm:$0xff] }
 0x258   : > { %v1597_v54 = vld [vmem:[#allocation8 + $0xa80] sm:$0xff] }
 0x259   : > { %4445 = vmatpush1.bf16.msra.mxu0 %v16839_v1  ;;  %4609 = vmatpush1.bf16.msra.mxu1 %v16841_v2  ;;  %v1561_v1 = vld [vmem:[#allocation8 + $0x960] sm:$0xff]  ;;  %v1558_v2 = vld [vmem:[#allocation8 + $0x948] sm:$0xff] }
 0x25a   : > { %4446 = vmatprep.subr.bf16.mxu0 %v16848_v7  ;;  %4610 = vmatprep.subr.bf16.mxu1 %v16850_v8  ;;  %v16896_v7 = vcombine.high %v1557_v63, %v1561_v1  ;;  %v16898_v8 = vcombine.high %v1558_v2, %v1562_v3  ;;  %v16897_v41 = vcombine.low %v1558_v2, %v1562_v3  ;;  %v1601_v55 = vld [vmem:[#allocation8 + $0xaa0] sm:$0xff]  ;;  %v1606_v2 = vld [vmem:[#allocation8 + $0xac8] sm:$0xff] }
 0x25b   : > { %v1610_v3 = vld [vmem:[#allocation8 + $0xae8] sm:$0xff] }
 0x25d   : > { %4447 = vmatpush1.bf16.msra.mxu0 %v16847_v19  ;;  %4611 = vmatpush1.bf16.msra.mxu1 %v16849_v12  ;;  %v1570_v19 = vld [vmem:[#allocation8 + $0x9a8] sm:$0xff]  ;;  %v16895_v12 = vcombine.low %v1557_v63, %v1561_v1  ;;  %v1605_v63 = vld [vmem:[#allocation8 + $0xac0] sm:$0xff] }
 0x25e   : > { %4457 = vmatprep.subr.bf16.mxu0 %v16856_v15  ;;  %4621 = vmatprep.subr.bf16.mxu1 %v16858_v21  ;;  %v16906_v14 = vcombine.high %v1566_v11, %v1570_v19  ;;  %v1573_v15 = vld [vmem:[#allocation8 + $0x9c0] sm:$0xff] }
 0x25f   : > { %v1577_v21 = vld [vmem:[#allocation8 + $0x9e0] sm:$0xff] }
 0x260   : > { %4449 = vmatmul.mubr.bf16.vlgmr.msra.gmra.mrb[8].mxu0 %v21307_v25  ;;  %4613 = vmatmul.mubr.bf16.vlgmr.msra.gmra.mrb[8].mxu1 %v21307_v25  ;;  %v16912_v27 = vcombine.high %v1573_v15, %v1577_v21  ;;  %v1609_v1 = vld [vmem:[#allocation8 + $0xae0] sm:$0xff] }
 0x261   : > { %4458 = vmatpush1.bf16.msra.mxu0 %v16855_v26  ;;  %4622 = vmatpush1.bf16.msra.mxu1 %v16857_v46  ;;  %v16903_v26 = vcombine.low %v1565_v9, %v1569_v10  ;;  %v16905_v46 = vcombine.low %v1566_v11, %v1570_v19  ;;  %v1613_v9 = vld [vmem:[#allocation8 + $0xb00] sm:$0xff]  ;;  %v1614_v11 = vld [vmem:[#allocation8 + $0xb08] sm:$0xff] }
 0x262   : > { %4459 = vmatprep.subr.bf16.mxu0 %v16864_v30  ;;  %4623 = vmatprep.subr.bf16.mxu1 %v16866_v32  ;;  %v1585_v30 = vld [vmem:[#allocation8 + $0xa20] sm:$0xff]  ;;  %v1582_v32 = vld [vmem:[#allocation8 + $0xa08] sm:$0xff] }
 0x263   : > { %4489 = vmatprep.mubr.bf16.mxu0 %v21309_v34  ;;  %4653 = vmatprep.mubr.bf16.mxu1 %v21309_v34  ;;  %v1617_v10 = vld [vmem:[#allocation8 + $0xb20] sm:$0xff]  ;;  %v1618_v19 = vld [vmem:[#allocation8 + $0xb28] sm:$0xff] }
 0x265   : > { %4460 = vmatpush1.bf16.msra.mxu0 %v16863_v36  ;;  %4624 = vmatpush1.bf16.msra.mxu1 %v16865_v39  ;;  %v16911_v36 = vcombine.low %v1573_v15, %v1577_v21  ;;  %v16913_v39 = vcombine.low %v1574_v22, %v1578_v23  ;;  %v1621_v15 = vld [vmem:[#allocation8 + $0xb40] sm:$0xff]  ;;  %v1622_v22 = vld [vmem:[#allocation8 + $0xb48] sm:$0xff] }
 0x266   : > { %4461 = vmatprep.subr.bf16.mxu0 %v16872_v40  ;;  %4625 = vmatprep.subr.bf16.mxu1 %v16874_v6  ;;  %v16920_v40 = vcombine.high %v1581_v29, %v1585_v30  ;;  %v16922_v6 = vcombine.high %v1582_v32, %v1586_v33  ;;  %v1625_v21 = vld [vmem:[#allocation8 + $0xb60] sm:$0xff]  ;;  %v1626_v23 = vld [vmem:[#allocation8 + $0xb68] sm:$0xff] }
 0x269   : > { %4462 = vmatpush1.bf16.msra.mxu0 %v16871_v49  ;;  %4626 = vmatpush1.bf16.msra.mxu1 %v16873_v50  ;;  %v16919_v49 = vcombine.low %v1581_v29, %v1585_v30  ;;  %v16921_v50 = vcombine.low %v1582_v32, %v1586_v33  ;;  %v16962_v29 = vcombine.high %v1622_v22, %v1626_v23  ;;  %v1629_v30 = vld [vmem:[#allocation8 + $0xb80] sm:$0xff]  ;;  %v1630_v33 = vld [vmem:[#allocation8 + $0xb88] sm:$0xff] }
 0x26a   : > { %4463 = vmatprep.subr.bf16.mxu0 %v16880_v52  ;;  %4627 = vmatprep.subr.bf16.mxu1 %v16882_v53  ;;  %v16928_v52 = vcombine.high %v1589_v43, %v1593_v44  ;;  %v16930_v53 = vcombine.high %v1590_v47, %v1594_v48  ;;  %v1633_v32 = vld [vmem:[#allocation8 + $0xba0] sm:$0xff] }
 0x26d   : > { %4464 = vmatpush1.bf16.msra.mxu0 %v16879_v59  ;;  %4628 = vmatpush1.bf16.msra.mxu1 %v16881_v60  ;;  %v16927_v59 = vcombine.low %v1589_v43, %v1593_v44  ;;  %v16929_v60 = vcombine.low %v1590_v47, %v1594_v48  ;;  %v16959_v43 = vcombine.low %v1621_v15, %v1625_v21 }
 0x26e   : > { %4465 = vmatprep.subr.bf16.mxu0 %v16888_v61  ;;  %4629 = vmatprep.subr.bf16.mxu1 %v16890_v62  ;;  %v16936_v61 = vcombine.high %v1597_v54, %v1601_v55  ;;  %v16938_v62 = vcombine.high %v1598_v56, %v1602_v57  ;;  %v16961_v44 = vcombine.low %v1622_v22, %v1626_v23  ;;  %v1662_v22 = vld [vmem:[#allocation8 + $0xc88] sm:$0xff] }
 0x26f   : > { %v16968_v47 = vcombine.high %v1629_v30, %v1633_v32  ;;  %v1666_v23 = vld [vmem:[#allocation8 + $0xca8] sm:$0xff] }
 0x271   : > { %4466 = vmatpush1.bf16.msra.mxu0 %v16887_v4  ;;  %4630 = vmatpush1.bf16.msra.mxu1 %v16889_v5  ;;  %v16935_v4 = vcombine.low %v1597_v54, %v1601_v55  ;;  %v16937_v5 = vcombine.low %v1598_v56, %v1602_v57  ;;  %v16967_v56 = vcombine.low %v1629_v30, %v1633_v32 }
 0x272   : > { %4467 = vmatprep.subr.bf16.mxu0 %v16896_v7  ;;  %4631 = vmatprep.subr.bf16.mxu1 %v16898_v8  ;;  %v16944_v7 = vcombine.high %v1605_v63, %v1609_v1  ;;  %v16946_v8 = vcombine.high %v1606_v2, %v1610_v3  ;;  %v17002_v32 = vcombine.high %v1662_v22, %v1666_v23 }
 0x275   : > { %4468 = vmatpush1.bf16.msra.mxu0 %v16895_v12  ;;  %4632 = vmatpush1.bf16.msra.mxu1 %v16897_v41  ;;  %v16943_v12 = vcombine.low %v1605_v63, %v1609_v1  ;;  %v16945_v41 = vcombine.low %v1606_v2, %v1610_v3  ;;  %v1646_v63 = vld [vmem:[#allocation8 + $0xc08] sm:$0xff] }
 0x276   : > { %4469 = vmatprep.subr.bf16.mxu0 %v16904_v13  ;;  %4633 = vmatprep.subr.bf16.mxu1 %v16906_v14  ;;  %v16952_v13 = vcombine.high %v1613_v9, %v1617_v10  ;;  %v16954_v14 = vcombine.high %v1614_v11, %v1618_v19  ;;  %v1650_v1 = vld [vmem:[#allocation8 + $0xc28] sm:$0xff] }
 0x279   : > { %4470 = vmatpush1.bf16.msra.mxu0 %v16903_v26  ;;  %4634 = vmatpush1.bf16.msra.mxu1 %v16905_v46  ;;  %v21316_v26 = vsub.s32 4, %v21254_v17  ;;  %v16951_v46 = vcombine.low %v1613_v9, %v1617_v10  ;;  %v1657_v9 = vld [vmem:[#allocation8 + $0xc60] sm:$0xff]  ;;  %v1654_v10 = vld [vmem:[#allocation8 + $0xc48] sm:$0xff] }
 0x27a   : > { %4471 = vmatprep.subr.bf16.mxu0 %v16912_v27  ;;  %4635 = vmatprep.subr.bf16.mxu1 %v16914_v28  ;;  %v16953_v27 = vcombine.low %v1614_v11, %v1618_v19  ;;  %v16960_v28 = vcombine.high %v1621_v15, %v1625_v21  ;;  %v1658_v11 = vld [vmem:[#allocation8 + $0xc68] sm:$0xff]  ;;  %v1661_v15 = vld [vmem:[#allocation8 + $0xc80] sm:$0xff] }
 0x27b   : > { %v1665_v21 = vld [vmem:[#allocation8 + $0xca0] sm:$0xff] }
 0x27c   : > { %v17000_v30 = vcombine.high %v1661_v15, %v1665_v21 }
 0x27d   : > { %4472 = vmatpush1.bf16.msra.mxu0 %v16911_v36  ;;  %4636 = vmatpush1.bf16.msra.mxu1 %v16913_v39  ;;  %v1634_v36 = vld [vmem:[#allocation8 + $0xba8] sm:$0xff]  ;;  %v21319_v39 = vsub.s32 7, %v21254_v17 }
 0x27e   : > { %4473 = vmatprep.subr.bf16.mxu0 %v16920_v40  ;;  %4637 = vmatprep.subr.bf16.mxu1 %v16922_v6  ;;  %v21321_v40 = vld [vmem:[#allocation7] sm:$0xff]  ;;  %v16970_v48 = vcombine.high %v1630_v33, %v1634_v36  ;;  %v16969_v57 = vcombine.low %v1630_v33, %v1634_v36  ;;  %v1673_v33 = vld [vmem:[#allocation8 + $0xce0] sm:$0xff]  ;;  %v1670_v36 = vld [vmem:[#allocation8 + $0xcc8] sm:$0xff] }
 0x27f   : > { %v1060_v6 = vrot.slane %v21321_v40, %v21316_v26  ;;  %v1072_v54 = vrot.slane %v21321_v40, %v21319_v39 }
 0x281   : > { %4474 = vmatpush1.bf16.msra.mxu0 %v16919_v49  ;;  %4638 = vmatpush1.bf16.msra.mxu1 %v16921_v50  ;;  %v1637_v49 = vld [vmem:[#allocation8 + $0xbc0] sm:$0xff]  ;;  %v1198_v55 = vadd.f32 %v21287_v45, %v1060_v6  ;;  %v1241_v2 = vadd.f32 %v21293_v35, %v1072_v54  ;;  %v16985_v35 = vcombine.low %v1646_v63, %v1650_v1  ;;  %v1674_v6 = vld [vmem:[#allocation8 + $0xce8] sm:$0xff] }
 0x282   : > { %4475 = vmatprep.subr.bf16.mxu0 %v16928_v52  ;;  %4639 = vmatprep.subr.bf16.mxu1 %v16930_v53  ;;  %v1641_v50 = vld [vmem:[#allocation8 + $0xbe0] sm:$0xff]  ;;  %v1638_v52 = vld [vmem:[#allocation8 + $0xbc8] sm:$0xff] }
 0x283   : > { %v1642_v53 = vld [vmem:[#allocation8 + $0xbe8] sm:$0xff]  ;;  %v1249_v3 = vmax.f32 %v1198_v55, 0.0  ;;  %v1252_v19 = vmax.f32 %v1241_v2, 0.0  ;;  %v17009_v55 = vcombine.low %v1670_v36, %v1674_v6 }
 0x285   : > { %4476 = vmatpush1.bf16.msra.mxu0 %v16927_v59  ;;  %4640 = vmatpush1.bf16.msra.mxu1 %v16929_v60  ;;  %v16976_v59 = vcombine.high %v1637_v49, %v1641_v50  ;;  %v16978_v60 = vcombine.high %v1638_v52, %v1642_v53 }
 0x286   : > { %4477 = vmatprep.subr.bf16.mxu0 %v16936_v61  ;;  %4641 = vmatprep.subr.bf16.mxu1 %v16938_v62  ;;  %v1645_v61 = vld [vmem:[#allocation8 + $0xc00] sm:$0xff] }
 0x287   : > { %v1649_v62 = vld [vmem:[#allocation8 + $0xc20] sm:$0xff] }
 0x288   : > { %v16984_v45 = vcombine.high %v1645_v61, %v1649_v62 }
 0x289   : > { %4478 = vmatpush1.bf16.msra.mxu0 %v16935_v4  ;;  %4642 = vmatpush1.bf16.msra.mxu1 %v16937_v5  ;;  %v16975_v4 = vcombine.low %v1637_v49, %v1641_v50  ;;  %v16977_v5 = vcombine.low %v1638_v52, %v1642_v53  ;;  %v1677_v49 = vld [vmem:[#allocation8 + $0xd00] sm:$0xff]  ;;  %v1678_v52 = vld [vmem:[#allocation8 + $0xd08] sm:$0xff] }
 0x28a   : > { %4479 = vmatprep.subr.bf16.mxu0 %v16944_v7  ;;  %4643 = vmatprep.subr.bf16.mxu1 %v16946_v8  ;;  %v16986_v7 = vcombine.high %v1646_v63, %v1650_v1  ;;  %v1653_v8 = vld [vmem:[#allocation8 + $0xc40] sm:$0xff]  ;;  %v1682_v53 = vld [vmem:[#allocation8 + $0xd28] sm:$0xff] }
 0x28b   : > { %v1681_v50 = vld [vmem:[#allocation8 + $0xd20] sm:$0xff]  ;;  %v17017_v1 = vcombine.low %v1678_v52, %v1682_v53 }
 0x28c   : > { %v17015_v63 = vcombine.low %v1677_v49, %v1681_v50 }
 0x28d   : > { %4480 = vmatpush1.bf16.msra.mxu0 %v16943_v12  ;;  %4644 = vmatpush1.bf16.msra.mxu1 %v16945_v41  ;;  %v21329_v12 = vpack.c.bf16 %v1249_v3, %v1249_v3  ;;  %v16983_v41 = vcombine.low %v1645_v61, %v1649_v62  ;;  %v1686_v61 = vld [vmem:[#allocation8 + $0xd48] sm:$0xff] }
 0x28e   : > { %4481 = vmatprep.subr.bf16.mxu0 %v16952_v13  ;;  %4645 = vmatprep.subr.bf16.mxu1 %v16954_v14  ;;  %v16992_v13 = vcombine.high %v1653_v8, %v1657_v9  ;;  %v16994_v14 = vcombine.high %v1654_v10, %v1658_v11  ;;  %v1690_v62 = vld [vmem:[#allocation8 + $0xd68] sm:$0xff] }
 0x28f   : > { %v17026_v3 = vcombine.high %v1686_v61, %v1690_v62 }
 0x291   : > { %4482 = vmatpush1.bf16.msra.mxu0 %v16951_v46  ;;  %4646 = vmatpush1.bf16.msra.mxu1 %v16953_v27  ;;  %v21331_v46 = vpack.c.bf16 %v1252_v19, %v1252_v19  ;;  %v16991_v27 = vcombine.low %v1653_v8, %v1657_v9  ;;  %v17025_v9 = vcombine.low %v1686_v61, %v1690_v62  ;;  %v1701_v19 = vld [vmem:[#allocation8 + $0xdc0] sm:$0xff] }
 0x292   : > { %4483 = vmatprep.subr.bf16.mxu0 %v16960_v28  ;;  %4647 = vmatprep.subr.bf16.mxu1 %v16962_v29  ;;  %v16993_v28 = vcombine.low %v1654_v10, %v1658_v11  ;;  %v1669_v29 = vld [vmem:[#allocation8 + $0xcc0] sm:$0xff] }
 0x293   : > { %v17007_v54 = vcombine.low %v1669_v29, %v1673_v33  ;;  %v1733_v62 = vld [vmem:[#allocation8 + $0xec0] sm:$0xff] }
 0x295   : > { %4484 = vmatpush1.bf16.msra.mxu0 %v16959_v43  ;;  %4648 = vmatpush1.bf16.msra.mxu1 %v16961_v44  ;;  %v16999_v43 = vcombine.low %v1661_v15, %v1665_v21  ;;  %v17001_v44 = vcombine.low %v1662_v22, %v1666_v23  ;;  %v1709_v23 = vld [vmem:[#allocation8 + $0xe00] sm:$0xff] }
 0x296   : > { %4485 = vmatprep.subr.bf16.mxu0 %v16968_v47  ;;  %4649 = vmatprep.subr.bf16.mxu1 %v16970_v48  ;;  %v17008_v47 = vcombine.high %v1669_v29, %v1673_v33  ;;  %v17010_v48 = vcombine.high %v1670_v36, %v1674_v6  ;;  %v1714_v29 = vld [vmem:[#allocation8 + $0xe28] sm:$0xff]  ;;  %v1717_v6 = vld [vmem:[#allocation8 + $0xe40] sm:$0xff] }
 0x299   : > { %4486 = vmatpush1.bf16.msra.mxu0 %v16967_v56  ;;  %4650 = vmatpush1.bf16.msra.mxu1 %v16969_v57  ;;  %v17016_v56 = vcombine.high %v1677_v49, %v1681_v50  ;;  %v17018_v57 = vcombine.high %v1678_v52, %v1682_v53  ;;  %v1725_v53 = vld [vmem:[#allocation8 + $0xe80] sm:$0xff] }
 0x29a   : > { %4487 = vmatprep.subr.bf16.mxu0 %v16976_v59  ;;  %4651 = vmatprep.subr.bf16.mxu1 %v16978_v60  ;;  %v1685_v59 = vld [vmem:[#allocation8 + $0xd40] sm:$0xff] }
 0x29b   : > { %v1689_v60 = vld [vmem:[#allocation8 + $0xd60] sm:$0xff] }
 0x29c   : > { %v17024_v2 = vcombine.high %v1685_v59, %v1689_v60  ;;  %v17023_v8 = vcombine.low %v1685_v59, %v1689_v60 }
 0x29d   : > { %4488 = vmatpush1.bf16.msra.mxu0 %v16975_v4  ;;  %4652 = vmatpush1.bf16.msra.mxu1 %v16977_v5  ;;  %v1693_v4 = vld [vmem:[#allocation8 + $0xd80] sm:$0xff] }
 0x29e   : > { %4498 = vmatprep.subr.bf16.mxu0 %v16984_v45  ;;  %4662 = vmatprep.subr.bf16.mxu1 %v16986_v7  ;;  %v1697_v5 = vld [vmem:[#allocation8 + $0xda0] sm:$0xff]  ;;  %v1694_v45 = vld [vmem:[#allocation8 + $0xd88] sm:$0xff] }
 0x29f   : > { %v1698_v7 = vld [vmem:[#allocation8 + $0xda8] sm:$0xff]  ;;  %v17032_v10 = vcombine.high %v1693_v4, %v1697_v5 }
 0x2a0   : > { %4490 = vmatmul.mubr.bf16.vlgmr.msra.gmra.mrb[8].mxu0 %v21329_v12  ;;  %4654 = vmatmul.mubr.bf16.vlgmr.msra.gmra.mrb[8].mxu1 %v21329_v12  ;;  %v17034_v11 = vcombine.high %v1694_v45, %v1698_v7  ;;  %v17033_v15 = vcombine.low %v1694_v45, %v1698_v7  ;;  %v1741_v7 = vld [vmem:[#allocation8 + $0xf00] sm:$0xff] }
 0x2a1   : > { %4499 = vmatpush1.bf16.msra.mxu0 %v16983_v41  ;;  %4663 = vmatpush1.bf16.msra.mxu1 %v16985_v35  ;;  %v1705_v41 = vld [vmem:[#allocation8 + $0xde0] sm:$0xff]  ;;  %v1702_v35 = vld [vmem:[#allocation8 + $0xdc8] sm:$0xff] }
 0x2a2   : > { %4500 = vmatprep.subr.bf16.mxu0 %v16992_v13  ;;  %4664 = vmatprep.subr.bf16.mxu1 %v16994_v14  ;;  %v1706_v13 = vld [vmem:[#allocation8 + $0xde8] sm:$0xff]  ;;  %v17031_v14 = vcombine.low %v1693_v4, %v1697_v5  ;;  %v17040_v21 = vcombine.high %v1701_v19, %v1705_v41 }
 0x2a3   : > { %4530 = vmatprep.mubr.bf16.mxu0 %v21331_v46  ;;  %4694 = vmatprep.mubr.bf16.mxu1 %v21331_v46  ;;  %v17042_v22 = vcombine.high %v1702_v35, %v1706_v13 }
 0x2a5   : > { %4501 = vmatpush1.bf16.msra.mxu0 %v16991_v27  ;;  %4665 = vmatpush1.bf16.msra.mxu1 %v16993_v28  ;;  %v1713_v27 = vld [vmem:[#allocation8 + $0xe20] sm:$0xff]  ;;  %v1710_v28 = vld [vmem:[#allocation8 + $0xe08] sm:$0xff] }
 0x2a6   : > { %4502 = vmatprep.subr.bf16.mxu0 %v17000_v30  ;;  %4666 = vmatprep.subr.bf16.mxu1 %v17002_v32  ;;  %v17039_v30 = vcombine.low %v1701_v19, %v1705_v41  ;;  %v17041_v32 = vcombine.low %v1702_v35, %v1706_v13  ;;  %v17048_v33 = vcombine.high %v1709_v23, %v1713_v27  ;;  %v1749_v13 = vld [vmem:[#allocation8 + $0xf40] sm:$0xff] }
 0x2a7   : > { %v17050_v36 = vcombine.high %v1710_v28, %v1714_v29  ;;  %v17049_v49 = vcombine.low %v1710_v28, %v1714_v29 }
 0x2a9   : > { %4503 = vmatpush1.bf16.msra.mxu0 %v16999_v43  ;;  %4667 = vmatpush1.bf16.msra.mxu1 %v17001_v44  ;;  %v1721_v43 = vld [vmem:[#allocation8 + $0xe60] sm:$0xff]  ;;  %v1718_v44 = vld [vmem:[#allocation8 + $0xe48] sm:$0xff] }
 0x2aa   : > { %4504 = vmatprep.subr.bf16.mxu0 %v17008_v47  ;;  %4668 = vmatprep.subr.bf16.mxu1 %v17010_v48  ;;  %v1722_v47 = vld [vmem:[#allocation8 + $0xe68] sm:$0xff]  ;;  %v17047_v48 = vcombine.low %v1709_v23, %v1713_v27  ;;  %v17056_v50 = vcombine.high %v1717_v6, %v1721_v43  ;;  %v21338_v27 = vsub.s32 6, %v21254_v17 }
 0x2ab   : > { %v17058_v52 = vcombine.high %v1718_v44, %v1722_v47  ;;  %v17057_v59 = vcombine.low %v1718_v44, %v1722_v47 }
 0x2ac   : > { %v1068_v44 = vrot.slane %v21321_v40, %v21338_v27  ;;  %v1267_v40 = vld [vmem:[#allocation8 + $0x30] sm:$0xff] }
 0x2ad   : > { %4505 = vmatpush1.bf16.msra.mxu0 %v17007_v54  ;;  %4669 = vmatpush1.bf16.msra.mxu1 %v17009_v55  ;;  %v1729_v54 = vld [vmem:[#allocation8 + $0xea0] sm:$0xff]  ;;  %v1726_v55 = vld [vmem:[#allocation8 + $0xe88] sm:$0xff] }
 0x2ae   : > { %4506 = vmatprep.subr.bf16.mxu0 %v17016_v56  ;;  %4670 = vmatprep.subr.bf16.mxu1 %v17018_v57  ;;  %v1730_v56 = vld [vmem:[#allocation8 + $0xea8] sm:$0xff]  ;;  %v17055_v57 = vcombine.low %v1717_v6, %v1721_v43  ;;  %v17064_v60 = vcombine.high %v1725_v53, %v1729_v54 }
 0x2af   : > { %v17066_v61 = vcombine.high %v1726_v55, %v1730_v56  ;;  %v17065_v4 = vcombine.low %v1726_v55, %v1730_v56  ;;  %v1239_v56 = vadd.f32 %v21291_v31, %v1068_v44  ;;  %v1272_v31 = vld [vmem:[#allocation8 + $0x58] sm:$0xff]  ;;  %v1299_v44 = vld [vmem:[#allocation8 + $0x130] sm:$0xff] }
 0x2b1   : > { %4507 = vmatpush1.bf16.msra.mxu0 %v17015_v63  ;;  %4671 = vmatpush1.bf16.msra.mxu1 %v17017_v1  ;;  %v1737_v63 = vld [vmem:[#allocation8 + $0xee0] sm:$0xff]  ;;  %v1734_v1 = vld [vmem:[#allocation8 + $0xec8] sm:$0xff] }
 0x2b2   : > { %4508 = vmatprep.subr.bf16.mxu0 %v17024_v2  ;;  %4672 = vmatprep.subr.bf16.mxu1 %v17026_v3  ;;  %v1738_v2 = vld [vmem:[#allocation8 + $0xee8] sm:$0xff]  ;;  %v17063_v3 = vcombine.low %v1725_v53, %v1729_v54  ;;  %v17072_v5 = vcombine.high %v1733_v62, %v1737_v63 }
 0x2b3   : > { %v17074_v45 = vcombine.high %v1734_v1, %v1738_v2  ;;  %v17073_v19 = vcombine.low %v1734_v1, %v1738_v2  ;;  %v1770_v53 = vld [vmem:[#allocation8 + $0xfe8] sm:$0xff]  ;;  %v1251_v2 = vmax.f32 %v1239_v56, 0.0 }
 0x2b5   : > { %4509 = vmatpush1.bf16.msra.mxu0 %v17023_v8  ;;  %4673 = vmatpush1.bf16.msra.mxu1 %v17025_v9  ;;  %v1745_v8 = vld [vmem:[#allocation8 + $0xf20] sm:$0xff]  ;;  %v1742_v9 = vld [vmem:[#allocation8 + $0xf08] sm:$0xff] }
 0x2b6   : > { %4510 = vmatprep.subr.bf16.mxu0 %v17032_v10  ;;  %4674 = vmatprep.subr.bf16.mxu1 %v17034_v11  ;;  %v1746_v10 = vld [vmem:[#allocation8 + $0xf28] sm:$0xff]  ;;  %v17071_v11 = vcombine.low %v1733_v62, %v1737_v63  ;;  %v17080_v41 = vcombine.high %v1741_v7, %v1745_v8  ;;  %v1268_v62 = vld [vmem:[#allocation8 + $0x38] sm:$0xff] }
 0x2b7   : > { %v17082_v35 = vcombine.high %v1742_v9, %v1746_v10  ;;  %v17081_v23 = vcombine.low %v1742_v9, %v1746_v10  ;;  %v21343_v9 = vpack.c.bf16 %v1251_v2, %v1251_v2  ;;  %v1316_v2 = vld [vmem:[#allocation8 + $0x1b8] sm:$0xff] }
 0x2b9   : > { %4511 = vmatpush1.bf16.msra.mxu0 %v17031_v14  ;;  %4675 = vmatpush1.bf16.msra.mxu1 %v17033_v15  ;;  %v1753_v14 = vld [vmem:[#allocation8 + $0xf60] sm:$0xff]  ;;  %v1750_v15 = vld [vmem:[#allocation8 + $0xf48] sm:$0xff] }
 0x2ba   : > { %4512 = vmatprep.subr.bf16.mxu0 %v17040_v21  ;;  %4676 = vmatprep.subr.bf16.mxu1 %v17042_v22  ;;  %v1754_v21 = vld [vmem:[#allocation8 + $0xf68] sm:$0xff]  ;;  %v17079_v22 = vcombine.low %v1741_v7, %v1745_v8  ;;  %v17088_v28 = vcombine.high %v1749_v13, %v1753_v14  ;;  %v17087_v6 = vcombine.low %v1749_v13, %v1753_v14  ;;  %v1276_v7 = vld [vmem:[#allocation8 + $0x78] sm:$0xff] }
 0x2bb   : > { %v17090_v29 = vcombine.high %v1750_v15, %v1754_v21  ;;  %v17089_v43 = vcombine.low %v1750_v15, %v1754_v21  ;;  %v1280_v13 = vld [vmem:[#allocation8 + $0x98] sm:$0xff]  ;;  %v16613_v21 = vcombine.low %v1272_v31, %v1276_v7 }
 0x2bc   : > { %v1284_v14 = vld [vmem:[#allocation8 + $0xb8] sm:$0xff] }
 0x2bd   : > { %4513 = vmatpush1.bf16.msra.mxu0 %v17039_v30  ;;  %4677 = vmatpush1.bf16.msra.mxu1 %v17041_v32  ;;  %v1757_v30 = vld [vmem:[#allocation8 + $0xf80] sm:$0xff] }
 0x2be   : > { %4514 = vmatprep.subr.bf16.mxu0 %v17048_v33  ;;  %4678 = vmatprep.subr.bf16.mxu1 %v17050_v36  ;;  %v1761_v32 = vld [vmem:[#allocation8 + $0xfa0] sm:$0xff]  ;;  %v1758_v33 = vld [vmem:[#allocation8 + $0xf88] sm:$0xff] }
 0x2bf   : > { %v1762_v36 = vld [vmem:[#allocation8 + $0xfa8] sm:$0xff]  ;;  %v17096_v47 = vcombine.high %v1757_v30, %v1761_v32  ;;  %v17095_v54 = vcombine.low %v1757_v30, %v1761_v32  ;;  %v1288_v30 = vld [vmem:[#allocation8 + $0xd8] sm:$0xff] }
 0x2c0   : > { %v17097_v55 = vcombine.low %v1758_v33, %v1762_v36  ;;  %v1292_v32 = vld [vmem:[#allocation8 + $0xf8] sm:$0xff] }
 0x2c1   : > { %4515 = vmatpush1.bf16.msra.mxu0 %v17047_v48  ;;  %4679 = vmatpush1.bf16.msra.mxu1 %v17049_v49  ;;  %v17098_v48 = vcombine.high %v1758_v33, %v1762_v36  ;;  %v1765_v49 = vld [vmem:[#allocation8 + $0xfc0] sm:$0xff]  ;;  %v16621_v36 = vcombine.low %v1280_v13, %v1284_v14 }
 0x2c2   : > { %4516 = vmatprep.subr.bf16.mxu0 %v17056_v50  ;;  %4680 = vmatprep.subr.bf16.mxu1 %v17058_v52  ;;  %v1769_v50 = vld [vmem:[#allocation8 + $0xfe0] sm:$0xff]  ;;  %v1766_v52 = vld [vmem:[#allocation8 + $0xfc8] sm:$0xff] }
 0x2c3   : > { %v17103_v63 = vcombine.low %v1765_v49, %v1769_v50  ;;  %v17105_v1 = vcombine.low %v1766_v52, %v1770_v53 }
 0x2c5   : > { %4517 = vmatpush1.bf16.msra.mxu0 %v17055_v57  ;;  %4681 = vmatpush1.bf16.msra.mxu1 %v17057_v59  ;;  %v17104_v57 = vcombine.high %v1765_v49, %v1769_v50  ;;  %v17106_v59 = vcombine.high %v1766_v52, %v1770_v53  ;;  %v16629_v50 = vcombine.low %v1288_v30, %v1292_v32  ;;  %v1303_v53 = vld [vmem:[#allocation8 + $0x150] sm:$0xff] }
 0x2c6   : > { %4518 = vmatprep.subr.bf16.mxu0 %v17064_v60  ;;  %4682 = vmatprep.subr.bf16.mxu1 %v17066_v61  ;;  %v1263_v60 = vld [vmem:[#allocation8 + $0x10] sm:$0xff]  ;;  %v1264_v61 = vld [vmem:[#allocation8 + $0x18] sm:$0xff] }
 0x2c7   : > { %v16603_v8 = vcombine.low %v1263_v60, %v1267_v40  ;;  %v16605_v10 = vcombine.low %v1264_v61, %v1268_v62 }
 0x2c9   : > { %4519 = vmatpush1.bf16.msra.mxu0 %v17063_v3  ;;  %4683 = vmatpush1.bf16.msra.mxu1 %v17065_v4  ;;  %v16604_v3 = vcombine.high %v1263_v60, %v1267_v40  ;;  %v16606_v4 = vcombine.high %v1264_v61, %v1268_v62  ;;  %v1311_v61 = vld [vmem:[#allocation8 + $0x190] sm:$0xff] }
 0x2ca   : > { %4520 = vmatprep.subr.bf16.mxu0 %v17072_v5  ;;  %4684 = vmatprep.subr.bf16.mxu1 %v17074_v45  ;;  %v1271_v5 = vld [vmem:[#allocation8 + $0x50] sm:$0xff] }
 0x2cb   : > { %v1275_v45 = vld [vmem:[#allocation8 + $0x70] sm:$0xff] }
 0x2cc   : > { %v16611_v15 = vcombine.low %v1271_v5, %v1275_v45  ;;  %v1315_v62 = vld [vmem:[#allocation8 + $0x1b0] sm:$0xff] }
 0x2cd   : > { %4521 = vmatpush1.bf16.msra.mxu0 %v17071_v11  ;;  %4685 = vmatpush1.bf16.msra.mxu1 %v17073_v19  ;;  %v16612_v11 = vcombine.high %v1271_v5, %v1275_v45  ;;  %v16614_v19 = vcombine.high %v1272_v31, %v1276_v7  ;;  %v16652_v5 = vcombine.high %v1311_v61, %v1315_v62  ;;  %v1319_v45 = vld [vmem:[#allocation8 + $0x1d0] sm:$0xff]  ;;  %v1320_v7 = vld [vmem:[#allocation8 + $0x1d8] sm:$0xff] }
 0x2ce   : > { %4522 = vmatprep.subr.bf16.mxu0 %v17080_v41  ;;  %4686 = vmatprep.subr.bf16.mxu1 %v17082_v35  ;;  %v1279_v41 = vld [vmem:[#allocation8 + $0x90] sm:$0xff] }
 0x2cf   : > { %v1283_v35 = vld [vmem:[#allocation8 + $0xb0] sm:$0xff] }
 0x2d0   : > { %v16619_v33 = vcombine.low %v1279_v41, %v1283_v35  ;;  %v1323_v31 = vld [vmem:[#allocation8 + $0x1f0] sm:$0xff] }
 0x2d1   : > { %4523 = vmatpush1.bf16.msra.mxu0 %v17079_v22  ;;  %4687 = vmatpush1.bf16.msra.mxu1 %v17081_v23  ;;  %v16620_v22 = vcombine.high %v1279_v41, %v1283_v35  ;;  %v16622_v23 = vcombine.high %v1280_v13, %v1284_v14  ;;  %v16660_v41 = vcombine.high %v1319_v45, %v1323_v31  ;;  %v1327_v35 = vld [vmem:[#allocation8 + $0x210] sm:$0xff]  ;;  %v1328_v14 = vld [vmem:[#allocation8 + $0x218] sm:$0xff] }
 0x2d2   : > { %4524 = vmatprep.subr.bf16.mxu0 %v17088_v28  ;;  %4688 = vmatprep.subr.bf16.mxu1 %v17090_v29  ;;  %v1287_v28 = vld [vmem:[#allocation8 + $0xd0] sm:$0xff] }
 0x2d3   : > { %v1291_v29 = vld [vmem:[#allocation8 + $0xf0] sm:$0xff] }
 0x2d4   : > { %v16627_v49 = vcombine.low %v1287_v28, %v1291_v29  ;;  %v1331_v13 = vld [vmem:[#allocation8 + $0x230] sm:$0xff] }
 0x2d5   : > { %4525 = vmatpush1.bf16.msra.mxu0 %v17087_v6  ;;  %4689 = vmatpush1.bf16.msra.mxu1 %v17089_v43  ;;  %v16628_v6 = vcombine.high %v1287_v28, %v1291_v29  ;;  %v1295_v43 = vld [vmem:[#allocation8 + $0x110] sm:$0xff]  ;;  %v16668_v28 = vcombine.high %v1327_v35, %v1331_v13 }
 0x2d6   : > { %4526 = vmatprep.subr.bf16.mxu0 %v17096_v47  ;;  %4690 = vmatprep.subr.bf16.mxu1 %v17098_v48  ;;  %v1296_v47 = vld [vmem:[#allocation8 + $0x118] sm:$0xff]  ;;  %v16636_v52 = vcombine.high %v1295_v43, %v1299_v44  ;;  %v1335_v29 = vld [vmem:[#allocation8 + $0x250] sm:$0xff] }
 0x2d7   : > { %v1300_v48 = vld [vmem:[#allocation8 + $0x138] sm:$0xff] }
 0x2d8   : > { %v16638_v56 = vcombine.high %v1296_v47, %v1300_v48  ;;  %v16637_v60 = vcombine.low %v1296_v47, %v1300_v48  ;;  %v1343_v47 = vld [vmem:[#allocation8 + $0x290] sm:$0xff]  ;;  %v1344_v48 = vld [vmem:[#allocation8 + $0x298] sm:$0xff] }
 0x2d9   : > { %4527 = vmatpush1.bf16.msra.mxu0 %v17095_v54  ;;  %4691 = vmatpush1.bf16.msra.mxu1 %v17097_v55  ;;  %v1307_v54 = vld [vmem:[#allocation8 + $0x170] sm:$0xff]  ;;  %v1304_v55 = vld [vmem:[#allocation8 + $0x158] sm:$0xff] }
 0x2da   : > { %4528 = vmatprep.subr.bf16.mxu0 %v17104_v57  ;;  %4692 = vmatprep.subr.bf16.mxu1 %v17106_v59  ;;  %v1308_v57 = vld [vmem:[#allocation8 + $0x178] sm:$0xff]  ;;  %v16635_v59 = vcombine.low %v1295_v43, %v1299_v44  ;;  %v16644_v40 = vcombine.high %v1303_v53, %v1307_v54 }
 0x2dd   : > { %4529 = vmatpush1.bf16.msra.mxu0 %v17103_v63  ;;  %4693 = vmatpush1.bf16.msra.mxu1 %v17105_v1  ;;  %v1312_v63 = vld [vmem:[#allocation8 + $0x198] sm:$0xff]  ;;  %v16646_v1 = vcombine.high %v1304_v55, %v1308_v57 }
 0x2de   : > { %4703 = vmatprep.subr.bf16.mxu0 %v16604_v3  ;;  %4867 = vmatprep.subr.bf16.mxu1 %v16606_v4  ;;  %v16643_v3 = vcombine.low %v1303_v53, %v1307_v54  ;;  %v16645_v4 = vcombine.low %v1304_v55, %v1308_v57  ;;  %v1351_v55 = vld [vmem:[#allocation8 + $0x2d0] sm:$0xff]  ;;  %v1352_v57 = vld [vmem:[#allocation8 + $0x2d8] sm:$0xff] }
 0x2e0   : > { %4531 = vmatmul.mubr.bf16.vlgmr.msra.gmra.mrb[8].mxu0 %v21343_v9  ;;  %4695 = vmatmul.mubr.bf16.vlgmr.msra.gmra.mrb[8].mxu1 %v21343_v9 }
 0x2e1   : > { %4704 = vmatpush1.bf16.msra.mxu0 %v16603_v8  ;;  %4735 = vmatprep.mubr.bf16.mxu0 %v21273_v37  ;;  %v16654_v8 = vcombine.high %v1312_v63, %v1316_v2 }
 0x2e2   : > { %4868 = vmatpush1.bf16.msra.mxu1 %v16605_v10  ;;  %4899 = vmatprep.mubr.bf16.mxu1 %v21273_v37  ;;  %v16630_v37 = vcombine.high %v1288_v30, %v1292_v32  ;;  %v1324_v10 = vld [vmem:[#allocation8 + $0x1f8] sm:$0xff]  ;;  %v1339_v30 = vld [vmem:[#allocation8 + $0x270] sm:$0xff] }
 0x2e3   : > { %4705 = vmatprep.subr.bf16.mxu0 %v16612_v11  ;;  %4869 = vmatprep.subr.bf16.mxu1 %v16614_v19  ;;  %v16651_v11 = vcombine.low %v1311_v61, %v1315_v62  ;;  %v16653_v19 = vcombine.low %v1312_v63, %v1316_v2  ;;  %v1336_v32 = vld [vmem:[#allocation8 + $0x258] sm:$0xff]  ;;  %v16676_v44 = vcombine.high %v1335_v29, %v1339_v30  ;;  %v1359_v63 = vld [vmem:[#allocation8 + $0x310] sm:$0xff] }
 0x2e4   : > { %v1360_v2 = vld [vmem:[#allocation8 + $0x318] sm:$0xff] }
 0x2e5   : > { %4706 = vmatpush1.bf16.msra.mxu0 %v16611_v15  ;;  %v16662_v15 = vcombine.high %v1320_v7, %v1324_v10 }
 0x2e6   : > { %4870 = vmatpush1.bf16.msra.mxu1 %v16613_v21  ;;  %4707 = vmatprep.subr.bf16.mxu0 %v16620_v22  ;;  %v1332_v21 = vld [vmem:[#allocation8 + $0x238] sm:$0xff]  ;;  %v16659_v22 = vcombine.low %v1319_v45, %v1323_v31 }
 0x2e7   : > { %4871 = vmatprep.subr.bf16.mxu1 %v16622_v23  ;;  %v16661_v23 = vcombine.low %v1320_v7, %v1324_v10  ;;  %v16669_v43 = vcombine.low %v1328_v14, %v1332_v21  ;;  %v1367_v7 = vld [vmem:[#allocation8 + $0x350] sm:$0xff]  ;;  %v1368_v10 = vld [vmem:[#allocation8 + $0x358] sm:$0xff] }
 0x2e9   : > { %4708 = vmatpush1.bf16.msra.mxu0 %v16619_v33  ;;  %v16670_v33 = vcombine.high %v1328_v14, %v1332_v21  ;;  %v1375_v14 = vld [vmem:[#allocation8 + $0x390] sm:$0xff]  ;;  %v1376_v21 = vld [vmem:[#allocation8 + $0x398] sm:$0xff] }
 0x2ea   : > { %4872 = vmatpush1.bf16.msra.mxu1 %v16621_v36  ;;  %4709 = vmatprep.subr.bf16.mxu0 %v16628_v6  ;;  %v1340_v36 = vld [vmem:[#allocation8 + $0x278] sm:$0xff]  ;;  %v16667_v6 = vcombine.low %v1327_v35, %v1331_v13 }
 0x2eb   : > { %4873 = vmatprep.subr.bf16.mxu1 %v16630_v37  ;;  %v1347_v37 = vld [vmem:[#allocation8 + $0x2b0] sm:$0xff]  ;;  %v16677_v53 = vcombine.low %v1336_v32, %v1340_v36 }
 0x2ec   : > { %v16684_v54 = vcombine.high %v1343_v47, %v1347_v37 }
 0x2ed   : > { %4710 = vmatpush1.bf16.msra.mxu0 %v16627_v49  ;;  %v16678_v49 = vcombine.high %v1336_v32, %v1340_v36  ;;  %v1383_v32 = vld [vmem:[#allocation8 + $0x3d0] sm:$0xff]  ;;  %v1384_v36 = vld [vmem:[#allocation8 + $0x3d8] sm:$0xff] }
 0x2ee   : > { %4874 = vmatpush1.bf16.msra.mxu1 %v16629_v50  ;;  %4711 = vmatprep.subr.bf16.mxu0 %v16636_v52  ;;  %v1348_v50 = vld [vmem:[#allocation8 + $0x2b8] sm:$0xff]  ;;  %v16675_v52 = vcombine.low %v1335_v29, %v1339_v30 }
 0x2ef   : > { %4875 = vmatprep.subr.bf16.mxu1 %v16638_v56  ;;  %v1355_v56 = vld [vmem:[#allocation8 + $0x2f0] sm:$0xff]  ;;  %v16685_v61 = vcombine.low %v1344_v48, %v1348_v50 }
 0x2f0   : > { %v16692_v62 = vcombine.high %v1351_v55, %v1355_v56 }
 0x2f1   : > { %4712 = vmatpush1.bf16.msra.mxu0 %v16635_v59  ;;  %v16686_v59 = vcombine.high %v1344_v48, %v1348_v50  ;;  %v1391_v48 = vld [vmem:[#allocation8 + $0x410] sm:$0xff]  ;;  %v1392_v50 = vld [vmem:[#allocation8 + $0x418] sm:$0xff] }
 0x2f2   : > { %4876 = vmatpush1.bf16.msra.mxu1 %v16637_v60  ;;  %4713 = vmatprep.subr.bf16.mxu0 %v16644_v40  ;;  %v1356_v60 = vld [vmem:[#allocation8 + $0x2f8] sm:$0xff]  ;;  %v16683_v40 = vcombine.low %v1343_v47, %v1347_v37 }
 0x2f3   : > { %4877 = vmatprep.subr.bf16.mxu1 %v16646_v1  ;;  %v1363_v1 = vld [vmem:[#allocation8 + $0x330] sm:$0xff]  ;;  %v16693_v45 = vcombine.low %v1352_v57, %v1356_v60 }
 0x2f4   : > { %v16700_v31 = vcombine.high %v1359_v63, %v1363_v1 }
 0x2f5   : > { %4714 = vmatpush1.bf16.msra.mxu0 %v16643_v3  ;;  %v16694_v3 = vcombine.high %v1352_v57, %v1356_v60  ;;  %v1399_v57 = vld [vmem:[#allocation8 + $0x450] sm:$0xff] }
 0x2f6   : > { %4878 = vmatpush1.bf16.msra.mxu1 %v16645_v4  ;;  %4715 = vmatprep.subr.bf16.mxu0 %v16652_v5  ;;  %v1364_v4 = vld [vmem:[#allocation8 + $0x338] sm:$0xff]  ;;  %v16691_v5 = vcombine.low %v1351_v55, %v1355_v56 }
 0x2f7   : > { %4879 = vmatprep.subr.bf16.mxu1 %v16654_v8  ;;  %v1371_v8 = vld [vmem:[#allocation8 + $0x370] sm:$0xff]  ;;  %v16701_v35 = vcombine.low %v1360_v2, %v1364_v4 }
 0x2f8   : > { %v16708_v13 = vcombine.high %v1367_v7, %v1371_v8 }
 0x2f9   : > { %4716 = vmatpush1.bf16.msra.mxu0 %v16651_v11  ;;  %v16702_v11 = vcombine.high %v1360_v2, %v1364_v4  ;;  %v1407_v2 = vld [vmem:[#allocation8 + $0x490] sm:$0xff]  ;;  %v1408_v4 = vld [vmem:[#allocation8 + $0x498] sm:$0xff] }
 0x2fa   : > { %4880 = vmatpush1.bf16.msra.mxu1 %v16653_v19  ;;  %4717 = vmatprep.subr.bf16.mxu0 %v16660_v41  ;;  %v1372_v19 = vld [vmem:[#allocation8 + $0x378] sm:$0xff]  ;;  %v16699_v41 = vcombine.low %v1359_v63, %v1363_v1 }
 0x2fb   : > { %4881 = vmatprep.subr.bf16.mxu1 %v16662_v15  ;;  %v1379_v15 = vld [vmem:[#allocation8 + $0x3b0] sm:$0xff]  ;;  %v16709_v29 = vcombine.low %v1368_v10, %v1372_v19 }
 0x2fc   : > { %v16716_v30 = vcombine.high %v1375_v14, %v1379_v15 }
 0x2fd   : > { %4718 = vmatpush1.bf16.msra.mxu0 %v16659_v22  ;;  %v16710_v22 = vcombine.high %v1368_v10, %v1372_v19  ;;  %v1419_v19 = vld [vmem:[#allocation8 + $0x4f0] sm:$0xff] }
 0x2fe   : > { %4882 = vmatpush1.bf16.msra.mxu1 %v16661_v23  ;;  %4719 = vmatprep.subr.bf16.mxu0 %v16668_v28  ;;  %v1380_v23 = vld [vmem:[#allocation8 + $0x3b8] sm:$0xff]  ;;  %v16707_v28 = vcombine.low %v1367_v7, %v1371_v8 }
 0x2ff   : > { %4883 = vmatprep.subr.bf16.mxu1 %v16670_v33  ;;  %v1387_v33 = vld [vmem:[#allocation8 + $0x3f0] sm:$0xff]  ;;  %v16717_v47 = vcombine.low %v1376_v21, %v1380_v23 }
 0x300   : > { %v16724_v37 = vcombine.high %v1383_v32, %v1387_v33 }
 0x301   : > { %4720 = vmatpush1.bf16.msra.mxu0 %v16667_v6  ;;  %v16718_v6 = vcombine.high %v1376_v21, %v1380_v23  ;;  %v1423_v21 = vld [vmem:[#allocation8 + $0x510] sm:$0xff]  ;;  %v1424_v23 = vld [vmem:[#allocation8 + $0x518] sm:$0xff] }
 0x302   : > { %4884 = vmatpush1.bf16.msra.mxu1 %v16669_v43  ;;  %4721 = vmatprep.subr.bf16.mxu0 %v16676_v44  ;;  %v1388_v43 = vld [vmem:[#allocation8 + $0x3f8] sm:$0xff]  ;;  %v16715_v44 = vcombine.low %v1375_v14, %v1379_v15 }
 0x303   : > { %4885 = vmatprep.subr.bf16.mxu1 %v16678_v49  ;;  %v1395_v49 = vld [vmem:[#allocation8 + $0x430] sm:$0xff]  ;;  %v16725_v55 = vcombine.low %v1384_v36, %v1388_v43 }
 0x304   : > { %v16732_v56 = vcombine.high %v1391_v48, %v1395_v49 }
 0x305   : > { %4722 = vmatpush1.bf16.msra.mxu0 %v16675_v52  ;;  %v16726_v52 = vcombine.high %v1384_v36, %v1388_v43  ;;  %v1435_v36 = vld [vmem:[#allocation8 + $0x570] sm:$0xff]  ;;  %v1436_v43 = vld [vmem:[#allocation8 + $0x578] sm:$0xff] }
 0x306   : > { %4886 = vmatpush1.bf16.msra.mxu1 %v16677_v53  ;;  %4723 = vmatprep.subr.bf16.mxu0 %v16684_v54  ;;  %v1396_v53 = vld [vmem:[#allocation8 + $0x438] sm:$0xff]  ;;  %v16723_v54 = vcombine.low %v1383_v32, %v1387_v33  ;;  %v1431_v33 = vld [vmem:[#allocation8 + $0x550] sm:$0xff] }
 0x307   : > { %4887 = vmatprep.subr.bf16.mxu1 %v16686_v59  ;;  %v1403_v59 = vld [vmem:[#allocation8 + $0x470] sm:$0xff]  ;;  %v16734_v60 = vcombine.high %v1392_v50, %v1396_v53  ;;  %v16733_v63 = vcombine.low %v1392_v50, %v1396_v53  ;;  %v1444_v53 = vld [vmem:[#allocation8 + $0x5b8] sm:$0xff] }
 0x308   : > { %v16740_v1 = vcombine.high %v1399_v57, %v1403_v59  ;;  %v1443_v50 = vld [vmem:[#allocation8 + $0x5b0] sm:$0xff] }
 0x309   : > { %4724 = vmatpush1.bf16.msra.mxu0 %v16683_v40  ;;  %v1400_v40 = vld [vmem:[#allocation8 + $0x458] sm:$0xff] }
 0x30a   : > { %4888 = vmatpush1.bf16.msra.mxu1 %v16685_v61  ;;  %4725 = vmatprep.subr.bf16.mxu0 %v16692_v62  ;;  %v1404_v61 = vld [vmem:[#allocation8 + $0x478] sm:$0xff]  ;;  %v16731_v62 = vcombine.low %v1391_v48, %v1395_v49  ;;  %v1439_v49 = vld [vmem:[#allocation8 + $0x590] sm:$0xff] }
 0x30b   : > { %4889 = vmatprep.subr.bf16.mxu1 %v16694_v3  ;;  %v1411_v3 = vld [vmem:[#allocation8 + $0x4b0] sm:$0xff]  ;;  %v16741_v7 = vcombine.low %v1400_v40, %v1404_v61 }
 0x30c   : > { %v16748_v8 = vcombine.high %v1407_v2, %v1411_v3 }
 0x30d   : > { %4726 = vmatpush1.bf16.msra.mxu0 %v16691_v5  ;;  %v16742_v5 = vcombine.high %v1400_v40, %v1404_v61  ;;  %v1448_v40 = vld [vmem:[#allocation8 + $0x5d8] sm:$0xff] }
 0x30e   : > { %4890 = vmatpush1.bf16.msra.mxu1 %v16693_v45  ;;  %4727 = vmatprep.subr.bf16.mxu0 %v16700_v31  ;;  %v1412_v45 = vld [vmem:[#allocation8 + $0x4b8] sm:$0xff]  ;;  %v16739_v31 = vcombine.low %v1399_v57, %v1403_v59  ;;  %v1447_v59 = vld [vmem:[#allocation8 + $0x5d0] sm:$0xff] }
 0x30f   : > { %4891 = vmatprep.subr.bf16.mxu1 %v16702_v11  ;;  %v16750_v10 = vcombine.high %v1408_v4, %v1412_v45  ;;  %v1415_v11 = vld [vmem:[#allocation8 + $0x4d0] sm:$0xff]  ;;  %v1452_v61 = vld [vmem:[#allocation8 + $0x5f8] sm:$0xff] }
 0x310   : > { %v16756_v14 = vcombine.high %v1415_v11, %v1419_v19 }
 0x311   : > { %4728 = vmatpush1.bf16.msra.mxu0 %v16699_v41  ;;  %v1416_v41 = vld [vmem:[#allocation8 + $0x4d8] sm:$0xff] }
 0x312   : > { %4892 = vmatpush1.bf16.msra.mxu1 %v16701_v35  ;;  %4729 = vmatprep.subr.bf16.mxu0 %v16708_v13  ;;  %v1420_v35 = vld [vmem:[#allocation8 + $0x4f8] sm:$0xff]  ;;  %v16747_v13 = vcombine.low %v1407_v2, %v1411_v3  ;;  %v16790_v2 = vcombine.high %v1448_v40, %v1452_v61  ;;  %v1455_v3 = vld [vmem:[#allocation8 + $0x610] sm:$0xff] }
 0x313   : > { %4893 = vmatprep.subr.bf16.mxu1 %v16710_v22  ;;  %v16758_v15 = vcombine.high %v1416_v41, %v1420_v35  ;;  %v1427_v22 = vld [vmem:[#allocation8 + $0x530] sm:$0xff] }
 0x315   : > { %4730 = vmatpush1.bf16.msra.mxu0 %v16707_v28  ;;  %v1428_v28 = vld [vmem:[#allocation8 + $0x538] sm:$0xff] }
 0x316   : > { %4894 = vmatpush1.bf16.msra.mxu1 %v16709_v29  ;;  %4731 = vmatprep.subr.bf16.mxu0 %v16716_v30  ;;  %v16757_v29 = vcombine.low %v1416_v41, %v1420_v35  ;;  %v16764_v30 = vcombine.high %v1423_v21, %v1427_v22  ;;  %v16766_v32 = vcombine.high %v1424_v23, %v1428_v28  ;;  %v1464_v41 = vld [vmem:[#allocation8 + $0x658] sm:$0xff] }
 0x317   : > { %4895 = vmatprep.subr.bf16.mxu1 %v16718_v6  ;;  %v1432_v6 = vld [vmem:[#allocation8 + $0x558] sm:$0xff] }
 0x318   : > { %v16774_v48 = vcombine.high %v1432_v6, %v1436_v43  ;;  %v1468_v35 = vld [vmem:[#allocation8 + $0x678] sm:$0xff] }
 0x319   : > { %4732 = vmatpush1.bf16.msra.mxu0 %v16715_v44  ;;  %v16763_v44 = vcombine.low %v1423_v21, %v1427_v22  ;;  %v1471_v21 = vld [vmem:[#allocation8 + $0x690] sm:$0xff] }
 0x31a   : > { %4896 = vmatpush1.bf16.msra.mxu1 %v16717_v47  ;;  %4733 = vmatprep.subr.bf16.mxu0 %v16724_v37  ;;  %v16765_v47 = vcombine.low %v1424_v23, %v1428_v28  ;;  %v16772_v37 = vcombine.high %v1431_v33, %v1435_v36  ;;  %v1475_v22 = vld [vmem:[#allocation8 + $0x6b0] sm:$0xff]  ;;  %v1472_v23 = vld [vmem:[#allocation8 + $0x698] sm:$0xff] }
 0x31b   : > { %4897 = vmatprep.subr.bf16.mxu1 %v16726_v52  ;;  %v1440_v52 = vld [vmem:[#allocation8 + $0x598] sm:$0xff] }
 0x31c   : > { %v16782_v57 = vcombine.high %v1440_v52, %v1444_v53  ;;  %v1476_v28 = vld [vmem:[#allocation8 + $0x6b8] sm:$0xff] }
 0x31d   : > { %4734 = vmatpush1.bf16.msra.mxu0 %v16723_v54  ;;  %v16771_v54 = vcombine.low %v1431_v33, %v1435_v36  ;;  %v1479_v33 = vld [vmem:[#allocation8 + $0x6d0] sm:$0xff] }
 0x31e   : > { %4898 = vmatpush1.bf16.msra.mxu1 %v16725_v55  ;;  %4744 = vmatprep.subr.bf16.mxu0 %v16732_v56  ;;  %v16773_v55 = vcombine.low %v1432_v6, %v1436_v43  ;;  %v16780_v56 = vcombine.high %v1439_v49, %v1443_v50  ;;  %v1483_v36 = vld [vmem:[#allocation8 + $0x6f0] sm:$0xff]  ;;  %v1480_v6 = vld [vmem:[#allocation8 + $0x6d8] sm:$0xff] }
 0x31f   : > { %4908 = vmatprep.subr.bf16.mxu1 %v16734_v60  ;;  %v1451_v60 = vld [vmem:[#allocation8 + $0x5f0] sm:$0xff]  ;;  %v1484_v43 = vld [vmem:[#allocation8 + $0x6f8] sm:$0xff] }
 0x320   : > { %4736 = vmatmul.mubr.bf16.vlgmr.msra.gmra.mrb[12].mxu0 %v21277_v42 }
 0x321   : > { %4900 = vmatmul.mubr.bf16.vlgmr.msra.gmra.mrb[12].mxu1 %v21277_v42  ;;  %4745 = vmatpush1.bf16.msra.mxu0 %v16731_v62  ;;  %v16749_v42 = vcombine.low %v1408_v4, %v1412_v45  ;;  %v16779_v62 = vcombine.low %v1439_v49, %v1443_v50  ;;  %v1459_v4 = vld [vmem:[#allocation8 + $0x630] sm:$0xff]  ;;  %v1460_v45 = vld [vmem:[#allocation8 + $0x638] sm:$0xff] }
 0x322   : > { %4776 = vmatprep.mubr.bf16.mxu0 %v21283_v58  ;;  %4909 = vmatpush1.bf16.msra.mxu1 %v16733_v63  ;;  %v16781_v63 = vcombine.low %v1440_v52, %v1444_v53  ;;  %v1487_v49 = vld [vmem:[#allocation8 + $0x710] sm:$0xff]  ;;  %v1488_v52 = vld [vmem:[#allocation8 + $0x718] sm:$0xff] }
 0x323   : > { %4940 = vmatprep.mubr.bf16.mxu1 %v21283_v58  ;;  %4746 = vmatprep.subr.bf16.mxu0 %v16740_v1  ;;  %v16755_v58 = vcombine.low %v1415_v11, %v1419_v19  ;;  %v16788_v1 = vcombine.high %v1447_v59, %v1451_v60  ;;  %v1463_v11 = vld [vmem:[#allocation8 + $0x650] sm:$0xff]  ;;  %v1492_v53 = vld [vmem:[#allocation8 + $0x738] sm:$0xff] }
 0x324   : > { %4910 = vmatprep.subr.bf16.mxu1 %v16742_v5  ;;  %v1456_v5 = vld [vmem:[#allocation8 + $0x618] sm:$0xff]  ;;  %v1467_v19 = vld [vmem:[#allocation8 + $0x670] sm:$0xff] }
 0x325   : > { %4747 = vmatpush1.bf16.msra.mxu0 %v16739_v31  ;;  %v16787_v31 = vcombine.low %v1447_v59, %v1451_v60  ;;  %v1491_v50 = vld [vmem:[#allocation8 + $0x730] sm:$0xff] }
 0x326   : > { %4911 = vmatpush1.bf16.msra.mxu1 %v16741_v7  ;;  %4748 = vmatprep.subr.bf16.mxu0 %v16748_v8  ;;  %v16789_v7 = vcombine.low %v1448_v40, %v1452_v61  ;;  %v16796_v8 = vcombine.high %v1455_v3, %v1459_v4  ;;  %v1495_v59 = vld [vmem:[#allocation8 + $0x750] sm:$0xff]  ;;  %v1496_v40 = vld [vmem:[#allocation8 + $0x758] sm:$0xff] }
 0x327   : > { %4912 = vmatprep.subr.bf16.mxu1 %v16750_v10  ;;  %v16798_v10 = vcombine.high %v1456_v5, %v1460_v45  ;;  %v1499_v60 = vld [vmem:[#allocation8 + $0x770] sm:$0xff]  ;;  %v1500_v61 = vld [vmem:[#allocation8 + $0x778] sm:$0xff] }
 0x329   : > { %4749 = vmatpush1.bf16.msra.mxu0 %v16747_v13  ;;  %v16795_v13 = vcombine.low %v1455_v3, %v1459_v4  ;;  %v1503_v3 = vld [vmem:[#allocation8 + $0x790] sm:$0xff] }
 0x32a   : > { %4913 = vmatpush1.bf16.msra.mxu1 %v16749_v42  ;;  %4750 = vmatprep.subr.bf16.mxu0 %v16756_v14  ;;  %v16797_v42 = vcombine.low %v1456_v5, %v1460_v45  ;;  %v16804_v14 = vcombine.high %v1463_v11, %v1467_v19  ;;  %v1507_v4 = vld [vmem:[#allocation8 + $0x7b0] sm:$0xff]  ;;  %v1504_v5 = vld [vmem:[#allocation8 + $0x798] sm:$0xff] }
 0x32b   : > { %4914 = vmatprep.subr.bf16.mxu1 %v16758_v15  ;;  %v16806_v15 = vcombine.high %v1464_v41, %v1468_v35  ;;  %v1508_v45 = vld [vmem:[#allocation8 + $0x7b8] sm:$0xff] }
 0x32d   : > { %4751 = vmatpush1.bf16.msra.mxu0 %v16755_v58  ;;  %v16803_v58 = vcombine.low %v1463_v11, %v1467_v19  ;;  %v1511_v11 = vld [vmem:[#allocation8 + $0x7d0] sm:$0xff] }
 0x32e   : > { %4915 = vmatpush1.bf16.msra.mxu1 %v16757_v29  ;;  %4752 = vmatprep.subr.bf16.mxu0 %v16764_v30  ;;  %v16805_v29 = vcombine.low %v1464_v41, %v1468_v35  ;;  %v16812_v30 = vcombine.high %v1471_v21, %v1475_v22  ;;  %v1515_v19 = vld [vmem:[#allocation8 + $0x7f0] sm:$0xff]  ;;  %v1512_v41 = vld [vmem:[#allocation8 + $0x7d8] sm:$0xff] }
 0x32f   : > { %4916 = vmatprep.subr.bf16.mxu1 %v16766_v32  ;;  %v16814_v32 = vcombine.high %v1472_v23, %v1476_v28  ;;  %v1516_v35 = vld [vmem:[#allocation8 + $0x7f8] sm:$0xff] }
 0x331   : > { %4753 = vmatpush1.bf16.msra.mxu0 %v16763_v44  ;;  %v16811_v44 = vcombine.low %v1471_v21, %v1475_v22  ;;  %v1519_v21 = vld [vmem:[#allocation8 + $0x810] sm:$0xff] }
 0x332   : > { %4917 = vmatpush1.bf16.msra.mxu1 %v16765_v47  ;;  %4754 = vmatprep.subr.bf16.mxu0 %v16772_v37  ;;  %v16813_v47 = vcombine.low %v1472_v23, %v1476_v28  ;;  %v16820_v37 = vcombine.high %v1479_v33, %v1483_v36  ;;  %v1523_v22 = vld [vmem:[#allocation8 + $0x830] sm:$0xff]  ;;  %v1520_v23 = vld [vmem:[#allocation8 + $0x818] sm:$0xff] }
 0x333   : > { %4918 = vmatprep.subr.bf16.mxu1 %v16774_v48  ;;  %v16822_v48 = vcombine.high %v1480_v6, %v1484_v43  ;;  %v1524_v28 = vld [vmem:[#allocation8 + $0x838] sm:$0xff] }
 0x335   : > { %4755 = vmatpush1.bf16.msra.mxu0 %v16771_v54  ;;  %v16819_v54 = vcombine.low %v1479_v33, %v1483_v36  ;;  %v1527_v33 = vld [vmem:[#allocation8 + $0x850] sm:$0xff] }
 0x336   : > { %4919 = vmatpush1.bf16.msra.mxu1 %v16773_v55  ;;  %4756 = vmatprep.subr.bf16.mxu0 %v16780_v56  ;;  %v16821_v55 = vcombine.low %v1480_v6, %v1484_v43  ;;  %v16828_v56 = vcombine.high %v1487_v49, %v1491_v50  ;;  %v1531_v36 = vld [vmem:[#allocation8 + $0x870] sm:$0xff]  ;;  %v16859_v6 = vcombine.low %v1519_v21, %v1523_v22  ;;  %v1528_v43 = vld [vmem:[#allocation8 + $0x858] sm:$0xff] }
 0x337   : > { %4920 = vmatprep.subr.bf16.mxu1 %v16782_v57  ;;  %v16830_v57 = vcombine.high %v1488_v52, %v1492_v53 }
 0x339   : > { %4757 = vmatpush1.bf16.msra.mxu0 %v16779_v62  ;;  %v16827_v62 = vcombine.low %v1487_v49, %v1491_v50  ;;  %v1539_v49 = vld [vmem:[#allocation8 + $0x8b0] sm:$0xff] }
 0x33a   : > { %4921 = vmatpush1.bf16.msra.mxu1 %v16781_v63  ;;  %4758 = vmatprep.subr.bf16.mxu0 %v16788_v1  ;;  %v16829_v63 = vcombine.low %v1488_v52, %v1492_v53  ;;  %v16836_v1 = vcombine.high %v1495_v59, %v1499_v60  ;;  %v1536_v52 = vld [vmem:[#allocation8 + $0x898] sm:$0xff] }
 0x33b   : > { %4922 = vmatprep.subr.bf16.mxu1 %v16790_v2  ;;  %v16838_v2 = vcombine.high %v1496_v40, %v1500_v61  ;;  %v1540_v53 = vld [vmem:[#allocation8 + $0x8b8] sm:$0xff] }
 0x33d   : > { %4759 = vmatpush1.bf16.msra.mxu0 %v16787_v31  ;;  %v16835_v31 = vcombine.low %v1495_v59, %v1499_v60  ;;  %v1543_v59 = vld [vmem:[#allocation8 + $0x8d0] sm:$0xff] }
 0x33e   : > { %4923 = vmatpush1.bf16.msra.mxu1 %v16789_v7  ;;  %4760 = vmatprep.subr.bf16.mxu0 %v16796_v8  ;;  %v16837_v7 = vcombine.low %v1496_v40, %v1500_v61  ;;  %v16844_v8 = vcombine.high %v1503_v3, %v1507_v4  ;;  %v1547_v60 = vld [vmem:[#allocation8 + $0x8f0] sm:$0xff]  ;;  %v1544_v40 = vld [vmem:[#allocation8 + $0x8d8] sm:$0xff] }
 0x33f   : > { %4924 = vmatprep.subr.bf16.mxu1 %v16798_v10  ;;  %v16846_v10 = vcombine.high %v1504_v5, %v1508_v45  ;;  %v1548_v61 = vld [vmem:[#allocation8 + $0x8f8] sm:$0xff] }
 0x341   : > { %4761 = vmatpush1.bf16.msra.mxu0 %v16795_v13  ;;  %v16843_v13 = vcombine.low %v1503_v3, %v1507_v4  ;;  %v1555_v3 = vld [vmem:[#allocation8 + $0x930] sm:$0xff]  ;;  %v1552_v4 = vld [vmem:[#allocation8 + $0x918] sm:$0xff] }
 0x342   : > { %4925 = vmatpush1.bf16.msra.mxu1 %v16797_v42  ;;  %4762 = vmatprep.subr.bf16.mxu0 %v16804_v14  ;;  %v16845_v42 = vcombine.low %v1504_v5, %v1508_v45  ;;  %v16852_v14 = vcombine.high %v1511_v11, %v1515_v19  ;;  %v1556_v5 = vld [vmem:[#allocation8 + $0x938] sm:$0xff]  ;;  %v16885_v45 = vcombine.low %v1544_v40, %v1548_v61 }
 0x343   : > { %4926 = vmatprep.subr.bf16.mxu1 %v16806_v15  ;;  %v16854_v15 = vcombine.high %v1512_v41, %v1516_v35 }
 0x345   : > { %4763 = vmatpush1.bf16.msra.mxu0 %v16803_v58  ;;  %v16851_v58 = vcombine.low %v1511_v11, %v1515_v19  ;;  %v1560_v11 = vld [vmem:[#allocation8 + $0x958] sm:$0xff] }
 0x346   : > { %4927 = vmatpush1.bf16.msra.mxu1 %v16805_v29  ;;  %4764 = vmatprep.subr.bf16.mxu0 %v16812_v30  ;;  %v16853_v29 = vcombine.low %v1512_v41, %v1516_v35  ;;  %v16860_v30 = vcombine.high %v1519_v21, %v1523_v22  ;;  %v1564_v19 = vld [vmem:[#allocation8 + $0x978] sm:$0xff]  ;;  %v16893_v35 = vcombine.low %v1552_v4, %v1556_v5 }
 0x347   : > { %4928 = vmatprep.subr.bf16.mxu1 %v16814_v32  ;;  %v16862_v32 = vcombine.high %v1520_v23, %v1524_v28  ;;  %v1568_v21 = vld [vmem:[#allocation8 + $0x998] sm:$0xff] }
 0x348   : > { %v1572_v22 = vld [vmem:[#allocation8 + $0x9b8] sm:$0xff] }
 0x349   : > { %4765 = vmatpush1.bf16.msra.mxu0 %v16811_v44  ;;  %v1532_v44 = vld [vmem:[#allocation8 + $0x878] sm:$0xff] }
 0x34a   : > { %4929 = vmatpush1.bf16.msra.mxu1 %v16813_v47  ;;  %4766 = vmatprep.subr.bf16.mxu0 %v16820_v37  ;;  %v16861_v47 = vcombine.low %v1520_v23, %v1524_v28  ;;  %v16868_v37 = vcombine.high %v1527_v33, %v1531_v36  ;;  %v16870_v50 = vcombine.high %v1528_v43, %v1532_v44 }
 0x34b   : > { %4930 = vmatprep.subr.bf16.mxu1 %v16822_v48  ;;  %v1535_v48 = vld [vmem:[#allocation8 + $0x890] sm:$0xff]  ;;  %v16901_v28 = vcombine.low %v1560_v11, %v1564_v19 }
 0x34d   : > { %4767 = vmatpush1.bf16.msra.mxu0 %v16819_v54  ;;  %v16867_v54 = vcombine.low %v1527_v33, %v1531_v36  ;;  %v1576_v33 = vld [vmem:[#allocation8 + $0x9d8] sm:$0xff] }
 0x34e   : > { %4931 = vmatpush1.bf16.msra.mxu1 %v16821_v55  ;;  %4768 = vmatprep.subr.bf16.mxu0 %v16828_v56  ;;  %v16869_v55 = vcombine.low %v1528_v43, %v1532_v44  ;;  %v16876_v56 = vcombine.high %v1535_v48, %v1539_v49  ;;  %v1580_v36 = vld [vmem:[#allocation8 + $0x9f8] sm:$0xff]  ;;  %v16909_v43 = vcombine.low %v1568_v21, %v1572_v22 }
 0x34f   : > { %4932 = vmatprep.subr.bf16.mxu1 %v16830_v57  ;;  %v16878_v57 = vcombine.high %v1536_v52, %v1540_v53 }
 0x351   : > { %4769 = vmatpush1.bf16.msra.mxu0 %v16827_v62  ;;  %v16875_v62 = vcombine.low %v1535_v48, %v1539_v49  ;;  %v1587_v48 = vld [vmem:[#allocation8 + $0xa30] sm:$0xff]  ;;  %v1584_v49 = vld [vmem:[#allocation8 + $0xa18] sm:$0xff] }
 0x352   : > { %4933 = vmatpush1.bf16.msra.mxu1 %v16829_v63  ;;  %4770 = vmatprep.subr.bf16.mxu0 %v16836_v1  ;;  %v16884_v63 = vcombine.high %v1543_v59, %v1547_v60  ;;  %v16886_v1 = vcombine.high %v1544_v40, %v1548_v61 }
 0x353   : > { %4934 = vmatprep.subr.bf16.mxu1 %v16838_v2  ;;  %v1551_v2 = vld [vmem:[#allocation8 + $0x910] sm:$0xff] }
 0x354   : > { %v16891_v41 = vcombine.low %v1551_v2, %v1555_v3 }
 0x355   : > { %4771 = vmatpush1.bf16.msra.mxu0 %v16835_v31  ;;  %v16892_v31 = vcombine.high %v1551_v2, %v1555_v3  ;;  %v1600_v2 = vld [vmem:[#allocation8 + $0xa98] sm:$0xff] }
 0x356   : > { %4935 = vmatpush1.bf16.msra.mxu1 %v16837_v7  ;;  %4772 = vmatprep.subr.bf16.mxu0 %v16844_v8  ;;  %v16894_v7 = vcombine.high %v1552_v4, %v1556_v5  ;;  %v1559_v8 = vld [vmem:[#allocation8 + $0x950] sm:$0xff]  ;;  %v1604_v3 = vld [vmem:[#allocation8 + $0xab8] sm:$0xff] }
 0x357   : > { %4936 = vmatprep.subr.bf16.mxu1 %v16846_v10  ;;  %v1563_v10 = vld [vmem:[#allocation8 + $0x970] sm:$0xff] }
 0x358   : > { %v16899_v23 = vcombine.low %v1559_v8, %v1563_v10 }
 0x359   : > { %4773 = vmatpush1.bf16.msra.mxu0 %v16843_v13  ;;  %v16900_v13 = vcombine.high %v1559_v8, %v1563_v10  ;;  %v1608_v8 = vld [vmem:[#allocation8 + $0xad8] sm:$0xff] }
 0x35a   : > { %4937 = vmatpush1.bf16.msra.mxu1 %v16845_v42  ;;  %4774 = vmatprep.subr.bf16.mxu0 %v16852_v14  ;;  %v16902_v42 = vcombine.high %v1560_v11, %v1564_v19  ;;  %v1567_v14 = vld [vmem:[#allocation8 + $0x990] sm:$0xff]  ;;  %v1612_v10 = vld [vmem:[#allocation8 + $0xaf8] sm:$0xff]  ;;  %v16941_v19 = vcombine.low %v1600_v2, %v1604_v3 }
 0x35b   : > { %4938 = vmatprep.subr.bf16.mxu1 %v16854_v15  ;;  %v1571_v15 = vld [vmem:[#allocation8 + $0x9b0] sm:$0xff] }
 0x35d   : > { %4775 = vmatpush1.bf16.msra.mxu0 %v16851_v58  ;;  %v16908_v58 = vcombine.high %v1567_v14, %v1571_v15 }
 0x35e   : > { %4939 = vmatpush1.bf16.msra.mxu1 %v16853_v29  ;;  %4785 = vmatprep.subr.bf16.mxu0 %v16860_v30  ;;  %v16910_v29 = vcombine.high %v1568_v21, %v1572_v22  ;;  %v1575_v30 = vld [vmem:[#allocation8 + $0x9d0] sm:$0xff]  ;;  %v16949_v22 = vcombine.low %v1608_v8, %v1612_v10 }
 0x35f   : > { %4949 = vmatprep.subr.bf16.mxu1 %v16862_v32  ;;  %v1579_v32 = vld [vmem:[#allocation8 + $0x9f0] sm:$0xff] }
 0x360   : > { %4777 = vmatmul.mubr.bf16.vlgmr.msra.gmra.mrb[12].mxu0 %v21307_v25  ;;  %v16916_v44 = vcombine.high %v1575_v30, %v1579_v32 }
 0x361   : > { %4941 = vmatmul.mubr.bf16.vlgmr.msra.gmra.mrb[12].mxu1 %v21307_v25  ;;  %4786 = vmatpush1.bf16.msra.mxu0 %v16859_v6  ;;  %v16877_v25 = vcombine.low %v1536_v52, %v1540_v53  ;;  %v16907_v6 = vcombine.low %v1567_v14, %v1571_v15  ;;  %v16915_v52 = vcombine.low %v1575_v30, %v1579_v32  ;;  %v1616_v14 = vld [vmem:[#allocation8 + $0xb18] sm:$0xff] }
 0x362   : > { %4817 = vmatprep.mubr.bf16.mxu0 %v21309_v34  ;;  %4950 = vmatpush1.bf16.msra.mxu1 %v16861_v47  ;;  %v16918_v47 = vcombine.high %v1576_v33, %v1580_v36  ;;  %v16917_v53 = vcombine.low %v1576_v33, %v1580_v36  ;;  %v1620_v15 = vld [vmem:[#allocation8 + $0xb38] sm:$0xff] }
 0x363   : > { %4981 = vmatprep.mubr.bf16.mxu1 %v21309_v34  ;;  %4787 = vmatprep.subr.bf16.mxu0 %v16868_v37  ;;  %v16883_v34 = vcombine.low %v1543_v59, %v1547_v60  ;;  %v1583_v37 = vld [vmem:[#allocation8 + $0xa10] sm:$0xff]  ;;  %v1592_v59 = vld [vmem:[#allocation8 + $0xa58] sm:$0xff]  ;;  %v16957_v36 = vcombine.low %v1616_v14, %v1620_v15 }
 0x364   : > { %4951 = vmatprep.subr.bf16.mxu1 %v16870_v50  ;;  %v1588_v50 = vld [vmem:[#allocation8 + $0xa38] sm:$0xff]  ;;  %v16923_v40 = vcombine.low %v1583_v37, %v1587_v48 }
 0x365   : > { %4788 = vmatpush1.bf16.msra.mxu0 %v16867_v54  ;;  %v16924_v54 = vcombine.high %v1583_v37, %v1587_v48  ;;  %v1596_v60 = vld [vmem:[#allocation8 + $0xa78] sm:$0xff]  ;;  %v16925_v61 = vcombine.low %v1584_v49, %v1588_v50 }
 0x366   : > { %4952 = vmatpush1.bf16.msra.mxu1 %v16869_v55  ;;  %4789 = vmatprep.subr.bf16.mxu0 %v16876_v56  ;;  %v16926_v55 = vcombine.high %v1584_v49, %v1588_v50  ;;  %v1591_v56 = vld [vmem:[#allocation8 + $0xa50] sm:$0xff]  ;;  %v16933_v5 = vcombine.low %v1592_v59, %v1596_v60  ;;  %v1624_v30 = vld [vmem:[#allocation8 + $0xb58] sm:$0xff] }
 0x367   : > { %4953 = vmatprep.subr.bf16.mxu1 %v16878_v57  ;;  %v1595_v57 = vld [vmem:[#allocation8 + $0xa70] sm:$0xff]  ;;  %v1628_v32 = vld [vmem:[#allocation8 + $0xb78] sm:$0xff] }
 0x368   : > { %v16931_v4 = vcombine.low %v1591_v56, %v1595_v57  ;;  %v1632_v37 = vld [vmem:[#allocation8 + $0xb98] sm:$0xff]  ;;  %v16965_v50 = vcombine.low %v1624_v30, %v1628_v32 }
 0x369   : > { %4790 = vmatpush1.bf16.msra.mxu0 %v16875_v62  ;;  %v16932_v62 = vcombine.high %v1591_v56, %v1595_v57  ;;  %v1636_v48 = vld [vmem:[#allocation8 + $0xbb8] sm:$0xff] }
 0x36a   : > { %4954 = vmatpush1.bf16.msra.mxu1 %v16877_v25  ;;  %4791 = vmatprep.subr.bf16.mxu0 %v16884_v63  ;;  %v16934_v25 = vcombine.high %v1592_v59, %v1596_v60  ;;  %v1599_v63 = vld [vmem:[#allocation8 + $0xa90] sm:$0xff]  ;;  %v1640_v56 = vld [vmem:[#allocation8 + $0xbd8] sm:$0xff]  ;;  %v16973_v60 = vcombine.low %v1632_v37, %v1636_v48 }
 0x36b   : > { %4955 = vmatprep.subr.bf16.mxu1 %v16886_v1  ;;  %v1603_v1 = vld [vmem:[#allocation8 + $0xab0] sm:$0xff]  ;;  %v1644_v57 = vld [vmem:[#allocation8 + $0xbf8] sm:$0xff] }
 0x36c   : > { %v16939_v11 = vcombine.low %v1599_v63, %v1603_v1 }
 0x36d   : > { %4792 = vmatpush1.bf16.msra.mxu0 %v16883_v34  ;;  %v16940_v34 = vcombine.high %v1599_v63, %v1603_v1  ;;  %v1648_v63 = vld [vmem:[#allocation8 + $0xc18] sm:$0xff] }
 0x36e   : > { %4956 = vmatpush1.bf16.msra.mxu1 %v16885_v45  ;;  %4793 = vmatprep.subr.bf16.mxu0 %v16892_v31  ;;  %v16942_v45 = vcombine.high %v1600_v2, %v1604_v3  ;;  %v1607_v31 = vld [vmem:[#allocation8 + $0xad0] sm:$0xff]  ;;  %v1652_v1 = vld [vmem:[#allocation8 + $0xc38] sm:$0xff]  ;;  %v16981_v3 = vcombine.low %v1640_v56, %v1644_v57 }
 0x36f   : > { %4957 = vmatprep.subr.bf16.mxu1 %v16894_v7  ;;  %v1611_v7 = vld [vmem:[#allocation8 + $0xaf0] sm:$0xff] }
 0x370   : > { %v16947_v21 = vcombine.low %v1607_v31, %v1611_v7 }
 0x371   : > { %4794 = vmatpush1.bf16.msra.mxu0 %v16891_v41  ;;  %v16948_v41 = vcombine.high %v1607_v31, %v1611_v7  ;;  %v1656_v7 = vld [vmem:[#allocation8 + $0xc58] sm:$0xff] }
 0x372   : > { %4958 = vmatpush1.bf16.msra.mxu1 %v16893_v35  ;;  %4795 = vmatprep.subr.bf16.mxu0 %v16900_v13  ;;  %v16950_v35 = vcombine.high %v1608_v8, %v1612_v10  ;;  %v1615_v13 = vld [vmem:[#allocation8 + $0xb10] sm:$0xff]  ;;  %v1660_v8 = vld [vmem:[#allocation8 + $0xc78] sm:$0xff]  ;;  %v16989_v10 = vcombine.low %v1648_v63, %v1652_v1 }
 0x373   : > { %4959 = vmatprep.subr.bf16.mxu1 %v16902_v42  ;;  %v1619_v42 = vld [vmem:[#allocation8 + $0xb30] sm:$0xff] }
 0x374   : > { %v16955_v33 = vcombine.low %v1615_v13, %v1619_v42 }
 0x375   : > { %4796 = vmatpush1.bf16.msra.mxu0 %v16899_v23  ;;  %v16956_v23 = vcombine.high %v1615_v13, %v1619_v42  ;;  %v1664_v13 = vld [vmem:[#allocation8 + $0xc98] sm:$0xff] }
 0x376   : > { %4960 = vmatpush1.bf16.msra.mxu1 %v16901_v28  ;;  %4797 = vmatprep.subr.bf16.mxu0 %v16908_v58  ;;  %v16958_v28 = vcombine.high %v1616_v14, %v1620_v15  ;;  %v1623_v58 = vld [vmem:[#allocation8 + $0xb50] sm:$0xff]  ;;  %v1668_v42 = vld [vmem:[#allocation8 + $0xcb8] sm:$0xff]  ;;  %v16997_v15 = vcombine.low %v1656_v7, %v1660_v8 }
 0x377   : > { %4961 = vmatprep.subr.bf16.mxu1 %v16910_v29  ;;  %v1627_v29 = vld [vmem:[#allocation8 + $0xb70] sm:$0xff] }
 0x378   : > { %v16963_v49 = vcombine.low %v1623_v58, %v1627_v29 }
 0x379   : > { %4798 = vmatpush1.bf16.msra.mxu0 %v16907_v6  ;;  %v16964_v6 = vcombine.high %v1623_v58, %v1627_v29  ;;  %v1672_v58 = vld [vmem:[#allocation8 + $0xcd8] sm:$0xff] }
 0x37a   : > { %4962 = vmatpush1.bf16.msra.mxu1 %v16909_v43  ;;  %4799 = vmatprep.subr.bf16.mxu0 %v16916_v44  ;;  %v16966_v43 = vcombine.high %v1624_v30, %v1628_v32  ;;  %v1631_v44 = vld [vmem:[#allocation8 + $0xb90] sm:$0xff]  ;;  %v1676_v29 = vld [vmem:[#allocation8 + $0xcf8] sm:$0xff] }
 0x37b   : > { %4963 = vmatprep.subr.bf16.mxu1 %v16918_v47  ;;  %v1635_v47 = vld [vmem:[#allocation8 + $0xbb0] sm:$0xff] }
 0x37c   : > { %v16971_v59 = vcombine.low %v1631_v44, %v1635_v47 }
 0x37d   : > { %4800 = vmatpush1.bf16.msra.mxu0 %v16915_v52  ;;  %v16972_v52 = vcombine.high %v1631_v44, %v1635_v47  ;;  %v1684_v44 = vld [vmem:[#allocation8 + $0xd38] sm:$0xff]  ;;  %v17013_v47 = vcombine.low %v1672_v58, %v1676_v29 }
 0x37e   : > { %4964 = vmatpush1.bf16.msra.mxu1 %v16917_v53  ;;  %4801 = vmatprep.subr.bf16.mxu0 %v16924_v54  ;;  %v16974_v53 = vcombine.high %v1632_v37, %v1636_v48  ;;  %v1639_v54 = vld [vmem:[#allocation8 + $0xbd0] sm:$0xff] }
 0x37f   : > { %4965 = vmatprep.subr.bf16.mxu1 %v16926_v55  ;;  %v1643_v55 = vld [vmem:[#allocation8 + $0xbf0] sm:$0xff] }
 0x380   : > { %v16979_v2 = vcombine.low %v1639_v54, %v1643_v55 }
 0x381   : > { %4802 = vmatpush1.bf16.msra.mxu0 %v16923_v40  ;;  %v16980_v40 = vcombine.high %v1639_v54, %v1643_v55 }
 0x382   : > { %4966 = vmatpush1.bf16.msra.mxu1 %v16925_v61  ;;  %4803 = vmatprep.subr.bf16.mxu0 %v16932_v62  ;;  %v16982_v61 = vcombine.high %v1640_v56, %v1644_v57  ;;  %v1647_v62 = vld [vmem:[#allocation8 + $0xc10] sm:$0xff] }
 0x383   : > { %4967 = vmatprep.subr.bf16.mxu1 %v16934_v25  ;;  %v1651_v25 = vld [vmem:[#allocation8 + $0xc30] sm:$0xff] }
 0x384   : > { %v16987_v31 = vcombine.low %v1647_v62, %v1651_v25 }
 0x385   : > { %4804 = vmatpush1.bf16.msra.mxu0 %v16931_v4  ;;  %v16988_v4 = vcombine.high %v1647_v62, %v1651_v25 }
 0x386   : > { %4968 = vmatpush1.bf16.msra.mxu1 %v16933_v5  ;;  %4805 = vmatprep.subr.bf16.mxu0 %v16940_v34  ;;  %v16990_v5 = vcombine.high %v1648_v63, %v1652_v1  ;;  %v1655_v34 = vld [vmem:[#allocation8 + $0xc50] sm:$0xff] }
 0x387   : > { %4969 = vmatprep.subr.bf16.mxu1 %v16942_v45  ;;  %v1659_v45 = vld [vmem:[#allocation8 + $0xc70] sm:$0xff] }
 0x388   : > { %v16995_v14 = vcombine.low %v1655_v34, %v1659_v45 }
 0x389   : > { %4806 = vmatpush1.bf16.msra.mxu0 %v16939_v11  ;;  %v16996_v11 = vcombine.high %v1655_v34, %v1659_v45 }
 0x38a   : > { %4970 = vmatpush1.bf16.msra.mxu1 %v16941_v19  ;;  %4807 = vmatprep.subr.bf16.mxu0 %v16948_v41  ;;  %v1663_v19 = vld [vmem:[#allocation8 + $0xc90] sm:$0xff] }
 0x38b   : > { %4971 = vmatprep.subr.bf16.mxu1 %v16950_v35  ;;  %v1667_v41 = vld [vmem:[#allocation8 + $0xcb0] sm:$0xff]  ;;  %v16998_v35 = vcombine.high %v1656_v7, %v1660_v8  ;;  %v1708_v7 = vld [vmem:[#allocation8 + $0xdf8] sm:$0xff] }
 0x38c   : > { %v17003_v30 = vcombine.low %v1663_v19, %v1667_v41 }
 0x38d   : > { %4808 = vmatpush1.bf16.msra.mxu0 %v16947_v21  ;;  %v17004_v21 = vcombine.high %v1663_v19, %v1667_v41 }
 0x38e   : > { %4972 = vmatpush1.bf16.msra.mxu1 %v16949_v22  ;;  %4809 = vmatprep.subr.bf16.mxu0 %v16956_v23  ;;  %v17006_v22 = vcombine.high %v1664_v13, %v1668_v42  ;;  %v1671_v23 = vld [vmem:[#allocation8 + $0xcd0] sm:$0xff] }
 0x38f   : > { %4973 = vmatprep.subr.bf16.mxu1 %v16958_v28  ;;  %v1675_v28 = vld [vmem:[#allocation8 + $0xcf0] sm:$0xff] }
 0x390   : > { %v17012_v32 = vcombine.high %v1671_v23, %v1675_v28 }
 0x391   : > { %4810 = vmatpush1.bf16.msra.mxu0 %v16955_v33  ;;  %v17014_v33 = vcombine.high %v1672_v58, %v1676_v29 }
 0x392   : > { %4974 = vmatpush1.bf16.msra.mxu1 %v16957_v36  ;;  %4811 = vmatprep.subr.bf16.mxu0 %v16964_v6  ;;  %v1679_v36 = vld [vmem:[#allocation8 + $0xd10] sm:$0xff] }
 0x393   : > { %4975 = vmatprep.subr.bf16.mxu1 %v16966_v43  ;;  %v1683_v6 = vld [vmem:[#allocation8 + $0xd30] sm:$0xff]  ;;  %v1680_v43 = vld [vmem:[#allocation8 + $0xd18] sm:$0xff] }
 0x394   : > { %v17020_v37 = vcombine.high %v1679_v36, %v1683_v6  ;;  %v17022_v48 = vcombine.high %v1680_v43, %v1684_v44  ;;  %v17019_v54 = vcombine.low %v1679_v36, %v1683_v6  ;;  %v17021_v55 = vcombine.low %v1680_v43, %v1684_v44 }
 0x395   : > { %4812 = vmatpush1.bf16.msra.mxu0 %v16963_v49  ;;  %v1687_v49 = vld [vmem:[#allocation8 + $0xd50] sm:$0xff] }
 0x396   : > { %4976 = vmatpush1.bf16.msra.mxu1 %v16965_v50  ;;  %4813 = vmatprep.subr.bf16.mxu0 %v16972_v52  ;;  %v1691_v50 = vld [vmem:[#allocation8 + $0xd70] sm:$0xff]  ;;  %v1688_v52 = vld [vmem:[#allocation8 + $0xd58] sm:$0xff] }
 0x397   : > { %4977 = vmatprep.subr.bf16.mxu1 %v16974_v53  ;;  %v1692_v53 = vld [vmem:[#allocation8 + $0xd78] sm:$0xff]  ;;  %v17028_v56 = vcombine.high %v1687_v49, %v1691_v50  ;;  %v17027_v62 = vcombine.low %v1687_v49, %v1691_v50 }
 0x398   : > { %v17030_v57 = vcombine.high %v1688_v52, %v1692_v53  ;;  %v17029_v25 = vcombine.low %v1688_v52, %v1692_v53 }
 0x399   : > { %4814 = vmatpush1.bf16.msra.mxu0 %v16971_v59  ;;  %v1695_v59 = vld [vmem:[#allocation8 + $0xd90] sm:$0xff] }
 0x39a   : > { %4978 = vmatpush1.bf16.msra.mxu1 %v16973_v60  ;;  %4815 = vmatprep.subr.bf16.mxu0 %v16980_v40  ;;  %v1699_v60 = vld [vmem:[#allocation8 + $0xdb0] sm:$0xff]  ;;  %v1696_v40 = vld [vmem:[#allocation8 + $0xd98] sm:$0xff] }
 0x39b   : > { %4979 = vmatprep.subr.bf16.mxu1 %v16982_v61  ;;  %v1700_v61 = vld [vmem:[#allocation8 + $0xdb8] sm:$0xff]  ;;  %v17036_v63 = vcombine.high %v1695_v59, %v1699_v60 }
 0x39d   : > { %4816 = vmatpush1.bf16.msra.mxu0 %v16979_v2 }
 0x39e   : > { %4980 = vmatpush1.bf16.msra.mxu1 %v16981_v3  ;;  %4826 = vmatprep.subr.bf16.mxu0 %v16988_v4  ;;  %v17038_v3 = vcombine.high %v1696_v40, %v1700_v61  ;;  %v1703_v4 = vld [vmem:[#allocation8 + $0xdd0] sm:$0xff] }
 0x39f   : > { %4990 = vmatprep.subr.bf16.mxu1 %v16990_v5  ;;  %v1707_v5 = vld [vmem:[#allocation8 + $0xdf0] sm:$0xff] }
 0x3a0   : > { %4818 = vmatmul.mubr.bf16.vlgmr.msra.gmra.mrb[12].mxu0 %v21329_v12 }
 0x3a1   : > { %4982 = vmatmul.mubr.bf16.vlgmr.msra.gmra.mrb[12].mxu1 %v21329_v12  ;;  %4827 = vmatpush1.bf16.msra.mxu0 %v16987_v31  ;;  %v17005_v12 = vcombine.low %v1664_v13, %v1668_v42  ;;  %v1704_v31 = vld [vmem:[#allocation8 + $0xdd8] sm:$0xff]  ;;  %v17044_v13 = vcombine.high %v1703_v4, %v1707_v5 }
 0x3a2   : > { %4858 = vmatprep.mubr.bf16.mxu0 %v21331_v46  ;;  %4991 = vmatpush1.bf16.msra.mxu1 %v16989_v10  ;;  %v17046_v42 = vcombine.high %v1704_v31, %v1708_v7 }
 0x3a3   : > { %5022 = vmatprep.mubr.bf16.mxu1 %v21331_v46  ;;  %4828 = vmatprep.subr.bf16.mxu0 %v16996_v11  ;;  %v17011_v46 = vcombine.low %v1671_v23, %v1675_v28  ;;  %v17035_v11 = vcombine.low %v1695_v59, %v1699_v60  ;;  %v17043_v23 = vcombine.low %v1703_v4, %v1707_v5 }
 0x3a4   : > { %4992 = vmatprep.subr.bf16.mxu1 %v16998_v35  ;;  %v17037_v35 = vcombine.low %v1696_v40, %v1700_v61  ;;  %v17045_v28 = vcombine.low %v1704_v31, %v1708_v7 }
 0x3a5   : > { %4829 = vmatpush1.bf16.msra.mxu0 %v16995_v14  ;;  %v1711_v14 = vld [vmem:[#allocation8 + $0xe10] sm:$0xff] }
 0x3a6   : > { %4993 = vmatpush1.bf16.msra.mxu1 %v16997_v15  ;;  %4830 = vmatprep.subr.bf16.mxu0 %v17004_v21  ;;  %v1715_v15 = vld [vmem:[#allocation8 + $0xe30] sm:$0xff]  ;;  %v1712_v21 = vld [vmem:[#allocation8 + $0xe18] sm:$0xff] }
 0x3a7   : > { %4994 = vmatprep.subr.bf16.mxu1 %v17006_v22  ;;  %v1716_v22 = vld [vmem:[#allocation8 + $0xe38] sm:$0xff]  ;;  %v17052_v58 = vcombine.high %v1711_v14, %v1715_v15  ;;  %v17051_v36 = vcombine.low %v1711_v14, %v1715_v15  ;;  %v1759_v14 = vld [vmem:[#allocation8 + $0xf90] sm:$0xff] }
 0x3a8   : > { %v17054_v29 = vcombine.high %v1712_v21, %v1716_v22  ;;  %v17053_v6 = vcombine.low %v1712_v21, %v1716_v22  ;;  %v1763_v15 = vld [vmem:[#allocation8 + $0xfb0] sm:$0xff]  ;;  %v1760_v21 = vld [vmem:[#allocation8 + $0xf98] sm:$0xff] }
 0x3a9   : > { %4831 = vmatpush1.bf16.msra.mxu0 %v17003_v30  ;;  %v1719_v30 = vld [vmem:[#allocation8 + $0xe50] sm:$0xff]  ;;  %v1764_v22 = vld [vmem:[#allocation8 + $0xfb8] sm:$0xff] }
 0x3aa   : > { %4995 = vmatpush1.bf16.msra.mxu1 %v17005_v12  ;;  %4832 = vmatprep.subr.bf16.mxu0 %v17012_v32  ;;  %v1723_v12 = vld [vmem:[#allocation8 + $0xe70] sm:$0xff]  ;;  %v1720_v32 = vld [vmem:[#allocation8 + $0xe58] sm:$0xff] }
 0x3ab   : > { %4996 = vmatprep.subr.bf16.mxu1 %v17014_v33  ;;  %v1724_v33 = vld [vmem:[#allocation8 + $0xe78] sm:$0xff]  ;;  %v17060_v43 = vcombine.high %v1719_v30, %v1723_v12  ;;  %v17059_v49 = vcombine.low %v1719_v30, %v1723_v12  ;;  %v17102_v30 = vcombine.high %v1760_v21, %v1764_v22  ;;  %v1767_v12 = vld [vmem:[#allocation8 + $0xfd0] sm:$0xff] }
 0x3ac   : > { %v17062_v44 = vcombine.high %v1720_v32, %v1724_v33  ;;  %v17061_v50 = vcombine.low %v1720_v32, %v1724_v33  ;;  %v1771_v32 = vld [vmem:[#allocation8 + $0xff0] sm:$0xff] }
 0x3ad   : > { %4833 = vmatpush1.bf16.msra.mxu0 %v17011_v46  ;;  %v1727_v46 = vld [vmem:[#allocation8 + $0xe90] sm:$0xff] }
 0x3ae   : > { %4997 = vmatpush1.bf16.msra.mxu1 %v17013_v47  ;;  %4834 = vmatprep.subr.bf16.mxu0 %v17020_v37  ;;  %v1731_v47 = vld [vmem:[#allocation8 + $0xeb0] sm:$0xff]  ;;  %v1728_v37 = vld [vmem:[#allocation8 + $0xe98] sm:$0xff] }
 0x3af   : > { %4998 = vmatprep.subr.bf16.mxu1 %v17022_v48  ;;  %v1732_v48 = vld [vmem:[#allocation8 + $0xeb8] sm:$0xff]  ;;  %v17068_v52 = vcombine.high %v1727_v46, %v1731_v47  ;;  %v17067_v59 = vcombine.low %v1727_v46, %v1731_v47  ;;  %v17108_v46 = vcombine.high %v1767_v12, %v1771_v32 }
 0x3b0   : > { %v17070_v53 = vcombine.high %v1728_v37, %v1732_v48  ;;  %v17069_v60 = vcombine.low %v1728_v37, %v1732_v48  ;;  %v17107_v48 = vcombine.low %v1767_v12, %v1771_v32  ;;  %v19106_v12 = vld [vmem:[#allocation11 + $0x308] ss:$48 sps:$4 sm:$0xff]   ;;  %v19111_v32 = vld [vmem:[#allocation11 + $0x364] ss:$48 sps:$4 sm:$0xff]  }
 0x3b1   : > { %4835 = vmatpush1.bf16.msra.mxu0 %v17019_v54  ;;  %v1735_v54 = vld [vmem:[#allocation8 + $0xed0] sm:$0xff] }
 0x3b2   : > { %4999 = vmatpush1.bf16.msra.mxu1 %v17021_v55  ;;  %4836 = vmatprep.subr.bf16.mxu0 %v17028_v56  ;;  %v1739_v55 = vld [vmem:[#allocation8 + $0xef0] sm:$0xff]  ;;  %v1736_v56 = vld [vmem:[#allocation8 + $0xed8] sm:$0xff] }
 0x3b3   : > { %v21361_v1 = vpop.f32.mrb[8].mxu0  ;;  %v21363_v2 = vpop.f32.mrb[8].mxu1  ;;  %5000 = vmatprep.subr.bf16.mxu1 %v17030_v57  ;;  %v1740_v57 = vld [vmem:[#allocation8 + $0xef8] sm:$0xff]  ;;  %v17076_v40 = vcombine.high %v1735_v54, %v1739_v55  ;;  %v17075_v4 = vcombine.low %v1735_v54, %v1739_v55  ;;  %v19058_v55 = vld [vmem:[#allocation11 + $0x8] ss:$48 sps:$4 sm:$0xff]  }
 0x3b4   : > { %v21365_v34 = vpop.f32.mrb[9].mxu0  ;;  %v21367_v45 = vpop.f32.mrb[9].mxu1  ;;  %v17078_v61 = vcombine.high %v1736_v56, %v1740_v57  ;;  %v17077_v5 = vcombine.low %v1736_v56, %v1740_v57  ;;  %v19055_v54 = vld [vmem:[#allocation11] ss:$48 sps:$4 sm:$0xff]   ;;  %v19063_v56 = vld [vmem:[#allocation11 + $0x64] ss:$48 sps:$4 sm:$0xff]  }
 0x3b5   : > { %v4536_v8 = vpop.f32.mrb[10].mxu0  ;;  %v4700_v10 = vpop.f32.mrb[10].mxu1  ;;  %4837 = vmatpush1.bf16.msra.mxu0 %v17027_v62  ;;  %v1743_v62 = vld [vmem:[#allocation8 + $0xf10] sm:$0xff] }
 0x3b6   : > { %5001 = vmatpush1.bf16.msra.mxu1 %v17029_v25  ;;  %v4537_v19 = vpop.f32.mrb[11].mxu0  ;;  %v4701_v41 = vpop.f32.mrb[11].mxu1  ;;  %4838 = vmatprep.subr.bf16.mxu0 %v17036_v63  ;;  %v1747_v25 = vld [vmem:[#allocation8 + $0xf30] sm:$0xff]  ;;  %v1744_v63 = vld [vmem:[#allocation8 + $0xf18] sm:$0xff] }
 0x3b7   : > { %5002 = vmatprep.subr.bf16.mxu1 %v17038_v3  ;;  %v1748_v3 = vld [vmem:[#allocation8 + $0xf38] sm:$0xff]  ;;  %v17084_v31 = vcombine.high %v1743_v62, %v1747_v25  ;;  %v1751_v8 = vld [vmem:[#allocation8 + $0xf50] sm:$0xff]  ;;  %v17083_v41 = vcombine.low %v1743_v62, %v1747_v25 }
 0x3b8   : > { %v17086_v7 = vcombine.high %v1744_v63, %v1748_v3  ;;  %v1755_v10 = vld [vmem:[#allocation8 + $0xf70] sm:$0xff]  ;;  %v1756_v19 = vld [vmem:[#allocation8 + $0xf78] sm:$0xff] }
 0x3b9   : > { %4839 = vmatpush1.bf16.msra.mxu0 %v17035_v11  ;;  %v1752_v11 = vld [vmem:[#allocation8 + $0xf58] sm:$0xff]  ;;  %v19070_v25 = vld [vmem:[#allocation11 + $0xc8] ss:$48 sps:$4 sm:$0xff]  }
 0x3ba   : > { %5003 = vmatpush1.bf16.msra.mxu1 %v17037_v35  ;;  %4840 = vmatprep.subr.bf16.mxu0 %v17044_v13  ;;  %v17085_v35 = vcombine.low %v1744_v63, %v1748_v3  ;;  %v17092_v13 = vcombine.high %v1751_v8, %v1755_v10  ;;  %v19067_v62 = vld [vmem:[#allocation11 + $0xc0] ss:$48 sps:$4 sm:$0xff]   ;;  %v19075_v63 = vld [vmem:[#allocation11 + $0x124] ss:$48 sps:$4 sm:$0xff]  }
 0x3bb   : > { %5004 = vmatprep.subr.bf16.mxu1 %v17046_v42  ;;  %v17094_v42 = vcombine.high %v1752_v11, %v1756_v19  ;;  %v19073_v3 = vld [vmem:[#allocation11 + $0x120] ss:$48 sps:$4 sm:$0xff]  }
 0x3bd   : > { %4841 = vmatpush1.bf16.msra.mxu0 %v17043_v23  ;;  %v21369_v23 = vld [vmem:[#allocation10] sm:$0xff] }
 0x3be   : > { %5005 = vmatpush1.bf16.msra.mxu1 %v17045_v28  ;;  %4842 = vmatprep.subr.bf16.mxu0 %v17052_v58  ;;  %v17091_v28 = vcombine.low %v1751_v8, %v1755_v10  ;;  %v17093_v58 = vcombine.low %v1752_v11, %v1756_v19  ;;  %v4342_v33 = vrot.slane %v21369_v23, %v21262_v20  ;;  %v19082_v8 = vld [vmem:[#allocation11 + $0x188] ss:$48 sps:$4 sm:$0xff]   ;;  %v19087_v10 = vld [vmem:[#allocation11 + $0x1e4] ss:$48 sps:$4 sm:$0xff]   ;;  %v19090_v11 = vld [vmem:[#allocation11 + $0x1ec] ss:$48 sps:$4 sm:$0xff]  }
 0x3bf   : > { %5006 = vmatprep.subr.bf16.mxu1 %v17054_v29  ;;  %v17100_v29 = vcombine.high %v1759_v14, %v1763_v15  ;;  %v19085_v19 = vld [vmem:[#allocation11 + $0x1e0] ss:$48 sps:$4 sm:$0xff]  }
 0x3c0   : > { %v18260_v37 = vadd.f32 %v21365_v34, %v4342_v33  ;;  %v19066_v34 = vld [vmem:[#allocation11 + $0x6c] ss:$48 sps:$4 sm:$0xff]  }
 0x3c1   : > { %4843 = vmatpush1.bf16.msra.mxu0 %v17051_v36  ;;  %v1768_v36 = vld [vmem:[#allocation8 + $0xfd8] sm:$0xff]  ;;  %v19114_v33 = vld [vmem:[#allocation11 + $0x36c] ss:$48 sps:$4 sm:$0xff]  }
 0x3c2   : > { %5007 = vmatpush1.bf16.msra.mxu1 %v17053_v6  ;;  %4844 = vmatprep.subr.bf16.mxu0 %v17060_v43  ;;  %v1772_v6 = vld [vmem:[#allocation8 + $0xff8] sm:$0xff]  ;;  %v17099_v43 = vcombine.low %v1759_v14, %v1763_v15  ;;  %v19094_v14 = vld [vmem:[#allocation11 + $0x248] ss:$48 sps:$4 sm:$0xff]  }
 0x3c3   : > { %5008 = vmatprep.subr.bf16.mxu1 %v17062_v44  ;;  %v17101_v44 = vcombine.low %v1760_v21, %v1764_v22  ;;  %v17110_v47 = vcombine.high %v1768_v36, %v1772_v6  ;;  %v19099_v15 = vld [vmem:[#allocation11 + $0x2a4] ss:$48 sps:$4 sm:$0xff]   ;;  %v19102_v21 = vld [vmem:[#allocation11 + $0x2ac] ss:$48 sps:$4 sm:$0xff]   ;;  %v19097_v22 = vld [vmem:[#allocation11 + $0x2a0] ss:$48 sps:$4 sm:$0xff]  }
 0x3c5   : > { %4845 = vmatpush1.bf16.msra.mxu0 %v17059_v49  ;;  %v17109_v49 = vcombine.low %v1768_v36, %v1772_v6  ;;  %v19109_v36 = vld [vmem:[#allocation11 + $0x360] ss:$48 sps:$4 sm:$0xff]   ;;  %v19112_v6 = vld [vmem:[#allocation11 + $0x368] ss:$48 sps:$4 sm:$0xff]  }
 0x3c6   : > { %5009 = vmatpush1.bf16.msra.mxu1 %v17061_v50  ;;  %4846 = vmatprep.subr.bf16.mxu0 %v17068_v52  ;;  %v19057_v50 = vld [vmem:[#allocation11 + $0x4] ss:$48 sps:$4 sm:$0xff]   ;;  %v19060_v52 = vld [vmem:[#allocation11 + $0xc] ss:$48 sps:$4 sm:$0xff]  }
 0x3c7   : > { %5010 = vmatprep.subr.bf16.mxu1 %v17070_v53  ;;  %v5032_v53 = vmax.f32 %v18260_v37, 0.0  ;;  %v19123_v37 = vld [vmem:[#allocation11 + $0x424] ss:$48 sps:$4 sm:$0xff]  }
 0x3c9   : > { %4847 = vmatpush1.bf16.msra.mxu0 %v17067_v59  ;;  %v21374_v57 = vpack.c.bf16 %v5032_v53, %v5032_v53  ;;  %v19061_v59 = vld [vmem:[#allocation11 + $0x60] ss:$48 sps:$4 sm:$0xff]   ;;  %v19132_v53 = vld [vmem:[#allocation11 + $0x48c] ss:$48 sps:$4 sm:$0xff]  }
 0x3ca   : > { %5011 = vmatpush1.bf16.msra.mxu1 %v17069_v60  ;;  %4848 = vmatprep.subr.bf16.mxu0 %v17076_v40  ;;  %v19064_v60 = vld [vmem:[#allocation11 + $0x68] ss:$48 sps:$4 sm:$0xff]   ;;  %v19069_v40 = vld [vmem:[#allocation11 + $0xc4] ss:$48 sps:$4 sm:$0xff]  }
 0x3cb   : > { %5012 = vmatprep.subr.bf16.mxu1 %v17078_v61  ;;  %v19072_v61 = vld [vmem:[#allocation11 + $0xcc] ss:$48 sps:$4 sm:$0xff]  }
 0x3cd   : > { %4849 = vmatpush1.bf16.msra.mxu0 %v17075_v4  ;;  %v19076_v4 = vld [vmem:[#allocation11 + $0x128] ss:$48 sps:$4 sm:$0xff]  }
 0x3ce   : > { %5013 = vmatpush1.bf16.msra.mxu1 %v17077_v5  ;;  %4850 = vmatprep.subr.bf16.mxu0 %v17084_v31  ;;  %v19081_v5 = vld [vmem:[#allocation11 + $0x184] ss:$48 sps:$4 sm:$0xff]   ;;  %v19084_v31 = vld [vmem:[#allocation11 + $0x18c] ss:$48 sps:$4 sm:$0xff]  }
 0x3cf   : > { %5014 = vmatprep.subr.bf16.mxu1 %v17086_v7  ;;  %v19079_v7 = vld [vmem:[#allocation11 + $0x180] ss:$48 sps:$4 sm:$0xff]  }
 0x3d1   : > { %4851 = vmatpush1.bf16.msra.mxu0 %v17083_v41  ;;  %v19088_v41 = vld [vmem:[#allocation11 + $0x1e8] ss:$48 sps:$4 sm:$0xff]  }
 0x3d2   : > { %5015 = vmatpush1.bf16.msra.mxu1 %v17085_v35  ;;  %4852 = vmatprep.subr.bf16.mxu0 %v17092_v13  ;;  %v19093_v35 = vld [vmem:[#allocation11 + $0x244] ss:$48 sps:$4 sm:$0xff]   ;;  %v19096_v13 = vld [vmem:[#allocation11 + $0x24c] ss:$48 sps:$4 sm:$0xff]  }
 0x3d3   : > { %5016 = vmatprep.subr.bf16.mxu1 %v17094_v42  ;;  %v19091_v42 = vld [vmem:[#allocation11 + $0x240] ss:$48 sps:$4 sm:$0xff]  }
 0x3d5   : > { %4853 = vmatpush1.bf16.msra.mxu0 %v17091_v28  ;;  %v19100_v28 = vld [vmem:[#allocation11 + $0x2a8] ss:$48 sps:$4 sm:$0xff]  }
 0x3d6   : > { %5017 = vmatpush1.bf16.msra.mxu1 %v17093_v58  ;;  %4854 = vmatprep.subr.bf16.mxu0 %v17100_v29  ;;  %v19105_v58 = vld [vmem:[#allocation11 + $0x304] ss:$48 sps:$4 sm:$0xff]   ;;  %v19108_v29 = vld [vmem:[#allocation11 + $0x30c] ss:$48 sps:$4 sm:$0xff]  }
 0x3d7   : > { %5018 = vmatprep.subr.bf16.mxu1 %v17102_v30  ;;  %v19103_v30 = vld [vmem:[#allocation11 + $0x300] ss:$48 sps:$4 sm:$0xff]  }
 0x3d9   : > { %4855 = vmatpush1.bf16.msra.mxu0 %v17099_v43  ;;  %v19117_v43 = vld [vmem:[#allocation11 + $0x3c4] ss:$48 sps:$4 sm:$0xff]  }
 0x3da   : > { %5019 = vmatpush1.bf16.msra.mxu1 %v17101_v44  ;;  %4856 = vmatprep.subr.bf16.mxu0 %v17108_v46  ;;  %v19120_v44 = vld [vmem:[#allocation11 + $0x3cc] ss:$48 sps:$4 sm:$0xff]   ;;  %v19115_v46 = vld [vmem:[#allocation11 + $0x3c0] ss:$48 sps:$4 sm:$0xff]  }
 0x3db   : > { %5020 = vmatprep.subr.bf16.mxu1 %v17110_v47  ;;  %v19118_v47 = vld [vmem:[#allocation11 + $0x3c8] ss:$48 sps:$4 sm:$0xff]  }
 0x3dd   : > { %4857 = vmatpush1.bf16.msra.mxu0 %v17107_v48  ;;  %v19126_v48 = vld [vmem:[#allocation11 + $0x42c] ss:$48 sps:$4 sm:$0xff]  }
 0x3de   : > { %5021 = vmatpush1.bf16.msra.mxu1 %v17109_v49  ;;  %9719 = vmatprep.subr.bf16.mxu0 %v19057_v50  ;;  %v19121_v49 = vld [vmem:[#allocation11 + $0x420] ss:$48 sps:$4 sm:$0xff]   ;;  %v19124_v50 = vld [vmem:[#allocation11 + $0x428] ss:$48 sps:$4 sm:$0xff]  }
 0x3df   : > { %9883 = vmatprep.subr.bf16.mxu1 %v19060_v52  ;;  %v19129_v52 = vld [vmem:[#allocation11 + $0x484] ss:$48 sps:$4 sm:$0xff]  }
 0x3e0   : > { %4859 = vmatmul.mubr.bf16.vlgmr.msra.gmra.mrb[12].mxu0 %v21343_v9 }
 0x3e1   : > { %5023 = vmatmul.mubr.bf16.vlgmr.msra.gmra.mrb[12].mxu1 %v21343_v9  ;;  %9720 = vmatpush1.bf16.msra.mxu0 %v19055_v54  ;;  %v19078_v9 = vld [vmem:[#allocation11 + $0x12c] ss:$48 sps:$4 sm:$0xff]   ;;  %v19127_v54 = vld [vmem:[#allocation11 + $0x480] ss:$48 sps:$4 sm:$0xff]  }
 0x3e2   : > { %9751 = vmatprep.mubr.bf16.mxu0 %v21374_v57  ;;  %9884 = vmatpush1.bf16.msra.mxu1 %v19058_v55  ;;  %v19130_v55 = vld [vmem:[#allocation11 + $0x488] ss:$48 sps:$4 sm:$0xff]  }
 0x3e3   : > { %9915 = vmatprep.mubr.bf16.mxu1 %v21374_v57  ;;  %9721 = vmatprep.subr.bf16.mxu0 %v19063_v56  ;;  %v19135_v56 = vld [vmem:[#allocation11 + $0x4e4] ss:$48 sps:$4 sm:$0xff]  }
 0x3e4   : > { %9885 = vmatprep.subr.bf16.mxu1 %v19066_v34  ;;  %v19138_v34 = vld [vmem:[#allocation11 + $0x4ec] ss:$48 sps:$4 sm:$0xff]  }
 0x3e5   : > { %9722 = vmatpush1.bf16.msra.mxu0 %v19061_v59  ;;  %v19133_v59 = vld [vmem:[#allocation11 + $0x4e0] ss:$48 sps:$4 sm:$0xff]  }
 0x3e6   : > { %9886 = vmatpush1.bf16.msra.mxu1 %v19064_v60  ;;  %9723 = vmatprep.subr.bf16.mxu0 %v19069_v40  ;;  %v4338_v60 = vrot.slane %v21369_v23, %v21257_v18  ;;  %v19136_v40 = vld [vmem:[#allocation11 + $0x4e8] ss:$48 sps:$4 sm:$0xff]  }
 0x3e7   : > { %9887 = vmatprep.subr.bf16.mxu1 %v19072_v61  ;;  %v19141_v61 = vld [vmem:[#allocation11 + $0x544] ss:$48 sps:$4 sm:$0xff]  }
 0x3e9   : > { %9724 = vmatpush1.bf16.msra.mxu0 %v19067_v62  ;;  %v19144_v62 = vld [vmem:[#allocation11 + $0x54c] ss:$48 sps:$4 sm:$0xff]  }
 0x3ea   : > { %9888 = vmatpush1.bf16.msra.mxu1 %v19070_v25  ;;  %9725 = vmatprep.subr.bf16.mxu0 %v19075_v63  ;;  %v4350_v25 = vrot.slane %v21369_v23, %v21269_v24  ;;  %v19139_v63 = vld [vmem:[#allocation11 + $0x540] ss:$48 sps:$4 sm:$0xff]  }
 0x3eb   : > { %9889 = vmatprep.subr.bf16.mxu1 %v19078_v9  ;;  %v18259_v9 = vadd.f32 %v21361_v1, %v4338_v60  ;;  %v19151_v1 = vld [vmem:[#allocation11 + $0x600] ss:$48 sps:$4 sm:$0xff]   ;;  %v19204_v60 = vld [vmem:[#allocation11 + $0x90c] ss:$48 sps:$4 sm:$0xff]  }
 0x3ed   : > { %9726 = vmatpush1.bf16.msra.mxu0 %v19073_v3  ;;  %v19142_v3 = vld [vmem:[#allocation11 + $0x548] ss:$48 sps:$4 sm:$0xff]  }
 0x3ee   : > { %9890 = vmatpush1.bf16.msra.mxu1 %v19076_v4  ;;  %9727 = vmatprep.subr.bf16.mxu0 %v19081_v5  ;;  %v19147_v4 = vld [vmem:[#allocation11 + $0x5a4] ss:$48 sps:$4 sm:$0xff]   ;;  %v19150_v5 = vld [vmem:[#allocation11 + $0x5ac] ss:$48 sps:$4 sm:$0xff]  }
 0x3ef   : > { %9891 = vmatprep.subr.bf16.mxu1 %v19084_v31  ;;  %v18262_v31 = vadd.f32 %v21367_v45, %v4350_v25  ;;  %v19210_v25 = vld [vmem:[#allocation11 + $0x96c] ss:$48 sps:$4 sm:$0xff]  }
 0x3f1   : > { %9728 = vmatpush1.bf16.msra.mxu0 %v19079_v7  ;;  %v19145_v7 = vld [vmem:[#allocation11 + $0x5a0] ss:$48 sps:$4 sm:$0xff]  }
 0x3f2   : > { %9892 = vmatpush1.bf16.msra.mxu1 %v19082_v8  ;;  %9729 = vmatprep.subr.bf16.mxu0 %v19087_v10  ;;  %v5031_v8 = vmax.f32 %v18259_v9, 0.0  ;;  %v19148_v10 = vld [vmem:[#allocation11 + $0x5a8] ss:$48 sps:$4 sm:$0xff]  }
 0x3f3   : > { %9893 = vmatprep.subr.bf16.mxu1 %v19090_v11  ;;  %v19153_v11 = vld [vmem:[#allocation11 + $0x604] ss:$48 sps:$4 sm:$0xff]   ;;  %v19208_v9 = vld [vmem:[#allocation11 + $0x968] ss:$48 sps:$4 sm:$0xff]  }
 0x3f5   : > { %9730 = vmatpush1.bf16.msra.mxu0 %v19085_v19  ;;  %v19156_v19 = vld [vmem:[#allocation11 + $0x60c] ss:$48 sps:$4 sm:$0xff]  }
 0x3f6   : > { %9894 = vmatpush1.bf16.msra.mxu1 %v19088_v41  ;;  %9731 = vmatprep.subr.bf16.mxu0 %v19093_v35  ;;  %v5034_v41 = vmax.f32 %v18262_v31, 0.0  ;;  %v21386_v35 = vpack.c.bf16 %v5031_v8, %v5031_v8  ;;  %v19214_v31 = vld [vmem:[#allocation11 + $0x9c8] ss:$48 sps:$4 sm:$0xff]   ;;  %v19222_v8 = vld [vmem:[#allocation11 + $0xa2c] ss:$48 sps:$4 sm:$0xff]  }
 0x3f7   : > { %9895 = vmatprep.subr.bf16.mxu1 %v19096_v13  ;;  %v19154_v13 = vld [vmem:[#allocation11 + $0x608] ss:$48 sps:$4 sm:$0xff]  }
 0x3f8   : > { %v21388_v45 = vpack.c.bf16 %v5034_v41, %v5034_v41  ;;  %v19228_v41 = vld [vmem:[#allocation11 + $0xa8c] ss:$48 sps:$4 sm:$0xff]  }
 0x3f9   : > { %9732 = vmatpush1.bf16.msra.mxu0 %v19091_v42  ;;  %v19159_v42 = vld [vmem:[#allocation11 + $0x664] ss:$48 sps:$4 sm:$0xff]  }
 0x3fa   : > { %9896 = vmatpush1.bf16.msra.mxu1 %v19094_v14  ;;  %9733 = vmatprep.subr.bf16.mxu0 %v19099_v15  ;;  %v19162_v14 = vld [vmem:[#allocation11 + $0x66c] ss:$48 sps:$4 sm:$0xff]   ;;  %v19157_v15 = vld [vmem:[#allocation11 + $0x660] ss:$48 sps:$4 sm:$0xff]  }
 0x3fb   : > { %9897 = vmatprep.subr.bf16.mxu1 %v19102_v21  ;;  %v19160_v21 = vld [vmem:[#allocation11 + $0x668] ss:$48 sps:$4 sm:$0xff]  }
 0x3fd   : > { %9734 = vmatpush1.bf16.msra.mxu0 %v19097_v22  ;;  %v19165_v22 = vld [vmem:[#allocation11 + $0x6c4] ss:$48 sps:$4 sm:$0xff]  }
 0x3fe   : > { %9898 = vmatpush1.bf16.msra.mxu1 %v19100_v28  ;;  %9735 = vmatprep.subr.bf16.mxu0 %v19105_v58  ;;  %v19168_v28 = vld [vmem:[#allocation11 + $0x6cc] ss:$48 sps:$4 sm:$0xff]   ;;  %v19163_v58 = vld [vmem:[#allocation11 + $0x6c0] ss:$48 sps:$4 sm:$0xff]  }
 0x3ff   : > { %9899 = vmatprep.subr.bf16.mxu1 %v19108_v29  ;;  %v19166_v29 = vld [vmem:[#allocation11 + $0x6c8] ss:$48 sps:$4 sm:$0xff]  }
 0x401   : > { %9736 = vmatpush1.bf16.msra.mxu0 %v19103_v30  ;;  %v19171_v30 = vld [vmem:[#allocation11 + $0x724] ss:$48 sps:$4 sm:$0xff]  }
 0x402   : > { %9900 = vmatpush1.bf16.msra.mxu1 %v19106_v12  ;;  %9737 = vmatprep.subr.bf16.mxu0 %v19111_v32  ;;  %v19174_v12 = vld [vmem:[#allocation11 + $0x72c] ss:$48 sps:$4 sm:$0xff]   ;;  %v19169_v32 = vld [vmem:[#allocation11 + $0x720] ss:$48 sps:$4 sm:$0xff]  }
 0x403   : > { %9901 = vmatprep.subr.bf16.mxu1 %v19114_v33  ;;  %v19172_v33 = vld [vmem:[#allocation11 + $0x728] ss:$48 sps:$4 sm:$0xff]  }
 0x405   : > { %9738 = vmatpush1.bf16.msra.mxu0 %v19109_v36  ;;  %v19177_v36 = vld [vmem:[#allocation11 + $0x784] ss:$48 sps:$4 sm:$0xff]  }
 0x406   : > { %9902 = vmatpush1.bf16.msra.mxu1 %v19112_v6  ;;  %9739 = vmatprep.subr.bf16.mxu0 %v19117_v43  ;;  %v19180_v6 = vld [vmem:[#allocation11 + $0x78c] ss:$48 sps:$4 sm:$0xff]   ;;  %v19175_v43 = vld [vmem:[#allocation11 + $0x780] ss:$48 sps:$4 sm:$0xff]  }
 0x407   : > { %9903 = vmatprep.subr.bf16.mxu1 %v19120_v44  ;;  %v19178_v44 = vld [vmem:[#allocation11 + $0x788] ss:$48 sps:$4 sm:$0xff]  }
 0x409   : > { %9740 = vmatpush1.bf16.msra.mxu0 %v19115_v46  ;;  %v19183_v46 = vld [vmem:[#allocation11 + $0x7e4] ss:$48 sps:$4 sm:$0xff]  }
 0x40a   : > { %9904 = vmatpush1.bf16.msra.mxu1 %v19118_v47  ;;  %9741 = vmatprep.subr.bf16.mxu0 %v19123_v37  ;;  %v19186_v47 = vld [vmem:[#allocation11 + $0x7ec] ss:$48 sps:$4 sm:$0xff]   ;;  %v19181_v37 = vld [vmem:[#allocation11 + $0x7e0] ss:$48 sps:$4 sm:$0xff]  }
 0x40b   : > { %9905 = vmatprep.subr.bf16.mxu1 %v19126_v48  ;;  %v19184_v48 = vld [vmem:[#allocation11 + $0x7e8] ss:$48 sps:$4 sm:$0xff]  }
 0x40d   : > { %9742 = vmatpush1.bf16.msra.mxu0 %v19121_v49  ;;  %v19189_v49 = vld [vmem:[#allocation11 + $0x844] ss:$48 sps:$4 sm:$0xff]  }
 0x40e   : > { %9906 = vmatpush1.bf16.msra.mxu1 %v19124_v50  ;;  %9743 = vmatprep.subr.bf16.mxu0 %v19129_v52  ;;  %v19192_v50 = vld [vmem:[#allocation11 + $0x84c] ss:$48 sps:$4 sm:$0xff]   ;;  %v19187_v52 = vld [vmem:[#allocation11 + $0x840] ss:$48 sps:$4 sm:$0xff]  }
 0x40f   : > { %9907 = vmatprep.subr.bf16.mxu1 %v19132_v53  ;;  %v19190_v53 = vld [vmem:[#allocation11 + $0x848] ss:$48 sps:$4 sm:$0xff]  }
 0x411   : > { %9744 = vmatpush1.bf16.msra.mxu0 %v19127_v54  ;;  %v19195_v54 = vld [vmem:[#allocation11 + $0x8a4] ss:$48 sps:$4 sm:$0xff]  }
 0x412   : > { %9908 = vmatpush1.bf16.msra.mxu1 %v19130_v55  ;;  %9745 = vmatprep.subr.bf16.mxu0 %v19135_v56  ;;  %v19198_v55 = vld [vmem:[#allocation11 + $0x8ac] ss:$48 sps:$4 sm:$0xff]   ;;  %v19193_v56 = vld [vmem:[#allocation11 + $0x8a0] ss:$48 sps:$4 sm:$0xff]  }
 0x413   : > { %9909 = vmatprep.subr.bf16.mxu1 %v19138_v34  ;;  %v19196_v34 = vld [vmem:[#allocation11 + $0x8a8] ss:$48 sps:$4 sm:$0xff]  }
 0x415   : > { %9746 = vmatpush1.bf16.msra.mxu0 %v19133_v59  ;;  %v19201_v59 = vld [vmem:[#allocation11 + $0x904] ss:$48 sps:$4 sm:$0xff]  }
 0x416   : > { %9910 = vmatpush1.bf16.msra.mxu1 %v19136_v40  ;;  %9747 = vmatprep.subr.bf16.mxu0 %v19141_v61  ;;  %v19199_v40 = vld [vmem:[#allocation11 + $0x900] ss:$48 sps:$4 sm:$0xff]   ;;  %v19202_v61 = vld [vmem:[#allocation11 + $0x908] ss:$48 sps:$4 sm:$0xff]  }
 0x417   : > { %9911 = vmatprep.subr.bf16.mxu1 %v19144_v62  ;;  %v19207_v62 = vld [vmem:[#allocation11 + $0x964] ss:$48 sps:$4 sm:$0xff]  }
 0x419   : > { %9748 = vmatpush1.bf16.msra.mxu0 %v19139_v63  ;;  %v19205_v63 = vld [vmem:[#allocation11 + $0x960] ss:$48 sps:$4 sm:$0xff]  }
 0x41a   : > { %9912 = vmatpush1.bf16.msra.mxu1 %v19142_v3  ;;  %9749 = vmatprep.subr.bf16.mxu0 %v19147_v4  ;;  %v19213_v3 = vld [vmem:[#allocation11 + $0x9c4] ss:$48 sps:$4 sm:$0xff]   ;;  %v19216_v4 = vld [vmem:[#allocation11 + $0x9cc] ss:$48 sps:$4 sm:$0xff]  }
 0x41b   : > { %9913 = vmatprep.subr.bf16.mxu1 %v19150_v5  ;;  %v19211_v5 = vld [vmem:[#allocation11 + $0x9c0] ss:$48 sps:$4 sm:$0xff]  }
 0x41d   : > { %9750 = vmatpush1.bf16.msra.mxu0 %v19145_v7  ;;  %v19219_v7 = vld [vmem:[#allocation11 + $0xa24] ss:$48 sps:$4 sm:$0xff]  }
 0x41e   : > { %9914 = vmatpush1.bf16.msra.mxu1 %v19148_v10  ;;  %9760 = vmatprep.subr.bf16.mxu0 %v19153_v11  ;;  %v19217_v10 = vld [vmem:[#allocation11 + $0xa20] ss:$48 sps:$4 sm:$0xff]   ;;  %v19220_v11 = vld [vmem:[#allocation11 + $0xa28] ss:$48 sps:$4 sm:$0xff]  }
 0x41f   : > { %9924 = vmatprep.subr.bf16.mxu1 %v19156_v19  ;;  %v19225_v19 = vld [vmem:[#allocation11 + $0xa84] ss:$48 sps:$4 sm:$0xff]  }
 0x420   : > { %9752 = vmatmul.mubr.bf16.vlgmr.msra.gmra.mrb[16].mxu0 %v21386_v35 }
 0x421   : > { %9916 = vmatmul.mubr.bf16.vlgmr.msra.gmra.mrb[16].mxu1 %v21386_v35  ;;  %9761 = vmatpush1.bf16.msra.mxu0 %v19151_v1  ;;  %v19223_v1 = vld [vmem:[#allocation11 + $0xa80] ss:$48 sps:$4 sm:$0xff]  }
 0x422   : > { %9792 = vmatprep.mubr.bf16.mxu0 %v21388_v45  ;;  %9925 = vmatpush1.bf16.msra.mxu1 %v19154_v13  ;;  %v19226_v13 = vld [vmem:[#allocation11 + $0xa88] ss:$48 sps:$4 sm:$0xff]  }
 0x423   : > { %9956 = vmatprep.mubr.bf16.mxu1 %v21388_v45  ;;  %9762 = vmatprep.subr.bf16.mxu0 %v19159_v42  ;;  %v19231_v42 = vld [vmem:[#allocation11 + $0xae4] ss:$48 sps:$4 sm:$0xff]  }
 0x424   : > { %9926 = vmatprep.subr.bf16.mxu1 %v19162_v14  ;;  %v19234_v14 = vld [vmem:[#allocation11 + $0xaec] ss:$48 sps:$4 sm:$0xff]  }
 0x425   : > { %9763 = vmatpush1.bf16.msra.mxu0 %v19157_v15  ;;  %v19229_v15 = vld [vmem:[#allocation11 + $0xae0] ss:$48 sps:$4 sm:$0xff]  }
 0x426   : > { %9927 = vmatpush1.bf16.msra.mxu1 %v19160_v21  ;;  %9764 = vmatprep.subr.bf16.mxu0 %v19165_v22  ;;  %v4346_v21 = vrot.slane %v21369_v23, %v21296_v38  ;;  %v19232_v22 = vld [vmem:[#allocation11 + $0xae8] ss:$48 sps:$4 sm:$0xff]  }
 0x427   : > { %9928 = vmatprep.subr.bf16.mxu1 %v19168_v28  ;;  %v19237_v28 = vld [vmem:[#allocation11 + $0xb44] ss:$48 sps:$4 sm:$0xff]  }
 0x429   : > { %9765 = vmatpush1.bf16.msra.mxu0 %v19163_v58  ;;  %v19240_v58 = vld [vmem:[#allocation11 + $0xb4c] ss:$48 sps:$4 sm:$0xff]  }
 0x42a   : > { %9929 = vmatpush1.bf16.msra.mxu1 %v19166_v29  ;;  %9766 = vmatprep.subr.bf16.mxu0 %v19171_v30  ;;  %v19235_v29 = vld [vmem:[#allocation11 + $0xb40] ss:$48 sps:$4 sm:$0xff]   ;;  %v18261_v30 = vadd.f32 %v21363_v2, %v4346_v21  ;;  %v19250_v2 = vld [vmem:[#allocation11 + $0xc08] ss:$48 sps:$4 sm:$0xff]   ;;  %v19303_v21 = vld [vmem:[#allocation11 + $0xf64] ss:$48 sps:$4 sm:$0xff]  }
 0x42b   : > { %9930 = vmatprep.subr.bf16.mxu1 %v19174_v12  ;;  %v19238_v12 = vld [vmem:[#allocation11 + $0xb48] ss:$48 sps:$4 sm:$0xff]  }
 0x42d   : > { %9767 = vmatpush1.bf16.msra.mxu0 %v19169_v32  ;;  %v19243_v32 = vld [vmem:[#allocation11 + $0xba4] ss:$48 sps:$4 sm:$0xff]  }
 0x42e   : > { %9931 = vmatpush1.bf16.msra.mxu1 %v19172_v33  ;;  %9768 = vmatprep.subr.bf16.mxu0 %v19177_v36  ;;  %v19246_v33 = vld [vmem:[#allocation11 + $0xbac] ss:$48 sps:$4 sm:$0xff]   ;;  %v19241_v36 = vld [vmem:[#allocation11 + $0xba0] ss:$48 sps:$4 sm:$0xff]  }
 0x42f   : > { %9932 = vmatprep.subr.bf16.mxu1 %v19180_v6  ;;  %v5033_v6 = vmax.f32 %v18261_v30, 0.0  ;;  %v19312_v30 = vld [vmem:[#allocation11 + $0xfcc] ss:$48 sps:$4 sm:$0xff]  }
 0x431   : > { %9769 = vmatpush1.bf16.msra.mxu0 %v19175_v43  ;;  %v19244_v43 = vld [vmem:[#allocation11 + $0xba8] ss:$48 sps:$4 sm:$0xff]  }
 0x432   : > { %9933 = vmatpush1.bf16.msra.mxu1 %v19178_v44  ;;  %9770 = vmatprep.subr.bf16.mxu0 %v19183_v46  ;;  %v19249_v44 = vld [vmem:[#allocation11 + $0xc04] ss:$48 sps:$4 sm:$0xff]   ;;  %v19252_v46 = vld [vmem:[#allocation11 + $0xc0c] ss:$48 sps:$4 sm:$0xff]  }
 0x433   : > { %9934 = vmatprep.subr.bf16.mxu1 %v19186_v47  ;;  %v19247_v47 = vld [vmem:[#allocation11 + $0xc00] ss:$48 sps:$4 sm:$0xff]  }
 0x435   : > { %9771 = vmatpush1.bf16.msra.mxu0 %v19181_v37  ;;  %v21397_v37 = vpack.c.bf16 %v5033_v6, %v5033_v6  ;;  %v19313_v6 = vld [vmem:[#allocation11 + $0x1020] ss:$48 sps:$4 sm:$0xff]  }
 0x436   : > { %9935 = vmatpush1.bf16.msra.mxu1 %v19184_v48  ;;  %9772 = vmatprep.subr.bf16.mxu0 %v19189_v49  ;;  %v19255_v48 = vld [vmem:[#allocation11 + $0xc64] ss:$48 sps:$4 sm:$0xff]   ;;  %v19258_v49 = vld [vmem:[#allocation11 + $0xc6c] ss:$48 sps:$4 sm:$0xff]  }
 0x437   : > { %9936 = vmatprep.subr.bf16.mxu1 %v19192_v50  ;;  %v19253_v50 = vld [vmem:[#allocation11 + $0xc60] ss:$48 sps:$4 sm:$0xff]  }
 0x439   : > { %9773 = vmatpush1.bf16.msra.mxu0 %v19187_v52  ;;  %v19256_v52 = vld [vmem:[#allocation11 + $0xc68] ss:$48 sps:$4 sm:$0xff]  }
 0x43a   : > { %9937 = vmatpush1.bf16.msra.mxu1 %v19190_v53  ;;  %9774 = vmatprep.subr.bf16.mxu0 %v19195_v54  ;;  %v19261_v53 = vld [vmem:[#allocation11 + $0xcc4] ss:$48 sps:$4 sm:$0xff]   ;;  %v19264_v54 = vld [vmem:[#allocation11 + $0xccc] ss:$48 sps:$4 sm:$0xff]  }
 0x43b   : > { %9938 = vmatprep.subr.bf16.mxu1 %v19198_v55  ;;  %v19259_v55 = vld [vmem:[#allocation11 + $0xcc0] ss:$48 sps:$4 sm:$0xff]  }
 0x43d   : > { %9775 = vmatpush1.bf16.msra.mxu0 %v19193_v56  ;;  %v19262_v56 = vld [vmem:[#allocation11 + $0xcc8] ss:$48 sps:$4 sm:$0xff]  }
 0x43e   : > { %9939 = vmatpush1.bf16.msra.mxu1 %v19196_v34  ;;  %9776 = vmatprep.subr.bf16.mxu0 %v19201_v59  ;;  %v19267_v34 = vld [vmem:[#allocation11 + $0xd24] ss:$48 sps:$4 sm:$0xff]   ;;  %v19270_v59 = vld [vmem:[#allocation11 + $0xd2c] ss:$48 sps:$4 sm:$0xff]  }
 0x43f   : > { %9940 = vmatprep.subr.bf16.mxu1 %v19204_v60  ;;  %v19265_v60 = vld [vmem:[#allocation11 + $0xd20] ss:$48 sps:$4 sm:$0xff]  }
 0x441   : > { %9777 = vmatpush1.bf16.msra.mxu0 %v19199_v40  ;;  %v19268_v40 = vld [vmem:[#allocation11 + $0xd28] ss:$48 sps:$4 sm:$0xff]  }
 0x442   : > { %9941 = vmatpush1.bf16.msra.mxu1 %v19202_v61  ;;  %9778 = vmatprep.subr.bf16.mxu0 %v19207_v62  ;;  %v19273_v61 = vld [vmem:[#allocation11 + $0xd84] ss:$48 sps:$4 sm:$0xff]   ;;  %v19276_v62 = vld [vmem:[#allocation11 + $0xd8c] ss:$48 sps:$4 sm:$0xff]  }
 0x443   : > { %9942 = vmatprep.subr.bf16.mxu1 %v19210_v25  ;;  %v19271_v25 = vld [vmem:[#allocation11 + $0xd80] ss:$48 sps:$4 sm:$0xff]  }
 0x445   : > { %9779 = vmatpush1.bf16.msra.mxu0 %v19205_v63  ;;  %v19274_v63 = vld [vmem:[#allocation11 + $0xd88] ss:$48 sps:$4 sm:$0xff]  }
 0x446   : > { %9943 = vmatpush1.bf16.msra.mxu1 %v19208_v9  ;;  %9780 = vmatprep.subr.bf16.mxu0 %v19213_v3  ;;  %v19279_v9 = vld [vmem:[#allocation11 + $0xde4] ss:$48 sps:$4 sm:$0xff]   ;;  %v19282_v3 = vld [vmem:[#allocation11 + $0xdec] ss:$48 sps:$4 sm:$0xff]  }
 0x447   : > { %9944 = vmatprep.subr.bf16.mxu1 %v19216_v4  ;;  %v19277_v4 = vld [vmem:[#allocation11 + $0xde0] ss:$48 sps:$4 sm:$0xff]  }
 0x449   : > { %9781 = vmatpush1.bf16.msra.mxu0 %v19211_v5  ;;  %v19280_v5 = vld [vmem:[#allocation11 + $0xde8] ss:$48 sps:$4 sm:$0xff]  }
 0x44a   : > { %9945 = vmatpush1.bf16.msra.mxu1 %v19214_v31  ;;  %9782 = vmatprep.subr.bf16.mxu0 %v19219_v7  ;;  %v19285_v31 = vld [vmem:[#allocation11 + $0xe44] ss:$48 sps:$4 sm:$0xff]   ;;  %v19288_v7 = vld [vmem:[#allocation11 + $0xe4c] ss:$48 sps:$4 sm:$0xff]  }
 0x44b   : > { %9946 = vmatprep.subr.bf16.mxu1 %v19222_v8  ;;  %v19283_v8 = vld [vmem:[#allocation11 + $0xe40] ss:$48 sps:$4 sm:$0xff]  }
 0x44d   : > { %9783 = vmatpush1.bf16.msra.mxu0 %v19217_v10  ;;  %v19286_v10 = vld [vmem:[#allocation11 + $0xe48] ss:$48 sps:$4 sm:$0xff]  }
 0x44e   : > { %9947 = vmatpush1.bf16.msra.mxu1 %v19220_v11  ;;  %9784 = vmatprep.subr.bf16.mxu0 %v19225_v19  ;;  %v19291_v11 = vld [vmem:[#allocation11 + $0xea4] ss:$48 sps:$4 sm:$0xff]   ;;  %v19294_v19 = vld [vmem:[#allocation11 + $0xeac] ss:$48 sps:$4 sm:$0xff]  }
 0x44f   : > { %9948 = vmatprep.subr.bf16.mxu1 %v19228_v41  ;;  %v19289_v41 = vld [vmem:[#allocation11 + $0xea0] ss:$48 sps:$4 sm:$0xff]  }
 0x451   : > { %9785 = vmatpush1.bf16.msra.mxu0 %v19223_v1  ;;  %v19292_v1 = vld [vmem:[#allocation11 + $0xea8] ss:$48 sps:$4 sm:$0xff]  }
 0x452   : > { %9949 = vmatpush1.bf16.msra.mxu1 %v19226_v13  ;;  %9786 = vmatprep.subr.bf16.mxu0 %v19231_v42  ;;  %v19297_v13 = vld [vmem:[#allocation11 + $0xf04] ss:$48 sps:$4 sm:$0xff]   ;;  %v19300_v42 = vld [vmem:[#allocation11 + $0xf0c] ss:$48 sps:$4 sm:$0xff]  }
 0x453   : > { %9950 = vmatprep.subr.bf16.mxu1 %v19234_v14  ;;  %v19295_v14 = vld [vmem:[#allocation11 + $0xf00] ss:$48 sps:$4 sm:$0xff]  }
 0x455   : > { %9787 = vmatpush1.bf16.msra.mxu0 %v19229_v15  ;;  %v19298_v15 = vld [vmem:[#allocation11 + $0xf08] ss:$48 sps:$4 sm:$0xff]  }
 0x456   : > { %9951 = vmatpush1.bf16.msra.mxu1 %v19232_v22  ;;  %9788 = vmatprep.subr.bf16.mxu0 %v19237_v28  ;;  %v19306_v22 = vld [vmem:[#allocation11 + $0xf6c] ss:$48 sps:$4 sm:$0xff]   ;;  %v19301_v28 = vld [vmem:[#allocation11 + $0xf60] ss:$48 sps:$4 sm:$0xff]  }
 0x457   : > { %9952 = vmatprep.subr.bf16.mxu1 %v19240_v58  ;;  %v19304_v58 = vld [vmem:[#allocation11 + $0xf68] ss:$48 sps:$4 sm:$0xff]  }
 0x459   : > { %9789 = vmatpush1.bf16.msra.mxu0 %v19235_v29  ;;  %v19309_v29 = vld [vmem:[#allocation11 + $0xfc4] ss:$48 sps:$4 sm:$0xff]  }
 0x45a   : > { %9953 = vmatpush1.bf16.msra.mxu1 %v19238_v12  ;;  %9790 = vmatprep.subr.bf16.mxu0 %v19243_v32  ;;  %v19307_v12 = vld [vmem:[#allocation11 + $0xfc0] ss:$48 sps:$4 sm:$0xff]   ;;  %v19310_v32 = vld [vmem:[#allocation11 + $0xfc8] ss:$48 sps:$4 sm:$0xff]  }
 0x45b   : > { %9954 = vmatprep.subr.bf16.mxu1 %v19246_v33  ;;  %v19315_v33 = vld [vmem:[#allocation11 + $0x1024] ss:$48 sps:$4 sm:$0xff]  }
 0x45d   : > { %9791 = vmatpush1.bf16.msra.mxu0 %v19241_v36  ;;  %v19318_v36 = vld [vmem:[#allocation11 + $0x102c] ss:$48 sps:$4 sm:$0xff]  }
 0x45e   : > { %9955 = vmatpush1.bf16.msra.mxu1 %v19244_v43  ;;  %9801 = vmatprep.subr.bf16.mxu0 %v19249_v44  ;;  %v19316_v43 = vld [vmem:[#allocation11 + $0x1028] ss:$48 sps:$4 sm:$0xff]   ;;  %v19321_v44 = vld [vmem:[#allocation11 + $0x1084] ss:$48 sps:$4 sm:$0xff]  }
 0x45f   : > { %9965 = vmatprep.subr.bf16.mxu1 %v19252_v46  ;;  %v19324_v46 = vld [vmem:[#allocation11 + $0x108c] ss:$48 sps:$4 sm:$0xff]  }
 0x460   : > { %9793 = vmatmul.mubr.bf16.vlgmr.msra.gmra.mrb[16].mxu0 %v21397_v37 }
 0x461   : > { %9957 = vmatmul.mubr.bf16.vlgmr.msra.gmra.mrb[16].mxu1 %v21397_v37  ;;  %9802 = vmatpush1.bf16.msra.mxu0 %v19247_v47  ;;  %v19319_v47 = vld [vmem:[#allocation11 + $0x1080] ss:$48 sps:$4 sm:$0xff]  }
 0x462   : > { %9966 = vmatpush1.bf16.msra.mxu1 %v19250_v2  ;;  %9803 = vmatprep.subr.bf16.mxu0 %v19255_v48  ;;  %v19322_v2 = vld [vmem:[#allocation11 + $0x1088] ss:$48 sps:$4 sm:$0xff]   ;;  %v19327_v48 = vld [vmem:[#allocation11 + $0x10e4] ss:$48 sps:$4 sm:$0xff]  }
 0x463   : > { %9967 = vmatprep.subr.bf16.mxu1 %v19258_v49  ;;  %v19330_v49 = vld [vmem:[#allocation11 + $0x10ec] ss:$48 sps:$4 sm:$0xff]  }
 0x465   : > { %9804 = vmatpush1.bf16.msra.mxu0 %v19253_v50  ;;  %v19325_v50 = vld [vmem:[#allocation11 + $0x10e0] ss:$48 sps:$4 sm:$0xff]  }
 0x466   : > { %9968 = vmatpush1.bf16.msra.mxu1 %v19256_v52  ;;  %9805 = vmatprep.subr.bf16.mxu0 %v19261_v53  ;;  %v19328_v52 = vld [vmem:[#allocation11 + $0x10e8] ss:$48 sps:$4 sm:$0xff]   ;;  %v19333_v53 = vld [vmem:[#allocation11 + $0x1144] ss:$48 sps:$4 sm:$0xff]  }
 0x467   : > { %9969 = vmatprep.subr.bf16.mxu1 %v19264_v54  ;;  %v19336_v54 = vld [vmem:[#allocation11 + $0x114c] ss:$48 sps:$4 sm:$0xff]  }
 0x469   : > { %9806 = vmatpush1.bf16.msra.mxu0 %v19259_v55  ;;  %v19331_v55 = vld [vmem:[#allocation11 + $0x1140] ss:$48 sps:$4 sm:$0xff]  }
 0x46a   : > { %9970 = vmatpush1.bf16.msra.mxu1 %v19262_v56  ;;  %9807 = vmatprep.subr.bf16.mxu0 %v19267_v34  ;;  %v19334_v56 = vld [vmem:[#allocation11 + $0x1148] ss:$48 sps:$4 sm:$0xff]   ;;  %v19339_v34 = vld [vmem:[#allocation11 + $0x11a4] ss:$48 sps:$4 sm:$0xff]  }
 0x46b   : > { %9971 = vmatprep.subr.bf16.mxu1 %v19270_v59  ;;  %v19342_v59 = vld [vmem:[#allocation11 + $0x11ac] ss:$48 sps:$4 sm:$0xff]  }
 0x46d   : > { %9808 = vmatpush1.bf16.msra.mxu0 %v19265_v60  ;;  %v19337_v60 = vld [vmem:[#allocation11 + $0x11a0] ss:$48 sps:$4 sm:$0xff]  }
 0x46e   : > { %9972 = vmatpush1.bf16.msra.mxu1 %v19268_v40  ;;  %9809 = vmatprep.subr.bf16.mxu0 %v19273_v61  ;;  %v19340_v40 = vld [vmem:[#allocation11 + $0x11a8] ss:$48 sps:$4 sm:$0xff]   ;;  %v19345_v61 = vld [vmem:[#allocation11 + $0x1204] ss:$48 sps:$4 sm:$0xff]  }
 0x46f   : > { %9973 = vmatprep.subr.bf16.mxu1 %v19276_v62  ;;  %v19348_v62 = vld [vmem:[#allocation11 + $0x120c] ss:$48 sps:$4 sm:$0xff]  }
 0x471   : > { %9810 = vmatpush1.bf16.msra.mxu0 %v19271_v25  ;;  %v4354_v25 = vrot.slane %v21369_v23, %v21316_v26 }
 0x472   : > { %9974 = vmatpush1.bf16.msra.mxu1 %v19274_v63  ;;  %9811 = vmatprep.subr.bf16.mxu0 %v19279_v9  ;;  %v4358_v63 = vrot.slane %v21369_v23, %v21299_v51  ;;  %v4366_v9 = vrot.slane %v21369_v23, %v21319_v39 }
 0x473   : > { %9975 = vmatprep.subr.bf16.mxu1 %v19282_v3 }
 0x475   : > { %9812 = vmatpush1.bf16.msra.mxu0 %v19277_v4 }
 0x476   : > { %9976 = vmatpush1.bf16.msra.mxu1 %v19280_v5  ;;  %9813 = vmatprep.subr.bf16.mxu0 %v19285_v31 }
 0x477   : > { %9977 = vmatprep.subr.bf16.mxu1 %v19288_v7 }
 0x479   : > { %9814 = vmatpush1.bf16.msra.mxu0 %v19283_v8 }
 0x47a   : > { %9978 = vmatpush1.bf16.msra.mxu1 %v19286_v10  ;;  %9815 = vmatprep.subr.bf16.mxu0 %v19291_v11 }
 0x47b   : > { %9979 = vmatprep.subr.bf16.mxu1 %v19294_v19 }
 0x47d   : > { %9816 = vmatpush1.bf16.msra.mxu0 %v19289_v41 }
 0x47e   : > { %9980 = vmatpush1.bf16.msra.mxu1 %v19292_v1  ;;  %9817 = vmatprep.subr.bf16.mxu0 %v19297_v13 }
 0x47f   : > { %9981 = vmatprep.subr.bf16.mxu1 %v19300_v42 }
 0x481   : > { %9818 = vmatpush1.bf16.msra.mxu0 %v19295_v14 }
 0x482   : > { %9982 = vmatpush1.bf16.msra.mxu1 %v19298_v15  ;;  %9819 = vmatprep.subr.bf16.mxu0 %v19303_v21  ;;  %v19343_v21 = vld [vmem:[#allocation11 + $0x1200] ss:$48 sps:$4 sm:$0xff]  }
 0x483   : > { %9983 = vmatprep.subr.bf16.mxu1 %v19306_v22  ;;  %v19346_v22 = vld [vmem:[#allocation11 + $0x1208] ss:$48 sps:$4 sm:$0xff]  }
 0x485   : > { %9820 = vmatpush1.bf16.msra.mxu0 %v19301_v28  ;;  %v19351_v28 = vld [vmem:[#allocation11 + $0x1264] ss:$48 sps:$4 sm:$0xff]  }
 0x486   : > { %9984 = vmatpush1.bf16.msra.mxu1 %v19304_v58  ;;  %9821 = vmatprep.subr.bf16.mxu0 %v19309_v29  ;;  %v19354_v58 = vld [vmem:[#allocation11 + $0x126c] ss:$48 sps:$4 sm:$0xff]  }
 0x487   : > { %9985 = vmatprep.subr.bf16.mxu1 %v19312_v30  ;;  %v19349_v30 = vld [vmem:[#allocation11 + $0x1260] ss:$48 sps:$4 sm:$0xff]  }
 0x489   : > { %9822 = vmatpush1.bf16.msra.mxu0 %v19307_v12  ;;  %v19352_v12 = vld [vmem:[#allocation11 + $0x1268] ss:$48 sps:$4 sm:$0xff]  }
 0x48a   : > { %9986 = vmatpush1.bf16.msra.mxu1 %v19310_v32  ;;  %9823 = vmatprep.subr.bf16.mxu0 %v19315_v33  ;;  %v19357_v32 = vld [vmem:[#allocation11 + $0x12c4] ss:$48 sps:$4 sm:$0xff]   ;;  %v19360_v33 = vld [vmem:[#allocation11 + $0x12cc] ss:$48 sps:$4 sm:$0xff]  }
 0x48b   : > { %9987 = vmatprep.subr.bf16.mxu1 %v19318_v36  ;;  %v19355_v36 = vld [vmem:[#allocation11 + $0x12c0] ss:$48 sps:$4 sm:$0xff]  }
 0x48d   : > { %9824 = vmatpush1.bf16.msra.mxu0 %v19313_v6  ;;  %v19358_v6 = vld [vmem:[#allocation11 + $0x12c8] ss:$48 sps:$4 sm:$0xff]  }
 0x48e   : > { %9988 = vmatpush1.bf16.msra.mxu1 %v19316_v43  ;;  %9825 = vmatprep.subr.bf16.mxu0 %v19321_v44  ;;  %v19363_v43 = vld [vmem:[#allocation11 + $0x1324] ss:$48 sps:$4 sm:$0xff]   ;;  %v19366_v44 = vld [vmem:[#allocation11 + $0x132c] ss:$48 sps:$4 sm:$0xff]  }
 0x48f   : > { %9989 = vmatprep.subr.bf16.mxu1 %v19324_v46  ;;  %v19361_v46 = vld [vmem:[#allocation11 + $0x1320] ss:$48 sps:$4 sm:$0xff]  }
 0x491   : > { %9826 = vmatpush1.bf16.msra.mxu0 %v19319_v47  ;;  %v19364_v47 = vld [vmem:[#allocation11 + $0x1328] ss:$48 sps:$4 sm:$0xff]  }
 0x492   : > { %9990 = vmatpush1.bf16.msra.mxu1 %v19322_v2  ;;  %9827 = vmatprep.subr.bf16.mxu0 %v19327_v48  ;;  %v19369_v2 = vld [vmem:[#allocation11 + $0x1384] ss:$48 sps:$4 sm:$0xff]   ;;  %v19372_v48 = vld [vmem:[#allocation11 + $0x138c] ss:$48 sps:$4 sm:$0xff]  }
 0x493   : > { %9991 = vmatprep.subr.bf16.mxu1 %v19330_v49  ;;  %v19367_v49 = vld [vmem:[#allocation11 + $0x1380] ss:$48 sps:$4 sm:$0xff]  }
 0x495   : > { %9828 = vmatpush1.bf16.msra.mxu0 %v19325_v50  ;;  %v19370_v50 = vld [vmem:[#allocation11 + $0x1388] ss:$48 sps:$4 sm:$0xff]  }
 0x496   : > { %9992 = vmatpush1.bf16.msra.mxu1 %v19328_v52  ;;  %9829 = vmatprep.subr.bf16.mxu0 %v19333_v53  ;;  %v19375_v52 = vld [vmem:[#allocation11 + $0x13e4] ss:$48 sps:$4 sm:$0xff]   ;;  %v19378_v53 = vld [vmem:[#allocation11 + $0x13ec] ss:$48 sps:$4 sm:$0xff]  }
 0x497   : > { %9993 = vmatprep.subr.bf16.mxu1 %v19336_v54  ;;  %v19373_v54 = vld [vmem:[#allocation11 + $0x13e0] ss:$48 sps:$4 sm:$0xff]  }
 0x499   : > { %9830 = vmatpush1.bf16.msra.mxu0 %v19331_v55  ;;  %v19376_v55 = vld [vmem:[#allocation11 + $0x13e8] ss:$48 sps:$4 sm:$0xff]  }
 0x49a   : > { %9994 = vmatpush1.bf16.msra.mxu1 %v19334_v56  ;;  %9831 = vmatprep.subr.bf16.mxu0 %v19339_v34  ;;  %v19381_v56 = vld [vmem:[#allocation11 + $0x1444] ss:$48 sps:$4 sm:$0xff]   ;;  %v19384_v34 = vld [vmem:[#allocation11 + $0x144c] ss:$48 sps:$4 sm:$0xff]  }
 0x49b   : > { %9995 = vmatprep.subr.bf16.mxu1 %v19342_v59  ;;  %v19379_v59 = vld [vmem:[#allocation11 + $0x1440] ss:$48 sps:$4 sm:$0xff]  }
 0x49d   : > { %9832 = vmatpush1.bf16.msra.mxu0 %v19337_v60  ;;  %v19382_v60 = vld [vmem:[#allocation11 + $0x1448] ss:$48 sps:$4 sm:$0xff]  }
 0x49e   : > { %9996 = vmatpush1.bf16.msra.mxu1 %v19340_v40  ;;  %9842 = vmatprep.subr.bf16.mxu0 %v19345_v61  ;;  %v19387_v40 = vld [vmem:[#allocation11 + $0x14a4] ss:$48 sps:$4 sm:$0xff]   ;;  %v19390_v61 = vld [vmem:[#allocation11 + $0x14ac] ss:$48 sps:$4 sm:$0xff]  }
 0x49f   : > { %10006 = vmatprep.subr.bf16.mxu1 %v19348_v62  ;;  %v19385_v62 = vld [vmem:[#allocation11 + $0x14a0] ss:$48 sps:$4 sm:$0xff]  }
 0x4b3   : > { %v4860_v3 = vpop.f32.mrb[12].mxu0 }
 0x4b4   : > { %v18263_v4 = vadd.f32 %v4860_v3, %v4354_v25  ;;  %v21407_v5 = vpop.f32.mrb[12].mxu1  ;;  %v4862_v31 = vpop.f32.mrb[13].mxu0  ;;  %v19388_v25 = vld [vmem:[#allocation11 + $0x14a8] ss:$48 sps:$4 sm:$0xff]   ;;  %v19391_v3 = vld [vmem:[#allocation11 + $0x1500] ss:$48 sps:$4 sm:$0xff]  }
 0x4b5   : > { %v18264_v7 = vadd.f32 %v4862_v31, %v4358_v63  ;;  %v5026_v8 = vpop.f32.mrb[13].mxu1  ;;  %v4864_v10 = vpop.f32.mrb[14].mxu0  ;;  %v19393_v63 = vld [vmem:[#allocation11 + $0x1504] ss:$48 sps:$4 sm:$0xff]  }
 0x4b6   : > { %v5035_v11 = vmax.f32 %v18263_v4, 0.0  ;;  %v18266_v19 = vadd.f32 %v5026_v8, %v4366_v9  ;;  %v5028_v41 = vpop.f32.mrb[14].mxu1  ;;  %v4865_v1 = vpop.f32.mrb[15].mxu0  ;;  %v19396_v9 = vld [vmem:[#allocation11 + $0x150c] ss:$48 sps:$4 sm:$0xff]  }
 0x4b7   : > { %v5036_v13 = vmax.f32 %v18264_v7, 0.0  ;;  %v5029_v42 = vpop.f32.mrb[15].mxu1  ;;  %v19394_v4 = vld [vmem:[#allocation11 + $0x1508] ss:$48 sps:$4 sm:$0xff]   ;;  %v19399_v31 = vld [vmem:[#allocation11 + $0x1564] ss:$48 sps:$4 sm:$0xff]  }
 0x4b8   : > { %v5038_v14 = vmax.f32 %v18266_v19, 0.0  ;;  %v21411_v23 = vpack.c.bf16 %v5035_v11, %v5035_v11  ;;  %v19402_v7 = vld [vmem:[#allocation11 + $0x156c] ss:$48 sps:$4 sm:$0xff]   ;;  %v19397_v8 = vld [vmem:[#allocation11 + $0x1560] ss:$48 sps:$4 sm:$0xff]  }
 0x4b9   : > { %v21409_v15 = vpack.c.bf16 %v5036_v13, %v5036_v13  ;;  %v19400_v10 = vld [vmem:[#allocation11 + $0x1568] ss:$48 sps:$4 sm:$0xff]   ;;  %v19405_v11 = vld [vmem:[#allocation11 + $0x15c4] ss:$48 sps:$4 sm:$0xff]   ;;  %v19408_v19 = vld [vmem:[#allocation11 + $0x15cc] ss:$48 sps:$4 sm:$0xff]  }
 0x4ba   : > { %v21415_v29 = vpack.c.bf16 %v5038_v14, %v5038_v14  ;;  %v19403_v41 = vld [vmem:[#allocation11 + $0x15c0] ss:$48 sps:$4 sm:$0xff]   ;;  %v19406_v1 = vld [vmem:[#allocation11 + $0x15c8] ss:$48 sps:$4 sm:$0xff]   ;;  %v19411_v13 = vld [vmem:[#allocation11 + $0x1624] ss:$48 sps:$4 sm:$0xff]  }
 0x4bb   : > { %9833 = vmatprep.mubr.bf16.mxu0 %v21409_v15  ;;  %9997 = vmatprep.mubr.bf16.mxu1 %v21409_v15  ;;  %v19414_v42 = vld [vmem:[#allocation11 + $0x162c] ss:$48 sps:$4 sm:$0xff]   ;;  %v19409_v14 = vld [vmem:[#allocation11 + $0x1620] ss:$48 sps:$4 sm:$0xff]  }
 0x4bc   : > { %9834 = vmatmul.mubr.bf16.vlgmr.msra.gmra.mrb[16].mxu0 %v21411_v23  ;;  %9998 = vmatmul.mubr.bf16.vlgmr.msra.gmra.mrb[16].mxu1 %v21411_v23 }
 0x4bd   : > { %9843 = vmatpush1.bf16.msra.mxu0 %v19343_v21  ;;  %10007 = vmatpush1.bf16.msra.mxu1 %v19346_v22  ;;  %v19412_v21 = vld [vmem:[#allocation11 + $0x1628] ss:$48 sps:$4 sm:$0xff]   ;;  %v19417_v22 = vld [vmem:[#allocation11 + $0x1684] ss:$48 sps:$4 sm:$0xff]  }
 0x4be   : > { %9874 = vmatprep.mubr.bf16.mxu0 %v21415_v29  ;;  %10038 = vmatprep.mubr.bf16.mxu1 %v21415_v29 }
 0x4bf   : > { %9844 = vmatprep.subr.bf16.mxu0 %v19351_v28  ;;  %10008 = vmatprep.subr.bf16.mxu1 %v19354_v58  ;;  %v19420_v28 = vld [vmem:[#allocation11 + $0x168c] ss:$48 sps:$4 sm:$0xff]   ;;  %v19415_v58 = vld [vmem:[#allocation11 + $0x1680] ss:$48 sps:$4 sm:$0xff]  }
 0x4c1   : > { %9845 = vmatpush1.bf16.msra.mxu0 %v19349_v30  ;;  %10009 = vmatpush1.bf16.msra.mxu1 %v19352_v12  ;;  %v19418_v30 = vld [vmem:[#allocation11 + $0x1688] ss:$48 sps:$4 sm:$0xff]   ;;  %v19423_v12 = vld [vmem:[#allocation11 + $0x16e4] ss:$48 sps:$4 sm:$0xff]  }
 0x4c2   : > { %9846 = vmatprep.subr.bf16.mxu0 %v19357_v32  ;;  %10010 = vmatprep.subr.bf16.mxu1 %v19360_v33  ;;  %v19426_v32 = vld [vmem:[#allocation11 + $0x16ec] ss:$48 sps:$4 sm:$0xff]   ;;  %v19421_v33 = vld [vmem:[#allocation11 + $0x16e0] ss:$48 sps:$4 sm:$0xff]  }
 0x4c5   : > { %9847 = vmatpush1.bf16.msra.mxu0 %v19355_v36  ;;  %10011 = vmatpush1.bf16.msra.mxu1 %v19358_v6  ;;  %v19424_v36 = vld [vmem:[#allocation11 + $0x16e8] ss:$48 sps:$4 sm:$0xff]  }
 0x4c6   : > { %9848 = vmatprep.subr.bf16.mxu0 %v19363_v43  ;;  %10012 = vmatprep.subr.bf16.mxu1 %v19366_v44  ;;  %v20467_v6 = vld [vmem:[#allocation10] sm:$0xff]  ;;  %v19429_v44 = vld [vmem:[#allocation11 + $0x1744] ss:$48 sps:$4 sm:$0xff]  }
 0x4c7   : > { %v4362_v43 = vrot.slane %v20467_v6, %v21338_v27  ;;  %v19492_v6 = vld [vmem:[#allocation11 + $0x31c] ss:$48 sps:$4 sm:$0xff]  }
 0x4c9   : > { %9849 = vmatpush1.bf16.msra.mxu0 %v19361_v46  ;;  %10013 = vmatpush1.bf16.msra.mxu1 %v19364_v47  ;;  %v19432_v46 = vld [vmem:[#allocation11 + $0x174c] ss:$48 sps:$4 sm:$0xff]   ;;  %v19427_v47 = vld [vmem:[#allocation11 + $0x1740] ss:$48 sps:$4 sm:$0xff]  }
 0x4ca   : > { %9850 = vmatprep.subr.bf16.mxu0 %v19369_v2  ;;  %10014 = vmatprep.subr.bf16.mxu1 %v19372_v48  ;;  %v19430_v2 = vld [vmem:[#allocation11 + $0x1748] ss:$48 sps:$4 sm:$0xff]   ;;  %v18265_v48 = vadd.f32 %v21407_v5, %v4362_v43  ;;  %v19487_v43 = vld [vmem:[#allocation11 + $0x310] ss:$48 sps:$4 sm:$0xff]  }
 0x4cb   : > { %v19442_v5 = vld [vmem:[#allocation11 + $0x18] ss:$48 sps:$4 sm:$0xff]  }
 0x4cd   : > { %9851 = vmatpush1.bf16.msra.mxu0 %v19367_v49  ;;  %10015 = vmatpush1.bf16.msra.mxu1 %v19370_v50  ;;  %v19435_v49 = vld [vmem:[#allocation11 + $0x17a4] ss:$48 sps:$4 sm:$0xff]   ;;  %v19438_v50 = vld [vmem:[#allocation11 + $0x17ac] ss:$48 sps:$4 sm:$0xff]  }
 0x4ce   : > { %9852 = vmatprep.subr.bf16.mxu0 %v19375_v52  ;;  %10016 = vmatprep.subr.bf16.mxu1 %v19378_v53  ;;  %v19433_v52 = vld [vmem:[#allocation11 + $0x17a0] ss:$48 sps:$4 sm:$0xff]   ;;  %v19436_v53 = vld [vmem:[#allocation11 + $0x17a8] ss:$48 sps:$4 sm:$0xff]  }
 0x4d1   : > { %9853 = vmatpush1.bf16.msra.mxu0 %v19373_v54  ;;  %10017 = vmatpush1.bf16.msra.mxu1 %v19376_v55  ;;  %v5037_v54 = vmax.f32 %v18265_v48, 0.0  ;;  %v19441_v55 = vld [vmem:[#allocation11 + $0x14] ss:$48 sps:$4 sm:$0xff]   ;;  %v19496_v48 = vld [vmem:[#allocation11 + $0x378] ss:$48 sps:$4 sm:$0xff]  }
 0x4d2   : > { %9854 = vmatprep.subr.bf16.mxu0 %v19381_v56  ;;  %10018 = vmatprep.subr.bf16.mxu1 %v19384_v34  ;;  %v19444_v56 = vld [vmem:[#allocation11 + $0x1c] ss:$48 sps:$4 sm:$0xff]   ;;  %v19439_v34 = vld [vmem:[#allocation11 + $0x10] ss:$48 sps:$4 sm:$0xff]  }
 0x4d5   : > { %9855 = vmatpush1.bf16.msra.mxu0 %v19379_v59  ;;  %10019 = vmatpush1.bf16.msra.mxu1 %v19382_v60  ;;  %v21423_v59 = vpack.c.bf16 %v5037_v54, %v5037_v54  ;;  %v19447_v60 = vld [vmem:[#allocation11 + $0x74] ss:$48 sps:$4 sm:$0xff]  }
 0x4d6   : > { %9856 = vmatprep.subr.bf16.mxu0 %v19387_v40  ;;  %10020 = vmatprep.subr.bf16.mxu1 %v19390_v61  ;;  %v19450_v40 = vld [vmem:[#allocation11 + $0x7c] ss:$48 sps:$4 sm:$0xff]   ;;  %v19445_v61 = vld [vmem:[#allocation11 + $0x70] ss:$48 sps:$4 sm:$0xff]   ;;  %v19507_v54 = vld [vmem:[#allocation11 + $0x434] ss:$48 sps:$4 sm:$0xff]  }
 0x4d9   : > { %9857 = vmatpush1.bf16.msra.mxu0 %v19385_v62  ;;  %10021 = vmatpush1.bf16.msra.mxu1 %v19388_v25  ;;  %v19448_v62 = vld [vmem:[#allocation11 + $0x78] ss:$48 sps:$4 sm:$0xff]   ;;  %v19453_v25 = vld [vmem:[#allocation11 + $0xd4] ss:$48 sps:$4 sm:$0xff]  }
 0x4da   : > { %9858 = vmatprep.subr.bf16.mxu0 %v19393_v63  ;;  %10022 = vmatprep.subr.bf16.mxu1 %v19396_v9  ;;  %v19456_v63 = vld [vmem:[#allocation11 + $0xdc] ss:$48 sps:$4 sm:$0xff]   ;;  %v19451_v9 = vld [vmem:[#allocation11 + $0xd0] ss:$48 sps:$4 sm:$0xff]  }
 0x4dd   : > { %9859 = vmatpush1.bf16.msra.mxu0 %v19391_v3  ;;  %10023 = vmatpush1.bf16.msra.mxu1 %v19394_v4  ;;  %v19454_v3 = vld [vmem:[#allocation11 + $0xd8] ss:$48 sps:$4 sm:$0xff]   ;;  %v19459_v4 = vld [vmem:[#allocation11 + $0x134] ss:$48 sps:$4 sm:$0xff]  }
 0x4de   : > { %9860 = vmatprep.subr.bf16.mxu0 %v19399_v31  ;;  %10024 = vmatprep.subr.bf16.mxu1 %v19402_v7  ;;  %v19462_v31 = vld [vmem:[#allocation11 + $0x13c] ss:$48 sps:$4 sm:$0xff]   ;;  %v19457_v7 = vld [vmem:[#allocation11 + $0x130] ss:$48 sps:$4 sm:$0xff]  }
 0x4e1   : > { %9861 = vmatpush1.bf16.msra.mxu0 %v19397_v8  ;;  %10025 = vmatpush1.bf16.msra.mxu1 %v19400_v10  ;;  %v19460_v8 = vld [vmem:[#allocation11 + $0x138] ss:$48 sps:$4 sm:$0xff]   ;;  %v19465_v10 = vld [vmem:[#allocation11 + $0x194] ss:$48 sps:$4 sm:$0xff]  }
 0x4e2   : > { %9862 = vmatprep.subr.bf16.mxu0 %v19405_v11  ;;  %10026 = vmatprep.subr.bf16.mxu1 %v19408_v19  ;;  %v19468_v11 = vld [vmem:[#allocation11 + $0x19c] ss:$48 sps:$4 sm:$0xff]   ;;  %v19463_v19 = vld [vmem:[#allocation11 + $0x190] ss:$48 sps:$4 sm:$0xff]  }
 0x4e5   : > { %9863 = vmatpush1.bf16.msra.mxu0 %v19403_v41  ;;  %10027 = vmatpush1.bf16.msra.mxu1 %v19406_v1  ;;  %v19466_v41 = vld [vmem:[#allocation11 + $0x198] ss:$48 sps:$4 sm:$0xff]   ;;  %v19471_v1 = vld [vmem:[#allocation11 + $0x1f4] ss:$48 sps:$4 sm:$0xff]  }
 0x4e6   : > { %9864 = vmatprep.subr.bf16.mxu0 %v19411_v13  ;;  %10028 = vmatprep.subr.bf16.mxu1 %v19414_v42  ;;  %v19474_v13 = vld [vmem:[#allocation11 + $0x1fc] ss:$48 sps:$4 sm:$0xff]   ;;  %v19469_v42 = vld [vmem:[#allocation11 + $0x1f0] ss:$48 sps:$4 sm:$0xff]  }
 0x4e9   : > { %9865 = vmatpush1.bf16.msra.mxu0 %v19409_v14  ;;  %10029 = vmatpush1.bf16.msra.mxu1 %v19412_v21  ;;  %v19472_v14 = vld [vmem:[#allocation11 + $0x1f8] ss:$48 sps:$4 sm:$0xff]   ;;  %v19477_v21 = vld [vmem:[#allocation11 + $0x254] ss:$48 sps:$4 sm:$0xff]  }
 0x4ea   : > { %9866 = vmatprep.subr.bf16.mxu0 %v19417_v22  ;;  %10030 = vmatprep.subr.bf16.mxu1 %v19420_v28  ;;  %v19480_v22 = vld [vmem:[#allocation11 + $0x25c] ss:$48 sps:$4 sm:$0xff]   ;;  %v19475_v28 = vld [vmem:[#allocation11 + $0x250] ss:$48 sps:$4 sm:$0xff]  }
 0x4ed   : > { %9867 = vmatpush1.bf16.msra.mxu0 %v19415_v58  ;;  %10031 = vmatpush1.bf16.msra.mxu1 %v19418_v30  ;;  %v19478_v58 = vld [vmem:[#allocation11 + $0x258] ss:$48 sps:$4 sm:$0xff]   ;;  %v19483_v30 = vld [vmem:[#allocation11 + $0x2b4] ss:$48 sps:$4 sm:$0xff]  }
 0x4ee   : > { %9868 = vmatprep.subr.bf16.mxu0 %v19423_v12  ;;  %10032 = vmatprep.subr.bf16.mxu1 %v19426_v32  ;;  %v19486_v12 = vld [vmem:[#allocation11 + $0x2bc] ss:$48 sps:$4 sm:$0xff]   ;;  %v19481_v32 = vld [vmem:[#allocation11 + $0x2b0] ss:$48 sps:$4 sm:$0xff]  }
 0x4f1   : > { %9869 = vmatpush1.bf16.msra.mxu0 %v19421_v33  ;;  %10033 = vmatpush1.bf16.msra.mxu1 %v19424_v36  ;;  %v19484_v33 = vld [vmem:[#allocation11 + $0x2b8] ss:$48 sps:$4 sm:$0xff]   ;;  %v19489_v36 = vld [vmem:[#allocation11 + $0x314] ss:$48 sps:$4 sm:$0xff]  }
 0x4f2   : > { %9870 = vmatprep.subr.bf16.mxu0 %v19429_v44  ;;  %10034 = vmatprep.subr.bf16.mxu1 %v19432_v46  ;;  %v19490_v44 = vld [vmem:[#allocation11 + $0x318] ss:$48 sps:$4 sm:$0xff]   ;;  %v19495_v46 = vld [vmem:[#allocation11 + $0x374] ss:$48 sps:$4 sm:$0xff]  }
 0x4f5   : > { %9871 = vmatpush1.bf16.msra.mxu0 %v19427_v47  ;;  %10035 = vmatpush1.bf16.msra.mxu1 %v19430_v2  ;;  %v19498_v47 = vld [vmem:[#allocation11 + $0x37c] ss:$48 sps:$4 sm:$0xff]   ;;  %v19493_v2 = vld [vmem:[#allocation11 + $0x370] ss:$48 sps:$4 sm:$0xff]  }
 0x4f6   : > { %9872 = vmatprep.subr.bf16.mxu0 %v19435_v49  ;;  %10036 = vmatprep.subr.bf16.mxu1 %v19438_v50  ;;  %v19501_v49 = vld [vmem:[#allocation11 + $0x3d4] ss:$48 sps:$4 sm:$0xff]   ;;  %v19504_v50 = vld [vmem:[#allocation11 + $0x3dc] ss:$48 sps:$4 sm:$0xff]  }
 0x4f9   : > { %9873 = vmatpush1.bf16.msra.mxu0 %v19433_v52  ;;  %10037 = vmatpush1.bf16.msra.mxu1 %v19436_v53  ;;  %v19499_v52 = vld [vmem:[#allocation11 + $0x3d0] ss:$48 sps:$4 sm:$0xff]   ;;  %v19502_v53 = vld [vmem:[#allocation11 + $0x3d8] ss:$48 sps:$4 sm:$0xff]  }
 0x4fa   : > { %10047 = vmatprep.subr.bf16.mxu0 %v19441_v55  ;;  %10211 = vmatprep.subr.bf16.mxu1 %v19444_v56  ;;  %v19510_v55 = vld [vmem:[#allocation11 + $0x43c] ss:$48 sps:$4 sm:$0xff]   ;;  %v19505_v56 = vld [vmem:[#allocation11 + $0x430] ss:$48 sps:$4 sm:$0xff]  }
 0x4fc   : > { %9875 = vmatmul.mubr.bf16.vlgmr.msra.gmra.mrb[16].mxu0 %v21423_v59  ;;  %10039 = vmatmul.mubr.bf16.vlgmr.msra.gmra.mrb[16].mxu1 %v21423_v59 }
 0x4fd   : > { %10048 = vmatpush1.bf16.msra.mxu0 %v19439_v34  ;;  %10079 = vmatprep.mubr.bf16.mxu0 %v21374_v57  ;;  %v19508_v34 = vld [vmem:[#allocation11 + $0x438] ss:$48 sps:$4 sm:$0xff]  }
 0x4fe   : > { %10212 = vmatpush1.bf16.msra.mxu1 %v19442_v5  ;;  %10243 = vmatprep.mubr.bf16.mxu1 %v21374_v57  ;;  %v19513_v5 = vld [vmem:[#allocation11 + $0x494] ss:$48 sps:$4 sm:$0xff]  }
 0x4ff   : > { %10049 = vmatprep.subr.bf16.mxu0 %v19447_v60  ;;  %10213 = vmatprep.subr.bf16.mxu1 %v19450_v40  ;;  %v19516_v60 = vld [vmem:[#allocation11 + $0x49c] ss:$48 sps:$4 sm:$0xff]   ;;  %v19511_v40 = vld [vmem:[#allocation11 + $0x490] ss:$48 sps:$4 sm:$0xff]  }
 0x501   : > { %10050 = vmatpush1.bf16.msra.mxu0 %v19445_v61  ;;  %v19514_v61 = vld [vmem:[#allocation11 + $0x498] ss:$48 sps:$4 sm:$0xff]  }
 0x502   : > { %10214 = vmatpush1.bf16.msra.mxu1 %v19448_v62  ;;  %10051 = vmatprep.subr.bf16.mxu0 %v19453_v25  ;;  %v19519_v62 = vld [vmem:[#allocation11 + $0x4f4] ss:$48 sps:$4 sm:$0xff]   ;;  %v19522_v25 = vld [vmem:[#allocation11 + $0x4fc] ss:$48 sps:$4 sm:$0xff]  }
 0x503   : > { %10215 = vmatprep.subr.bf16.mxu1 %v19456_v63  ;;  %v19517_v63 = vld [vmem:[#allocation11 + $0x4f0] ss:$48 sps:$4 sm:$0xff]  }
 0x505   : > { %10052 = vmatpush1.bf16.msra.mxu0 %v19451_v9  ;;  %v19520_v9 = vld [vmem:[#allocation11 + $0x4f8] ss:$48 sps:$4 sm:$0xff]  }
 0x506   : > { %10216 = vmatpush1.bf16.msra.mxu1 %v19454_v3  ;;  %10053 = vmatprep.subr.bf16.mxu0 %v19459_v4  ;;  %v19525_v3 = vld [vmem:[#allocation11 + $0x554] ss:$48 sps:$4 sm:$0xff]   ;;  %v19528_v4 = vld [vmem:[#allocation11 + $0x55c] ss:$48 sps:$4 sm:$0xff]  }
 0x507   : > { %10217 = vmatprep.subr.bf16.mxu1 %v19462_v31  ;;  %v19523_v31 = vld [vmem:[#allocation11 + $0x550] ss:$48 sps:$4 sm:$0xff]  }
 0x509   : > { %10054 = vmatpush1.bf16.msra.mxu0 %v19457_v7  ;;  %v19526_v7 = vld [vmem:[#allocation11 + $0x558] ss:$48 sps:$4 sm:$0xff]  }
 0x50a   : > { %10218 = vmatpush1.bf16.msra.mxu1 %v19460_v8  ;;  %10055 = vmatprep.subr.bf16.mxu0 %v19465_v10  ;;  %v19531_v8 = vld [vmem:[#allocation11 + $0x5b4] ss:$48 sps:$4 sm:$0xff]   ;;  %v19534_v10 = vld [vmem:[#allocation11 + $0x5bc] ss:$48 sps:$4 sm:$0xff]  }
 0x50b   : > { %10219 = vmatprep.subr.bf16.mxu1 %v19468_v11  ;;  %v19529_v11 = vld [vmem:[#allocation11 + $0x5b0] ss:$48 sps:$4 sm:$0xff]  }
 0x50d   : > { %10056 = vmatpush1.bf16.msra.mxu0 %v19463_v19  ;;  %v19532_v19 = vld [vmem:[#allocation11 + $0x5b8] ss:$48 sps:$4 sm:$0xff]  }
 0x50e   : > { %10220 = vmatpush1.bf16.msra.mxu1 %v19466_v41  ;;  %10057 = vmatprep.subr.bf16.mxu0 %v19471_v1  ;;  %v19537_v41 = vld [vmem:[#allocation11 + $0x614] ss:$48 sps:$4 sm:$0xff]   ;;  %v19540_v1 = vld [vmem:[#allocation11 + $0x61c] ss:$48 sps:$4 sm:$0xff]  }
 0x50f   : > { %10221 = vmatprep.subr.bf16.mxu1 %v19474_v13  ;;  %v19535_v13 = vld [vmem:[#allocation11 + $0x610] ss:$48 sps:$4 sm:$0xff]  }
 0x511   : > { %10058 = vmatpush1.bf16.msra.mxu0 %v19469_v42  ;;  %v19538_v42 = vld [vmem:[#allocation11 + $0x618] ss:$48 sps:$4 sm:$0xff]  }
 0x512   : > { %10222 = vmatpush1.bf16.msra.mxu1 %v19472_v14  ;;  %10059 = vmatprep.subr.bf16.mxu0 %v19477_v21  ;;  %v19543_v14 = vld [vmem:[#allocation11 + $0x674] ss:$48 sps:$4 sm:$0xff]   ;;  %v19546_v21 = vld [vmem:[#allocation11 + $0x67c] ss:$48 sps:$4 sm:$0xff]  }
 0x513   : > { %10223 = vmatprep.subr.bf16.mxu1 %v19480_v22  ;;  %v19541_v22 = vld [vmem:[#allocation11 + $0x670] ss:$48 sps:$4 sm:$0xff]  }
 0x515   : > { %10060 = vmatpush1.bf16.msra.mxu0 %v19475_v28  ;;  %v19544_v28 = vld [vmem:[#allocation11 + $0x678] ss:$48 sps:$4 sm:$0xff]  }
 0x516   : > { %10224 = vmatpush1.bf16.msra.mxu1 %v19478_v58  ;;  %10061 = vmatprep.subr.bf16.mxu0 %v19483_v30  ;;  %v19549_v58 = vld [vmem:[#allocation11 + $0x6d4] ss:$48 sps:$4 sm:$0xff]   ;;  %v19552_v30 = vld [vmem:[#allocation11 + $0x6dc] ss:$48 sps:$4 sm:$0xff]  }
 0x517   : > { %10225 = vmatprep.subr.bf16.mxu1 %v19486_v12  ;;  %v19547_v12 = vld [vmem:[#allocation11 + $0x6d0] ss:$48 sps:$4 sm:$0xff]  }
 0x519   : > { %10062 = vmatpush1.bf16.msra.mxu0 %v19481_v32  ;;  %v19550_v32 = vld [vmem:[#allocation11 + $0x6d8] ss:$48 sps:$4 sm:$0xff]  }
 0x51a   : > { %10226 = vmatpush1.bf16.msra.mxu1 %v19484_v33  ;;  %10063 = vmatprep.subr.bf16.mxu0 %v19489_v36  ;;  %v19555_v33 = vld [vmem:[#allocation11 + $0x734] ss:$48 sps:$4 sm:$0xff]   ;;  %v19558_v36 = vld [vmem:[#allocation11 + $0x73c] ss:$48 sps:$4 sm:$0xff]  }
 0x51b   : > { %10227 = vmatprep.subr.bf16.mxu1 %v19492_v6  ;;  %v19553_v6 = vld [vmem:[#allocation11 + $0x730] ss:$48 sps:$4 sm:$0xff]  }
 0x51d   : > { %10064 = vmatpush1.bf16.msra.mxu0 %v19487_v43  ;;  %v19556_v43 = vld [vmem:[#allocation11 + $0x738] ss:$48 sps:$4 sm:$0xff]  }
 0x51e   : > { %10228 = vmatpush1.bf16.msra.mxu1 %v19490_v44  ;;  %10065 = vmatprep.subr.bf16.mxu0 %v19495_v46  ;;  %v19561_v44 = vld [vmem:[#allocation11 + $0x794] ss:$48 sps:$4 sm:$0xff]   ;;  %v19564_v46 = vld [vmem:[#allocation11 + $0x79c] ss:$48 sps:$4 sm:$0xff]  }
 0x51f   : > { %10229 = vmatprep.subr.bf16.mxu1 %v19498_v47  ;;  %v19559_v47 = vld [vmem:[#allocation11 + $0x790] ss:$48 sps:$4 sm:$0xff]  }
 0x521   : > { %10066 = vmatpush1.bf16.msra.mxu0 %v19493_v2  ;;  %v19562_v2 = vld [vmem:[#allocation11 + $0x798] ss:$48 sps:$4 sm:$0xff]  }
 0x522   : > { %10230 = vmatpush1.bf16.msra.mxu1 %v19496_v48  ;;  %10067 = vmatprep.subr.bf16.mxu0 %v19501_v49  ;;  %v19567_v48 = vld [vmem:[#allocation11 + $0x7f4] ss:$48 sps:$4 sm:$0xff]   ;;  %v19570_v49 = vld [vmem:[#allocation11 + $0x7fc] ss:$48 sps:$4 sm:$0xff]  }
 0x523   : > { %10231 = vmatprep.subr.bf16.mxu1 %v19504_v50  ;;  %v19565_v50 = vld [vmem:[#allocation11 + $0x7f0] ss:$48 sps:$4 sm:$0xff]  }
 0x525   : > { %10068 = vmatpush1.bf16.msra.mxu0 %v19499_v52  ;;  %v19568_v52 = vld [vmem:[#allocation11 + $0x7f8] ss:$48 sps:$4 sm:$0xff]  }
 0x526   : > { %10232 = vmatpush1.bf16.msra.mxu1 %v19502_v53  ;;  %10069 = vmatprep.subr.bf16.mxu0 %v19507_v54  ;;  %v19573_v53 = vld [vmem:[#allocation11 + $0x854] ss:$48 sps:$4 sm:$0xff]   ;;  %v19576_v54 = vld [vmem:[#allocation11 + $0x85c] ss:$48 sps:$4 sm:$0xff]  }
 0x527   : > { %10233 = vmatprep.subr.bf16.mxu1 %v19510_v55  ;;  %v19571_v55 = vld [vmem:[#allocation11 + $0x850] ss:$48 sps:$4 sm:$0xff]  }
 0x529   : > { %10070 = vmatpush1.bf16.msra.mxu0 %v19505_v56  ;;  %v19574_v56 = vld [vmem:[#allocation11 + $0x858] ss:$48 sps:$4 sm:$0xff]  }
 0x52a   : > { %10234 = vmatpush1.bf16.msra.mxu1 %v19508_v34  ;;  %10071 = vmatprep.subr.bf16.mxu0 %v19513_v5  ;;  %v19579_v34 = vld [vmem:[#allocation11 + $0x8b4] ss:$48 sps:$4 sm:$0xff]   ;;  %v19582_v5 = vld [vmem:[#allocation11 + $0x8bc] ss:$48 sps:$4 sm:$0xff]  }
 0x52b   : > { %10235 = vmatprep.subr.bf16.mxu1 %v19516_v60  ;;  %v19577_v60 = vld [vmem:[#allocation11 + $0x8b0] ss:$48 sps:$4 sm:$0xff]  }
 0x52d   : > { %10072 = vmatpush1.bf16.msra.mxu0 %v19511_v40  ;;  %v19580_v40 = vld [vmem:[#allocation11 + $0x8b8] ss:$48 sps:$4 sm:$0xff]  }
 0x52e   : > { %10236 = vmatpush1.bf16.msra.mxu1 %v19514_v61  ;;  %10073 = vmatprep.subr.bf16.mxu0 %v19519_v62  ;;  %v19585_v61 = vld [vmem:[#allocation11 + $0x914] ss:$48 sps:$4 sm:$0xff]   ;;  %v19588_v62 = vld [vmem:[#allocation11 + $0x91c] ss:$48 sps:$4 sm:$0xff]  }
 0x52f   : > { %10237 = vmatprep.subr.bf16.mxu1 %v19522_v25  ;;  %v19583_v25 = vld [vmem:[#allocation11 + $0x910] ss:$48 sps:$4 sm:$0xff]  }
 0x531   : > { %10074 = vmatpush1.bf16.msra.mxu0 %v19517_v63  ;;  %v19586_v63 = vld [vmem:[#allocation11 + $0x918] ss:$48 sps:$4 sm:$0xff]  }
 0x532   : > { %10238 = vmatpush1.bf16.msra.mxu1 %v19520_v9  ;;  %10075 = vmatprep.subr.bf16.mxu0 %v19525_v3  ;;  %v19591_v9 = vld [vmem:[#allocation11 + $0x974] ss:$48 sps:$4 sm:$0xff]   ;;  %v19594_v3 = vld [vmem:[#allocation11 + $0x97c] ss:$48 sps:$4 sm:$0xff]  }
 0x533   : > { %10239 = vmatprep.subr.bf16.mxu1 %v19528_v4  ;;  %v19589_v4 = vld [vmem:[#allocation11 + $0x970] ss:$48 sps:$4 sm:$0xff]  }
 0x535   : > { %10076 = vmatpush1.bf16.msra.mxu0 %v19523_v31  ;;  %v19592_v31 = vld [vmem:[#allocation11 + $0x978] ss:$48 sps:$4 sm:$0xff]  }
 0x536   : > { %10240 = vmatpush1.bf16.msra.mxu1 %v19526_v7  ;;  %10077 = vmatprep.subr.bf16.mxu0 %v19531_v8  ;;  %v19597_v7 = vld [vmem:[#allocation11 + $0x9d4] ss:$48 sps:$4 sm:$0xff]   ;;  %v19600_v8 = vld [vmem:[#allocation11 + $0x9dc] ss:$48 sps:$4 sm:$0xff]  }
 0x537   : > { %10241 = vmatprep.subr.bf16.mxu1 %v19534_v10  ;;  %v19595_v10 = vld [vmem:[#allocation11 + $0x9d0] ss:$48 sps:$4 sm:$0xff]  }
 0x539   : > { %10078 = vmatpush1.bf16.msra.mxu0 %v19529_v11  ;;  %v19598_v11 = vld [vmem:[#allocation11 + $0x9d8] ss:$48 sps:$4 sm:$0xff]  }
 0x53a   : > { %10242 = vmatpush1.bf16.msra.mxu1 %v19532_v19  ;;  %10088 = vmatprep.subr.bf16.mxu0 %v19537_v41  ;;  %v19603_v19 = vld [vmem:[#allocation11 + $0xa34] ss:$48 sps:$4 sm:$0xff]   ;;  %v19606_v41 = vld [vmem:[#allocation11 + $0xa3c] ss:$48 sps:$4 sm:$0xff]  }
 0x53b   : > { %10252 = vmatprep.subr.bf16.mxu1 %v19540_v1  ;;  %v19601_v1 = vld [vmem:[#allocation11 + $0xa30] ss:$48 sps:$4 sm:$0xff]  }
 0x53c   : > { %10080 = vmatmul.mubr.bf16.vlgmr.msra.gmra.mrb[20].mxu0 %v21386_v35 }
 0x53d   : > { %10244 = vmatmul.mubr.bf16.vlgmr.msra.gmra.mrb[20].mxu1 %v21386_v35  ;;  %10089 = vmatpush1.bf16.msra.mxu0 %v19535_v13  ;;  %v19604_v13 = vld [vmem:[#allocation11 + $0xa38] ss:$48 sps:$4 sm:$0xff]  }
 0x53e   : > { %10120 = vmatprep.mubr.bf16.mxu0 %v21388_v45  ;;  %10253 = vmatpush1.bf16.msra.mxu1 %v19538_v42  ;;  %v19609_v42 = vld [vmem:[#allocation11 + $0xa94] ss:$48 sps:$4 sm:$0xff]  }
 0x53f   : > { %10284 = vmatprep.mubr.bf16.mxu1 %v21388_v45  ;;  %10090 = vmatprep.subr.bf16.mxu0 %v19543_v14  ;;  %v19612_v14 = vld [vmem:[#allocation11 + $0xa9c] ss:$48 sps:$4 sm:$0xff]  }
 0x540   : > { %10254 = vmatprep.subr.bf16.mxu1 %v19546_v21  ;;  %v19607_v21 = vld [vmem:[#allocation11 + $0xa90] ss:$48 sps:$4 sm:$0xff]  }
 0x541   : > { %10091 = vmatpush1.bf16.msra.mxu0 %v19541_v22  ;;  %v19610_v22 = vld [vmem:[#allocation11 + $0xa98] ss:$48 sps:$4 sm:$0xff]  }
 0x542   : > { %10255 = vmatpush1.bf16.msra.mxu1 %v19544_v28  ;;  %10092 = vmatprep.subr.bf16.mxu0 %v19549_v58  ;;  %v19615_v28 = vld [vmem:[#allocation11 + $0xaf4] ss:$48 sps:$4 sm:$0xff]   ;;  %v19618_v58 = vld [vmem:[#allocation11 + $0xafc] ss:$48 sps:$4 sm:$0xff]  }
 0x543   : > { %10256 = vmatprep.subr.bf16.mxu1 %v19552_v30  ;;  %v19613_v30 = vld [vmem:[#allocation11 + $0xaf0] ss:$48 sps:$4 sm:$0xff]  }
 0x545   : > { %10093 = vmatpush1.bf16.msra.mxu0 %v19547_v12  ;;  %v19616_v12 = vld [vmem:[#allocation11 + $0xaf8] ss:$48 sps:$4 sm:$0xff]  }
 0x546   : > { %10257 = vmatpush1.bf16.msra.mxu1 %v19550_v32  ;;  %10094 = vmatprep.subr.bf16.mxu0 %v19555_v33  ;;  %v19621_v32 = vld [vmem:[#allocation11 + $0xb54] ss:$48 sps:$4 sm:$0xff]   ;;  %v19624_v33 = vld [vmem:[#allocation11 + $0xb5c] ss:$48 sps:$4 sm:$0xff]  }
 0x547   : > { %10258 = vmatprep.subr.bf16.mxu1 %v19558_v36  ;;  %v19619_v36 = vld [vmem:[#allocation11 + $0xb50] ss:$48 sps:$4 sm:$0xff]  }
 0x549   : > { %10095 = vmatpush1.bf16.msra.mxu0 %v19553_v6  ;;  %v19622_v6 = vld [vmem:[#allocation11 + $0xb58] ss:$48 sps:$4 sm:$0xff]  }
 0x54a   : > { %10259 = vmatpush1.bf16.msra.mxu1 %v19556_v43  ;;  %10096 = vmatprep.subr.bf16.mxu0 %v19561_v44  ;;  %v19627_v43 = vld [vmem:[#allocation11 + $0xbb4] ss:$48 sps:$4 sm:$0xff]   ;;  %v19630_v44 = vld [vmem:[#allocation11 + $0xbbc] ss:$48 sps:$4 sm:$0xff]  }
 0x54b   : > { %10260 = vmatprep.subr.bf16.mxu1 %v19564_v46  ;;  %v19625_v46 = vld [vmem:[#allocation11 + $0xbb0] ss:$48 sps:$4 sm:$0xff]  }
 0x54d   : > { %10097 = vmatpush1.bf16.msra.mxu0 %v19559_v47  ;;  %v19628_v47 = vld [vmem:[#allocation11 + $0xbb8] ss:$48 sps:$4 sm:$0xff]  }
 0x54e   : > { %10261 = vmatpush1.bf16.msra.mxu1 %v19562_v2  ;;  %10098 = vmatprep.subr.bf16.mxu0 %v19567_v48  ;;  %v19633_v2 = vld [vmem:[#allocation11 + $0xc14] ss:$48 sps:$4 sm:$0xff]   ;;  %v19636_v48 = vld [vmem:[#allocation11 + $0xc1c] ss:$48 sps:$4 sm:$0xff]  }
 0x54f   : > { %10262 = vmatprep.subr.bf16.mxu1 %v19570_v49  ;;  %v19631_v49 = vld [vmem:[#allocation11 + $0xc10] ss:$48 sps:$4 sm:$0xff]  }
 0x551   : > { %10099 = vmatpush1.bf16.msra.mxu0 %v19565_v50  ;;  %v19634_v50 = vld [vmem:[#allocation11 + $0xc18] ss:$48 sps:$4 sm:$0xff]  }
 0x552   : > { %10263 = vmatpush1.bf16.msra.mxu1 %v19568_v52  ;;  %10100 = vmatprep.subr.bf16.mxu0 %v19573_v53  ;;  %v19639_v52 = vld [vmem:[#allocation11 + $0xc74] ss:$48 sps:$4 sm:$0xff]   ;;  %v19642_v53 = vld [vmem:[#allocation11 + $0xc7c] ss:$48 sps:$4 sm:$0xff]  }
 0x553   : > { %10264 = vmatprep.subr.bf16.mxu1 %v19576_v54  ;;  %v19637_v54 = vld [vmem:[#allocation11 + $0xc70] ss:$48 sps:$4 sm:$0xff]  }
 0x555   : > { %10101 = vmatpush1.bf16.msra.mxu0 %v19571_v55  ;;  %v19640_v55 = vld [vmem:[#allocation11 + $0xc78] ss:$48 sps:$4 sm:$0xff]  }
 0x556   : > { %10265 = vmatpush1.bf16.msra.mxu1 %v19574_v56  ;;  %10102 = vmatprep.subr.bf16.mxu0 %v19579_v34  ;;  %v19645_v56 = vld [vmem:[#allocation11 + $0xcd4] ss:$48 sps:$4 sm:$0xff]   ;;  %v19648_v34 = vld [vmem:[#allocation11 + $0xcdc] ss:$48 sps:$4 sm:$0xff]  }
 0x557   : > { %10266 = vmatprep.subr.bf16.mxu1 %v19582_v5  ;;  %v19643_v5 = vld [vmem:[#allocation11 + $0xcd0] ss:$48 sps:$4 sm:$0xff]  }
 0x559   : > { %10103 = vmatpush1.bf16.msra.mxu0 %v19577_v60  ;;  %v19646_v60 = vld [vmem:[#allocation11 + $0xcd8] ss:$48 sps:$4 sm:$0xff]  }
 0x55a   : > { %10267 = vmatpush1.bf16.msra.mxu1 %v19580_v40  ;;  %10104 = vmatprep.subr.bf16.mxu0 %v19585_v61  ;;  %v19651_v40 = vld [vmem:[#allocation11 + $0xd34] ss:$48 sps:$4 sm:$0xff]   ;;  %v19654_v61 = vld [vmem:[#allocation11 + $0xd3c] ss:$48 sps:$4 sm:$0xff]  }
 0x55b   : > { %10268 = vmatprep.subr.bf16.mxu1 %v19588_v62  ;;  %v19649_v62 = vld [vmem:[#allocation11 + $0xd30] ss:$48 sps:$4 sm:$0xff]  }
 0x55d   : > { %10105 = vmatpush1.bf16.msra.mxu0 %v19583_v25  ;;  %v19652_v25 = vld [vmem:[#allocation11 + $0xd38] ss:$48 sps:$4 sm:$0xff]  }
 0x55e   : > { %10269 = vmatpush1.bf16.msra.mxu1 %v19586_v63  ;;  %10106 = vmatprep.subr.bf16.mxu0 %v19591_v9  ;;  %v19657_v63 = vld [vmem:[#allocation11 + $0xd94] ss:$48 sps:$4 sm:$0xff]   ;;  %v19660_v9 = vld [vmem:[#allocation11 + $0xd9c] ss:$48 sps:$4 sm:$0xff]  }
 0x55f   : > { %10270 = vmatprep.subr.bf16.mxu1 %v19594_v3  ;;  %v19655_v3 = vld [vmem:[#allocation11 + $0xd90] ss:$48 sps:$4 sm:$0xff]  }
 0x561   : > { %10107 = vmatpush1.bf16.msra.mxu0 %v19589_v4  ;;  %v19658_v4 = vld [vmem:[#allocation11 + $0xd98] ss:$48 sps:$4 sm:$0xff]  }
 0x562   : > { %10271 = vmatpush1.bf16.msra.mxu1 %v19592_v31  ;;  %10108 = vmatprep.subr.bf16.mxu0 %v19597_v7  ;;  %v19663_v31 = vld [vmem:[#allocation11 + $0xdf4] ss:$48 sps:$4 sm:$0xff]   ;;  %v19666_v7 = vld [vmem:[#allocation11 + $0xdfc] ss:$48 sps:$4 sm:$0xff]  }
 0x563   : > { %10272 = vmatprep.subr.bf16.mxu1 %v19600_v8  ;;  %v19661_v8 = vld [vmem:[#allocation11 + $0xdf0] ss:$48 sps:$4 sm:$0xff]  }
 0x565   : > { %10109 = vmatpush1.bf16.msra.mxu0 %v19595_v10  ;;  %v19664_v10 = vld [vmem:[#allocation11 + $0xdf8] ss:$48 sps:$4 sm:$0xff]  }
 0x566   : > { %10273 = vmatpush1.bf16.msra.mxu1 %v19598_v11  ;;  %10110 = vmatprep.subr.bf16.mxu0 %v19603_v19  ;;  %v19669_v11 = vld [vmem:[#allocation11 + $0xe54] ss:$48 sps:$4 sm:$0xff]   ;;  %v19672_v19 = vld [vmem:[#allocation11 + $0xe5c] ss:$48 sps:$4 sm:$0xff]  }
 0x567   : > { %10274 = vmatprep.subr.bf16.mxu1 %v19606_v41  ;;  %v19667_v41 = vld [vmem:[#allocation11 + $0xe50] ss:$48 sps:$4 sm:$0xff]  }
 0x569   : > { %10111 = vmatpush1.bf16.msra.mxu0 %v19601_v1  ;;  %v19670_v1 = vld [vmem:[#allocation11 + $0xe58] ss:$48 sps:$4 sm:$0xff]  }
 0x56a   : > { %10275 = vmatpush1.bf16.msra.mxu1 %v19604_v13  ;;  %10112 = vmatprep.subr.bf16.mxu0 %v19609_v42  ;;  %v19675_v13 = vld [vmem:[#allocation11 + $0xeb4] ss:$48 sps:$4 sm:$0xff]   ;;  %v19678_v42 = vld [vmem:[#allocation11 + $0xebc] ss:$48 sps:$4 sm:$0xff]  }
 0x56b   : > { %10276 = vmatprep.subr.bf16.mxu1 %v19612_v14  ;;  %v19673_v14 = vld [vmem:[#allocation11 + $0xeb0] ss:$48 sps:$4 sm:$0xff]  }
 0x56d   : > { %10113 = vmatpush1.bf16.msra.mxu0 %v19607_v21  ;;  %v19676_v21 = vld [vmem:[#allocation11 + $0xeb8] ss:$48 sps:$4 sm:$0xff]  }
 0x56e   : > { %10277 = vmatpush1.bf16.msra.mxu1 %v19610_v22  ;;  %10114 = vmatprep.subr.bf16.mxu0 %v19615_v28  ;;  %v19681_v22 = vld [vmem:[#allocation11 + $0xf14] ss:$48 sps:$4 sm:$0xff]   ;;  %v19684_v28 = vld [vmem:[#allocation11 + $0xf1c] ss:$48 sps:$4 sm:$0xff]  }
 0x56f   : > { %10278 = vmatprep.subr.bf16.mxu1 %v19618_v58  ;;  %v19679_v58 = vld [vmem:[#allocation11 + $0xf10] ss:$48 sps:$4 sm:$0xff]  }
 0x571   : > { %10115 = vmatpush1.bf16.msra.mxu0 %v19613_v30  ;;  %v19682_v30 = vld [vmem:[#allocation11 + $0xf18] ss:$48 sps:$4 sm:$0xff]  }
 0x572   : > { %10279 = vmatpush1.bf16.msra.mxu1 %v19616_v12  ;;  %10116 = vmatprep.subr.bf16.mxu0 %v19621_v32  ;;  %v19687_v12 = vld [vmem:[#allocation11 + $0xf74] ss:$48 sps:$4 sm:$0xff]   ;;  %v19690_v32 = vld [vmem:[#allocation11 + $0xf7c] ss:$48 sps:$4 sm:$0xff]  }
 0x573   : > { %10280 = vmatprep.subr.bf16.mxu1 %v19624_v33  ;;  %v19685_v33 = vld [vmem:[#allocation11 + $0xf70] ss:$48 sps:$4 sm:$0xff]  }
 0x575   : > { %10117 = vmatpush1.bf16.msra.mxu0 %v19619_v36  ;;  %v19688_v36 = vld [vmem:[#allocation11 + $0xf78] ss:$48 sps:$4 sm:$0xff]  }
 0x576   : > { %10281 = vmatpush1.bf16.msra.mxu1 %v19622_v6  ;;  %10118 = vmatprep.subr.bf16.mxu0 %v19627_v43  ;;  %v19693_v6 = vld [vmem:[#allocation11 + $0xfd4] ss:$48 sps:$4 sm:$0xff]   ;;  %v19696_v43 = vld [vmem:[#allocation11 + $0xfdc] ss:$48 sps:$4 sm:$0xff]  }
 0x577   : > { %10282 = vmatprep.subr.bf16.mxu1 %v19630_v44  ;;  %v19691_v44 = vld [vmem:[#allocation11 + $0xfd0] ss:$48 sps:$4 sm:$0xff]  }
 0x579   : > { %10119 = vmatpush1.bf16.msra.mxu0 %v19625_v46  ;;  %v19694_v46 = vld [vmem:[#allocation11 + $0xfd8] ss:$48 sps:$4 sm:$0xff]  }
 0x57a   : > { %10283 = vmatpush1.bf16.msra.mxu1 %v19628_v47  ;;  %10129 = vmatprep.subr.bf16.mxu0 %v19633_v2  ;;  %v19699_v47 = vld [vmem:[#allocation11 + $0x1034] ss:$48 sps:$4 sm:$0xff]   ;;  %v19702_v2 = vld [vmem:[#allocation11 + $0x103c] ss:$48 sps:$4 sm:$0xff]  }
 0x57b   : > { %10293 = vmatprep.subr.bf16.mxu1 %v19636_v48  ;;  %v19697_v48 = vld [vmem:[#allocation11 + $0x1030] ss:$48 sps:$4 sm:$0xff]  }
 0x57c   : > { %10121 = vmatmul.mubr.bf16.vlgmr.msra.gmra.mrb[20].mxu0 %v21397_v37 }
 0x57d   : > { %10285 = vmatmul.mubr.bf16.vlgmr.msra.gmra.mrb[20].mxu1 %v21397_v37  ;;  %10130 = vmatpush1.bf16.msra.mxu0 %v19631_v49  ;;  %v19700_v49 = vld [vmem:[#allocation11 + $0x1038] ss:$48 sps:$4 sm:$0xff]  }
 0x57e   : > { %10161 = vmatprep.mubr.bf16.mxu0 %v21409_v15  ;;  %10294 = vmatpush1.bf16.msra.mxu1 %v19634_v50  ;;  %v19705_v50 = vld [vmem:[#allocation11 + $0x1094] ss:$48 sps:$4 sm:$0xff]  }
 0x57f   : > { %10325 = vmatprep.mubr.bf16.mxu1 %v21409_v15  ;;  %10131 = vmatprep.subr.bf16.mxu0 %v19639_v52  ;;  %v19708_v52 = vld [vmem:[#allocation11 + $0x109c] ss:$48 sps:$4 sm:$0xff]  }
 0x580   : > { %10295 = vmatprep.subr.bf16.mxu1 %v19642_v53  ;;  %v19703_v53 = vld [vmem:[#allocation11 + $0x1090] ss:$48 sps:$4 sm:$0xff]  }
 0x581   : > { %10132 = vmatpush1.bf16.msra.mxu0 %v19637_v54  ;;  %v19706_v54 = vld [vmem:[#allocation11 + $0x1098] ss:$48 sps:$4 sm:$0xff]  }
 0x582   : > { %10296 = vmatpush1.bf16.msra.mxu1 %v19640_v55  ;;  %10133 = vmatprep.subr.bf16.mxu0 %v19645_v56  ;;  %v19711_v55 = vld [vmem:[#allocation11 + $0x10f4] ss:$48 sps:$4 sm:$0xff]   ;;  %v19714_v56 = vld [vmem:[#allocation11 + $0x10fc] ss:$48 sps:$4 sm:$0xff]  }
 0x583   : > { %10297 = vmatprep.subr.bf16.mxu1 %v19648_v34  ;;  %v19709_v34 = vld [vmem:[#allocation11 + $0x10f0] ss:$48 sps:$4 sm:$0xff]  }
 0x585   : > { %10134 = vmatpush1.bf16.msra.mxu0 %v19643_v5  ;;  %v19712_v5 = vld [vmem:[#allocation11 + $0x10f8] ss:$48 sps:$4 sm:$0xff]  }
 0x586   : > { %10298 = vmatpush1.bf16.msra.mxu1 %v19646_v60  ;;  %10135 = vmatprep.subr.bf16.mxu0 %v19651_v40  ;;  %v19717_v60 = vld [vmem:[#allocation11 + $0x1154] ss:$48 sps:$4 sm:$0xff]   ;;  %v19720_v40 = vld [vmem:[#allocation11 + $0x115c] ss:$48 sps:$4 sm:$0xff]  }
 0x587   : > { %10299 = vmatprep.subr.bf16.mxu1 %v19654_v61  ;;  %v19715_v61 = vld [vmem:[#allocation11 + $0x1150] ss:$48 sps:$4 sm:$0xff]  }
 0x589   : > { %10136 = vmatpush1.bf16.msra.mxu0 %v19649_v62  ;;  %v19718_v62 = vld [vmem:[#allocation11 + $0x1158] ss:$48 sps:$4 sm:$0xff]  }
 0x58a   : > { %10300 = vmatpush1.bf16.msra.mxu1 %v19652_v25  ;;  %10137 = vmatprep.subr.bf16.mxu0 %v19657_v63  ;;  %v19723_v25 = vld [vmem:[#allocation11 + $0x11b4] ss:$48 sps:$4 sm:$0xff]   ;;  %v19726_v63 = vld [vmem:[#allocation11 + $0x11bc] ss:$48 sps:$4 sm:$0xff]  }
 0x58b   : > { %10301 = vmatprep.subr.bf16.mxu1 %v19660_v9  ;;  %v19721_v9 = vld [vmem:[#allocation11 + $0x11b0] ss:$48 sps:$4 sm:$0xff]  }
 0x58d   : > { %10138 = vmatpush1.bf16.msra.mxu0 %v19655_v3  ;;  %v19724_v3 = vld [vmem:[#allocation11 + $0x11b8] ss:$48 sps:$4 sm:$0xff]  }
 0x58e   : > { %10302 = vmatpush1.bf16.msra.mxu1 %v19658_v4  ;;  %10139 = vmatprep.subr.bf16.mxu0 %v19663_v31  ;;  %v19729_v4 = vld [vmem:[#allocation11 + $0x1214] ss:$48 sps:$4 sm:$0xff]   ;;  %v19732_v31 = vld [vmem:[#allocation11 + $0x121c] ss:$48 sps:$4 sm:$0xff]  }
 0x58f   : > { %10303 = vmatprep.subr.bf16.mxu1 %v19666_v7  ;;  %v19727_v7 = vld [vmem:[#allocation11 + $0x1210] ss:$48 sps:$4 sm:$0xff]  }
 0x591   : > { %10140 = vmatpush1.bf16.msra.mxu0 %v19661_v8  ;;  %v19730_v8 = vld [vmem:[#allocation11 + $0x1218] ss:$48 sps:$4 sm:$0xff]  }
 0x592   : > { %10304 = vmatpush1.bf16.msra.mxu1 %v19664_v10  ;;  %10141 = vmatprep.subr.bf16.mxu0 %v19669_v11  ;;  %v19735_v10 = vld [vmem:[#allocation11 + $0x1274] ss:$48 sps:$4 sm:$0xff]   ;;  %v19738_v11 = vld [vmem:[#allocation11 + $0x127c] ss:$48 sps:$4 sm:$0xff]  }
 0x593   : > { %10305 = vmatprep.subr.bf16.mxu1 %v19672_v19  ;;  %v19733_v19 = vld [vmem:[#allocation11 + $0x1270] ss:$48 sps:$4 sm:$0xff]  }
 0x595   : > { %10142 = vmatpush1.bf16.msra.mxu0 %v19667_v41  ;;  %v19736_v41 = vld [vmem:[#allocation11 + $0x1278] ss:$48 sps:$4 sm:$0xff]  }
 0x596   : > { %10306 = vmatpush1.bf16.msra.mxu1 %v19670_v1  ;;  %10143 = vmatprep.subr.bf16.mxu0 %v19675_v13  ;;  %v19741_v1 = vld [vmem:[#allocation11 + $0x12d4] ss:$48 sps:$4 sm:$0xff]   ;;  %v19744_v13 = vld [vmem:[#allocation11 + $0x12dc] ss:$48 sps:$4 sm:$0xff]  }
 0x597   : > { %10307 = vmatprep.subr.bf16.mxu1 %v19678_v42  ;;  %v19739_v42 = vld [vmem:[#allocation11 + $0x12d0] ss:$48 sps:$4 sm:$0xff]  }
 0x599   : > { %10144 = vmatpush1.bf16.msra.mxu0 %v19673_v14  ;;  %v19742_v14 = vld [vmem:[#allocation11 + $0x12d8] ss:$48 sps:$4 sm:$0xff]  }
 0x59a   : > { %10308 = vmatpush1.bf16.msra.mxu1 %v19676_v21  ;;  %10145 = vmatprep.subr.bf16.mxu0 %v19681_v22  ;;  %v19747_v21 = vld [vmem:[#allocation11 + $0x1334] ss:$48 sps:$4 sm:$0xff]   ;;  %v19750_v22 = vld [vmem:[#allocation11 + $0x133c] ss:$48 sps:$4 sm:$0xff]  }
 0x59b   : > { %10309 = vmatprep.subr.bf16.mxu1 %v19684_v28  ;;  %v19745_v28 = vld [vmem:[#allocation11 + $0x1330] ss:$48 sps:$4 sm:$0xff]  }
 0x59d   : > { %10146 = vmatpush1.bf16.msra.mxu0 %v19679_v58  ;;  %v19748_v58 = vld [vmem:[#allocation11 + $0x1338] ss:$48 sps:$4 sm:$0xff]  }
 0x59e   : > { %10310 = vmatpush1.bf16.msra.mxu1 %v19682_v30  ;;  %10147 = vmatprep.subr.bf16.mxu0 %v19687_v12  ;;  %v19753_v30 = vld [vmem:[#allocation11 + $0x1394] ss:$48 sps:$4 sm:$0xff]   ;;  %v19756_v12 = vld [vmem:[#allocation11 + $0x139c] ss:$48 sps:$4 sm:$0xff]  }
 0x59f   : > { %10311 = vmatprep.subr.bf16.mxu1 %v19690_v32  ;;  %v19751_v32 = vld [vmem:[#allocation11 + $0x1390] ss:$48 sps:$4 sm:$0xff]  }
 0x5a1   : > { %10148 = vmatpush1.bf16.msra.mxu0 %v19685_v33  ;;  %v5815_v33 = vld [vmem:[#allocation13] sm:$0xff] }
 0x5a2   : > { %10312 = vmatpush1.bf16.msra.mxu1 %v19688_v36  ;;  %10149 = vmatprep.subr.bf16.mxu0 %v19693_v6  ;;  %v20828_v36 = vmov 1966171168  }
 0x5a3   : > { %10313 = vmatprep.subr.bf16.mxu1 %v19696_v43  ;;  %v10710_v6 = vunpack.c.l.s4 %v20828_v36  ;;  %v19754_v43 = vld [vmem:[#allocation11 + $0x1398] ss:$48 sps:$4 sm:$0xff]   ;;  %v19786_v36 = vld [vmem:[#allocation11 + $0x157c] ss:$48 sps:$4 sm:$0xff]  }
 0x5a5   : > { %10150 = vmatpush1.bf16.msra.mxu0 %v19691_v44  ;;  %v19759_v44 = vld [vmem:[#allocation11 + $0x13f4] ss:$48 sps:$4 sm:$0xff]  }
 0x5a6   : > { %10314 = vmatpush1.bf16.msra.mxu1 %v19694_v46  ;;  %10151 = vmatprep.subr.bf16.mxu0 %v19699_v47  ;;  %v19762_v46 = vld [vmem:[#allocation11 + $0x13fc] ss:$48 sps:$4 sm:$0xff]   ;;  %v9662_v47 = vrot.slane %v5815_v33, %v21257_v18 }
 0x5a7   : > { %10315 = vmatprep.subr.bf16.mxu1 %v19702_v2  ;;  %v9670_v2 = vrot.slane %v5815_v33, %v21296_v38 }
 0x5a9   : > { %10152 = vmatpush1.bf16.msra.mxu0 %v19697_v48  ;;  %v9666_v48 = vrot.slane %v5815_v33, %v21262_v20 }
 0x5aa   : > { %10316 = vmatpush1.bf16.msra.mxu1 %v19700_v49  ;;  %10153 = vmatprep.subr.bf16.mxu0 %v19705_v50  ;;  %v10711_v49 = vunpack.c.0.s8 %v10710_v6  ;;  %v9674_v50 = vrot.slane %v5815_v33, %v21269_v24  ;;  %v19783_v33 = vld [vmem:[#allocation11 + $0x1574] ss:$48 sps:$4 sm:$0xff]   ;;  %v19781_v6 = vld [vmem:[#allocation11 + $0x1570] ss:$48 sps:$4 sm:$0xff]  }
 0x5ab   : > { %10317 = vmatprep.subr.bf16.mxu1 %v19708_v52  ;;  %v19757_v52 = vld [vmem:[#allocation11 + $0x13f0] ss:$48 sps:$4 sm:$0xff]  }
 0x5ad   : > { %10154 = vmatpush1.bf16.msra.mxu0 %v19703_v53  ;;  %v19760_v53 = vld [vmem:[#allocation11 + $0x13f8] ss:$48 sps:$4 sm:$0xff]  }
 0x5ae   : > { %10318 = vmatpush1.bf16.msra.mxu1 %v19706_v54  ;;  %10155 = vmatprep.subr.bf16.mxu0 %v19711_v55  ;;  %v19765_v54 = vld [vmem:[#allocation11 + $0x1454] ss:$48 sps:$4 sm:$0xff]  }
 0x5af   : > { %10319 = vmatprep.subr.bf16.mxu1 %v19714_v56 }
 0x5b1   : > { %10156 = vmatpush1.bf16.msra.mxu0 %v19709_v34  ;;  %v19768_v34 = vld [vmem:[#allocation11 + $0x145c] ss:$48 sps:$4 sm:$0xff]  }
 0x5b2   : > { %10320 = vmatpush1.bf16.msra.mxu1 %v19712_v5  ;;  %10157 = vmatprep.subr.bf16.mxu0 %v19717_v60 }
 0x5b3   : > { %10321 = vmatprep.subr.bf16.mxu1 %v19720_v40 }
 0x5b5   : > { %10158 = vmatpush1.bf16.msra.mxu0 %v19715_v61 }
 0x5b6   : > { %10322 = vmatpush1.bf16.msra.mxu1 %v19718_v62  ;;  %10159 = vmatprep.subr.bf16.mxu0 %v19723_v25  ;;  %v21446_v25 = vsub.s32 %v10711_v49, %v21254_v17  ;;  %v19793_v49 = vld [vmem:[#allocation11 + $0x1630] ss:$48 sps:$4 sm:$0xff]  }
 0x5b7   : > { %10323 = vmatprep.subr.bf16.mxu1 %v19726_v63 }
 0x5b9   : > { %10160 = vmatpush1.bf16.msra.mxu0 %v19721_v9 }
 0x5ba   : > { %10324 = vmatpush1.bf16.msra.mxu1 %v19724_v3  ;;  %10170 = vmatprep.subr.bf16.mxu0 %v19729_v4  ;;  %v19763_v4 = vld [vmem:[#allocation11 + $0x1450] ss:$48 sps:$4 sm:$0xff]  }
 0x5bb   : > { %10334 = vmatprep.subr.bf16.mxu1 %v19732_v31 }
 0x5bc   : > { %10162 = vmatmul.mubr.bf16.vlgmr.msra.gmra.mrb[20].mxu0 %v21411_v23 }
 0x5bd   : > { %10326 = vmatmul.mubr.bf16.vlgmr.msra.gmra.mrb[20].mxu1 %v21411_v23  ;;  %10171 = vmatpush1.bf16.msra.mxu0 %v19727_v7 }
 0x5be   : > { %10202 = vmatprep.mubr.bf16.mxu0 %v21415_v29  ;;  %10335 = vmatpush1.bf16.msra.mxu1 %v19730_v8  ;;  %v19766_v8 = vld [vmem:[#allocation11 + $0x1458] ss:$48 sps:$4 sm:$0xff]  }
 0x5bf   : > { %10366 = vmatprep.mubr.bf16.mxu1 %v21415_v29  ;;  %10172 = vmatprep.subr.bf16.mxu0 %v19735_v10  ;;  %v19771_v10 = vld [vmem:[#allocation11 + $0x14b4] ss:$48 sps:$4 sm:$0xff]  }
 0x5c0   : > { %10336 = vmatprep.subr.bf16.mxu1 %v19738_v11 }
 0x5c1   : > { %10173 = vmatpush1.bf16.msra.mxu0 %v19733_v19 }
 0x5c2   : > { %10337 = vmatpush1.bf16.msra.mxu1 %v19736_v41  ;;  %10174 = vmatprep.subr.bf16.mxu0 %v19741_v1  ;;  %v19774_v41 = vld [vmem:[#allocation11 + $0x14bc] ss:$48 sps:$4 sm:$0xff]  }
 0x5c3   : > { %10338 = vmatprep.subr.bf16.mxu1 %v19744_v13 }
 0x5c5   : > { %10175 = vmatpush1.bf16.msra.mxu0 %v19739_v42  ;;  %v19769_v42 = vld [vmem:[#allocation11 + $0x14b0] ss:$48 sps:$4 sm:$0xff]  }
 0x5c6   : > { %10339 = vmatpush1.bf16.msra.mxu1 %v19742_v14  ;;  %10176 = vmatprep.subr.bf16.mxu0 %v19747_v21  ;;  %v19772_v14 = vld [vmem:[#allocation11 + $0x14b8] ss:$48 sps:$4 sm:$0xff]   ;;  %v19777_v21 = vld [vmem:[#allocation11 + $0x1514] ss:$48 sps:$4 sm:$0xff]  }
 0x5c7   : > { %10340 = vmatprep.subr.bf16.mxu1 %v19750_v22 }
 0x5c9   : > { %10177 = vmatpush1.bf16.msra.mxu0 %v19745_v28  ;;  %v19780_v28 = vld [vmem:[#allocation11 + $0x151c] ss:$48 sps:$4 sm:$0xff]  }
 0x5ca   : > { %10341 = vmatpush1.bf16.msra.mxu1 %v19748_v58  ;;  %10178 = vmatprep.subr.bf16.mxu0 %v19753_v30 }
 0x5cb   : > { %10342 = vmatprep.subr.bf16.mxu1 %v19756_v12  ;;  %v19775_v12 = vld [vmem:[#allocation11 + $0x1510] ss:$48 sps:$4 sm:$0xff]  }
 0x5cd   : > { %10179 = vmatpush1.bf16.msra.mxu0 %v19751_v32  ;;  %v19778_v32 = vld [vmem:[#allocation11 + $0x1518] ss:$48 sps:$4 sm:$0xff]  }
 0x5ce   : > { %10343 = vmatpush1.bf16.msra.mxu1 %v19754_v43  ;;  %10180 = vmatprep.subr.bf16.mxu0 %v19759_v44  ;;  %v19789_v43 = vld [vmem:[#allocation11 + $0x15d4] ss:$48 sps:$4 sm:$0xff]   ;;  %v19792_v44 = vld [vmem:[#allocation11 + $0x15dc] ss:$48 sps:$4 sm:$0xff]  }
 0x5cf   : > { %v9876_v55 = vpop.f32.mrb[16].mxu0  ;;  %v10040_v56 = vpop.f32.mrb[16].mxu1  ;;  %10344 = vmatprep.subr.bf16.mxu1 %v19762_v46  ;;  %v19787_v46 = vld [vmem:[#allocation11 + $0x15d0] ss:$48 sps:$4 sm:$0xff]  }
 0x5d0   : > { %v18267_v5 = vadd.f32 %v9876_v55, %v9662_v47  ;;  %v18269_v60 = vadd.f32 %v10040_v56, %v9670_v2  ;;  %v9878_v40 = vpop.f32.mrb[17].mxu0  ;;  %v10042_v61 = vpop.f32.mrb[17].mxu1  ;;  %v19790_v47 = vld [vmem:[#allocation11 + $0x15d8] ss:$48 sps:$4 sm:$0xff]   ;;  %v19795_v2 = vld [vmem:[#allocation11 + $0x1634] ss:$48 sps:$4 sm:$0xff]  }
 0x5d1   : > { %v18268_v62 = vadd.f32 %v9878_v40, %v9666_v48  ;;  %v18270_v63 = vadd.f32 %v10042_v61, %v9674_v50  ;;  %v9880_v9 = vpop.f32.mrb[18].mxu0  ;;  %v10044_v3 = vpop.f32.mrb[18].mxu1  ;;  %10181 = vmatpush1.bf16.msra.mxu0 %v19757_v52  ;;  %v19798_v48 = vld [vmem:[#allocation11 + $0x163c] ss:$48 sps:$4 sm:$0xff]   ;;  %v19796_v50 = vld [vmem:[#allocation11 + $0x1638] ss:$48 sps:$4 sm:$0xff]  }
 0x5d2   : > { %10345 = vmatpush1.bf16.msra.mxu1 %v19760_v53  ;;  %v9881_v31 = vpop.f32.mrb[19].mxu0  ;;  %v10045_v7 = vpop.f32.mrb[19].mxu1  ;;  %10182 = vmatprep.subr.bf16.mxu0 %v19765_v54  ;;  %v19801_v52 = vld [vmem:[#allocation11 + $0x1694] ss:$48 sps:$4 sm:$0xff]   ;;  %v19804_v53 = vld [vmem:[#allocation11 + $0x169c] ss:$48 sps:$4 sm:$0xff]  }
 0x5d3   : > { %v10707_v11 = vcombine.low %v18267_v5, %v18268_v62  ;;  %v10708_v19 = vcombine.low %v18269_v60, %v18270_v63  ;;  %10346 = vmatprep.subr.bf16.mxu1 %v19768_v34  ;;  %v19799_v54 = vld [vmem:[#allocation11 + $0x1690] ss:$48 sps:$4 sm:$0xff]   ;;  %v19802_v55 = vld [vmem:[#allocation11 + $0x1698] ss:$48 sps:$4 sm:$0xff]   ;;  %v19807_v56 = vld [vmem:[#allocation11 + $0x16f4] ss:$48 sps:$4 sm:$0xff]  }
 0x5d4   : > { %v19810_v34 = vld [vmem:[#allocation11 + $0x16fc] ss:$48 sps:$4 sm:$0xff]   ;;  %v19805_v5 = vld [vmem:[#allocation11 + $0x16f0] ss:$48 sps:$4 sm:$0xff]   ;;  %v19808_v60 = vld [vmem:[#allocation11 + $0x16f8] ss:$48 sps:$4 sm:$0xff]  }
 0x5d5   : > { %v10715_v1 = vrot.slane %v10707_v11, %v21446_v25  ;;  %v10722_v13 = vrot.slane %v10708_v19, %v21446_v25  ;;  %10183 = vmatpush1.bf16.msra.mxu0 %v19763_v4  ;;  %v19813_v40 = vld [vmem:[#allocation11 + $0x1754] ss:$48 sps:$4 sm:$0xff]   ;;  %v19816_v61 = vld [vmem:[#allocation11 + $0x175c] ss:$48 sps:$4 sm:$0xff]   ;;  %v19811_v62 = vld [vmem:[#allocation11 + $0x1750] ss:$48 sps:$4 sm:$0xff]  }
 0x5d6   : > { %10347 = vmatpush1.bf16.msra.mxu1 %v19766_v8  ;;  %10184 = vmatprep.subr.bf16.mxu0 %v19771_v10  ;;  %v19814_v63 = vld [vmem:[#allocation11 + $0x1758] ss:$48 sps:$4 sm:$0xff]   ;;  %v19819_v9 = vld [vmem:[#allocation11 + $0x17b4] ss:$48 sps:$4 sm:$0xff]   ;;  %v19822_v3 = vld [vmem:[#allocation11 + $0x17bc] ss:$48 sps:$4 sm:$0xff]  }
 0x5d7   : > { %v10723_v22 = vcombine.low %v10715_v1, %v10722_v13  ;;  %10348 = vmatprep.subr.bf16.mxu1 %v19774_v41  ;;  %v19817_v4 = vld [vmem:[#allocation11 + $0x17b0] ss:$48 sps:$4 sm:$0xff]   ;;  %v19820_v31 = vld [vmem:[#allocation11 + $0x17b8] ss:$48 sps:$4 sm:$0xff]   ;;  %v19825_v7 = vld [vmem:[#allocation11 + $0x24] ss:$48 sps:$4 sm:$0xff]  }
 0x5d8   : > { %v19828_v8 = vld [vmem:[#allocation11 + $0x2c] ss:$48 sps:$4 sm:$0xff]   ;;  %v19823_v10 = vld [vmem:[#allocation11 + $0x20] ss:$48 sps:$4 sm:$0xff]   ;;  %v19826_v11 = vld [vmem:[#allocation11 + $0x28] ss:$48 sps:$4 sm:$0xff]  }
 0x5d9   : > { %v10730_v30 = vrot.slane %v10723_v22, %v21446_v25  ;;  %10185 = vmatpush1.bf16.msra.mxu0 %v19769_v42  ;;  %v19831_v19 = vld [vmem:[#allocation11 + $0x84] ss:$48 sps:$4 sm:$0xff]   ;;  %v19834_v41 = vld [vmem:[#allocation11 + $0x8c] ss:$48 sps:$4 sm:$0xff]   ;;  %v19829_v1 = vld [vmem:[#allocation11 + $0x80] ss:$48 sps:$4 sm:$0xff]  }
 0x5da   : > { %10349 = vmatpush1.bf16.msra.mxu1 %v19772_v14  ;;  %10186 = vmatprep.subr.bf16.mxu0 %v19777_v21  ;;  %v19832_v13 = vld [vmem:[#allocation11 + $0x88] ss:$48 sps:$4 sm:$0xff]   ;;  %v19837_v42 = vld [vmem:[#allocation11 + $0xe4] ss:$48 sps:$4 sm:$0xff]   ;;  %v19840_v14 = vld [vmem:[#allocation11 + $0xec] ss:$48 sps:$4 sm:$0xff]  }
 0x5db   : > { %10736 = vst.msk [vmem:[#allocation2] ss:$4 sm:$0xf] %vm21451_vm0, %v10730_v30  ;;  %10350 = vmatprep.subr.bf16.mxu1 %v19780_v28  ;;  %v19835_v21 = vld [vmem:[#allocation11 + $0xe0] ss:$48 sps:$4 sm:$0xff]  }
 0x5dc   : > { %v19838_v22 = vld [vmem:[#allocation11 + $0xe8] ss:$48 sps:$4 sm:$0xff]   ;;  %v19843_v28 = vld [vmem:[#allocation11 + $0x144] ss:$48 sps:$4 sm:$0xff]   ;;  %v19846_v30 = vld [vmem:[#allocation11 + $0x14c] ss:$48 sps:$4 sm:$0xff]  }
 0x5dd   : > { %10187 = vmatpush1.bf16.msra.mxu0 %v19775_v12  ;;  %v19841_v12 = vld [vmem:[#allocation11 + $0x140] ss:$48 sps:$4 sm:$0xff]  }
 0x5de   : > { %10351 = vmatpush1.bf16.msra.mxu1 %v19778_v32  ;;  %10188 = vmatprep.subr.bf16.mxu0 %v19783_v33  ;;  %v19844_v32 = vld [vmem:[#allocation11 + $0x148] ss:$48 sps:$4 sm:$0xff]   ;;  %v19849_v33 = vld [vmem:[#allocation11 + $0x1a4] ss:$48 sps:$4 sm:$0xff]  }
 0x5df   : > { %10352 = vmatprep.subr.bf16.mxu1 %v19786_v36  ;;  %v19852_v36 = vld [vmem:[#allocation11 + $0x1ac] ss:$48 sps:$4 sm:$0xff]  }
 0x5e1   : > { %10189 = vmatpush1.bf16.msra.mxu0 %v19781_v6  ;;  %v19850_v6 = vld [vmem:[#allocation11 + $0x1a8] ss:$48 sps:$4 sm:$0xff]  }
 0x5e2   : > { %10353 = vmatpush1.bf16.msra.mxu1 %v19784_v16  ;;  %10190 = vmatprep.subr.bf16.mxu0 %v19789_v43  ;;  %v19855_v16 = vld [vmem:[#allocation11 + $0x204] ss:$48 sps:$4 sm:$0xff]   ;;  %v19858_v43 = vld [vmem:[#allocation11 + $0x20c] ss:$48 sps:$4 sm:$0xff]  }
 0x5e3   : > { %10354 = vmatprep.subr.bf16.mxu1 %v19792_v44  ;;  %v19853_v44 = vld [vmem:[#allocation11 + $0x200] ss:$48 sps:$4 sm:$0xff]  }
 0x5e5   : > { %10191 = vmatpush1.bf16.msra.mxu0 %v19787_v46  ;;  %v19856_v46 = vld [vmem:[#allocation11 + $0x208] ss:$48 sps:$4 sm:$0xff]  }
 0x5e6   : > { %10355 = vmatpush1.bf16.msra.mxu1 %v19790_v47  ;;  %10192 = vmatprep.subr.bf16.mxu0 %v19795_v2  ;;  %v19861_v47 = vld [vmem:[#allocation11 + $0x264] ss:$48 sps:$4 sm:$0xff]   ;;  %v19864_v2 = vld [vmem:[#allocation11 + $0x26c] ss:$48 sps:$4 sm:$0xff]  }
 0x5e7   : > { %10356 = vmatprep.subr.bf16.mxu1 %v19798_v48  ;;  %v19859_v48 = vld [vmem:[#allocation11 + $0x260] ss:$48 sps:$4 sm:$0xff]  }
 0x5e9   : > { %10193 = vmatpush1.bf16.msra.mxu0 %v19793_v49  ;;  %v19862_v49 = vld [vmem:[#allocation11 + $0x268] ss:$48 sps:$4 sm:$0xff]  }
 0x5ea   : > { %10357 = vmatpush1.bf16.msra.mxu1 %v19796_v50  ;;  %10194 = vmatprep.subr.bf16.mxu0 %v19801_v52  ;;  %v19867_v50 = vld [vmem:[#allocation11 + $0x2c4] ss:$48 sps:$4 sm:$0xff]   ;;  %v19870_v52 = vld [vmem:[#allocation11 + $0x2cc] ss:$48 sps:$4 sm:$0xff]  }
 0x5eb   : > { %10358 = vmatprep.subr.bf16.mxu1 %v19804_v53  ;;  %v19865_v53 = vld [vmem:[#allocation11 + $0x2c0] ss:$48 sps:$4 sm:$0xff]  }
 0x5ed   : > { %10195 = vmatpush1.bf16.msra.mxu0 %v19799_v54  ;;  %v19868_v54 = vld [vmem:[#allocation11 + $0x2c8] ss:$48 sps:$4 sm:$0xff]  }
 0x5ee   : > { %10359 = vmatpush1.bf16.msra.mxu1 %v19802_v55  ;;  %10196 = vmatprep.subr.bf16.mxu0 %v19807_v56  ;;  %v19873_v55 = vld [vmem:[#allocation11 + $0x324] ss:$48 sps:$4 sm:$0xff]   ;;  %v19876_v56 = vld [vmem:[#allocation11 + $0x32c] ss:$48 sps:$4 sm:$0xff]  }
 0x5ef   : > { %10360 = vmatprep.subr.bf16.mxu1 %v19810_v34  ;;  %v19871_v34 = vld [vmem:[#allocation11 + $0x320] ss:$48 sps:$4 sm:$0xff]  }
 0x5f1   : > { %10197 = vmatpush1.bf16.msra.mxu0 %v19805_v5  ;;  %v19874_v5 = vld [vmem:[#allocation11 + $0x328] ss:$48 sps:$4 sm:$0xff]  }
 0x5f2   : > { %10361 = vmatpush1.bf16.msra.mxu1 %v19808_v60  ;;  %10198 = vmatprep.subr.bf16.mxu0 %v19813_v40  ;;  %v19879_v60 = vld [vmem:[#allocation11 + $0x384] ss:$48 sps:$4 sm:$0xff]   ;;  %v19882_v40 = vld [vmem:[#allocation11 + $0x38c] ss:$48 sps:$4 sm:$0xff]  }
 0x5f3   : > { %10362 = vmatprep.subr.bf16.mxu1 %v19816_v61  ;;  %v19877_v61 = vld [vmem:[#allocation11 + $0x380] ss:$48 sps:$4 sm:$0xff]  }
 0x5f5   : > { %10199 = vmatpush1.bf16.msra.mxu0 %v19811_v62  ;;  %v19880_v62 = vld [vmem:[#allocation11 + $0x388] ss:$48 sps:$4 sm:$0xff]  }
 0x5f6   : > { %10363 = vmatpush1.bf16.msra.mxu1 %v19814_v63  ;;  %10200 = vmatprep.subr.bf16.mxu0 %v19819_v9  ;;  %v19885_v63 = vld [vmem:[#allocation11 + $0x3e4] ss:$48 sps:$4 sm:$0xff]   ;;  %v19888_v9 = vld [vmem:[#allocation11 + $0x3ec] ss:$48 sps:$4 sm:$0xff]  }
 0x5f7   : > { %10364 = vmatprep.subr.bf16.mxu1 %v19822_v3  ;;  %v19883_v3 = vld [vmem:[#allocation11 + $0x3e0] ss:$48 sps:$4 sm:$0xff]  }
 0x5f9   : > { %10201 = vmatpush1.bf16.msra.mxu0 %v19817_v4  ;;  %v19886_v4 = vld [vmem:[#allocation11 + $0x3e8] ss:$48 sps:$4 sm:$0xff]  }
 0x5fa   : > { %10365 = vmatpush1.bf16.msra.mxu1 %v19820_v31  ;;  %10375 = vmatprep.subr.bf16.mxu0 %v19825_v7  ;;  %v19891_v31 = vld [vmem:[#allocation11 + $0x444] ss:$48 sps:$4 sm:$0xff]   ;;  %v19894_v7 = vld [vmem:[#allocation11 + $0x44c] ss:$48 sps:$4 sm:$0xff]  }
 0x5fb   : > { %10539 = vmatprep.subr.bf16.mxu1 %v19828_v8  ;;  %v19889_v8 = vld [vmem:[#allocation11 + $0x440] ss:$48 sps:$4 sm:$0xff]  }
 0x5fc   : > { %10203 = vmatmul.mubr.bf16.vlgmr.msra.gmra.mrb[20].mxu0 %v21423_v59 }
 0x5fd   : > { %10367 = vmatmul.mubr.bf16.vlgmr.msra.gmra.mrb[20].mxu1 %v21423_v59  ;;  %10376 = vmatpush1.bf16.msra.mxu0 %v19823_v10  ;;  %v19892_v10 = vld [vmem:[#allocation11 + $0x448] ss:$48 sps:$4 sm:$0xff]  }
 0x5fe   : > { %10407 = vmatprep.mubr.bf16.mxu0 %v21374_v57  ;;  %10540 = vmatpush1.bf16.msra.mxu1 %v19826_v11  ;;  %v19897_v11 = vld [vmem:[#allocation11 + $0x4a4] ss:$48 sps:$4 sm:$0xff]  }
 0x5ff   : > { %10571 = vmatprep.mubr.bf16.mxu1 %v21374_v57  ;;  %10377 = vmatprep.subr.bf16.mxu0 %v19831_v19  ;;  %v19847_v57 = vld [vmem:[#allocation11 + $0x1a0] ss:$48 sps:$4 sm:$0xff]   ;;  %v19900_v19 = vld [vmem:[#allocation11 + $0x4ac] ss:$48 sps:$4 sm:$0xff]  }
 0x600   : > { %10541 = vmatprep.subr.bf16.mxu1 %v19834_v41  ;;  %v19895_v41 = vld [vmem:[#allocation11 + $0x4a0] ss:$48 sps:$4 sm:$0xff]  }
 0x601   : > { %10378 = vmatpush1.bf16.msra.mxu0 %v19829_v1  ;;  %v19898_v1 = vld [vmem:[#allocation11 + $0x4a8] ss:$48 sps:$4 sm:$0xff]  }
 0x602   : > { %10542 = vmatpush1.bf16.msra.mxu1 %v19832_v13  ;;  %10379 = vmatprep.subr.bf16.mxu0 %v19837_v42  ;;  %v19903_v13 = vld [vmem:[#allocation11 + $0x504] ss:$48 sps:$4 sm:$0xff]   ;;  %v19906_v42 = vld [vmem:[#allocation11 + $0x50c] ss:$48 sps:$4 sm:$0xff]  }
 0x603   : > { %10543 = vmatprep.subr.bf16.mxu1 %v19840_v14  ;;  %v19901_v14 = vld [vmem:[#allocation11 + $0x500] ss:$48 sps:$4 sm:$0xff]  }
 0x605   : > { %10380 = vmatpush1.bf16.msra.mxu0 %v19835_v21  ;;  %v19904_v21 = vld [vmem:[#allocation11 + $0x508] ss:$48 sps:$4 sm:$0xff]  }
 0x606   : > { %10544 = vmatpush1.bf16.msra.mxu1 %v19838_v22  ;;  %10381 = vmatprep.subr.bf16.mxu0 %v19843_v28  ;;  %v19909_v22 = vld [vmem:[#allocation11 + $0x564] ss:$48 sps:$4 sm:$0xff]   ;;  %v19912_v28 = vld [vmem:[#allocation11 + $0x56c] ss:$48 sps:$4 sm:$0xff]  }
 0x607   : > { %10545 = vmatprep.subr.bf16.mxu1 %v19846_v30  ;;  %v19907_v30 = vld [vmem:[#allocation11 + $0x560] ss:$48 sps:$4 sm:$0xff]  }
 0x609   : > { %10382 = vmatpush1.bf16.msra.mxu0 %v19841_v12  ;;  %v19910_v12 = vld [vmem:[#allocation11 + $0x568] ss:$48 sps:$4 sm:$0xff]  }
 0x60a   : > { %10546 = vmatpush1.bf16.msra.mxu1 %v19844_v32  ;;  %10383 = vmatprep.subr.bf16.mxu0 %v19849_v33  ;;  %v19915_v32 = vld [vmem:[#allocation11 + $0x5c4] ss:$48 sps:$4 sm:$0xff]   ;;  %v19918_v33 = vld [vmem:[#allocation11 + $0x5cc] ss:$48 sps:$4 sm:$0xff]  }
 0x60b   : > { %10547 = vmatprep.subr.bf16.mxu1 %v19852_v36  ;;  %v19913_v36 = vld [vmem:[#allocation11 + $0x5c0] ss:$48 sps:$4 sm:$0xff]  }
 0x60d   : > { %10384 = vmatpush1.bf16.msra.mxu0 %v19847_v57  ;;  %v19916_v57 = vld [vmem:[#allocation11 + $0x5c8] ss:$48 sps:$4 sm:$0xff]  }
 0x60e   : > { %10548 = vmatpush1.bf16.msra.mxu1 %v19850_v6  ;;  %10385 = vmatprep.subr.bf16.mxu0 %v19855_v16  ;;  %v19921_v6 = vld [vmem:[#allocation11 + $0x624] ss:$48 sps:$4 sm:$0xff]   ;;  %v19924_v16 = vld [vmem:[#allocation11 + $0x62c] ss:$48 sps:$4 sm:$0xff]  }
 0x60f   : > { %10549 = vmatprep.subr.bf16.mxu1 %v19858_v43  ;;  %v19919_v43 = vld [vmem:[#allocation11 + $0x620] ss:$48 sps:$4 sm:$0xff]  }
 0x611   : > { %10386 = vmatpush1.bf16.msra.mxu0 %v19853_v44  ;;  %v19922_v44 = vld [vmem:[#allocation11 + $0x628] ss:$48 sps:$4 sm:$0xff]  }
 0x612   : > { %10550 = vmatpush1.bf16.msra.mxu1 %v19856_v46  ;;  %10387 = vmatprep.subr.bf16.mxu0 %v19861_v47  ;;  %v19927_v46 = vld [vmem:[#allocation11 + $0x684] ss:$48 sps:$4 sm:$0xff]   ;;  %v19930_v47 = vld [vmem:[#allocation11 + $0x68c] ss:$48 sps:$4 sm:$0xff]  }
 0x613   : > { %10551 = vmatprep.subr.bf16.mxu1 %v19864_v2  ;;  %v19925_v2 = vld [vmem:[#allocation11 + $0x680] ss:$48 sps:$4 sm:$0xff]  }
 0x615   : > { %10388 = vmatpush1.bf16.msra.mxu0 %v19859_v48  ;;  %v19928_v48 = vld [vmem:[#allocation11 + $0x688] ss:$48 sps:$4 sm:$0xff]  }
 0x616   : > { %10552 = vmatpush1.bf16.msra.mxu1 %v19862_v49  ;;  %10389 = vmatprep.subr.bf16.mxu0 %v19867_v50  ;;  %v19933_v49 = vld [vmem:[#allocation11 + $0x6e4] ss:$48 sps:$4 sm:$0xff]   ;;  %v19936_v50 = vld [vmem:[#allocation11 + $0x6ec] ss:$48 sps:$4 sm:$0xff]  }
 0x617   : > { %10553 = vmatprep.subr.bf16.mxu1 %v19870_v52  ;;  %v19931_v52 = vld [vmem:[#allocation11 + $0x6e0] ss:$48 sps:$4 sm:$0xff]  }
 0x619   : > { %10390 = vmatpush1.bf16.msra.mxu0 %v19865_v53  ;;  %v19934_v53 = vld [vmem:[#allocation11 + $0x6e8] ss:$48 sps:$4 sm:$0xff]  }
 0x61a   : > { %10554 = vmatpush1.bf16.msra.mxu1 %v19868_v54  ;;  %10391 = vmatprep.subr.bf16.mxu0 %v19873_v55  ;;  %v19939_v54 = vld [vmem:[#allocation11 + $0x744] ss:$48 sps:$4 sm:$0xff]   ;;  %v19937_v55 = vld [vmem:[#allocation11 + $0x740] ss:$48 sps:$4 sm:$0xff]  }
 0x61b   : > { %10555 = vmatprep.subr.bf16.mxu1 %v19876_v56  ;;  %v19940_v56 = vld [vmem:[#allocation11 + $0x748] ss:$48 sps:$4 sm:$0xff]  }
 0x61d   : > { %10392 = vmatpush1.bf16.msra.mxu0 %v19871_v34  ;;  %v19945_v34 = vld [vmem:[#allocation11 + $0x7a4] ss:$48 sps:$4 sm:$0xff]  }
 0x61e   : > { %10556 = vmatpush1.bf16.msra.mxu1 %v19874_v5  ;;  %10393 = vmatprep.subr.bf16.mxu0 %v19879_v60  ;;  %v19948_v5 = vld [vmem:[#allocation11 + $0x7ac] ss:$48 sps:$4 sm:$0xff]   ;;  %v19946_v60 = vld [vmem:[#allocation11 + $0x7a8] ss:$48 sps:$4 sm:$0xff]  }
 0x61f   : > { %10557 = vmatprep.subr.bf16.mxu1 %v19882_v40  ;;  %v19951_v40 = vld [vmem:[#allocation11 + $0x804] ss:$48 sps:$4 sm:$0xff]  }
 0x621   : > { %10394 = vmatpush1.bf16.msra.mxu0 %v19877_v61  ;;  %v19954_v61 = vld [vmem:[#allocation11 + $0x80c] ss:$48 sps:$4 sm:$0xff]  }
 0x622   : > { %10558 = vmatpush1.bf16.msra.mxu1 %v19880_v62  ;;  %10395 = vmatprep.subr.bf16.mxu0 %v19885_v63  ;;  %v19949_v62 = vld [vmem:[#allocation11 + $0x800] ss:$48 sps:$4 sm:$0xff]   ;;  %v19952_v63 = vld [vmem:[#allocation11 + $0x808] ss:$48 sps:$4 sm:$0xff]  }
 0x623   : > { %10559 = vmatprep.subr.bf16.mxu1 %v19888_v9  ;;  %v19957_v9 = vld [vmem:[#allocation11 + $0x864] ss:$48 sps:$4 sm:$0xff]  }
 0x625   : > { %10396 = vmatpush1.bf16.msra.mxu0 %v19883_v3  ;;  %v19960_v3 = vld [vmem:[#allocation11 + $0x86c] ss:$48 sps:$4 sm:$0xff]  }
 0x626   : > { %10560 = vmatpush1.bf16.msra.mxu1 %v19886_v4  ;;  %10397 = vmatprep.subr.bf16.mxu0 %v19891_v31  ;;  %v19955_v4 = vld [vmem:[#allocation11 + $0x860] ss:$48 sps:$4 sm:$0xff]   ;;  %v19958_v31 = vld [vmem:[#allocation11 + $0x868] ss:$48 sps:$4 sm:$0xff]  }
 0x627   : > { %10561 = vmatprep.subr.bf16.mxu1 %v19894_v7  ;;  %v19963_v7 = vld [vmem:[#allocation11 + $0x8c4] ss:$48 sps:$4 sm:$0xff]  }
 0x629   : > { %10398 = vmatpush1.bf16.msra.mxu0 %v19889_v8  ;;  %v19966_v8 = vld [vmem:[#allocation11 + $0x8cc] ss:$48 sps:$4 sm:$0xff]  }
 0x62a   : > { %10562 = vmatpush1.bf16.msra.mxu1 %v19892_v10  ;;  %10399 = vmatprep.subr.bf16.mxu0 %v19897_v11  ;;  %v19961_v10 = vld [vmem:[#allocation11 + $0x8c0] ss:$48 sps:$4 sm:$0xff]   ;;  %v19964_v11 = vld [vmem:[#allocation11 + $0x8c8] ss:$48 sps:$4 sm:$0xff]  }
 0x62b   : > { %10563 = vmatprep.subr.bf16.mxu1 %v19900_v19  ;;  %v19969_v19 = vld [vmem:[#allocation11 + $0x924] ss:$48 sps:$4 sm:$0xff]  }
 0x62d   : > { %10400 = vmatpush1.bf16.msra.mxu0 %v19895_v41  ;;  %v19972_v41 = vld [vmem:[#allocation11 + $0x92c] ss:$48 sps:$4 sm:$0xff]  }
 0x62e   : > { %10564 = vmatpush1.bf16.msra.mxu1 %v19898_v1  ;;  %10401 = vmatprep.subr.bf16.mxu0 %v19903_v13  ;;  %v19967_v1 = vld [vmem:[#allocation11 + $0x920] ss:$48 sps:$4 sm:$0xff]   ;;  %v19970_v13 = vld [vmem:[#allocation11 + $0x928] ss:$48 sps:$4 sm:$0xff]  }
 0x62f   : > { %10565 = vmatprep.subr.bf16.mxu1 %v19906_v42  ;;  %v19975_v42 = vld [vmem:[#allocation11 + $0x984] ss:$48 sps:$4 sm:$0xff]  }
 0x631   : > { %10402 = vmatpush1.bf16.msra.mxu0 %v19901_v14  ;;  %v19978_v14 = vld [vmem:[#allocation11 + $0x98c] ss:$48 sps:$4 sm:$0xff]  }
 0x632   : > { %10566 = vmatpush1.bf16.msra.mxu1 %v19904_v21  ;;  %10403 = vmatprep.subr.bf16.mxu0 %v19909_v22  ;;  %v19973_v21 = vld [vmem:[#allocation11 + $0x980] ss:$48 sps:$4 sm:$0xff]   ;;  %v19976_v22 = vld [vmem:[#allocation11 + $0x988] ss:$48 sps:$4 sm:$0xff]  }
 0x633   : > { %10567 = vmatprep.subr.bf16.mxu1 %v19912_v28  ;;  %v19981_v28 = vld [vmem:[#allocation11 + $0x9e4] ss:$48 sps:$4 sm:$0xff]  }
 0x635   : > { %10404 = vmatpush1.bf16.msra.mxu0 %v19907_v30  ;;  %v19984_v30 = vld [vmem:[#allocation11 + $0x9ec] ss:$48 sps:$4 sm:$0xff]  }
 0x636   : > { %10568 = vmatpush1.bf16.msra.mxu1 %v19910_v12  ;;  %10405 = vmatprep.subr.bf16.mxu0 %v19915_v32  ;;  %v19979_v12 = vld [vmem:[#allocation11 + $0x9e0] ss:$48 sps:$4 sm:$0xff]   ;;  %v19982_v32 = vld [vmem:[#allocation11 + $0x9e8] ss:$48 sps:$4 sm:$0xff]  }
 0x637   : > { %10569 = vmatprep.subr.bf16.mxu1 %v19918_v33  ;;  %v19987_v33 = vld [vmem:[#allocation11 + $0xa44] ss:$48 sps:$4 sm:$0xff]  }
 0x639   : > { %10406 = vmatpush1.bf16.msra.mxu0 %v19913_v36  ;;  %v19990_v36 = vld [vmem:[#allocation11 + $0xa4c] ss:$48 sps:$4 sm:$0xff]  }
 0x63a   : > { %10570 = vmatpush1.bf16.msra.mxu1 %v19916_v57  ;;  %10416 = vmatprep.subr.bf16.mxu0 %v19921_v6  ;;  %v19985_v57 = vld [vmem:[#allocation11 + $0xa40] ss:$48 sps:$4 sm:$0xff]   ;;  %v19988_v6 = vld [vmem:[#allocation11 + $0xa48] ss:$48 sps:$4 sm:$0xff]  }
 0x63b   : > { %10580 = vmatprep.subr.bf16.mxu1 %v19924_v16  ;;  %v19993_v16 = vld [vmem:[#allocation11 + $0xaa4] ss:$48 sps:$4 sm:$0xff]  }
 0x63c   : > { %10408 = vmatmul.mubr.bf16.vlgmr.msra.gmra.mrb[24].mxu0 %v21386_v35 }
 0x63d   : > { %10572 = vmatmul.mubr.bf16.vlgmr.msra.gmra.mrb[24].mxu1 %v21386_v35  ;;  %10417 = vmatpush1.bf16.msra.mxu0 %v19919_v43  ;;  %v19942_v35 = vld [vmem:[#allocation11 + $0x74c] ss:$48 sps:$4 sm:$0xff]  }
 0x63e   : > { %10448 = vmatprep.mubr.bf16.mxu0 %v21388_v45  ;;  %10581 = vmatpush1.bf16.msra.mxu1 %v19922_v44  ;;  %v19996_v43 = vld [vmem:[#allocation11 + $0xaac] ss:$48 sps:$4 sm:$0xff]   ;;  %v19991_v44 = vld [vmem:[#allocation11 + $0xaa0] ss:$48 sps:$4 sm:$0xff]  }
 0x63f   : > { %10612 = vmatprep.mubr.bf16.mxu1 %v21388_v45  ;;  %10418 = vmatprep.subr.bf16.mxu0 %v19927_v46  ;;  %v19943_v45 = vld [vmem:[#allocation11 + $0x7a0] ss:$48 sps:$4 sm:$0xff]   ;;  %v19994_v46 = vld [vmem:[#allocation11 + $0xaa8] ss:$48 sps:$4 sm:$0xff]  }
 0x640   : > { %10582 = vmatprep.subr.bf16.mxu1 %v19930_v47  ;;  %v19999_v47 = vld [vmem:[#allocation11 + $0xb04] ss:$48 sps:$4 sm:$0xff]  }
 0x641   : > { %10419 = vmatpush1.bf16.msra.mxu0 %v19925_v2  ;;  %v20002_v2 = vld [vmem:[#allocation11 + $0xb0c] ss:$48 sps:$4 sm:$0xff]  }
 0x642   : > { %10583 = vmatpush1.bf16.msra.mxu1 %v19928_v48  ;;  %10420 = vmatprep.subr.bf16.mxu0 %v19933_v49  ;;  %v19997_v48 = vld [vmem:[#allocation11 + $0xb00] ss:$48 sps:$4 sm:$0xff]   ;;  %v20000_v49 = vld [vmem:[#allocation11 + $0xb08] ss:$48 sps:$4 sm:$0xff]  }
 0x643   : > { %10584 = vmatprep.subr.bf16.mxu1 %v19936_v50  ;;  %v20005_v50 = vld [vmem:[#allocation11 + $0xb64] ss:$48 sps:$4 sm:$0xff]  }
 0x645   : > { %10421 = vmatpush1.bf16.msra.mxu0 %v19931_v52  ;;  %v20008_v52 = vld [vmem:[#allocation11 + $0xb6c] ss:$48 sps:$4 sm:$0xff]  }
 0x646   : > { %10585 = vmatpush1.bf16.msra.mxu1 %v19934_v53  ;;  %10422 = vmatprep.subr.bf16.mxu0 %v19939_v54  ;;  %v20003_v53 = vld [vmem:[#allocation11 + $0xb60] ss:$48 sps:$4 sm:$0xff]   ;;  %v20006_v54 = vld [vmem:[#allocation11 + $0xb68] ss:$48 sps:$4 sm:$0xff]  }
 0x647   : > { %10586 = vmatprep.subr.bf16.mxu1 %v19942_v35  ;;  %v20011_v35 = vld [vmem:[#allocation11 + $0xbc4] ss:$48 sps:$4 sm:$0xff]  }
 0x649   : > { %10423 = vmatpush1.bf16.msra.mxu0 %v19937_v55  ;;  %v20014_v55 = vld [vmem:[#allocation11 + $0xbcc] ss:$48 sps:$4 sm:$0xff]  }
 0x64a   : > { %10587 = vmatpush1.bf16.msra.mxu1 %v19940_v56  ;;  %10424 = vmatprep.subr.bf16.mxu0 %v19945_v34  ;;  %v20009_v56 = vld [vmem:[#allocation11 + $0xbc0] ss:$48 sps:$4 sm:$0xff]   ;;  %v20012_v34 = vld [vmem:[#allocation11 + $0xbc8] ss:$48 sps:$4 sm:$0xff]  }
 0x64b   : > { %10588 = vmatprep.subr.bf16.mxu1 %v19948_v5  ;;  %v20017_v5 = vld [vmem:[#allocation11 + $0xc24] ss:$48 sps:$4 sm:$0xff]  }
 0x64d   : > { %10425 = vmatpush1.bf16.msra.mxu0 %v19943_v45  ;;  %v20020_v45 = vld [vmem:[#allocation11 + $0xc2c] ss:$48 sps:$4 sm:$0xff]  }
 0x64e   : > { %10589 = vmatpush1.bf16.msra.mxu1 %v19946_v60  ;;  %10426 = vmatprep.subr.bf16.mxu0 %v19951_v40  ;;  %v20015_v60 = vld [vmem:[#allocation11 + $0xc20] ss:$48 sps:$4 sm:$0xff]   ;;  %v20018_v40 = vld [vmem:[#allocation11 + $0xc28] ss:$48 sps:$4 sm:$0xff]  }
 0x64f   : > { %10590 = vmatprep.subr.bf16.mxu1 %v19954_v61  ;;  %v20023_v61 = vld [vmem:[#allocation11 + $0xc84] ss:$48 sps:$4 sm:$0xff]  }
 0x651   : > { %10427 = vmatpush1.bf16.msra.mxu0 %v19949_v62  ;;  %v20026_v62 = vld [vmem:[#allocation11 + $0xc8c] ss:$48 sps:$4 sm:$0xff]  }
 0x652   : > { %10591 = vmatpush1.bf16.msra.mxu1 %v19952_v63  ;;  %10428 = vmatprep.subr.bf16.mxu0 %v19957_v9  ;;  %v20021_v63 = vld [vmem:[#allocation11 + $0xc80] ss:$48 sps:$4 sm:$0xff]   ;;  %v20024_v9 = vld [vmem:[#allocation11 + $0xc88] ss:$48 sps:$4 sm:$0xff]  }
 0x653   : > { %10592 = vmatprep.subr.bf16.mxu1 %v19960_v3  ;;  %v20029_v3 = vld [vmem:[#allocation11 + $0xce4] ss:$48 sps:$4 sm:$0xff]  }
 0x655   : > { %10429 = vmatpush1.bf16.msra.mxu0 %v19955_v4  ;;  %v20032_v4 = vld [vmem:[#allocation11 + $0xcec] ss:$48 sps:$4 sm:$0xff]  }
 0x656   : > { %10593 = vmatpush1.bf16.msra.mxu1 %v19958_v31  ;;  %10430 = vmatprep.subr.bf16.mxu0 %v19963_v7  ;;  %v20027_v31 = vld [vmem:[#allocation11 + $0xce0] ss:$48 sps:$4 sm:$0xff]   ;;  %v20030_v7 = vld [vmem:[#allocation11 + $0xce8] ss:$48 sps:$4 sm:$0xff]  }
 0x657   : > { %10594 = vmatprep.subr.bf16.mxu1 %v19966_v8  ;;  %v20035_v8 = vld [vmem:[#allocation11 + $0xd44] ss:$48 sps:$4 sm:$0xff]  }
 0x659   : > { %10431 = vmatpush1.bf16.msra.mxu0 %v19961_v10  ;;  %v20033_v10 = vld [vmem:[#allocation11 + $0xd40] ss:$48 sps:$4 sm:$0xff]  }
 0x65a   : > { %10595 = vmatpush1.bf16.msra.mxu1 %v19964_v11  ;;  %10432 = vmatprep.subr.bf16.mxu0 %v19969_v19  ;;  %v20036_v11 = vld [vmem:[#allocation11 + $0xd48] ss:$48 sps:$4 sm:$0xff]   ;;  %v20041_v19 = vld [vmem:[#allocation11 + $0xda4] ss:$48 sps:$4 sm:$0xff]  }
 0x65b   : > { %10596 = vmatprep.subr.bf16.mxu1 %v19972_v41  ;;  %v20044_v41 = vld [vmem:[#allocation11 + $0xdac] ss:$48 sps:$4 sm:$0xff]  }
 0x65d   : > { %10433 = vmatpush1.bf16.msra.mxu0 %v19967_v1  ;;  %v20042_v1 = vld [vmem:[#allocation11 + $0xda8] ss:$48 sps:$4 sm:$0xff]  }
 0x65e   : > { %10597 = vmatpush1.bf16.msra.mxu1 %v19970_v13  ;;  %10434 = vmatprep.subr.bf16.mxu0 %v19975_v42  ;;  %v20047_v13 = vld [vmem:[#allocation11 + $0xe04] ss:$48 sps:$4 sm:$0xff]   ;;  %v20050_v42 = vld [vmem:[#allocation11 + $0xe0c] ss:$48 sps:$4 sm:$0xff]  }
 0x65f   : > { %10598 = vmatprep.subr.bf16.mxu1 %v19978_v14  ;;  %v20045_v14 = vld [vmem:[#allocation11 + $0xe00] ss:$48 sps:$4 sm:$0xff]  }
 0x661   : > { %10435 = vmatpush1.bf16.msra.mxu0 %v19973_v21  ;;  %v20048_v21 = vld [vmem:[#allocation11 + $0xe08] ss:$48 sps:$4 sm:$0xff]  }
 0x662   : > { %10599 = vmatpush1.bf16.msra.mxu1 %v19976_v22  ;;  %10436 = vmatprep.subr.bf16.mxu0 %v19981_v28  ;;  %v20053_v22 = vld [vmem:[#allocation11 + $0xe64] ss:$48 sps:$4 sm:$0xff]   ;;  %v20056_v28 = vld [vmem:[#allocation11 + $0xe6c] ss:$48 sps:$4 sm:$0xff]  }
 0x663   : > { %10600 = vmatprep.subr.bf16.mxu1 %v19984_v30  ;;  %v20051_v30 = vld [vmem:[#allocation11 + $0xe60] ss:$48 sps:$4 sm:$0xff]  }
 0x665   : > { %10437 = vmatpush1.bf16.msra.mxu0 %v19979_v12  ;;  %v20054_v12 = vld [vmem:[#allocation11 + $0xe68] ss:$48 sps:$4 sm:$0xff]  }
 0x666   : > { %10601 = vmatpush1.bf16.msra.mxu1 %v19982_v32  ;;  %10438 = vmatprep.subr.bf16.mxu0 %v19987_v33  ;;  %v20059_v32 = vld [vmem:[#allocation11 + $0xec4] ss:$48 sps:$4 sm:$0xff]   ;;  %v20062_v33 = vld [vmem:[#allocation11 + $0xecc] ss:$48 sps:$4 sm:$0xff]  }
 0x667   : > { %10602 = vmatprep.subr.bf16.mxu1 %v19990_v36  ;;  %v20057_v36 = vld [vmem:[#allocation11 + $0xec0] ss:$48 sps:$4 sm:$0xff]  }
 0x669   : > { %10439 = vmatpush1.bf16.msra.mxu0 %v19985_v57  ;;  %v20060_v57 = vld [vmem:[#allocation11 + $0xec8] ss:$48 sps:$4 sm:$0xff]  }
 0x66a   : > { %10603 = vmatpush1.bf16.msra.mxu1 %v19988_v6  ;;  %10440 = vmatprep.subr.bf16.mxu0 %v19993_v16  ;;  %v20065_v6 = vld [vmem:[#allocation11 + $0xf24] ss:$48 sps:$4 sm:$0xff]   ;;  %v20068_v16 = vld [vmem:[#allocation11 + $0xf2c] ss:$48 sps:$4 sm:$0xff]  }
 0x66b   : > { %10604 = vmatprep.subr.bf16.mxu1 %v19996_v43  ;;  %v20063_v43 = vld [vmem:[#allocation11 + $0xf20] ss:$48 sps:$4 sm:$0xff]  }
 0x66d   : > { %10441 = vmatpush1.bf16.msra.mxu0 %v19991_v44  ;;  %v20066_v44 = vld [vmem:[#allocation11 + $0xf28] ss:$48 sps:$4 sm:$0xff]  }
 0x66e   : > { %10605 = vmatpush1.bf16.msra.mxu1 %v19994_v46  ;;  %10442 = vmatprep.subr.bf16.mxu0 %v19999_v47  ;;  %v20071_v46 = vld [vmem:[#allocation11 + $0xf84] ss:$48 sps:$4 sm:$0xff]   ;;  %v20074_v47 = vld [vmem:[#allocation11 + $0xf8c] ss:$48 sps:$4 sm:$0xff]  }
 0x66f   : > { %10606 = vmatprep.subr.bf16.mxu1 %v20002_v2  ;;  %v20069_v2 = vld [vmem:[#allocation11 + $0xf80] ss:$48 sps:$4 sm:$0xff]  }
 0x671   : > { %10443 = vmatpush1.bf16.msra.mxu0 %v19997_v48  ;;  %v20072_v48 = vld [vmem:[#allocation11 + $0xf88] ss:$48 sps:$4 sm:$0xff]  }
 0x672   : > { %10607 = vmatpush1.bf16.msra.mxu1 %v20000_v49  ;;  %10444 = vmatprep.subr.bf16.mxu0 %v20005_v50  ;;  %v20077_v49 = vld [vmem:[#allocation11 + $0xfe4] ss:$48 sps:$4 sm:$0xff]   ;;  %v20080_v50 = vld [vmem:[#allocation11 + $0xfec] ss:$48 sps:$4 sm:$0xff]  }
 0x673   : > { %10608 = vmatprep.subr.bf16.mxu1 %v20008_v52  ;;  %v20075_v52 = vld [vmem:[#allocation11 + $0xfe0] ss:$48 sps:$4 sm:$0xff]  }
 0x675   : > { %10445 = vmatpush1.bf16.msra.mxu0 %v20003_v53  ;;  %v20078_v53 = vld [vmem:[#allocation11 + $0xfe8] ss:$48 sps:$4 sm:$0xff]  }
 0x676   : > { %10609 = vmatpush1.bf16.msra.mxu1 %v20006_v54  ;;  %10446 = vmatprep.subr.bf16.mxu0 %v20011_v35  ;;  %v20083_v54 = vld [vmem:[#allocation11 + $0x1044] ss:$48 sps:$4 sm:$0xff]   ;;  %v20086_v35 = vld [vmem:[#allocation11 + $0x104c] ss:$48 sps:$4 sm:$0xff]  }
 0x677   : > { %10610 = vmatprep.subr.bf16.mxu1 %v20014_v55  ;;  %v20081_v55 = vld [vmem:[#allocation11 + $0x1040] ss:$48 sps:$4 sm:$0xff]  }
 0x679   : > { %10447 = vmatpush1.bf16.msra.mxu0 %v20009_v56  ;;  %v20084_v56 = vld [vmem:[#allocation11 + $0x1048] ss:$48 sps:$4 sm:$0xff]  }
 0x67a   : > { %10611 = vmatpush1.bf16.msra.mxu1 %v20012_v34  ;;  %10457 = vmatprep.subr.bf16.mxu0 %v20017_v5  ;;  %v20089_v34 = vld [vmem:[#allocation11 + $0x10a4] ss:$48 sps:$4 sm:$0xff]   ;;  %v20092_v5 = vld [vmem:[#allocation11 + $0x10ac] ss:$48 sps:$4 sm:$0xff]  }
 0x67b   : > { %10621 = vmatprep.subr.bf16.mxu1 %v20020_v45  ;;  %v20087_v45 = vld [vmem:[#allocation11 + $0x10a0] ss:$48 sps:$4 sm:$0xff]  }
 0x67c   : > { %10449 = vmatmul.mubr.bf16.vlgmr.msra.gmra.mrb[24].mxu0 %v21397_v37 }
 0x67d   : > { %10613 = vmatmul.mubr.bf16.vlgmr.msra.gmra.mrb[24].mxu1 %v21397_v37  ;;  %10458 = vmatpush1.bf16.msra.mxu0 %v20015_v60  ;;  %v20038_v37 = vld [vmem:[#allocation11 + $0xd4c] ss:$48 sps:$4 sm:$0xff]   ;;  %v20090_v60 = vld [vmem:[#allocation11 + $0x10a8] ss:$48 sps:$4 sm:$0xff]  }
 0x67e   : > { %10489 = vmatprep.mubr.bf16.mxu0 %v21409_v15  ;;  %10622 = vmatpush1.bf16.msra.mxu1 %v20018_v40  ;;  %v20095_v40 = vld [vmem:[#allocation11 + $0x1104] ss:$48 sps:$4 sm:$0xff]  }
 0x67f   : > { %10653 = vmatprep.mubr.bf16.mxu1 %v21409_v15  ;;  %10459 = vmatprep.subr.bf16.mxu0 %v20023_v61  ;;  %v20039_v15 = vld [vmem:[#allocation11 + $0xda0] ss:$48 sps:$4 sm:$0xff]   ;;  %v20098_v61 = vld [vmem:[#allocation11 + $0x110c] ss:$48 sps:$4 sm:$0xff]  }
 0x680   : > { %10623 = vmatprep.subr.bf16.mxu1 %v20026_v62  ;;  %v20093_v62 = vld [vmem:[#allocation11 + $0x1100] ss:$48 sps:$4 sm:$0xff]  }
 0x681   : > { %10460 = vmatpush1.bf16.msra.mxu0 %v20021_v63  ;;  %v20096_v63 = vld [vmem:[#allocation11 + $0x1108] ss:$48 sps:$4 sm:$0xff]  }
 0x682   : > { %10624 = vmatpush1.bf16.msra.mxu1 %v20024_v9  ;;  %10461 = vmatprep.subr.bf16.mxu0 %v20029_v3  ;;  %v20101_v9 = vld [vmem:[#allocation11 + $0x1164] ss:$48 sps:$4 sm:$0xff]   ;;  %v20104_v3 = vld [vmem:[#allocation11 + $0x116c] ss:$48 sps:$4 sm:$0xff]  }
 0x683   : > { %10625 = vmatprep.subr.bf16.mxu1 %v20032_v4  ;;  %v20099_v4 = vld [vmem:[#allocation11 + $0x1160] ss:$48 sps:$4 sm:$0xff]  }
 0x685   : > { %10462 = vmatpush1.bf16.msra.mxu0 %v20027_v31  ;;  %v20102_v31 = vld [vmem:[#allocation11 + $0x1168] ss:$48 sps:$4 sm:$0xff]  }
 0x686   : > { %10626 = vmatpush1.bf16.msra.mxu1 %v20030_v7  ;;  %10463 = vmatprep.subr.bf16.mxu0 %v20035_v8  ;;  %v20107_v7 = vld [vmem:[#allocation11 + $0x11c4] ss:$48 sps:$4 sm:$0xff]   ;;  %v20110_v8 = vld [vmem:[#allocation11 + $0x11cc] ss:$48 sps:$4 sm:$0xff]  }
 0x687   : > { %10627 = vmatprep.subr.bf16.mxu1 %v20038_v37  ;;  %v20105_v37 = vld [vmem:[#allocation11 + $0x11c0] ss:$48 sps:$4 sm:$0xff]  }
 0x689   : > { %10464 = vmatpush1.bf16.msra.mxu0 %v20033_v10  ;;  %v20108_v10 = vld [vmem:[#allocation11 + $0x11c8] ss:$48 sps:$4 sm:$0xff]  }
 0x68a   : > { %10628 = vmatpush1.bf16.msra.mxu1 %v20036_v11  ;;  %10465 = vmatprep.subr.bf16.mxu0 %v20041_v19  ;;  %v20113_v11 = vld [vmem:[#allocation11 + $0x1224] ss:$48 sps:$4 sm:$0xff]   ;;  %v20116_v19 = vld [vmem:[#allocation11 + $0x122c] ss:$48 sps:$4 sm:$0xff]  }
 0x68b   : > { %10629 = vmatprep.subr.bf16.mxu1 %v20044_v41  ;;  %v20111_v41 = vld [vmem:[#allocation11 + $0x1220] ss:$48 sps:$4 sm:$0xff]  }
 0x68d   : > { %10466 = vmatpush1.bf16.msra.mxu0 %v20039_v15  ;;  %v20114_v15 = vld [vmem:[#allocation11 + $0x1228] ss:$48 sps:$4 sm:$0xff]  }
 0x68e   : > { %10630 = vmatpush1.bf16.msra.mxu1 %v20042_v1  ;;  %10467 = vmatprep.subr.bf16.mxu0 %v20047_v13  ;;  %v20119_v1 = vld [vmem:[#allocation11 + $0x1284] ss:$48 sps:$4 sm:$0xff]   ;;  %v20122_v13 = vld [vmem:[#allocation11 + $0x128c] ss:$48 sps:$4 sm:$0xff]  }
 0x68f   : > { %10631 = vmatprep.subr.bf16.mxu1 %v20050_v42  ;;  %v20117_v42 = vld [vmem:[#allocation11 + $0x1280] ss:$48 sps:$4 sm:$0xff]  }
 0x691   : > { %10468 = vmatpush1.bf16.msra.mxu0 %v20045_v14  ;;  %v20120_v14 = vld [vmem:[#allocation11 + $0x1288] ss:$48 sps:$4 sm:$0xff]  }
 0x692   : > { %10632 = vmatpush1.bf16.msra.mxu1 %v20048_v21  ;;  %10469 = vmatprep.subr.bf16.mxu0 %v20053_v22  ;;  %v20125_v21 = vld [vmem:[#allocation11 + $0x12e4] ss:$48 sps:$4 sm:$0xff]   ;;  %v20128_v22 = vld [vmem:[#allocation11 + $0x12ec] ss:$48 sps:$4 sm:$0xff]  }
 0x693   : > { %10633 = vmatprep.subr.bf16.mxu1 %v20056_v28  ;;  %v20123_v28 = vld [vmem:[#allocation11 + $0x12e0] ss:$48 sps:$4 sm:$0xff]  }
 0x695   : > { %10470 = vmatpush1.bf16.msra.mxu0 %v20051_v30  ;;  %v20126_v30 = vld [vmem:[#allocation11 + $0x12e8] ss:$48 sps:$4 sm:$0xff]  }
 0x696   : > { %10634 = vmatpush1.bf16.msra.mxu1 %v20054_v12  ;;  %10471 = vmatprep.subr.bf16.mxu0 %v20059_v32  ;;  %v20131_v12 = vld [vmem:[#allocation11 + $0x1344] ss:$48 sps:$4 sm:$0xff]   ;;  %v20129_v32 = vld [vmem:[#allocation11 + $0x1340] ss:$48 sps:$4 sm:$0xff]  }
 0x697   : > { %10635 = vmatprep.subr.bf16.mxu1 %v20062_v33  ;;  %v20132_v33 = vld [vmem:[#allocation11 + $0x1348] ss:$48 sps:$4 sm:$0xff]  }
 0x699   : > { %10472 = vmatpush1.bf16.msra.mxu0 %v20057_v36  ;;  %v20137_v36 = vld [vmem:[#allocation11 + $0x13a4] ss:$48 sps:$4 sm:$0xff]  }
 0x69a   : > { %10636 = vmatpush1.bf16.msra.mxu1 %v20060_v57  ;;  %10473 = vmatprep.subr.bf16.mxu0 %v20065_v6  ;;  %v20140_v57 = vld [vmem:[#allocation11 + $0x13ac] ss:$48 sps:$4 sm:$0xff]   ;;  %v20138_v6 = vld [vmem:[#allocation11 + $0x13a8] ss:$48 sps:$4 sm:$0xff]  }
 0x69b   : > { %10637 = vmatprep.subr.bf16.mxu1 %v20068_v16  ;;  %v20143_v16 = vld [vmem:[#allocation11 + $0x1404] ss:$48 sps:$4 sm:$0xff]  }
 0x69d   : > { %10474 = vmatpush1.bf16.msra.mxu0 %v20063_v43  ;;  %v20146_v43 = vld [vmem:[#allocation11 + $0x140c] ss:$48 sps:$4 sm:$0xff]  }
 0x69e   : > { %10638 = vmatpush1.bf16.msra.mxu1 %v20066_v44  ;;  %10475 = vmatprep.subr.bf16.mxu0 %v20071_v46  ;;  %v20468_v44 = vld [vmem:[#allocation13] sm:$0xff] }
 0x69f   : > { %10639 = vmatprep.subr.bf16.mxu1 %v20074_v47  ;;  %v9678_v46 = vrot.slane %v20468_v44, %v21316_v26  ;;  %v9686_v47 = vrot.slane %v20468_v44, %v21338_v27  ;;  %v20147_v27 = vld [vmem:[#allocation11 + $0x1460] ss:$48 sps:$4 sm:$0xff]  }
 0x6a1   : > { %10476 = vmatpush1.bf16.msra.mxu0 %v20069_v2  ;;  %v9682_v2 = vrot.slane %v20468_v44, %v21299_v51 }
 0x6a2   : > { %10640 = vmatpush1.bf16.msra.mxu1 %v20072_v48  ;;  %10477 = vmatprep.subr.bf16.mxu0 %v20077_v49  ;;  %v20141_v48 = vld [vmem:[#allocation11 + $0x1400] ss:$48 sps:$4 sm:$0xff]   ;;  %v9690_v49 = vrot.slane %v20468_v44, %v21319_v39  ;;  %v20150_v39 = vld [vmem:[#allocation11 + $0x1468] ss:$48 sps:$4 sm:$0xff]  }
 0x6a3   : > { %10641 = vmatprep.subr.bf16.mxu1 %v20080_v50  ;;  %v20144_v50 = vld [vmem:[#allocation11 + $0x1408] ss:$48 sps:$4 sm:$0xff]   ;;  %v20189_v44 = vld [vmem:[#allocation11 + $0x1700] ss:$48 sps:$4 sm:$0xff]  }
 0x6a5   : > { %10478 = vmatpush1.bf16.msra.mxu0 %v20075_v52  ;;  %v20149_v52 = vld [vmem:[#allocation11 + $0x1464] ss:$48 sps:$4 sm:$0xff]  }
 0x6a6   : > { %10642 = vmatpush1.bf16.msra.mxu1 %v20078_v53  ;;  %10479 = vmatprep.subr.bf16.mxu0 %v20083_v54  ;;  %v20152_v54 = vld [vmem:[#allocation11 + $0x146c] ss:$48 sps:$4 sm:$0xff]  }
 0x6a7   : > { %10643 = vmatprep.subr.bf16.mxu1 %v20086_v35 }
 0x6a9   : > { %10480 = vmatpush1.bf16.msra.mxu0 %v20081_v55 }
 0x6aa   : > { %10644 = vmatpush1.bf16.msra.mxu1 %v20084_v56  ;;  %10481 = vmatprep.subr.bf16.mxu0 %v20089_v34 }
 0x6ab   : > { %10645 = vmatprep.subr.bf16.mxu1 %v20092_v5 }
 0x6ad   : > { %10482 = vmatpush1.bf16.msra.mxu0 %v20087_v45 }
 0x6ae   : > { %10646 = vmatpush1.bf16.msra.mxu1 %v20090_v60  ;;  %10483 = vmatprep.subr.bf16.mxu0 %v20095_v40 }
 0x6af   : > { %10647 = vmatprep.subr.bf16.mxu1 %v20098_v61  ;;  %v20155_v61 = vld [vmem:[#allocation11 + $0x14c4] ss:$48 sps:$4 sm:$0xff]  }
 0x6b1   : > { %10484 = vmatpush1.bf16.msra.mxu0 %v20093_v62 }
 0x6b2   : > { %10648 = vmatpush1.bf16.msra.mxu1 %v20096_v63  ;;  %10485 = vmatprep.subr.bf16.mxu0 %v20101_v9  ;;  %v20158_v9 = vld [vmem:[#allocation11 + $0x14cc] ss:$48 sps:$4 sm:$0xff]  }
 0x6b3   : > { %10649 = vmatprep.subr.bf16.mxu1 %v20104_v3 }
 0x6b5   : > { %10486 = vmatpush1.bf16.msra.mxu0 %v20099_v4 }
 0x6b6   : > { %10650 = vmatpush1.bf16.msra.mxu1 %v20102_v31  ;;  %10487 = vmatprep.subr.bf16.mxu0 %v20107_v7  ;;  %v20153_v31 = vld [vmem:[#allocation11 + $0x14c0] ss:$48 sps:$4 sm:$0xff]  }
 0x6b7   : > { %10651 = vmatprep.subr.bf16.mxu1 %v20110_v8  ;;  %v20156_v8 = vld [vmem:[#allocation11 + $0x14c8] ss:$48 sps:$4 sm:$0xff]  }
 0x6b9   : > { %10488 = vmatpush1.bf16.msra.mxu0 %v20105_v37  ;;  %v20161_v37 = vld [vmem:[#allocation11 + $0x1524] ss:$48 sps:$4 sm:$0xff]  }
 0x6ba   : > { %10652 = vmatpush1.bf16.msra.mxu1 %v20108_v10  ;;  %10498 = vmatprep.subr.bf16.mxu0 %v20113_v11  ;;  %v20164_v10 = vld [vmem:[#allocation11 + $0x152c] ss:$48 sps:$4 sm:$0xff]  }
 0x6bb   : > { %10662 = vmatprep.subr.bf16.mxu1 %v20116_v19  ;;  %v20159_v19 = vld [vmem:[#allocation11 + $0x1520] ss:$48 sps:$4 sm:$0xff]  }
 0x6bc   : > { %10490 = vmatmul.mubr.bf16.vlgmr.msra.gmra.mrb[24].mxu0 %v21411_v23 }
 0x6bd   : > { %10654 = vmatmul.mubr.bf16.vlgmr.msra.gmra.mrb[24].mxu1 %v21411_v23  ;;  %10499 = vmatpush1.bf16.msra.mxu0 %v20111_v41  ;;  %v20134_v23 = vld [vmem:[#allocation11 + $0x134c] ss:$48 sps:$4 sm:$0xff]  }
 0x6be   : > { %10530 = vmatprep.mubr.bf16.mxu0 %v21415_v29  ;;  %10663 = vmatpush1.bf16.msra.mxu1 %v20114_v15  ;;  %v20162_v15 = vld [vmem:[#allocation11 + $0x1528] ss:$48 sps:$4 sm:$0xff]  }
 0x6bf   : > { %10694 = vmatprep.mubr.bf16.mxu1 %v21415_v29  ;;  %10500 = vmatprep.subr.bf16.mxu0 %v20119_v1  ;;  %v20135_v29 = vld [vmem:[#allocation11 + $0x13a0] ss:$48 sps:$4 sm:$0xff]   ;;  %v20167_v1 = vld [vmem:[#allocation11 + $0x1584] ss:$48 sps:$4 sm:$0xff]  }
 0x6c0   : > { %10664 = vmatprep.subr.bf16.mxu1 %v20122_v13  ;;  %v20170_v13 = vld [vmem:[#allocation11 + $0x158c] ss:$48 sps:$4 sm:$0xff]  }
 0x6c1   : > { %10501 = vmatpush1.bf16.msra.mxu0 %v20117_v42  ;;  %v20165_v42 = vld [vmem:[#allocation11 + $0x1580] ss:$48 sps:$4 sm:$0xff]  }
 0x6c2   : > { %10665 = vmatpush1.bf16.msra.mxu1 %v20120_v14  ;;  %10502 = vmatprep.subr.bf16.mxu0 %v20125_v21  ;;  %v20168_v14 = vld [vmem:[#allocation11 + $0x1588] ss:$48 sps:$4 sm:$0xff]   ;;  %v20173_v21 = vld [vmem:[#allocation11 + $0x15e4] ss:$48 sps:$4 sm:$0xff]  }
 0x6c3   : > { %10666 = vmatprep.subr.bf16.mxu1 %v20128_v22  ;;  %v20176_v22 = vld [vmem:[#allocation11 + $0x15ec] ss:$48 sps:$4 sm:$0xff]  }
 0x6c5   : > { %10503 = vmatpush1.bf16.msra.mxu0 %v20123_v28  ;;  %v20171_v28 = vld [vmem:[#allocation11 + $0x15e0] ss:$48 sps:$4 sm:$0xff]  }
 0x6c6   : > { %10667 = vmatpush1.bf16.msra.mxu1 %v20126_v30  ;;  %10504 = vmatprep.subr.bf16.mxu0 %v20131_v12  ;;  %v20174_v30 = vld [vmem:[#allocation11 + $0x15e8] ss:$48 sps:$4 sm:$0xff]   ;;  %v20179_v12 = vld [vmem:[#allocation11 + $0x1644] ss:$48 sps:$4 sm:$0xff]  }
 0x6c7   : > { %10668 = vmatprep.subr.bf16.mxu1 %v20134_v23  ;;  %v20182_v23 = vld [vmem:[#allocation11 + $0x164c] ss:$48 sps:$4 sm:$0xff]  }
 0x6c9   : > { %10505 = vmatpush1.bf16.msra.mxu0 %v20129_v32  ;;  %v20177_v32 = vld [vmem:[#allocation11 + $0x1640] ss:$48 sps:$4 sm:$0xff]  }
 0x6ca   : > { %10669 = vmatpush1.bf16.msra.mxu1 %v20132_v33  ;;  %10506 = vmatprep.subr.bf16.mxu0 %v20137_v36  ;;  %v20180_v33 = vld [vmem:[#allocation11 + $0x1648] ss:$48 sps:$4 sm:$0xff]   ;;  %v20185_v36 = vld [vmem:[#allocation11 + $0x16a4] ss:$48 sps:$4 sm:$0xff]  }
 0x6cb   : > { %10670 = vmatprep.subr.bf16.mxu1 %v20140_v57  ;;  %v20188_v57 = vld [vmem:[#allocation11 + $0x16ac] ss:$48 sps:$4 sm:$0xff]  }
 0x6cd   : > { %10507 = vmatpush1.bf16.msra.mxu0 %v20135_v29  ;;  %v20183_v29 = vld [vmem:[#allocation11 + $0x16a0] ss:$48 sps:$4 sm:$0xff]  }
 0x6ce   : > { %10671 = vmatpush1.bf16.msra.mxu1 %v20138_v6  ;;  %10508 = vmatprep.subr.bf16.mxu0 %v20143_v16  ;;  %v20186_v6 = vld [vmem:[#allocation11 + $0x16a8] ss:$48 sps:$4 sm:$0xff]   ;;  %v20191_v16 = vld [vmem:[#allocation11 + $0x1704] ss:$48 sps:$4 sm:$0xff]  }
 0x6cf   : > { %v10204_v53 = vpop.f32.mrb[20].mxu0  ;;  %10672 = vmatprep.subr.bf16.mxu1 %v20146_v43  ;;  %v20194_v43 = vld [vmem:[#allocation11 + $0x170c] ss:$48 sps:$4 sm:$0xff]  }
 0x6d0   : > { %v18271_v35 = vadd.f32 %v10204_v53, %v9678_v46  ;;  %v10368_v55 = vpop.f32.mrb[20].mxu1  ;;  %v10206_v56 = vpop.f32.mrb[21].mxu0  ;;  %v20192_v46 = vld [vmem:[#allocation11 + $0x1708] ss:$48 sps:$4 sm:$0xff]   ;;  %v10865_v53 = vld [vmem:[%s21491_s21] sm:$0xff] }
 0x6d1   : > { %v18273_v34 = vadd.f32 %v10368_v55, %v9686_v47  ;;  %v18272_v26 = vadd.f32 %v10206_v56, %v9682_v2  ;;  %v10370_v5 = vpop.f32.mrb[21].mxu1  ;;  %v10208_v45 = vpop.f32.mrb[22].mxu0  ;;  %10509 = vmatpush1.bf16.msra.mxu0 %v20141_v48  ;;  %v20197_v47 = vld [vmem:[#allocation11 + $0x1764] ss:$48 sps:$4 sm:$0xff]   ;;  %v20200_v2 = vld [vmem:[#allocation11 + $0x176c] ss:$48 sps:$4 sm:$0xff]  }
 0x6d2   : > { %v18274_v51 = vadd.f32 %v10370_v5, %v9690_v49  ;;  %v10372_v60 = vpop.f32.mrb[22].mxu1  ;;  %10673 = vmatpush1.bf16.msra.mxu1 %v20144_v50  ;;  %v10209_v40 = vpop.f32.mrb[23].mxu0  ;;  %10510 = vmatprep.subr.bf16.mxu0 %v20149_v52  ;;  %v20195_v48 = vld [vmem:[#allocation11 + $0x1760] ss:$48 sps:$4 sm:$0xff]   ;;  %v20198_v49 = vld [vmem:[#allocation11 + $0x1768] ss:$48 sps:$4 sm:$0xff]  }
 0x6d3   : > { %v10741_v62 = vcombine.low %v18271_v35, %v18272_v26  ;;  %v10373_v63 = vpop.f32.mrb[23].mxu1  ;;  %10674 = vmatprep.subr.bf16.mxu1 %v20152_v54  ;;  %v20203_v50 = vld [vmem:[#allocation11 + $0x17c4] ss:$48 sps:$4 sm:$0xff]   ;;  %v20206_v52 = vld [vmem:[#allocation11 + $0x17cc] ss:$48 sps:$4 sm:$0xff]  }
 0x6d4   : > { %v10742_v3 = vcombine.low %v18273_v34, %v18274_v51  ;;  %v10866_v54 = vld [vmem:[%s21491_s21 + $0x8] sm:$0xff]  ;;  %v20201_v35 = vld [vmem:[#allocation11 + $0x17c0] ss:$48 sps:$4 sm:$0xff]   ;;  %v10868_v26 = vld [vmem:[%s21491_s21 + $0x18] sm:$0xff] }
 0x6d5   : > { %v10749_v4 = vrot.slane %v10741_v62, %v21446_v25  ;;  %10511 = vmatpush1.bf16.msra.mxu0 %v20147_v27  ;;  %v20204_v55 = vld [vmem:[#allocation11 + $0x17c8] ss:$48 sps:$4 sm:$0xff]   ;;  %v10881_v56 = vpack.c.bf16 %v10866_v54, %v10865_v53  ;;  %v10867_v34 = vld [vmem:[%s21491_s21 + $0x10] sm:$0xff]  ;;  %v10869_v27 = vld [vmem:[%s21491_s21 + $0x20] sm:$0xff] }
 0x6d6   : > { %v10756_v7 = vrot.slane %v10742_v3, %v21446_v25  ;;  %10675 = vmatpush1.bf16.msra.mxu1 %v20150_v39  ;;  %10512 = vmatprep.subr.bf16.mxu0 %v20155_v61  ;;  %v10882_v5 = vpack.c.bf16 %v10868_v26, %v10867_v34  ;;  %v20207_v45 = vld [vmem:[#allocation14] sm:$0xff]   ;;  %v10872_v39 = vld [vmem:[%s21491_s21 + $0x38] sm:$0xff]  ;;  %v10873_v62 = vld [vmem:[%s21491_s21 + $0x40] sm:$0xff] }
 0x6d7   : > { %10676 = vmatprep.subr.bf16.mxu1 %v20158_v9  ;;  %v10870_v51 = vld [vmem:[%s21491_s21 + $0x28] sm:$0xff]  ;;  %v10871_v40 = vld [vmem:[%s21491_s21 + $0x30] sm:$0xff]  ;;  %v10876_v3 = vld [vmem:[%s21491_s21 + $0x58] sm:$0xff] }
 0x6d8   : > { %v10757_v11 = vcombine.low %v10749_v4, %v10756_v7  ;;  %v10883_v60 = vpack.c.bf16 %v10870_v51, %v10869_v27  ;;  %v10884_v61 = vpack.c.bf16 %v10872_v39, %v10871_v40  ;;  %v10874_v63 = vld [vmem:[%s21491_s21 + $0x48] sm:$0xff]  ;;  %v10875_v9 = vld [vmem:[%s21491_s21 + $0x50] sm:$0xff]  ;;  %v20237_v53 = vld [vmem:[#allocation14 + $0xf0] sm:$0xff]  }
 0x6d9   : > { %10513 = vmatpush1.bf16.msra.mxu0 %v20153_v31  ;;  %v10886_v4 = vpack.c.bf16 %v10876_v3, %v10875_v9  ;;  %v10877_v31 = vld [vmem:[%s21491_s21 + $0x60] sm:$0xff]  ;;  %v10878_v7 = vld [vmem:[%s21491_s21 + $0x68] sm:$0xff] }
 0x6da   : > { %v10764_v41 = vrot.slane %v10757_v11, %v21446_v25  ;;  %10677 = vmatpush1.bf16.msra.mxu1 %v20156_v8  ;;  %10514 = vmatprep.subr.bf16.mxu0 %v20161_v37  ;;  %v10887_v8 = vpack.c.bf16 %v10878_v7, %v10877_v31  ;;  %v10879_v37 = vld [vmem:[%s21491_s21 + $0x70] sm:$0xff]  ;;  %v20238_v54 = vld [vmem:[#allocation14 + $0xf8] sm:$0xff]   ;;  %v20829_v7 = vmov 65535  }
 0x6db   : > { %10678 = vmatprep.subr.bf16.mxu1 %v20164_v10  ;;  %v10880_v10 = vld [vmem:[%s21491_s21 + $0x78] sm:$0xff]  ;;  %s22523_s21 = sld [smem:[#allocation32_spill]] }
 0x6dc   : > { %10767 = vst.msk [vmem:[#allocation2 + $0x1] ss:$4 sm:$0xf] %vm21451_vm0, %v10764_v41  ;;  %v10888_v11 = vpack.c.bf16 %v10880_v10, %v10879_v37  ;;  %v20209_v41 = vld [vmem:[#allocation14 + $0x10] sm:$0xff]  }
 0x6dd   : > { %10515 = vmatpush1.bf16.msra.mxu0 %v20159_v19  ;;  %v20208_v19 = vld [vmem:[#allocation14 + $0x8] sm:$0xff]  }
 0x6de   : > { %10679 = vmatpush1.bf16.msra.mxu1 %v20162_v15  ;;  %10516 = vmatprep.subr.bf16.mxu0 %v20167_v1  ;;  %v20210_v15 = vld [vmem:[#allocation14 + $0x18] sm:$0xff]   ;;  %v20211_v1 = vld [vmem:[#allocation14 + $0x20] sm:$0xff]  }
 0x6df   : > { %10680 = vmatprep.subr.bf16.mxu1 %v20170_v13  ;;  %v20212_v13 = vld [vmem:[#allocation14 + $0x28] sm:$0xff]  }
 0x6e1   : > { %10517 = vmatpush1.bf16.msra.mxu0 %v20165_v42  ;;  %v20213_v42 = vld [vmem:[#allocation14 + $0x30] sm:$0xff]  }
 0x6e2   : > { %10681 = vmatpush1.bf16.msra.mxu1 %v20168_v14  ;;  %10518 = vmatprep.subr.bf16.mxu0 %v20173_v21  ;;  %v20214_v14 = vld [vmem:[#allocation14 + $0x38] sm:$0xff]   ;;  %v20215_v21 = vld [vmem:[#allocation14 + $0x40] sm:$0xff]  }
 0x6e3   : > { %10682 = vmatprep.subr.bf16.mxu1 %v20176_v22  ;;  %v20216_v22 = vld [vmem:[#allocation14 + $0x48] sm:$0xff]  }
 0x6e5   : > { %10519 = vmatpush1.bf16.msra.mxu0 %v20171_v28  ;;  %v20217_v28 = vld [vmem:[#allocation14 + $0x50] sm:$0xff]  }
 0x6e6   : > { %10683 = vmatpush1.bf16.msra.mxu1 %v20174_v30  ;;  %10520 = vmatprep.subr.bf16.mxu0 %v20179_v12  ;;  %v20218_v30 = vld [vmem:[#allocation14 + $0x58] sm:$0xff]   ;;  %v20219_v12 = vld [vmem:[#allocation14 + $0x60] sm:$0xff]  }
 0x6e7   : > { %10684 = vmatprep.subr.bf16.mxu1 %v20182_v23  ;;  %v20220_v23 = vld [vmem:[#allocation14 + $0x68] sm:$0xff]  }
 0x6e9   : > { %10521 = vmatpush1.bf16.msra.mxu0 %v20177_v32  ;;  %v20221_v32 = vld [vmem:[#allocation14 + $0x70] sm:$0xff]  }
 0x6ea   : > { %10685 = vmatpush1.bf16.msra.mxu1 %v20180_v33  ;;  %10522 = vmatprep.subr.bf16.mxu0 %v20185_v36  ;;  %v20222_v33 = vld [vmem:[#allocation14 + $0x78] sm:$0xff]   ;;  %v20223_v36 = vld [vmem:[#allocation14 + $0x80] sm:$0xff]  }
 0x6eb   : > { %10686 = vmatprep.subr.bf16.mxu1 %v20188_v57  ;;  %v20224_v57 = vld [vmem:[#allocation14 + $0x88] sm:$0xff]  }
 0x6ed   : > { %10523 = vmatpush1.bf16.msra.mxu0 %v20183_v29  ;;  %v20225_v29 = vld [vmem:[#allocation14 + $0x90] sm:$0xff]  }
 0x6ee   : > { %10687 = vmatpush1.bf16.msra.mxu1 %v20186_v6  ;;  %10524 = vmatprep.subr.bf16.mxu0 %v20191_v16  ;;  %v20226_v6 = vld [vmem:[#allocation14 + $0x98] sm:$0xff]   ;;  %v20227_v16 = vld [vmem:[#allocation14 + $0xa0] sm:$0xff]  }
 0x6ef   : > { %10688 = vmatprep.subr.bf16.mxu1 %v20194_v43  ;;  %v20228_v43 = vld [vmem:[#allocation14 + $0xa8] sm:$0xff]  }
 0x6f1   : > { %10525 = vmatpush1.bf16.msra.mxu0 %v20189_v44  ;;  %v20229_v44 = vld [vmem:[#allocation14 + $0xb0] sm:$0xff]  }
 0x6f2   : > { %10689 = vmatpush1.bf16.msra.mxu1 %v20192_v46  ;;  %10526 = vmatprep.subr.bf16.mxu0 %v20197_v47  ;;  %v20230_v46 = vld [vmem:[#allocation14 + $0xb8] sm:$0xff]   ;;  %v20231_v47 = vld [vmem:[#allocation14 + $0xc0] sm:$0xff]  }
 0x6f3   : > { %10690 = vmatprep.subr.bf16.mxu1 %v20200_v2  ;;  %v20232_v2 = vld [vmem:[#allocation14 + $0xc8] sm:$0xff]  }
 0x6f5   : > { %10527 = vmatpush1.bf16.msra.mxu0 %v20195_v48  ;;  %v20233_v48 = vld [vmem:[#allocation14 + $0xd0] sm:$0xff]  }
 0x6f6   : > { %10691 = vmatpush1.bf16.msra.mxu1 %v20198_v49  ;;  %10528 = vmatprep.subr.bf16.mxu0 %v20203_v50  ;;  %v20234_v49 = vld [vmem:[#allocation14 + $0xd8] sm:$0xff]   ;;  %v20235_v50 = vld [vmem:[#allocation14 + $0xe0] sm:$0xff]  }
 0x6f7   : > { %10692 = vmatprep.subr.bf16.mxu1 %v20206_v52  ;;  %v20236_v52 = vld [vmem:[#allocation14 + $0xe8] sm:$0xff]  }
 0x6f9   : > { %10529 = vmatpush1.bf16.msra.mxu0 %v20201_v35  ;;  %v5816_v35 = vld [vmem:[#allocation13 + $0x8] sm:$0xf] }
 0x6fa   : > { %10693 = vmatpush1.bf16.msra.mxu1 %v20204_v55  ;;  %18179 = vmatprep.subr.bf16.mxu0 %v10881_v56  ;;  %v9694_v55 = vrot.slane %v5816_v35, %v21257_v18  ;;  %v9698_v34 = vrot.slane %v5816_v35, %v21262_v20  ;;  %v9706_v26 = vrot.slane %v5816_v35, %v21269_v24 }
 0x6fc   : > { %10531 = vmatmul.mubr.bf16.vlgmr.msra.gmra.mrb[24].mxu0 %v21423_v59 }
 0x6fd   : > { %10695 = vmatmul.mubr.bf16.vlgmr.msra.gmra.mrb[24].mxu1 %v21423_v59  ;;  %18180 = vmatpush3.bf16.msra.mxu0 %v10881_v56  ;;  %v10885_v59 = vpack.c.bf16 %v10874_v63, %v10873_v62  ;;  %v9702_v56 = vrot.slane %v5816_v35, %v21296_v38 }
 0x6fe   : > { %18181 = vmatprep.subr.bf16.mxu0 %v10882_v5  ;;  %18195 = vmatprep.mubr.bf16.mxu0 %v20207_v45 }
 0x6ff   : > { %12133 = vmatprep.mubr.bf16.mxu1 %v20827_v0 }
 0x701   : > { %18182 = vmatpush3.bf16.msra.mxu0 %v10882_v5 }
 0x702   : > { %18183 = vmatprep.subr.bf16.mxu0 %v10883_v60 }
 0x705   : > { %18184 = vmatpush3.bf16.msra.mxu0 %v10883_v60 }
 0x706   : > { %18185 = vmatprep.subr.bf16.mxu0 %v10884_v61 }
 0x709   : > { %18186 = vmatpush3.bf16.msra.mxu0 %v10884_v61 }
 0x70a   : > { %18187 = vmatprep.subr.bf16.mxu0 %v10885_v59 }
 0x70d   : > { %18188 = vmatpush3.bf16.msra.mxu0 %v10885_v59 }
 0x70e   : > { %18189 = vmatprep.subr.bf16.mxu0 %v10886_v4 }
 0x711   : > { %18190 = vmatpush3.bf16.msra.mxu0 %v10886_v4 }
 0x712   : > { %18191 = vmatprep.subr.bf16.mxu0 %v10887_v8 }
 0x715   : > { %18192 = vmatpush3.bf16.msra.mxu0 %v10887_v8  ;;  %v12087_v8 = vsel %vm12085_vm1, 4294967295, %v20829_v7  ;;  %v20245_v7 = vld [vmem:[%s22520_s25 + $0x20] sm:$0xff]  }
 0x716   : > { %18193 = vmatprep.subr.bf16.mxu0 %v10888_v11 }
 0x719   : > { %18194 = vmatpush3.bf16.msra.mxu0 %v10888_v11 }
 0x71c   : > { %18196 = vmatmul.mubr.bf16.vlgmr.msra.gmra.mrb[28].mxu0 %v20208_v19 }
 0x71d   : > { %18199 = vmatprep.mubr.bf16.mxu0 %v20209_v41 }
 0x724   : > { %18200 = vmatmul.mubr.bf16.gmra.mrb[32].mxu0 %v20210_v15 }
 0x725   : > { %18203 = vmatprep.mubr.bf16.mxu0 %v20211_v1  ;;  %v12088_v1 = vsel %vm12086_vm2, %v12087_v8, 0  ;;  %v10904_v8 = vld [vmem:[%s22521_s16 + $0x78] sm:$0xff] }
 0x72c   : > { %18204 = vmatmul.mubr.bf16.gmra.mrb[36].mxu0 %v20212_v13 }
 0x72d   : > { %18207 = vmatprep.mubr.bf16.mxu0 %v20213_v42 }
 0x734   : > { %18208 = vmatmul.mubr.bf16.gmra.mrb[40].mxu0 %v20214_v14 }
 0x735   : > { %18211 = vmatprep.mubr.bf16.mxu0 %v20215_v21  ;;  %v20241_v21 = vld [vmem:[%s22520_s25] sm:$0xff]  }
 0x73c   : > { %18212 = vmatmul.mubr.bf16.gmra.mrb[44].mxu0 %v20216_v22  ;;  %v10891_v22 = vld [vmem:[%s22521_s16 + $0x10] sm:$0xff] }
 0x73d   : > { %18215 = vmatprep.mubr.bf16.mxu0 %v20217_v28  ;;  %v10889_v28 = vld [vmem:[%s22521_s16] sm:$0xff] }
 0x744   : > { %18216 = vmatmul.mubr.bf16.gmra.mrb[48].mxu0 %v20218_v30 }
 0x745   : > { %18219 = vmatprep.mubr.bf16.mxu0 %v20219_v12 }
 0x74c   : > { %18220 = vmatmul.mubr.bf16.gmra.mrb[52].mxu0 %v20220_v23 }
 0x74d   : > { %18223 = vmatprep.mubr.bf16.mxu0 %v20221_v32  ;;  %v10890_v32 = vld [vmem:[%s22521_s16 + $0x8] sm:$0xff] }
 0x754   : > { %18224 = vmatmul.mubr.bf16.gmra.mrb[56].mxu0 %v20222_v33  ;;  %v10892_v33 = vld [vmem:[%s22521_s16 + $0x18] sm:$0xff] }
 0x755   : > { %18227 = vmatprep.mubr.bf16.mxu0 %v20223_v36 }
 0x75c   : > { %18228 = vmatmul.mubr.bf16.gmra.mrb[60].mxu0 %v20224_v57 }
 0x75d   : > { %18231 = vmatprep.mubr.bf16.mxu0 %v20225_v29 }
 0x764   : > { %18232 = vmatmul.mubr.bf16.gmra.mrb[64].mxu0 %v20226_v6  ;;  %v20242_v6 = vld [vmem:[%s22520_s25 + $0x8] sm:$0xff]  }
 0x765   : > { %18235 = vmatprep.mubr.bf16.mxu0 %v20227_v16 }
 0x76c   : > { %18236 = vmatmul.mubr.bf16.gmra.mrb[68].mxu0 %v20228_v43 }
 0x76d   : > { %18239 = vmatprep.mubr.bf16.mxu0 %v20229_v44  ;;  %v10893_v44 = vld [vmem:[%s22521_s16 + $0x20] sm:$0xff] }
 0x774   : > { %18240 = vmatmul.mubr.bf16.gmra.mrb[72].mxu0 %v20230_v46 }
 0x775   : > { %18243 = vmatprep.mubr.bf16.mxu0 %v20231_v47 }
 0x77c   : > { %18244 = vmatmul.mubr.bf16.gmra.mrb[76].mxu0 %v20232_v2  ;;  %v10894_v2 = vld [vmem:[%s22521_s16 + $0x28] sm:$0xff] }
 0x77d   : > { %18247 = vmatprep.mubr.bf16.mxu0 %v20233_v48  ;;  %v10895_v48 = vld [vmem:[%s22521_s16 + $0x30] sm:$0xff] }
 0x784   : > { %18248 = vmatmul.mubr.bf16.gmra.mrb[80].mxu0 %v20234_v49 }
 0x785   : > { %18251 = vmatprep.mubr.bf16.mxu0 %v20235_v50 }
 0x78c   : > { %18252 = vmatmul.mubr.bf16.gmra.mrb[84].mxu0 %v20236_v52 }
 0x78d   : > { %18255 = vmatprep.mubr.bf16.mxu0 %v20237_v53  ;;  %v20243_v53 = vld [vmem:[%s22520_s25 + $0x10] sm:$0xff]  }
 0x794   : > { %18256 = vmatmul.mubr.bf16.gmra.mrb[88].mxu0 %v20238_v54  ;;  %v10896_v54 = vld [vmem:[%s22521_s16 + $0x38] sm:$0xff] }
 0x795   : > { %12486 = vmatprep.mubr.bf16.mxu0 %v20827_v0 }
 0x7cf   : > { %v10532_v5 = vpop.f32.mrb[24].mxu0 }
 0x7d0   : > { %v18275_v45 = vadd.f32 %v10532_v5, %v9694_v55  ;;  %v10696_v27 = vpop.f32.mrb[24].mxu1  ;;  %v10534_v51 = vpop.f32.mrb[25].mxu0 }
 0x7d1   : > { %v18277_v60 = vadd.f32 %v10696_v27, %v9702_v56  ;;  %v18276_v40 = vadd.f32 %v10534_v51, %v9698_v34  ;;  %v10698_v39 = vpop.f32.mrb[25].mxu1  ;;  %v10536_v61 = vpop.f32.mrb[26].mxu0  ;;  %v10897_v34 = vld [vmem:[%s22521_s16 + $0x40] sm:$0xff]  ;;  %v10899_v27 = vld [vmem:[%s22521_s16 + $0x50] sm:$0xff] }
 0x7d2   : > { %v18278_v62 = vadd.f32 %v10698_v39, %v9706_v26  ;;  %v10700_v63 = vpop.f32.mrb[26].mxu1  ;;  %v10537_v59 = vpop.f32.mrb[27].mxu0  ;;  %v20244_v39 = vld [vmem:[%s22520_s25 + $0x18] sm:$0xff]  }
 0x7d3   : > { %v10772_v9 = vcombine.low %v18275_v45, %v18276_v40  ;;  %v10701_v3 = vpop.f32.mrb[27].mxu1  ;;  %v10898_v45 = vld [vmem:[%s22521_s16 + $0x48] sm:$0xff]  ;;  %v10900_v61 = vld [vmem:[%s22521_s16 + $0x58] sm:$0xff] }
 0x7d4   : > { %v10773_v18 = vcombine.low %v18277_v60, %v18278_v62 }
 0x7d5   : > { %v10780_v38 = vrot.slane %v10772_v9, %v21446_v25  ;;  %v10901_v9 = vld [vmem:[%s22521_s16 + $0x60] sm:$0xff] }
 0x7d6   : > { %v10787_v20 = vrot.slane %v10773_v18, %v21446_v25 }
 0x7d8   : > { %v10788_v4 = vcombine.low %v10780_v38, %v10787_v20  ;;  %v10902_v38 = vld [vmem:[%s22521_s16 + $0x68] sm:$0xff]  ;;  %v10903_v20 = vld [vmem:[%s22521_s16 + $0x70] sm:$0xff] }
 0x7da   : > { %v10795_v24 = vrot.slane %v10788_v4, %v21446_v25 }
 0x7dc   : > { %10798 = vst.msk [vmem:[#allocation2 + $0x2] ss:$4 sm:$0xf] %vm21451_vm0, %v10795_v24 }
 0x7e3   : > { %v10799_v31 = vld [vmem:[#allocation2] sm:$0x77]  ;;  %v10800_v37 = vld [vmem:[#allocation2 + $0x8] sm:$0x77] }
 0x7e4   : > { %v21522_v10 = vcombine.high %v10799_v31, %v10799_v31  ;;  %v21524_v11 = vcombine.high %v10800_v37, %v10800_v37  ;;  %v11504_v19 = vpack.c.bf16 %v10799_v31, %v10799_v31  ;;  %v11506_v41 = vpack.c.bf16 %v10800_v37, %v10800_v37 }
 0x7e6   : > { %22518 = vst [vmem:[#allocation26_spill] sm:$0xff] %v21522_v10  ;;  %22519 = vst [vmem:[#allocation27_spill] sm:$0xff] %v21524_v11  ;;  %v11505_v15 = vpack.c.bf16 %v21522_v10, %v21522_v10  ;;  %v11507_v25 = vpack.c.bf16 %v21524_v11, %v21524_v11  ;;  %v12090_v42 = vand.u32 %v12088_v1, %v11504_v19 }
 0x7e7   : > { %v12096_v14 = vand.u32 %v12088_v1, %v11506_v41 }
 0x7e8   : > { %v12093_v58 = vand.u32 %v12088_v1, %v11505_v15  ;;  %v12099_v13 = vand.u32 %v12088_v1, %v11507_v25  ;;  %v10905_v15 = vld [vmem:[%s22521_s16 + $0x80] sm:$0xff] }
 0x7ea   : > { %12101 = vmatprep.subr.bf16.mxu1 %v12093_v58  ;;  %12454 = vmatprep.subr.bf16.mxu0 %v12099_v13  ;;  %v10906_v58 = vld [vmem:[%s22521_s16 + $0x88] sm:$0xff]  ;;  %v10907_v13 = vld [vmem:[%s22521_s16 + $0x90] sm:$0xff] }
 0x7eb   : > { %12102 = vmatpush1.bf16.msra.mxu1 %v12090_v42  ;;  %12455 = vmatpush1.bf16.msra.mxu0 %v12096_v14 }
 0x7ee   : > { %17943 = vmatmul.mubr.msk.bf16.vlgmr.msra.gmra.mrb[28].mxu1 %vm11988_vm3, %v20241_v21  ;;  %17975 = vmatmul.mubr.msk.bf16.vlgmr.msra.gmra.mrb[92].mxu0 %vm11988_vm3, %v20241_v21 }
 0x7ef   : > { %v18197_v30 = vpop.f32.mrb[28].mxu0  ;;  %12143 = vmatprep.mubr.bf16.mxu1 %v20827_v0  ;;  %12496 = vmatprep.mubr.bf16.mxu0 %v20827_v0 }
 0x7f0   : > { %v11179_v12 = vpop.f32.mrb[29].mxu0  ;;  %v11188_v23 = vadd.f32 %v18197_v30, %v10891_v22  ;;  %v20246_v22 = vld [vmem:[%s22520_s25 + $0x28] sm:$0xff]  }
 0x7f1   : > { %v18198_v36 = vpop.f32.mrb[30].mxu0  ;;  %v11180_v57 = vadd.f32 %v11179_v12, %v10889_v28  ;;  %v10908_v28 = vld [vmem:[%s22521_s16 + $0x98] sm:$0xff] }
 0x7f2   : > { %v11182_v29 = vpop.f32.mrb[31].mxu0  ;;  %11520 = vperm.xlu1 %19054, %v11188_v23   ;;  %v11191_v43 = vadd.f32 %v18198_v36, %v10892_v33 }
 0x7f3   : > { %11510 = vperm.xlu0 %19053, %v11180_v57   ;;  %v11183_v16 = vadd.f32 %v11182_v29, %v10890_v32  ;;  %v10909_v32 = vld [vmem:[%s22521_s16 + $0xa0] sm:$0xff]  ;;  %v10910_v57 = vld [vmem:[%s22521_s16 + $0xa8] sm:$0xff]  ;;  %v10911_v29 = vld [vmem:[%s22521_s16 + $0xb0] sm:$0xff] }
 0x7f6   : > { %17944 = vmatmul.mubr.msk.bf16.gmra.mrb[32].mxu1 %vm11988_vm3, %v20242_v6  ;;  %17976 = vmatmul.mubr.msk.bf16.gmra.mrb[96].mxu0 %vm11988_vm3, %v20242_v6 }
 0x7f7   : > { %v18201_v46 = vpop.f32.mrb[32].mxu0  ;;  %11515 = vperm.xlu0 %19053, %v11183_v16   ;;  %11525 = vperm.xlu1 %19054, %v11191_v43  }
 0x7f8   : > { %v11195_v47 = vpop.f32.mrb[33].mxu0  ;;  %12153 = vmatprep.mubr.bf16.mxu1 %v20827_v0  ;;  %12506 = vmatprep.mubr.bf16.mxu0 %v20827_v0  ;;  %v11204_v55 = vadd.f32 %v18201_v46, %v10895_v48  ;;  %v10912_v46 = vld [vmem:[%s22521_s16 + $0xb8] sm:$0xff] }
 0x7f9   : > { %v18202_v49 = vpop.f32.mrb[34].mxu0  ;;  %v11196_v50 = vadd.f32 %v11195_v47, %v10893_v44  ;;  %v20247_v44 = vld [vmem:[%s22520_s25 + $0x30] sm:$0xff]  }
 0x7fa   : > { %v11198_v52 = vpop.f32.mrb[35].mxu0  ;;  %v11207_v56 = vadd.f32 %v18202_v49, %v10896_v54  ;;  %v10913_v49 = vld [vmem:[%s22521_s16 + $0xc0] sm:$0xff]  ;;  %v10915_v54 = vld [vmem:[%s22521_s16 + $0xd0] sm:$0xff] }
 0x7fb   : > { %11530 = vperm.xlu0 %19053, %v11196_v50   ;;  %v11199_v35 = vadd.f32 %v11198_v52, %v10894_v2 }
 0x7fd   : > { %11535 = vperm.xlu1 %19054, %v11199_v35  }
 0x7fe   : > { %17945 = vmatmul.mubr.msk.bf16.gmra.mrb[36].mxu1 %vm11988_vm3, %v20243_v53  ;;  %17977 = vmatmul.mubr.msk.bf16.gmra.mrb[100].mxu0 %vm11988_vm3, %v20243_v53  ;;  %v10914_v53 = vld [vmem:[%s22521_s16 + $0xc8] sm:$0xff] }
 0x7ff   : > { %v18205_v26 = vpop.f32.mrb[36].mxu0  ;;  %11540 = vperm.xlu0 %19053, %v11204_v55   ;;  %12163 = vmatprep.mubr.bf16.mxu1 %v20827_v0 }
 0x800   : > { %v11211_v5 = vpop.f32.mrb[37].mxu0  ;;  %12516 = vmatprep.mubr.bf16.mxu0 %v20827_v0  ;;  %v11220_v63 = vadd.f32 %v18205_v26, %v10899_v27  ;;  %v10916_v26 = vld [vmem:[%s22521_s16 + $0xd8] sm:$0xff] }
 0x801   : > { %v18206_v51 = vpop.f32.mrb[38].mxu0  ;;  %11545 = vperm.xlu1 %19054, %v11207_v56   ;;  %v11212_v60 = vadd.f32 %v11211_v5, %v10897_v34  ;;  %v20248_v34 = vld [vmem:[%s22520_s25 + $0x38] sm:$0xff]  }
 0x802   : > { %v11214_v40 = vpop.f32.mrb[39].mxu0  ;;  %v11223_v59 = vadd.f32 %v18206_v51, %v10900_v61  ;;  %v10917_v51 = vld [vmem:[%s22521_s16 + $0xe0] sm:$0xff]  ;;  %v10919_v61 = vld [vmem:[%s22521_s16 + $0xf0] sm:$0xff] }
 0x803   : > { %11550 = vperm.xlu0 %19053, %v11212_v60   ;;  %v11215_v62 = vadd.f32 %v11214_v40, %v10898_v45 }
 0x805   : > { %11555 = vperm.xlu1 %19054, %v11215_v62  }
 0x806   : > { %17946 = vmatmul.mubr.msk.bf16.gmra.mrb[40].mxu1 %vm11988_vm3, %v20244_v39  ;;  %17978 = vmatmul.mubr.msk.bf16.gmra.mrb[104].mxu0 %vm11988_vm3, %v20244_v39  ;;  %v10918_v39 = vld [vmem:[%s22521_s16 + $0xe8] sm:$0xff] }
 0x807   : > { %v18209_v3 = vpop.f32.mrb[40].mxu0  ;;  %11560 = vperm.xlu0 %19053, %v11220_v63   ;;  %12173 = vmatprep.mubr.bf16.mxu1 %v20827_v0 }
 0x808   : > { %v11227_v18 = vpop.f32.mrb[41].mxu0  ;;  %12526 = vmatprep.mubr.bf16.mxu0 %v20827_v0  ;;  %v11236_v19 = vadd.f32 %v18209_v3, %v10903_v20  ;;  %v10920_v3 = vld [vmem:[%s22521_s16 + $0xf8] sm:$0xff] }
 0x809   : > { %v18210_v4 = vpop.f32.mrb[42].mxu0  ;;  %11565 = vperm.xlu1 %19054, %v11223_v59   ;;  %v11228_v24 = vadd.f32 %v11227_v18, %v10901_v9  ;;  %v20249_v9 = vld [vmem:[%s22520_s25 + $0x40] sm:$0xff]  }
 0x80a   : > { %v11230_v31 = vpop.f32.mrb[43].mxu0  ;;  %v11239_v41 = vadd.f32 %v18210_v4, %v10904_v8  ;;  %v10921_v4 = vld [vmem:[%s22521_s16 + $0x100] sm:$0xff]  ;;  %v10923_v8 = vld [vmem:[%s22521_s16 + $0x110] sm:$0xff] }
 0x80b   : > { %11570 = vperm.xlu0 %19053, %v11228_v24   ;;  %v11231_v37 = vadd.f32 %v11230_v31, %v10902_v38 }
 0x80d   : > { %11575 = vperm.xlu1 %19054, %v11231_v37  }
 0x80e   : > { %17947 = vmatmul.mubr.msk.bf16.gmra.mrb[44].mxu1 %vm11988_vm3, %v20245_v7  ;;  %17979 = vmatmul.mubr.msk.bf16.gmra.mrb[108].mxu0 %vm11988_vm3, %v20245_v7  ;;  %v10922_v7 = vld [vmem:[%s22521_s16 + $0x108] sm:$0xff] }
 0x80f   : > { %v18213_v1 = vpop.f32.mrb[44].mxu0  ;;  %11580 = vperm.xlu0 %19053, %v11236_v19   ;;  %12183 = vmatprep.mubr.bf16.mxu1 %v20827_v0 }
 0x810   : > { %v11243_v25 = vpop.f32.mrb[45].mxu0  ;;  %12536 = vmatprep.mubr.bf16.mxu0 %v20827_v0  ;;  %v11252_v12 = vadd.f32 %v18213_v1, %v10907_v13  ;;  %v10924_v1 = vld [vmem:[%s22521_s16 + $0x118] sm:$0xff] }
 0x811   : > { %v18214_v42 = vpop.f32.mrb[46].mxu0  ;;  %11585 = vperm.xlu1 %19054, %v11239_v41   ;;  %v11244_v14 = vadd.f32 %v11243_v25, %v10905_v15  ;;  %v20250_v15 = vld [vmem:[%s22520_s25 + $0x48] sm:$0xff]  }
 0x812   : > { %v11246_v21 = vpop.f32.mrb[47].mxu0  ;;  %v11255_v23 = vadd.f32 %v18214_v42, %v10908_v28  ;;  %v10925_v42 = vld [vmem:[%s22521_s16 + $0x120] sm:$0xff]  ;;  %v10927_v28 = vld [vmem:[%s22521_s16 + $0x130] sm:$0xff] }
 0x813   : > { %11590 = vperm.xlu0 %19053, %v11244_v14   ;;  %v11247_v30 = vadd.f32 %v11246_v21, %v10906_v58 }
 0x815   : > { %11595 = vperm.xlu1 %19054, %v11247_v30  }
 0x816   : > { %17948 = vmatmul.mubr.msk.bf16.gmra.mrb[48].mxu1 %vm11988_vm3, %v20246_v22  ;;  %17980 = vmatmul.mubr.msk.bf16.gmra.mrb[112].mxu0 %vm11988_vm3, %v20246_v22  ;;  %v10926_v22 = vld [vmem:[%s22521_s16 + $0x128] sm:$0xff] }
 0x817   : > { %v18217_v33 = vpop.f32.mrb[48].mxu0  ;;  %11600 = vperm.xlu0 %19053, %v11252_v12   ;;  %12193 = vmatprep.mubr.bf16.mxu1 %v20827_v0 }
 0x818   : > { %v11259_v36 = vpop.f32.mrb[49].mxu0  ;;  %12546 = vmatprep.mubr.bf16.mxu0 %v20827_v0  ;;  %v11268_v2 = vadd.f32 %v18217_v33, %v10911_v29  ;;  %v10928_v33 = vld [vmem:[%s22521_s16 + $0x138] sm:$0xff] }
 0x819   : > { %v18218_v6 = vpop.f32.mrb[50].mxu0  ;;  %11605 = vperm.xlu1 %19054, %v11255_v23   ;;  %v11260_v16 = vadd.f32 %v11259_v36, %v10909_v32  ;;  %v20251_v32 = vld [vmem:[%s22520_s25 + $0x50] sm:$0xff]  }
 0x81a   : > { %v11262_v43 = vpop.f32.mrb[51].mxu0  ;;  %v11271_v48 = vadd.f32 %v18218_v6, %v10912_v46  ;;  %v10929_v6 = vld [vmem:[%s22521_s16 + $0x140] sm:$0xff]  ;;  %v10931_v46 = vld [vmem:[%s22521_s16 + $0x150] sm:$0xff] }
 0x81b   : > { %11610 = vperm.xlu0 %19053, %v11260_v16   ;;  %v11263_v47 = vadd.f32 %v11262_v43, %v10910_v57 }
 0x81d   : > { %11615 = vperm.xlu1 %19054, %v11263_v47  }
 0x81e   : > { %17949 = vmatmul.mubr.msk.bf16.gmra.mrb[52].mxu1 %vm11988_vm3, %v20247_v44  ;;  %17981 = vmatmul.mubr.msk.bf16.gmra.mrb[116].mxu0 %vm11988_vm3, %v20247_v44  ;;  %v10930_v44 = vld [vmem:[%s22521_s16 + $0x148] sm:$0xff] }
 0x81f   : > { %v18221_v50 = vpop.f32.mrb[52].mxu0  ;;  %11620 = vperm.xlu0 %19053, %v11268_v2   ;;  %12203 = vmatprep.mubr.bf16.mxu1 %v20827_v0 }
 0x820   : > { %v11275_v52 = vpop.f32.mrb[53].mxu0  ;;  %12556 = vmatprep.mubr.bf16.mxu0 %v20827_v0  ;;  %v11284_v45 = vadd.f32 %v18221_v50, %v10915_v54  ;;  %v10932_v50 = vld [vmem:[%s22521_s16 + $0x158] sm:$0xff] }
 0x821   : > { %v18222_v35 = vpop.f32.mrb[54].mxu0  ;;  %11625 = vperm.xlu1 %19054, %v11271_v48   ;;  %v11276_v55 = vadd.f32 %v11275_v52, %v10913_v49  ;;  %v20252_v49 = vld [vmem:[%s22520_s25 + $0x58] sm:$0xff]  }
 0x822   : > { %v11278_v56 = vpop.f32.mrb[55].mxu0  ;;  %v11287_v27 = vadd.f32 %v18222_v35, %v10916_v26  ;;  %v10933_v35 = vld [vmem:[%s22521_s16 + $0x160] sm:$0xff]  ;;  %v10935_v26 = vld [vmem:[%s22521_s16 + $0x170] sm:$0xff] }
 0x823   : > { %11630 = vperm.xlu0 %19053, %v11276_v55   ;;  %v11279_v5 = vadd.f32 %v11278_v56, %v10914_v53 }
 0x825   : > { %11635 = vperm.xlu1 %19054, %v11279_v5  }
 0x826   : > { %17950 = vmatmul.mubr.msk.bf16.gmra.mrb[56].mxu1 %vm11988_vm3, %v20248_v34  ;;  %17982 = vmatmul.mubr.msk.bf16.gmra.mrb[120].mxu0 %vm11988_vm3, %v20248_v34  ;;  %v10934_v34 = vld [vmem:[%s22521_s16 + $0x168] sm:$0xff] }
 0x827   : > { %v18225_v60 = vpop.f32.mrb[56].mxu0  ;;  %11640 = vperm.xlu0 %19053, %v11284_v45   ;;  %12213 = vmatprep.mubr.bf16.mxu1 %v20827_v0 }
 0x828   : > { %v11291_v40 = vpop.f32.mrb[57].mxu0  ;;  %12566 = vmatprep.mubr.bf16.mxu0 %v20827_v0  ;;  %v11300_v38 = vadd.f32 %v18225_v60, %v10919_v61  ;;  %v10936_v60 = vld [vmem:[%s22521_s16 + $0x178] sm:$0xff] }
 0x829   : > { %v18226_v62 = vpop.f32.mrb[58].mxu0  ;;  %11645 = vperm.xlu1 %19054, %v11287_v27   ;;  %v11292_v63 = vadd.f32 %v11291_v40, %v10917_v51  ;;  %v20253_v51 = vld [vmem:[%s22520_s25 + $0x60] sm:$0xff]  }
 0x82a   : > { %v11294_v59 = vpop.f32.mrb[59].mxu0  ;;  %v11303_v20 = vadd.f32 %v18226_v62, %v10920_v3  ;;  %v10937_v62 = vld [vmem:[%s22521_s16 + $0x180] sm:$0xff]  ;;  %v10939_v3 = vld [vmem:[%s22521_s16 + $0x190] sm:$0xff] }
 0x82b   : > { %11650 = vperm.xlu0 %19053, %v11292_v63   ;;  %v11295_v18 = vadd.f32 %v11294_v59, %v10918_v39 }
 0x82d   : > { %11655 = vperm.xlu1 %19054, %v11295_v18  }
 0x82e   : > { %17951 = vmatmul.mubr.msk.bf16.gmra.mrb[60].mxu1 %vm11988_vm3, %v20249_v9  ;;  %17983 = vmatmul.mubr.msk.bf16.gmra.mrb[124].mxu0 %vm11988_vm3, %v20249_v9  ;;  %v10938_v9 = vld [vmem:[%s22521_s16 + $0x188] sm:$0xff] }
 0x82f   : > { %v18229_v24 = vpop.f32.mrb[60].mxu0  ;;  %11660 = vperm.xlu0 %19053, %v11300_v38   ;;  %12223 = vmatprep.mubr.bf16.mxu1 %v20827_v0 }
 0x830   : > { %v11307_v31 = vpop.f32.mrb[61].mxu0  ;;  %12576 = vmatprep.mubr.bf16.mxu0 %v20827_v0  ;;  %v11316_v58 = vadd.f32 %v18229_v24, %v10923_v8  ;;  %v10940_v24 = vld [vmem:[%s22521_s16 + $0x198] sm:$0xff] }
 0x831   : > { %v18230_v37 = vpop.f32.mrb[62].mxu0  ;;  %11665 = vperm.xlu1 %19054, %v11303_v20   ;;  %v11308_v19 = vadd.f32 %v11307_v31, %v10921_v4  ;;  %v20254_v4 = vld [vmem:[%s22520_s25 + $0x68] sm:$0xff]  }
 0x832   : > { %v11310_v41 = vpop.f32.mrb[63].mxu0  ;;  %v11319_v13 = vadd.f32 %v18230_v37, %v10924_v1  ;;  %v10941_v37 = vld [vmem:[%s22521_s16 + $0x1a0] sm:$0xff]  ;;  %v10943_v1 = vld [vmem:[%s22521_s16 + $0x1b0] sm:$0xff] }
 0x833   : > { %11670 = vperm.xlu0 %19053, %v11308_v19   ;;  %v11311_v25 = vadd.f32 %v11310_v41, %v10922_v7 }
 0x835   : > { %11675 = vperm.xlu1 %19054, %v11311_v25  }
 0x836   : > { %17952 = vmatmul.mubr.msk.bf16.gmra.mrb[64].mxu1 %vm11988_vm3, %v20250_v15  ;;  %17984 = vmatmul.mubr.msk.bf16.gmra.mrb[128].mxu0 %vm11988_vm3, %v20250_v15  ;;  %v10942_v15 = vld [vmem:[%s22521_s16 + $0x1a8] sm:$0xff] }
 0x837   : > { %v18233_v14 = vpop.f32.mrb[64].mxu0  ;;  %11680 = vperm.xlu0 %19053, %v11316_v58   ;;  %12233 = vmatprep.mubr.bf16.mxu1 %v20827_v0 }
 0x838   : > { %v11323_v21 = vpop.f32.mrb[65].mxu0  ;;  %12586 = vmatprep.mubr.bf16.mxu0 %v20827_v0  ;;  %v11332_v57 = vadd.f32 %v18233_v14, %v10927_v28  ;;  %v10944_v14 = vld [vmem:[%s22521_s16 + $0x1b8] sm:$0xff] }
 0x839   : > { %v18234_v30 = vpop.f32.mrb[66].mxu0  ;;  %11685 = vperm.xlu1 %19054, %v11319_v13   ;;  %v11324_v12 = vadd.f32 %v11323_v21, %v10925_v42  ;;  %v20255_v42 = vld [vmem:[%s22520_s25 + $0x70] sm:$0xff]  }
 0x83a   : > { %v11326_v23 = vpop.f32.mrb[67].mxu0  ;;  %v11335_v29 = vadd.f32 %v18234_v30, %v10928_v33  ;;  %v10945_v30 = vld [vmem:[%s22521_s16 + $0x1c0] sm:$0xff]  ;;  %v10947_v33 = vld [vmem:[%s22521_s16 + $0x1d0] sm:$0xff] }
 0x83b   : > { %11690 = vperm.xlu0 %19053, %v11324_v12   ;;  %v11327_v36 = vadd.f32 %v11326_v23, %v10926_v22 }
 0x83d   : > { %11695 = vperm.xlu1 %19054, %v11327_v36  }
 0x83e   : > { %17953 = vmatmul.mubr.msk.bf16.gmra.mrb[68].mxu1 %vm11988_vm3, %v20251_v32  ;;  %17985 = vmatmul.mubr.msk.bf16.gmra.mrb[132].mxu0 %vm11988_vm3, %v20251_v32  ;;  %v10946_v32 = vld [vmem:[%s22521_s16 + $0x1c8] sm:$0xff] }
 0x83f   : > { %v18237_v16 = vpop.f32.mrb[68].mxu0  ;;  %11700 = vperm.xlu0 %19053, %v11332_v57   ;;  %12243 = vmatprep.mubr.bf16.mxu1 %v20827_v0 }
 0x840   : > { %v11339_v43 = vpop.f32.mrb[69].mxu0  ;;  %12596 = vmatprep.mubr.bf16.mxu0 %v20827_v0  ;;  %v11348_v53 = vadd.f32 %v18237_v16, %v10931_v46  ;;  %v10948_v16 = vld [vmem:[%s22521_s16 + $0x1d8] sm:$0xff] }
 0x841   : > { %v18238_v47 = vpop.f32.mrb[70].mxu0  ;;  %11705 = vperm.xlu1 %19054, %v11335_v29   ;;  %v11340_v2 = vadd.f32 %v11339_v43, %v10929_v6  ;;  %v20256_v6 = vld [vmem:[%s22520_s25 + $0x78] sm:$0xff]  }
 0x842   : > { %v11342_v48 = vpop.f32.mrb[71].mxu0  ;;  %v11351_v54 = vadd.f32 %v18238_v47, %v10932_v50  ;;  %v10949_v47 = vld [vmem:[%s22521_s16 + $0x1e0] sm:$0xff]  ;;  %v10951_v50 = vld [vmem:[%s22521_s16 + $0x1f0] sm:$0xff] }
 0x843   : > { %11710 = vperm.xlu0 %19053, %v11340_v2   ;;  %v11343_v52 = vadd.f32 %v11342_v48, %v10930_v44 }
 0x845   : > { %11715 = vperm.xlu1 %19054, %v11343_v52  }
 0x846   : > { %17954 = vmatmul.mubr.msk.bf16.gmra.mrb[72].mxu1 %vm11988_vm3, %v20252_v49  ;;  %17986 = vmatmul.mubr.msk.bf16.gmra.mrb[136].mxu0 %vm11988_vm3, %v20252_v49  ;;  %v10950_v49 = vld [vmem:[%s22521_s16 + $0x1e8] sm:$0xff] }
 0x847   : > { %v18241_v55 = vpop.f32.mrb[72].mxu0  ;;  %11720 = vperm.xlu0 %19053, %v11348_v53   ;;  %12253 = vmatprep.mubr.bf16.mxu1 %v20827_v0 }
 0x848   : > { %v11355_v56 = vpop.f32.mrb[73].mxu0  ;;  %12606 = vmatprep.mubr.bf16.mxu0 %v20827_v0  ;;  %v11364_v39 = vadd.f32 %v18241_v55, %v10935_v26  ;;  %v10952_v55 = vld [vmem:[%s22521_s16 + $0x1f8] sm:$0xff] }
 0x849   : > { %v18242_v5 = vpop.f32.mrb[74].mxu0  ;;  %11725 = vperm.xlu1 %19054, %v11351_v54   ;;  %v11356_v45 = vadd.f32 %v11355_v56, %v10933_v35  ;;  %v20257_v35 = vld [vmem:[%s22520_s25 + $0x80] sm:$0xff]  }
 0x84a   : > { %v11358_v27 = vpop.f32.mrb[75].mxu0  ;;  %v11367_v61 = vadd.f32 %v18242_v5, %v10936_v60  ;;  %v13319_v5 = vld [vmem:[%s22522_s22] sm:$0xff]  ;;  %v13322_v60 = vld [vmem:[%s22522_s22 + $0x18] sm:$0xff] }
 0x84b   : > { %11730 = vperm.xlu0 %19053, %v11356_v45   ;;  %v11359_v40 = vadd.f32 %v11358_v27, %v10934_v34  ;;  %v13320_v45 = vld [vmem:[%s22522_s22 + $0x8] sm:$0xff] }
 0x84c   : > { %v20258_v27 = vld [vmem:[%s22520_s25 + $0x88] sm:$0xff]  }
 0x84d   : > { %11735 = vperm.xlu1 %19054, %v11359_v40   ;;  %v13323_v40 = vld [vmem:[%s22522_s22 + $0x20] sm:$0xff] }
 0x84e   : > { %17955 = vmatmul.mubr.msk.bf16.gmra.mrb[76].mxu1 %vm11988_vm3, %v20253_v51  ;;  %17987 = vmatmul.mubr.msk.bf16.gmra.mrb[140].mxu0 %vm11988_vm3, %v20253_v51  ;;  %v13321_v51 = vld [vmem:[%s22522_s22 + $0x10] sm:$0xff] }
 0x84f   : > { %v18245_v63 = vpop.f32.mrb[76].mxu0  ;;  %11740 = vperm.xlu0 %19053, %v11364_v39   ;;  %12263 = vmatprep.mubr.bf16.mxu1 %v20827_v0  ;;  %v13324_v39 = vld [vmem:[%s22522_s22 + $0x28] sm:$0xff] }
 0x850   : > { %v11371_v59 = vpop.f32.mrb[77].mxu0  ;;  %12616 = vmatprep.mubr.bf16.mxu0 %v20827_v0  ;;  %v11380_v7 = vadd.f32 %v18245_v63, %v10939_v3  ;;  %v13326_v63 = vld [vmem:[%s22522_s22 + $0x38] sm:$0xff] }
 0x851   : > { %v18246_v18 = vpop.f32.mrb[78].mxu0  ;;  %11745 = vperm.xlu1 %19054, %v11367_v61   ;;  %v11372_v38 = vadd.f32 %v11371_v59, %v10937_v62  ;;  %v20259_v61 = vld [vmem:[%s22520_s25 + $0x90] sm:$0xff]   ;;  %v13327_v59 = vld [vmem:[%s22522_s22 + $0x40] sm:$0xff]  ;;  %v20260_v3 = vld [vmem:[%s22520_s25 + $0x98] sm:$0xff]  }
 0x852   : > { %v11374_v20 = vpop.f32.mrb[79].mxu0  ;;  %v11383_v8 = vadd.f32 %v18246_v18, %v10940_v24  ;;  %v13325_v62 = vld [vmem:[%s22522_s22 + $0x30] sm:$0xff]  ;;  %v20261_v24 = vld [vmem:[%s22520_s25 + $0xa0] sm:$0xff]  }
 0x853   : > { %11750 = vperm.xlu0 %19053, %v11372_v38   ;;  %v11375_v31 = vadd.f32 %v11374_v20, %v10938_v9  ;;  %v13328_v9 = vld [vmem:[%s22522_s22 + $0x48] sm:$0xff]  ;;  %v13329_v18 = vld [vmem:[%s22522_s22 + $0x50] sm:$0xff]  ;;  %v13330_v38 = vld [vmem:[%s22522_s22 + $0x58] sm:$0xff] }
 0x854   : > { %v13331_v20 = vld [vmem:[%s22522_s22 + $0x60] sm:$0xff] }
 0x855   : > { %11755 = vperm.xlu1 %19054, %v11375_v31   ;;  %v13333_v31 = vld [vmem:[%s22522_s22 + $0x70] sm:$0xff] }
 0x856   : > { %17956 = vmatmul.mubr.msk.bf16.gmra.mrb[80].mxu1 %vm11988_vm3, %v20254_v4  ;;  %17988 = vmatmul.mubr.msk.bf16.gmra.mrb[144].mxu0 %vm11988_vm3, %v20254_v4  ;;  %v13332_v4 = vld [vmem:[%s22522_s22 + $0x68] sm:$0xff] }
 0x857   : > { %v18249_v19 = vpop.f32.mrb[80].mxu0  ;;  %11760 = vperm.xlu0 %19053, %v11380_v7   ;;  %12273 = vmatprep.mubr.bf16.mxu1 %v20827_v0  ;;  %v13334_v7 = vld [vmem:[%s22522_s22 + $0x78] sm:$0xff] }
 0x858   : > { %v11387_v41 = vpop.f32.mrb[81].mxu0  ;;  %12626 = vmatprep.mubr.bf16.mxu0 %v20827_v0  ;;  %v11396_v22 = vadd.f32 %v18249_v19, %v10943_v1  ;;  %v13336_v19 = vld [vmem:[%s22522_s22 + $0x88] sm:$0xff]  ;;  %v13337_v1 = vld [vmem:[%s22522_s22 + $0x90] sm:$0xff] }
 0x859   : > { %v18250_v25 = vpop.f32.mrb[82].mxu0  ;;  %11765 = vperm.xlu1 %19054, %v11383_v8   ;;  %v11388_v58 = vadd.f32 %v11387_v41, %v10941_v37  ;;  %v13335_v37 = vld [vmem:[%s22522_s22 + $0x80] sm:$0xff]  ;;  %v20262_v41 = vld [vmem:[%s22520_s25 + $0xa8] sm:$0xff]  }
 0x85a   : > { %v11390_v13 = vpop.f32.mrb[83].mxu0  ;;  %v11399_v28 = vadd.f32 %v18250_v25, %v10944_v14  ;;  %v13340_v14 = vld [vmem:[%s22522_s22 + $0xa8] sm:$0xff] }
 0x85b   : > { %11770 = vperm.xlu0 %19053, %v11388_v58   ;;  %v11391_v21 = vadd.f32 %v11390_v13, %v10942_v15  ;;  %v13338_v58 = vld [vmem:[%s22522_s22 + $0x98] sm:$0xff]  ;;  %v13339_v13 = vld [vmem:[%s22522_s22 + $0xa0] sm:$0xff] }
 0x85d   : > { %11775 = vperm.xlu1 %19054, %v11391_v21   ;;  %v20263_v21 = vld [vmem:[%s22520_s25 + $0xb0] sm:$0xff]  }
 0x85e   : > { %17957 = vmatmul.mubr.msk.bf16.gmra.mrb[84].mxu1 %vm11988_vm3, %v20255_v42  ;;  %17989 = vmatmul.mubr.msk.bf16.gmra.mrb[148].mxu0 %vm11988_vm3, %v20255_v42 }
 0x85f   : > { %v18253_v12 = vpop.f32.mrb[84].mxu0  ;;  %11780 = vperm.xlu0 %19053, %v11396_v22   ;;  %12283 = vmatprep.mubr.bf16.mxu1 %v20827_v0 }
 0x860   : > { %v11403_v23 = vpop.f32.mrb[85].mxu0  ;;  %12636 = vmatprep.mubr.bf16.mxu0 %v20827_v0  ;;  %v11412_v44 = vadd.f32 %v18253_v12, %v10947_v33  ;;  %v13344_v33 = vld [vmem:[%s22522_s22 + $0xc8] sm:$0xff] }
 0x861   : > { %v18254_v36 = vpop.f32.mrb[86].mxu0  ;;  %11785 = vperm.xlu1 %19054, %v11399_v28   ;;  %v11404_v57 = vadd.f32 %v11403_v23, %v10945_v30  ;;  %v13341_v28 = vld [vmem:[%s22522_s22 + $0xb0] sm:$0xff]  ;;  %v13342_v30 = vld [vmem:[%s22522_s22 + $0xb8] sm:$0xff]  ;;  %v13343_v23 = vld [vmem:[%s22522_s22 + $0xc0] sm:$0xff] }
 0x862   : > { %v11406_v29 = vpop.f32.mrb[87].mxu0  ;;  %v11415_v46 = vadd.f32 %v18254_v36, %v10948_v16  ;;  %v20264_v36 = vld [vmem:[%s22520_s25 + $0xb8] sm:$0xff]  }
 0x863   : > { %11790 = vperm.xlu0 %19053, %v11404_v57   ;;  %v11407_v43 = vadd.f32 %v11406_v29, %v10946_v32  ;;  %v13345_v57 = vld [vmem:[%s22522_s22 + $0xd0] sm:$0xff] }
 0x865   : > { %11795 = vperm.xlu1 %19054, %v11407_v43   ;;  %v13347_v43 = vld [vmem:[%s22522_s22 + $0xe0] sm:$0xff] }
 0x866   : > { %17958 = vmatmul.mubr.msk.bf16.gmra.mrb[88].mxu1 %vm11988_vm3, %v20256_v6  ;;  %17990 = vmatmul.mubr.msk.bf16.gmra.mrb[152].mxu0 %vm11988_vm3, %v20256_v6  ;;  %v13346_v6 = vld [vmem:[%s22522_s22 + $0xd8] sm:$0xff] }
 0x867   : > { %v18257_v2 = vpop.f32.mrb[88].mxu0  ;;  %11800 = vperm.xlu0 %19053, %v11412_v44   ;;  %12293 = vmatprep.mubr.bf16.mxu1 %v20827_v0  ;;  %v13348_v44 = vld [vmem:[%s22522_s22 + $0xe8] sm:$0xff] }
 0x868   : > { %v11419_v48 = vpop.f32.mrb[89].mxu0  ;;  %12646 = vmatprep.mubr.bf16.mxu0 %v20827_v0  ;;  %v11428_v34 = vadd.f32 %v18257_v2, %v10951_v50  ;;  %v13349_v2 = vld [vmem:[%s22522_s22 + $0xf0] sm:$0xff]  ;;  %v13351_v50 = vld [vmem:[%s22522_s22 + $0x100] sm:$0xff] }
 0x869   : > { %v18258_v52 = vpop.f32.mrb[90].mxu0  ;;  %11805 = vperm.xlu1 %19054, %v11415_v46   ;;  %v11420_v53 = vadd.f32 %v11419_v48, %v10949_v47  ;;  %v20265_v46 = vld [vmem:[%s22520_s25 + $0xc0] sm:$0xff]  }
 0x86a   : > { %v11422_v54 = vpop.f32.mrb[91].mxu0  ;;  %v11431_v26 = vadd.f32 %v18258_v52, %v10952_v55  ;;  %v13353_v55 = vld [vmem:[%s22522_s22 + $0x110] sm:$0xff] }
 0x86b   : > { %11810 = vperm.xlu0 %19053, %v11420_v53   ;;  %v11423_v56 = vadd.f32 %v11422_v54, %v10950_v49  ;;  %v13350_v49 = vld [vmem:[%s22522_s22 + $0xf8] sm:$0xff]  ;;  %v13352_v53 = vld [vmem:[%s22522_s22 + $0x108] sm:$0xff] }
 0x86c   : > { %v20266_v54 = vld [vmem:[%s22520_s25 + $0xc8] sm:$0xff]  }
 0x86d   : > { %11815 = vperm.xlu1 %19054, %v11423_v56   ;;  %v13354_v56 = vld [vmem:[%s22522_s22 + $0x118] sm:$0xff] }
 0x86e   : > { %17959 = vmatmul.mubr.msk.bf16.gmra.mrb[92].mxu1 %vm11988_vm3, %v20257_v35  ;;  %17991 = vmatmul.mubr.msk.bf16.gmra.mrb[156].mxu0 %vm11988_vm3, %v20257_v35 }
 0x86f   : > { %11820 = vperm.xlu0 %19053, %v11428_v34   ;;  %12303 = vmatprep.mubr.bf16.mxu1 %v20827_v0 }
 0x870   : > { %12656 = vmatprep.mubr.bf16.mxu0 %v20827_v0 }
 0x871   : > { %11825 = vperm.xlu1 %19054, %v11431_v26   ;;  %v21928_v15 = vpop.permute.xlu1 %11520  ;;  %v13355_v26 = vld [vmem:[%s22522_s22 + $0x120] sm:$0xff] }
 0x872   : > { %v21915_v8 = vpop.permute.xlu0 %11510 }
 0x873   : > { %13385 = vperm.xlu0 %19053, %v13319_v5  }
 0x875   : > { %13390 = vperm.xlu1 %19054, %v13320_v45   ;;  %v13356_v45 = vld [vmem:[%s22522_s22 + $0x128] sm:$0xff] }
 0x876   : > { %17960 = vmatmul.mubr.msk.bf16.gmra.mrb[96].mxu1 %vm11988_vm3, %v20258_v27  ;;  %17992 = vmatmul.mubr.msk.bf16.gmra.mrb[160].mxu0 %vm11988_vm3, %v20258_v27  ;;  %v21933_v25 = vpop.permute.xlu0 %11515  ;;  %v21945_v42 = vpop.permute.xlu1 %11525  ;;  %v20267_v27 = vld [vmem:[%s22520_s25 + $0xd0] sm:$0xff]  }
 0x877   : > { %13395 = vperm.xlu0 %19053, %v13321_v51   ;;  %12313 = vmatprep.mubr.bf16.mxu1 %v20827_v0  ;;  %v13357_v51 = vld [vmem:[%s22522_s22 + $0x130] sm:$0xff] }
 0x878   : > { %12666 = vmatprep.mubr.bf16.mxu0 %v20827_v0 }
 0x879   : > { %13400 = vperm.xlu1 %19054, %v13322_v60  }
 0x87a   : > { %v21953_v22 = vpop.permute.xlu0 %11530 }
 0x87b   : > { %13405 = vperm.xlu0 %19053, %v13323_v40   ;;  %v13358_v40 = vld [vmem:[%s22522_s22 + $0x138] sm:$0xff] }
 0x87c   : > { %v21963_v12 = vpop.permute.xlu1 %11535 }
 0x87d   : > { %13410 = vperm.xlu1 %19054, %v13324_v39  }
 0x87e   : > { %17961 = vmatmul.mubr.msk.bf16.gmra.mrb[100].mxu1 %vm11988_vm3, %v20259_v61  ;;  %17993 = vmatmul.mubr.msk.bf16.gmra.mrb[164].mxu0 %vm11988_vm3, %v20259_v61  ;;  %v21970_v32 = vpop.permute.xlu0 %11540  ;;  %v13359_v61 = vld [vmem:[%s22522_s22 + $0x140] sm:$0xff] }
 0x87f   : > { %13415 = vperm.xlu0 %19053, %v13325_v62   ;;  %12323 = vmatprep.mubr.bf16.mxu1 %v20827_v0 }
 0x880   : > { %12676 = vmatprep.mubr.bf16.mxu0 %v20827_v0  ;;  %v21981_v29 = vpop.permute.xlu1 %11545 }
 0x881   : > { %13420 = vperm.xlu1 %19054, %v13326_v63  }
 0x882   : > { %v21988_v16 = vpop.permute.xlu0 %11550 }
 0x883   : > { %13425 = vperm.xlu0 %19053, %v13327_v59  }
 0x884   : > { %v22001_v47 = vpop.permute.xlu1 %11555 }
 0x885   : > { %13430 = vperm.xlu1 %19054, %v13328_v9  }
 0x886   : > { %17962 = vmatmul.mubr.msk.bf16.gmra.mrb[104].mxu1 %vm11988_vm3, %v20260_v3  ;;  %17994 = vmatmul.mubr.msk.bf16.gmra.mrb[168].mxu0 %vm11988_vm3, %v20260_v3  ;;  %v22006_v48 = vpop.permute.xlu0 %11560 }
 0x887   : > { %13435 = vperm.xlu0 %19053, %v13329_v18   ;;  %12333 = vmatprep.mubr.bf16.mxu1 %v20827_v0 }
 0x888   : > { %12686 = vmatprep.mubr.bf16.mxu0 %v20827_v0  ;;  %v22018_v52 = vpop.permute.xlu1 %11565 }
 0x889   : > { %13440 = vperm.xlu1 %19054, %v13330_v38   ;;  %v13360_v38 = vld [vmem:[%s22522_s22 + $0x148] sm:$0xff] }
 0x88a   : > { %v22026_v35 = vpop.permute.xlu0 %11570 }
 0x88b   : > { %13445 = vperm.xlu0 %19053, %v13331_v20   ;;  %v20268_v20 = vld [vmem:[%s22520_s25 + $0xd8] sm:$0xff]  }
 0x88c   : > { %v22036_v34 = vpop.permute.xlu1 %11575 }
 0x88d   : > { %13450 = vperm.xlu1 %19054, %v13332_v4  }
 0x88e   : > { %17963 = vmatmul.mubr.msk.bf16.gmra.mrb[108].mxu1 %vm11988_vm3, %v20261_v24  ;;  %17995 = vmatmul.mubr.msk.bf16.gmra.mrb[172].mxu0 %vm11988_vm3, %v20261_v24  ;;  %v22043_v5 = vpop.permute.xlu0 %11580 }
 0x88f   : > { %13455 = vperm.xlu0 %19053, %v13333_v31   ;;  %12343 = vmatprep.mubr.bf16.mxu1 %v20827_v0 }
 0x890   : > { %12696 = vmatprep.mubr.bf16.mxu0 %v20827_v0  ;;  %v22054_v60 = vpop.permute.xlu1 %11585 }
 0x891   : > { %13460 = vperm.xlu1 %19054, %v13334_v7  }
 0x892   : > { %v22061_v39 = vpop.permute.xlu0 %11590 }
 0x893   : > { %13465 = vperm.xlu0 %19053, %v13335_v37  }
 0x894   : > { %v22076_v4 = vpop.permute.xlu1 %11595 }
 0x895   : > { %13470 = vperm.xlu1 %19054, %v13336_v19  }
 0x896   : > { %17964 = vmatmul.mubr.msk.bf16.gmra.mrb[112].mxu1 %vm11988_vm3, %v20262_v41  ;;  %17996 = vmatmul.mubr.msk.bf16.gmra.mrb[176].mxu0 %vm11988_vm3, %v20262_v41 }
 0x897   : > { %13475 = vperm.xlu0 %19053, %v13337_v1   ;;  %12353 = vmatprep.mubr.bf16.mxu1 %v20827_v0  ;;  %v13361_v1 = vld [vmem:[%s22522_s22 + $0x150] sm:$0xff] }
 0x898   : > { %12706 = vmatprep.mubr.bf16.mxu0 %v20827_v0 }
 0x899   : > { %13480 = vperm.xlu1 %19054, %v13338_v58   ;;  %v22084_v58 = vpop.permute.xlu0 %11600 }
 0x89b   : > { %13485 = vperm.xlu0 %19053, %v13339_v13  }
 0x89d   : > { %13490 = vperm.xlu1 %19054, %v13340_v14  }
 0x89e   : > { %17965 = vmatmul.mubr.msk.bf16.gmra.mrb[116].mxu1 %vm11988_vm3, %v20263_v21  ;;  %17997 = vmatmul.mubr.msk.bf16.gmra.mrb[180].mxu0 %vm11988_vm3, %v20263_v21 }
 0x89f   : > { %13495 = vperm.xlu0 %19053, %v13341_v28   ;;  %12363 = vmatprep.mubr.bf16.mxu1 %v20827_v0 }
 0x8a0   : > { %12716 = vmatprep.mubr.bf16.mxu0 %v20827_v0 }
 0x8a1   : > { %13500 = vperm.xlu1 %19054, %v13342_v30  }
 0x8a3   : > { %13505 = vperm.xlu0 %19053, %v13343_v23  }
 0x8a5   : > { %13510 = vperm.xlu1 %19054, %v13344_v33  }
 0x8a6   : > { %17966 = vmatmul.mubr.msk.bf16.gmra.mrb[120].mxu1 %vm11988_vm3, %v20264_v36  ;;  %17998 = vmatmul.mubr.msk.bf16.gmra.mrb[184].mxu0 %vm11988_vm3, %v20264_v36  ;;  %v13362_v36 = vld [vmem:[%s22522_s22 + $0x158] sm:$0xff] }
 0x8a7   : > { %13515 = vperm.xlu0 %19053, %v13345_v57   ;;  %12373 = vmatprep.mubr.bf16.mxu1 %v20827_v0 }
 0x8a8   : > { %12726 = vmatprep.mubr.bf16.mxu0 %v20827_v0 }
 0x8a9   : > { %13520 = vperm.xlu1 %19054, %v13346_v6  }
 0x8ab   : > { %13525 = vperm.xlu0 %19053, %v13347_v43  }
 0x8ad   : > { %13530 = vperm.xlu1 %19054, %v13348_v44  }
 0x8ae   : > { %17967 = vmatmul.mubr.msk.bf16.gmra.mrb[124].mxu1 %vm11988_vm3, %v20265_v46  ;;  %17999 = vmatmul.mubr.msk.bf16.gmra.mrb[188].mxu0 %vm11988_vm3, %v20265_v46 }
 0x8af   : > { %13535 = vperm.xlu0 %19053, %v13349_v2   ;;  %12383 = vmatprep.mubr.bf16.mxu1 %v20827_v0  ;;  %v22099_v2 = vpop.permute.xlu1 %11605 }
 0x8b0   : > { %12736 = vmatprep.mubr.bf16.mxu0 %v20827_v0 }
 0x8b1   : > { %13540 = vperm.xlu1 %19054, %v13350_v49  }
 0x8b3   : > { %13545 = vperm.xlu0 %19053, %v13351_v50  }
 0x8b5   : > { %13550 = vperm.xlu1 %19054, %v13352_v53  }
 0x8b6   : > { %17968 = vmatmul.mubr.msk.bf16.gmra.mrb[128].mxu1 %vm11988_vm3, %v20266_v54  ;;  %18000 = vmatmul.mubr.msk.bf16.gmra.mrb[192].mxu0 %vm11988_vm3, %v20266_v54 }
 0x8b7   : > { %13555 = vperm.xlu0 %19053, %v13353_v55   ;;  %12393 = vmatprep.mubr.bf16.mxu1 %v20827_v0 }
 0x8b8   : > { %12746 = vmatprep.mubr.bf16.mxu0 %v20827_v0 }
 0x8b9   : > { %13560 = vperm.xlu1 %19054, %v13354_v56  }
 0x8bb   : > { %13565 = vperm.xlu0 %19053, %v13355_v26   ;;  %v13364_v26 = vld [vmem:[%s22522_s22 + $0x168] sm:$0xff] }
 0x8bd   : > { %13570 = vperm.xlu1 %19054, %v13356_v45   ;;  %v20269_v45 = vld [vmem:[%s22520_s25 + $0xe0] sm:$0xff]  }
 0x8be   : > { %17969 = vmatmul.mubr.msk.bf16.gmra.mrb[132].mxu1 %vm11988_vm3, %v20267_v27  ;;  %18001 = vmatmul.mubr.msk.bf16.gmra.mrb[196].mxu0 %vm11988_vm3, %v20267_v27  ;;  %v22107_v27 = vpop.permute.xlu0 %11610 }
 0x8bf   : > { %13575 = vperm.xlu0 %19053, %v13357_v51   ;;  %12403 = vmatprep.mubr.bf16.mxu1 %v20827_v0 }
 0x8c0   : > { %12756 = vmatprep.mubr.bf16.mxu0 %v20827_v0 }
 0x8c1   : > { %v12135_v62 = vpop.f32.mrb[28].mxu1  ;;  %v12488_v63 = vpop.f32.mrb[92].mxu0  ;;  %13580 = vperm.xlu1 %19054, %v13358_v40  }
 0x8c2   : > { %v12136_v59 = vadd.f32 %v12135_v62, %v21915_v8  ;;  %v12489_v9 = vadd.f32 %v12488_v63, %v21915_v8  ;;  %v12137_v3 = vpop.f32.mrb[29].mxu1  ;;  %v12490_v18 = vpop.f32.mrb[93].mxu0 }
 0x8c3   : > { %v12138_v24 = vadd.f32 %v12137_v3, %v21915_v8  ;;  %v12491_v31 = vadd.f32 %v12490_v18, %v21915_v8  ;;  %v12139_v7 = vpop.f32.mrb[30].mxu1  ;;  %13585 = vperm.xlu0 %19053, %v13359_v61   ;;  %v12492_v19 = vpop.f32.mrb[94].mxu0  ;;  %v13365_v3 = vld [vmem:[%s22522_s22 + $0x170] sm:$0xff] }
 0x8c4   : > { %v12140_v37 = vadd.f32 %v12139_v7, %v21933_v25  ;;  %v12141_v41 = vpop.f32.mrb[31].mxu1  ;;  %v12809_v13 = vmax.f32 %v12489_v9, 0.0  ;;  %v12493_v14 = vadd.f32 %v12492_v19, %v21933_v25  ;;  %v12494_v28 = vpop.f32.mrb[95].mxu0  ;;  %v12807_v8 = vmax.f32 %v12136_v59, 0.0  ;;  %v13366_v19 = vld [vmem:[%s22522_s22 + $0x178] sm:$0xff] }
 0x8c5   : > { %v12142_v21 = vadd.f32 %v12141_v41, %v21933_v25  ;;  %13590 = vperm.xlu1 %19054, %v13360_v38   ;;  %v12810_v30 = vmax.f32 %v12491_v31, 0.0  ;;  %v12495_v33 = vadd.f32 %v12494_v28, %v21933_v25  ;;  %v12808_v57 = vmax.f32 %v12138_v24, 0.0  ;;  %v13363_v25 = vld [vmem:[%s22522_s22 + $0x160] sm:$0xff] }
 0x8c6   : > { %v12811_v23 = vmax.f32 %v12140_v37, 0.0  ;;  %17970 = vmatmul.mubr.msk.bf16.gmra.mrb[136].mxu1 %vm11988_vm3, %v20268_v20  ;;  %18002 = vmatmul.mubr.msk.bf16.gmra.mrb[200].mxu0 %vm11988_vm3, %v20268_v20  ;;  %v12813_v6 = vmax.f32 %v12493_v14, 0.0 }
 0x8c7   : > { %v12812_v43 = vmax.f32 %v12142_v21, 0.0  ;;  %13595 = vperm.xlu0 %19053, %v13361_v1   ;;  %12413 = vmatprep.mubr.bf16.mxu1 %v20827_v0  ;;  %v12814_v46 = vmax.f32 %v12495_v33, 0.0 }
 0x8c8   : > { %v13191_v44 = vpack.c.bf16 %v12811_v23, %v12807_v8  ;;  %12766 = vmatprep.mubr.bf16.mxu0 %v20827_v0  ;;  %v13193_v49 = vpack.c.bf16 %v12813_v6, %v12809_v13 }
 0x8c9   : > { %v12145_v50 = vpop.f32.mrb[32].mxu1  ;;  %13600 = vperm.xlu1 %19054, %v13362_v36   ;;  %v13192_v53 = vpack.c.bf16 %v12812_v43, %v12808_v57  ;;  %v12498_v54 = vpop.f32.mrb[96].mxu0  ;;  %v13194_v56 = vpack.c.bf16 %v12814_v46, %v12810_v30  ;;  %v20270_v46 = vld [vmem:[%s22520_s25 + $0xe8] sm:$0xff]  }
 0x8ca   : > { %v12147_v55 = vpop.f32.mrb[33].mxu1  ;;  %v12146_v51 = vadd.f32 %v12145_v50, %v21928_v15  ;;  %v12499_v40 = vadd.f32 %v12498_v54, %v21928_v15  ;;  %v12500_v61 = vpop.f32.mrb[97].mxu0 }
 0x8cb   : > { %14343 = vmatprep.subr.bf16.mxu1 %v13192_v53  ;;  %13605 = vperm.xlu0 %19053, %v13363_v25   ;;  %v12148_v62 = vadd.f32 %v12147_v55, %v21928_v15  ;;  %v12501_v63 = vadd.f32 %v12500_v61, %v21928_v15  ;;  %v12149_v59 = vpop.f32.mrb[34].mxu1  ;;  %v12502_v9 = vpop.f32.mrb[98].mxu0  ;;  %v13368_v53 = vld [vmem:[%s22522_s22 + $0x188] sm:$0xff] }
 0x8cc   : > { %15049 = vmatprep.subr.bf16.mxu0 %v13194_v56  ;;  %14344 = vmatpush1.bf16.msra.mxu1 %v13191_v44  ;;  %v12817_v18 = vmax.f32 %v12499_v40, 0.0  ;;  %v12150_v38 = vadd.f32 %v12149_v59, %v21945_v42  ;;  %v12503_v20 = vadd.f32 %v12502_v9, %v21945_v42  ;;  %v12151_v24 = vpop.f32.mrb[35].mxu1  ;;  %v12504_v31 = vpop.f32.mrb[99].mxu0  ;;  %v12815_v41 = vmax.f32 %v12146_v51, 0.0 }
 0x8cd   : > { %15050 = vmatpush1.bf16.msra.mxu0 %v13193_v49  ;;  %13610 = vperm.xlu1 %19054, %v13364_v26   ;;  %v12818_v7 = vmax.f32 %v12501_v63, 0.0  ;;  %v12152_v15 = vadd.f32 %v12151_v24, %v21945_v42  ;;  %v12505_v37 = vadd.f32 %v12504_v31, %v21945_v42  ;;  %v12816_v14 = vmax.f32 %v12148_v62, 0.0  ;;  %v13367_v42 = vld [vmem:[%s22522_s22 + $0x180] sm:$0xff]  ;;  %v22130_v36 = vpop.permute.xlu1 %11615  ;;  %v22136_v25 = vpop.permute.xlu0 %11620 }
 0x8ce   : > { %17971 = vmatmul.mubr.msk.bf16.gmra.mrb[140].mxu1 %vm11988_vm3, %v20269_v45  ;;  %18003 = vmatmul.mubr.msk.bf16.gmra.mrb[204].mxu0 %vm11988_vm3, %v20269_v45  ;;  %v12819_v1 = vmax.f32 %v12150_v38, 0.0  ;;  %v12821_v13 = vmax.f32 %v12503_v20, 0.0  ;;  %v13369_v45 = vld [vmem:[%s22522_s22 + $0x190] sm:$0xff]  ;;  %v13370_v20 = vld [vmem:[%s22522_s22 + $0x198] sm:$0xff] }
 0x8cf   : > { %13615 = vperm.xlu0 %19053, %v13365_v3   ;;  %12423 = vmatprep.mubr.bf16.mxu1 %v20827_v0  ;;  %v12820_v21 = vmax.f32 %v12152_v15, 0.0  ;;  %v12822_v28 = vmax.f32 %v12505_v37, 0.0 }
 0x8d0   : > { %12776 = vmatprep.mubr.bf16.mxu0 %v20827_v0  ;;  %v13195_v8 = vpack.c.bf16 %v12819_v1, %v12815_v41  ;;  %v13197_v30 = vpack.c.bf16 %v12821_v13, %v12817_v18 }
 0x8d1   : > { %v12155_v23 = vpop.f32.mrb[36].mxu1  ;;  %v12508_v33 = vpop.f32.mrb[100].mxu0  ;;  %13620 = vperm.xlu1 %19054, %v13366_v19   ;;  %v13198_v57 = vpack.c.bf16 %v12822_v28, %v12818_v7  ;;  %v13196_v44 = vpack.c.bf16 %v12820_v21, %v12816_v14 }
 0x8d2   : > { %v12509_v6 = vadd.f32 %v12508_v33, %v21953_v22  ;;  %v12157_v43 = vpop.f32.mrb[37].mxu1  ;;  %v12156_v49 = vadd.f32 %v12155_v23, %v21953_v22  ;;  %v12510_v50 = vpop.f32.mrb[101].mxu0  ;;  %v13372_v33 = vld [vmem:[%s22522_s22 + $0x1a8] sm:$0xff] }
 0x8d3   : > { %13625 = vperm.xlu0 %19053, %v13367_v42   ;;  %v12158_v54 = vadd.f32 %v12157_v43, %v21953_v22  ;;  %v12511_v55 = vadd.f32 %v12510_v50, %v21953_v22  ;;  %v12159_v56 = vpop.f32.mrb[38].mxu1  ;;  %v12512_v26 = vpop.f32.mrb[102].mxu0  ;;  %14345 = vmatprep.subr.bf16.mxu1 %v13196_v44  ;;  %v20271_v42 = vld [vmem:[%s22520_s25 + $0xf0] sm:$0xff]  }
 0x8d4   : > { %15051 = vmatprep.subr.bf16.mxu0 %v13198_v57  ;;  %v12825_v51 = vmax.f32 %v12509_v6, 0.0  ;;  %v12160_v40 = vadd.f32 %v12159_v56, %v21963_v12  ;;  %v12513_v61 = vadd.f32 %v12512_v26, %v21963_v12  ;;  %v12161_v62 = vpop.f32.mrb[39].mxu1  ;;  %v12514_v63 = vpop.f32.mrb[103].mxu0  ;;  %14346 = vmatpush1.bf16.msra.mxu1 %v13195_v8  ;;  %v12823_v3 = vmax.f32 %v12156_v49, 0.0 }
 0x8d5   : > { %15052 = vmatpush1.bf16.msra.mxu0 %v13197_v30  ;;  %v12826_v59 = vmax.f32 %v12511_v55, 0.0  ;;  %v12162_v22 = vadd.f32 %v12161_v62, %v21963_v12  ;;  %v12515_v9 = vadd.f32 %v12514_v63, %v21963_v12  ;;  %13630 = vperm.xlu1 %19054, %v13368_v53   ;;  %v12824_v24 = vmax.f32 %v12158_v54, 0.0  ;;  %v13371_v12 = vld [vmem:[%s22522_s22 + $0x1a0] sm:$0xff]  ;;  %v22161_v1 = vpop.permute.xlu1 %11625  ;;  %v22167_v8 = vpop.permute.xlu0 %11630 }
 0x8d6   : > { %17972 = vmatmul.mubr.msk.bf16.gmra.mrb[144].mxu1 %vm11988_vm3, %v20270_v46  ;;  %v12827_v18 = vmax.f32 %v12160_v40, 0.0  ;;  %v12829_v38 = vmax.f32 %v12513_v61, 0.0  ;;  %18004 = vmatmul.mubr.msk.bf16.gmra.mrb[208].mxu0 %vm11988_vm3, %v20270_v46  ;;  %v13373_v46 = vld [vmem:[%s22522_s22 + $0x1b0] sm:$0xff]  ;;  %v13374_v61 = vld [vmem:[%s22522_s22 + $0x1b8] sm:$0xff] }
 0x8d7   : > { %13635 = vperm.xlu0 %19053, %v13369_v45   ;;  %v12828_v31 = vmax.f32 %v12162_v22, 0.0  ;;  %v12830_v7 = vmax.f32 %v12515_v9, 0.0  ;;  %12433 = vmatprep.mubr.bf16.mxu1 %v20827_v0 }
 0x8d8   : > { %12786 = vmatprep.mubr.bf16.mxu0 %v20827_v0  ;;  %v13199_v15 = vpack.c.bf16 %v12827_v18, %v12823_v3  ;;  %v13201_v37 = vpack.c.bf16 %v12829_v38, %v12825_v51 }
 0x8d9   : > { %v12165_v19 = vpop.f32.mrb[40].mxu1  ;;  %v12518_v41 = vpop.f32.mrb[104].mxu0  ;;  %v13202_v13 = vpack.c.bf16 %v12830_v7, %v12826_v59  ;;  %13640 = vperm.xlu1 %19054, %v13370_v20   ;;  %v13200_v28 = vpack.c.bf16 %v12828_v31, %v12824_v24 }
 0x8da   : > { %v12519_v14 = vadd.f32 %v12518_v41, %v21970_v32  ;;  %v12167_v21 = vpop.f32.mrb[41].mxu1  ;;  %v12166_v30 = vadd.f32 %v12165_v19, %v21970_v32  ;;  %v12520_v23 = vpop.f32.mrb[105].mxu0  ;;  %v13376_v19 = vld [vmem:[%s22522_s22 + $0x1c8] sm:$0xff] }
 0x8db   : > { %13645 = vperm.xlu0 %19053, %v13371_v12   ;;  %v12168_v57 = vadd.f32 %v12167_v21, %v21970_v32  ;;  %v12521_v6 = vadd.f32 %v12520_v23, %v21970_v32  ;;  %v12169_v43 = vpop.f32.mrb[42].mxu1  ;;  %v12522_v44 = vpop.f32.mrb[106].mxu0  ;;  %14347 = vmatprep.subr.bf16.mxu1 %v13200_v28  ;;  %v20272_v12 = vld [vmem:[%s22520_s25 + $0xf8] sm:$0xff]   ;;  %v13377_v28 = vld [vmem:[%s22522_s22 + $0x1d0] sm:$0xff] }
 0x8dc   : > { %15053 = vmatprep.subr.bf16.mxu0 %v13202_v13  ;;  %v12833_v49 = vmax.f32 %v12519_v14, 0.0  ;;  %v12170_v50 = vadd.f32 %v12169_v43, %v21981_v29  ;;  %v12523_v53 = vadd.f32 %v12522_v44, %v21981_v29  ;;  %v12171_v54 = vpop.f32.mrb[43].mxu1  ;;  %v12524_v55 = vpop.f32.mrb[107].mxu0  ;;  %14348 = vmatpush1.bf16.msra.mxu1 %v13199_v15  ;;  %v12831_v45 = vmax.f32 %v12166_v30, 0.0 }
 0x8dd   : > { %15054 = vmatpush1.bf16.msra.mxu0 %v13201_v37  ;;  %v12834_v56 = vmax.f32 %v12521_v6, 0.0  ;;  %v12172_v32 = vadd.f32 %v12171_v54, %v21981_v29  ;;  %v12525_v26 = vadd.f32 %v12524_v55, %v21981_v29  ;;  %13650 = vperm.xlu1 %19054, %v13372_v33   ;;  %v12832_v62 = vmax.f32 %v12168_v57, 0.0  ;;  %v13375_v29 = vld [vmem:[%s22522_s22 + $0x1c0] sm:$0xff]  ;;  %v22192_v38 = vpop.permute.xlu1 %11635  ;;  %v22198_v15 = vpop.permute.xlu0 %11640 }
 0x8de   : > { %17973 = vmatmul.mubr.msk.bf16.gmra.mrb[148].mxu1 %vm11988_vm3, %v20271_v42  ;;  %v12835_v51 = vmax.f32 %v12170_v50, 0.0  ;;  %v12837_v40 = vmax.f32 %v12523_v53, 0.0  ;;  %18005 = vmatmul.mubr.msk.bf16.gmra.mrb[212].mxu0 %vm11988_vm3, %v20271_v42  ;;  %v20275_v42 = vld [vmem:[#allocation16 + $0x4] ss:$16 sps:$4 sm:$0xff]   ;;  %v13378_v53 = vld [vmem:[%s22522_s22 + $0x1d8] sm:$0xff] }
 0x8df   : > { %13655 = vperm.xlu0 %19053, %v13373_v46   ;;  %v12836_v63 = vmax.f32 %v12172_v32, 0.0  ;;  %v12838_v59 = vmax.f32 %v12525_v26, 0.0  ;;  %12443 = vmatprep.mubr.bf16.mxu1 %v20827_v0 }
 0x8e0   : > { %12796 = vmatprep.mubr.bf16.mxu0 %v20827_v0  ;;  %v13203_v22 = vpack.c.bf16 %v12835_v51, %v12831_v45  ;;  %v13205_v9 = vpack.c.bf16 %v12837_v40, %v12833_v49 }
 0x8e1   : > { %v12175_v3 = vpop.f32.mrb[44].mxu1  ;;  %v12528_v18 = vpop.f32.mrb[108].mxu0  ;;  %v13204_v20 = vpack.c.bf16 %v12836_v63, %v12832_v62  ;;  %v13206_v24 = vpack.c.bf16 %v12838_v59, %v12834_v56  ;;  %13660 = vperm.xlu1 %19054, %v13374_v61  }
 0x8e2   : > { %v12529_v31 = vadd.f32 %v12528_v18, %v21988_v16  ;;  %v12177_v7 = vpop.f32.mrb[45].mxu1  ;;  %v12176_v0 = vadd.f32 %v12175_v3, %v21988_v16  ;;  %v12530_v37 = vpop.f32.mrb[109].mxu0  ;;  %v13380_v3 = vld [vmem:[%s22522_s22 + $0x1e8] sm:$0xff] }
 0x8e3   : > { %13665 = vperm.xlu0 %19053, %v13375_v29   ;;  %v12178_v41 = vadd.f32 %v12177_v7, %v21988_v16  ;;  %v12531_v13 = vadd.f32 %v12530_v37, %v21988_v16  ;;  %v12179_v14 = vpop.f32.mrb[46].mxu1  ;;  %v12532_v21 = vpop.f32.mrb[110].mxu0  ;;  %14349 = vmatprep.subr.bf16.mxu1 %v13204_v20  ;;  %v13381_v7 = vld [vmem:[%s22522_s22 + $0x1f0] sm:$0xff] }
 0x8e4   : > { %15055 = vmatprep.subr.bf16.mxu0 %v13206_v24  ;;  %v12841_v30 = vmax.f32 %v12529_v31, 0.0  ;;  %v12180_v23 = vadd.f32 %v12179_v14, %v22001_v47  ;;  %v12533_v33 = vadd.f32 %v12532_v21, %v22001_v47  ;;  %v12181_v57 = vpop.f32.mrb[47].mxu1  ;;  %v12534_v6 = vpop.f32.mrb[111].mxu0  ;;  %14350 = vmatpush1.bf16.msra.mxu1 %v13203_v22  ;;  %v12839_v46 = vmax.f32 %v12176_v0, 0.0 }
 0x8e5   : > { %15056 = vmatpush1.bf16.msra.mxu0 %v13205_v9  ;;  %v12842_v43 = vmax.f32 %v12531_v13, 0.0  ;;  %v12182_v16 = vadd.f32 %v12181_v57, %v22001_v47  ;;  %v12535_v44 = vadd.f32 %v12534_v6, %v22001_v47  ;;  %13670 = vperm.xlu1 %19054, %v13376_v19   ;;  %v12840_v54 = vmax.f32 %v12178_v41, 0.0  ;;  %v13379_v47 = vld [vmem:[%s22522_s22 + $0x1e0] sm:$0xff]  ;;  %v22221_v40 = vpop.permute.xlu1 %11645  ;;  %v22224_v29 = vpop.permute.xlu0 %11650 }
 0x8e6   : > { %17974 = vmatmul.mubr.msk.bf16.gmra.mrb[152].mxu1 %vm11988_vm3, %v20272_v12  ;;  %v12843_v49 = vmax.f32 %v12180_v23, 0.0  ;;  %v12845_v50 = vmax.f32 %v12533_v33, 0.0  ;;  %18006 = vmatmul.mubr.msk.bf16.gmra.mrb[216].mxu0 %vm11988_vm3, %v20272_v12  ;;  %v16140_v6 = vld [vmem:[%s22523_s21] sm:$0x7] }
 0x8e7   : > { %13675 = vperm.xlu0 %19053, %v13377_v28   ;;  %v12844_v55 = vmax.f32 %v12182_v16, 0.0  ;;  %v12846_v56 = vmax.f32 %v12535_v44, 0.0  ;;  %14375 = vmatprep.mubr.bf16.mxu1 %v20275_v42 }
 0x8e8   : > { %15081 = vmatprep.mubr.bf16.mxu0 %v20275_v42  ;;  %v13207_v32 = vpack.c.bf16 %v12843_v49, %v12839_v46  ;;  %v13209_v26 = vpack.c.bf16 %v12845_v50, %v12841_v30  ;;  %v13382_v30 = vld [vmem:[%s22522_s22 + $0x1f8] sm:$0xff] }
 0x8e9   : > { %v12185_v45 = vpop.f32.mrb[48].mxu1  ;;  %v12538_v51 = vpop.f32.mrb[112].mxu0  ;;  %v13208_v61 = vpack.c.bf16 %v12844_v55, %v12840_v54  ;;  %v13210_v62 = vpack.c.bf16 %v12846_v56, %v12842_v43  ;;  %13680 = vperm.xlu1 %19054, %v13378_v53  }
 0x8ea   : > { %v12539_v63 = vadd.f32 %v12538_v51, %v22006_v48  ;;  %v12187_v59 = vpop.f32.mrb[49].mxu1  ;;  %v12186_v22 = vadd.f32 %v12185_v45, %v22006_v48  ;;  %v12540_v9 = vpop.f32.mrb[113].mxu0 }
 0x8eb   : > { %13685 = vperm.xlu0 %19053, %v13379_v47   ;;  %v12188_v18 = vadd.f32 %v12187_v59, %v22006_v48  ;;  %v12541_v20 = vadd.f32 %v12540_v9, %v22006_v48  ;;  %v12189_v24 = vpop.f32.mrb[50].mxu1  ;;  %v12542_v31 = vpop.f32.mrb[114].mxu0  ;;  %14351 = vmatprep.subr.bf16.mxu1 %v13208_v61 }
 0x8ec   : > { %15057 = vmatprep.subr.bf16.mxu0 %v13210_v62  ;;  %v12849_v12 = vmax.f32 %v12539_v63, 0.0  ;;  %v12190_v0 = vadd.f32 %v12189_v24, %v22018_v52  ;;  %v12543_v37 = vadd.f32 %v12542_v31, %v22018_v52  ;;  %v12191_v19 = vpop.f32.mrb[51].mxu1  ;;  %v12544_v41 = vpop.f32.mrb[115].mxu0  ;;  %14352 = vmatpush1.bf16.msra.mxu1 %v13207_v32  ;;  %v12847_v21 = vmax.f32 %v12186_v22, 0.0 }
 0x8ed   : > { %15058 = vmatpush1.bf16.msra.mxu0 %v13209_v26  ;;  %v12850_v13 = vmax.f32 %v12541_v20, 0.0  ;;  %v12192_v48 = vadd.f32 %v12191_v19, %v22018_v52  ;;  %v12545_v14 = vadd.f32 %v12544_v41, %v22018_v52  ;;  %13690 = vperm.xlu1 %19054, %v13380_v3   ;;  %v12848_v23 = vmax.f32 %v12188_v18, 0.0  ;;  %v22245_v46 = vpop.permute.xlu1 %11655  ;;  %v22248_v55 = vpop.permute.xlu0 %11660 }
 0x8ee   : > { %v12851_v28 = vmax.f32 %v12190_v0, 0.0  ;;  %v12853_v42 = vmax.f32 %v12543_v37, 0.0 }
 0x8ef   : > { %13695 = vperm.xlu0 %19053, %v13381_v7   ;;  %v12852_v33 = vmax.f32 %v12192_v48, 0.0  ;;  %v12854_v57 = vmax.f32 %v12545_v14, 0.0 }
 0x8f0   : > { %v13211_v43 = vpack.c.bf16 %v12851_v28, %v12847_v21  ;;  %v13213_v16 = vpack.c.bf16 %v12853_v42, %v12849_v12 }
 0x8f1   : > { %v12195_v44 = vpop.f32.mrb[52].mxu1  ;;  %v12548_v52 = vpop.f32.mrb[116].mxu0  ;;  %v13212_v49 = vpack.c.bf16 %v12852_v33, %v12848_v23  ;;  %v13214_v50 = vpack.c.bf16 %v12854_v57, %v12850_v13  ;;  %13700 = vperm.xlu1 %19054, %v13382_v30  }
 0x8f2   : > { %v12549_v53 = vadd.f32 %v12548_v52, %v22026_v35  ;;  %v12197_v54 = vpop.f32.mrb[53].mxu1  ;;  %v12196_v56 = vadd.f32 %v12195_v44, %v22026_v35  ;;  %v12550_v47 = vpop.f32.mrb[117].mxu0 }
 0x8f3   : > { %16143 = vperm.xlu0 %19053, %v16140_v6   ;;  %v12198_v32 = vadd.f32 %v12197_v54, %v22026_v35  ;;  %v12551_v26 = vadd.f32 %v12550_v47, %v22026_v35  ;;  %v12199_v45 = vpop.f32.mrb[54].mxu1  ;;  %v12552_v51 = vpop.f32.mrb[118].mxu0  ;;  %14353 = vmatprep.subr.bf16.mxu1 %v13212_v49 }
 0x8f4   : > { %15059 = vmatprep.subr.bf16.mxu0 %v13214_v50  ;;  %v12857_v61 = vmax.f32 %v12549_v53, 0.0  ;;  %v12200_v62 = vadd.f32 %v12199_v45, %v22036_v34  ;;  %v12553_v63 = vadd.f32 %v12552_v51, %v22036_v34  ;;  %v12201_v59 = vpop.f32.mrb[55].mxu1  ;;  %v12554_v22 = vpop.f32.mrb[119].mxu0  ;;  %14354 = vmatpush1.bf16.msra.mxu1 %v13211_v43  ;;  %v12855_v20 = vmax.f32 %v12196_v56, 0.0 }
 0x8f5   : > { %15060 = vmatpush1.bf16.msra.mxu0 %v13213_v16  ;;  %v12858_v9 = vmax.f32 %v12551_v26, 0.0  ;;  %v12202_v3 = vadd.f32 %v12201_v59, %v22036_v34  ;;  %v12555_v18 = vadd.f32 %v12554_v22, %v22036_v34  ;;  %v12856_v31 = vmax.f32 %v12198_v32, 0.0 }
 0x8f6   : > { %v12859_v35 = vmax.f32 %v12200_v62, 0.0  ;;  %v12861_v24 = vmax.f32 %v12553_v63, 0.0 }
 0x8f7   : > { %v12860_v7 = vmax.f32 %v12202_v3, 0.0  ;;  %v12862_v12 = vmax.f32 %v12555_v18, 0.0 }
 0x8f8   : > { %v13215_v0 = vpack.c.bf16 %v12859_v35, %v12855_v20  ;;  %v13217_v37 = vpack.c.bf16 %v12861_v24, %v12857_v61 }
 0x8f9   : > { %v12205_v19 = vpop.f32.mrb[56].mxu1  ;;  %v12558_v41 = vpop.f32.mrb[120].mxu0  ;;  %v13216_v13 = vpack.c.bf16 %v12860_v7, %v12856_v31  ;;  %v13218_v48 = vpack.c.bf16 %v12862_v12, %v12858_v9 }
 0x8fa   : > { %v12559_v14 = vadd.f32 %v12558_v41, %v22043_v5  ;;  %v12207_v21 = vpop.f32.mrb[57].mxu1  ;;  %v12206_v28 = vadd.f32 %v12205_v19, %v22043_v5  ;;  %v12560_v42 = vpop.f32.mrb[121].mxu0 }
 0x8fb   : > { %v12208_v34 = vadd.f32 %v12207_v21, %v22043_v5  ;;  %v12561_v30 = vadd.f32 %v12560_v42, %v22043_v5  ;;  %v12209_v23 = vpop.f32.mrb[58].mxu1  ;;  %v12562_v33 = vpop.f32.mrb[122].mxu0  ;;  %14355 = vmatprep.subr.bf16.mxu1 %v13216_v13  ;;  %15061 = vmatprep.subr.bf16.mxu0 %v13218_v48 }
 0x8fc   : > { %v12865_v57 = vmax.f32 %v12559_v14, 0.0  ;;  %v12210_v6 = vadd.f32 %v12209_v23, %v22054_v60  ;;  %v12563_v43 = vadd.f32 %v12562_v33, %v22054_v60  ;;  %v12211_v16 = vpop.f32.mrb[59].mxu1  ;;  %v12564_v44 = vpop.f32.mrb[123].mxu0  ;;  %14356 = vmatpush1.bf16.msra.mxu1 %v13215_v0  ;;  %15062 = vmatpush1.bf16.msra.mxu0 %v13217_v37  ;;  %v12863_v53 = vmax.f32 %v12206_v28, 0.0 }
 0x8fd   : > { %v12866_v52 = vmax.f32 %v12561_v30, 0.0  ;;  %v12212_v49 = vadd.f32 %v12211_v16, %v22054_v60  ;;  %v12565_v50 = vadd.f32 %v12564_v44, %v22054_v60  ;;  %v12864_v56 = vmax.f32 %v12208_v34, 0.0 }
 0x8fe   : > { %v12867_v5 = vmax.f32 %v12210_v6, 0.0  ;;  %v12869_v54 = vmax.f32 %v12563_v43, 0.0 }
 0x8ff   : > { %v12868_v47 = vmax.f32 %v12212_v49, 0.0  ;;  %v12870_v32 = vmax.f32 %v12565_v50, 0.0 }
 0x900   : > { %v13219_v26 = vpack.c.bf16 %v12867_v5, %v12863_v53  ;;  %v13221_v45 = vpack.c.bf16 %v12869_v54, %v12865_v57 }
 0x901   : > { %v12215_v51 = vpop.f32.mrb[60].mxu1  ;;  %v12568_v61 = vpop.f32.mrb[124].mxu0  ;;  %v13220_v62 = vpack.c.bf16 %v12868_v47, %v12864_v56  ;;  %v13222_v63 = vpack.c.bf16 %v12870_v32, %v12866_v52 }
 0x902   : > { %v12217_v59 = vpop.f32.mrb[61].mxu1  ;;  %v12216_v22 = vadd.f32 %v12215_v51, %v22061_v39  ;;  %v12569_v9 = vadd.f32 %v12568_v61, %v22061_v39  ;;  %v12570_v3 = vpop.f32.mrb[125].mxu0 }
 0x903   : > { %v12218_v60 = vadd.f32 %v12217_v59, %v22061_v39  ;;  %v12571_v18 = vadd.f32 %v12570_v3, %v22061_v39  ;;  %v12219_v20 = vpop.f32.mrb[62].mxu1  ;;  %v12572_v35 = vpop.f32.mrb[126].mxu0  ;;  %14357 = vmatprep.subr.bf16.mxu1 %v13220_v62  ;;  %15063 = vmatprep.subr.bf16.mxu0 %v13222_v63 }
 0x904   : > { %v12220_v24 = vadd.f32 %v12219_v20, %v22076_v4  ;;  %v12573_v31 = vadd.f32 %v12572_v35, %v22076_v4  ;;  %v12221_v7 = vpop.f32.mrb[63].mxu1  ;;  %v12574_v12 = vpop.f32.mrb[127].mxu0  ;;  %14358 = vmatpush1.bf16.msra.mxu1 %v13219_v26  ;;  %15064 = vmatpush1.bf16.msra.mxu0 %v13221_v45  ;;  %v12871_v19 = vmax.f32 %v12216_v22, 0.0  ;;  %v12873_v41 = vmax.f32 %v12569_v9, 0.0 }
 0x905   : > { %v12222_v0 = vadd.f32 %v12221_v7, %v22076_v4  ;;  %v12575_v37 = vadd.f32 %v12574_v12, %v22076_v4  ;;  %v12872_v48 = vmax.f32 %v12218_v60, 0.0  ;;  %v12874_v14 = vmax.f32 %v12571_v18, 0.0 }
 0x906   : > { %v12875_v13 = vmax.f32 %v12220_v24, 0.0  ;;  %v12877_v39 = vmax.f32 %v12573_v31, 0.0 }
 0x907   : > { %v12876_v21 = vmax.f32 %v12222_v0, 0.0  ;;  %v12878_v28 = vmax.f32 %v12575_v37, 0.0 }
 0x908   : > { %v13223_v42 = vpack.c.bf16 %v12875_v13, %v12871_v19  ;;  %v13225_v34 = vpack.c.bf16 %v12877_v39, %v12873_v41 }
 0x909   : > { %v12225_v30 = vpop.f32.mrb[64].mxu1  ;;  %v12578_v23 = vpop.f32.mrb[128].mxu0  ;;  %v13224_v33 = vpack.c.bf16 %v12876_v21, %v12872_v48  ;;  %v13226_v57 = vpack.c.bf16 %v12878_v28, %v12874_v14 }
 0x90a   : > { %v12227_v6 = vpop.f32.mrb[65].mxu1  ;;  %v12226_v43 = vadd.f32 %v12225_v30, %v22084_v58  ;;  %v12579_v16 = vadd.f32 %v12578_v23, %v22084_v58  ;;  %v12580_v4 = vpop.f32.mrb[129].mxu0 }
 0x90b   : > { %v12228_v44 = vadd.f32 %v12227_v6, %v22084_v58  ;;  %v12581_v52 = vadd.f32 %v12580_v4, %v22084_v58  ;;  %v12229_v49 = vpop.f32.mrb[66].mxu1  ;;  %v12582_v50 = vpop.f32.mrb[130].mxu0  ;;  %14359 = vmatprep.subr.bf16.mxu1 %v13224_v33  ;;  %15065 = vmatprep.subr.bf16.mxu0 %v13226_v57 }
 0x90c   : > { %v12230_v53 = vadd.f32 %v12229_v49, %v22099_v2  ;;  %v12583_v5 = vadd.f32 %v12582_v50, %v22099_v2  ;;  %v12231_v54 = vpop.f32.mrb[67].mxu1  ;;  %v12584_v56 = vpop.f32.mrb[131].mxu0  ;;  %14360 = vmatpush1.bf16.msra.mxu1 %v13223_v42  ;;  %15066 = vmatpush1.bf16.msra.mxu0 %v13225_v34  ;;  %v12879_v26 = vmax.f32 %v12226_v43, 0.0  ;;  %v12881_v45 = vmax.f32 %v12579_v16, 0.0 }
 0x90d   : > { %v12232_v47 = vadd.f32 %v12231_v54, %v22099_v2  ;;  %v12585_v32 = vadd.f32 %v12584_v56, %v22099_v2  ;;  %v12880_v61 = vmax.f32 %v12228_v44, 0.0  ;;  %v12882_v62 = vmax.f32 %v12581_v52, 0.0 }
 0x90e   : > { %v12883_v51 = vmax.f32 %v12230_v53, 0.0  ;;  %v12885_v58 = vmax.f32 %v12583_v5, 0.0 }
 0x90f   : > { %v12884_v63 = vmax.f32 %v12232_v47, 0.0  ;;  %v12886_v59 = vmax.f32 %v12585_v32, 0.0 }
 0x910   : > { %v13227_v22 = vpack.c.bf16 %v12883_v51, %v12879_v26  ;;  %v13229_v9 = vpack.c.bf16 %v12885_v58, %v12881_v45 }
 0x911   : > { %v12235_v3 = vpop.f32.mrb[68].mxu1  ;;  %v12588_v60 = vpop.f32.mrb[132].mxu0  ;;  %v13228_v18 = vpack.c.bf16 %v12884_v63, %v12880_v61  ;;  %v13230_v20 = vpack.c.bf16 %v12886_v59, %v12882_v62 }
 0x912   : > { %v12237_v35 = vpop.f32.mrb[69].mxu1  ;;  %v12236_v24 = vadd.f32 %v12235_v3, %v22107_v27  ;;  %v12589_v31 = vadd.f32 %v12588_v60, %v22107_v27  ;;  %v12590_v2 = vpop.f32.mrb[133].mxu0 }
 0x913   : > { %v12238_v7 = vadd.f32 %v12237_v35, %v22107_v27  ;;  %v12591_v12 = vadd.f32 %v12590_v2, %v22107_v27  ;;  %v12239_v0 = vpop.f32.mrb[70].mxu1  ;;  %v12592_v37 = vpop.f32.mrb[134].mxu0  ;;  %14361 = vmatprep.subr.bf16.mxu1 %v13228_v18  ;;  %15067 = vmatprep.subr.bf16.mxu0 %v13230_v20 }
 0x914   : > { %v12240_v19 = vadd.f32 %v12239_v0, %v22130_v36  ;;  %v12593_v41 = vadd.f32 %v12592_v37, %v22130_v36  ;;  %v12241_v13 = vpop.f32.mrb[71].mxu1  ;;  %v12594_v39 = vpop.f32.mrb[135].mxu0  ;;  %14362 = vmatpush1.bf16.msra.mxu1 %v13227_v22  ;;  %15068 = vmatpush1.bf16.msra.mxu0 %v13229_v9  ;;  %v12887_v21 = vmax.f32 %v12236_v24, 0.0  ;;  %v12889_v28 = vmax.f32 %v12589_v31, 0.0 }
 0x915   : > { %v12242_v48 = vadd.f32 %v12241_v13, %v22130_v36  ;;  %v12595_v14 = vadd.f32 %v12594_v39, %v22130_v36  ;;  %v12888_v34 = vmax.f32 %v12238_v7, 0.0  ;;  %v12890_v30 = vmax.f32 %v12591_v12, 0.0 }
 0x916   : > { %v12891_v42 = vmax.f32 %v12240_v19, 0.0  ;;  %v12893_v27 = vmax.f32 %v12593_v41, 0.0 }
 0x917   : > { %v12892_v23 = vmax.f32 %v12242_v48, 0.0  ;;  %v12894_v33 = vmax.f32 %v12595_v14, 0.0 }
 0x918   : > { %v13231_v57 = vpack.c.bf16 %v12891_v42, %v12887_v21  ;;  %v13233_v6 = vpack.c.bf16 %v12893_v27, %v12889_v28 }
 0x919   : > { %v12245_v43 = vpop.f32.mrb[72].mxu1  ;;  %v12598_v16 = vpop.f32.mrb[136].mxu0  ;;  %v13232_v4 = vpack.c.bf16 %v12892_v23, %v12888_v34  ;;  %v13234_v44 = vpack.c.bf16 %v12894_v33, %v12890_v30 }
 0x91a   : > { %v12247_v52 = vpop.f32.mrb[73].mxu1  ;;  %v12246_v49 = vadd.f32 %v12245_v43, %v22136_v25  ;;  %v12599_v50 = vadd.f32 %v12598_v16, %v22136_v25  ;;  %v12600_v36 = vpop.f32.mrb[137].mxu0 }
 0x91b   : > { %v12248_v53 = vadd.f32 %v12247_v52, %v22136_v25  ;;  %v12601_v5 = vadd.f32 %v12600_v36, %v22136_v25  ;;  %v12249_v54 = vpop.f32.mrb[74].mxu1  ;;  %v12602_v56 = vpop.f32.mrb[138].mxu0  ;;  %14363 = vmatprep.subr.bf16.mxu1 %v13232_v4  ;;  %15069 = vmatprep.subr.bf16.mxu0 %v13234_v44 }
 0x91c   : > { %v12250_v47 = vadd.f32 %v12249_v54, %v22161_v1  ;;  %v12603_v32 = vadd.f32 %v12602_v56, %v22161_v1  ;;  %v12251_v26 = vpop.f32.mrb[75].mxu1  ;;  %v12604_v45 = vpop.f32.mrb[139].mxu0  ;;  %14364 = vmatpush1.bf16.msra.mxu1 %v13231_v57  ;;  %15070 = vmatpush1.bf16.msra.mxu0 %v13233_v6  ;;  %v12895_v61 = vmax.f32 %v12246_v49, 0.0  ;;  %v12897_v62 = vmax.f32 %v12599_v50, 0.0 }
 0x91d   : > { %v12252_v51 = vadd.f32 %v12251_v26, %v22161_v1  ;;  %v12605_v58 = vadd.f32 %v12604_v45, %v22161_v1  ;;  %v12896_v59 = vmax.f32 %v12248_v53, 0.0  ;;  %v12898_v22 = vmax.f32 %v12601_v5, 0.0 }
 0x91e   : > { %v12899_v63 = vmax.f32 %v12250_v47, 0.0  ;;  %v12901_v25 = vmax.f32 %v12603_v32, 0.0 }
 0x91f   : > { %v12900_v9 = vmax.f32 %v12252_v51, 0.0  ;;  %v12902_v3 = vmax.f32 %v12605_v58, 0.0 }
 0x920   : > { %v13235_v60 = vpack.c.bf16 %v12899_v63, %v12895_v61  ;;  %v13237_v18 = vpack.c.bf16 %v12901_v25, %v12897_v62 }
 0x921   : > { %v12255_v20 = vpop.f32.mrb[76].mxu1  ;;  %v12608_v35 = vpop.f32.mrb[140].mxu0  ;;  %v13236_v24 = vpack.c.bf16 %v12900_v9, %v12896_v59  ;;  %v13238_v31 = vpack.c.bf16 %v12902_v3, %v12898_v22 }
 0x922   : > { %v12257_v2 = vpop.f32.mrb[77].mxu1  ;;  %v12256_v7 = vadd.f32 %v12255_v20, %v22167_v8  ;;  %v12609_v12 = vadd.f32 %v12608_v35, %v22167_v8  ;;  %v12610_v1 = vpop.f32.mrb[141].mxu0 }
 0x923   : > { %v12258_v0 = vadd.f32 %v12257_v2, %v22167_v8  ;;  %v12611_v37 = vadd.f32 %v12610_v1, %v22167_v8  ;;  %v12259_v19 = vpop.f32.mrb[78].mxu1  ;;  %v12612_v41 = vpop.f32.mrb[142].mxu0  ;;  %14365 = vmatprep.subr.bf16.mxu1 %v13236_v24  ;;  %15071 = vmatprep.subr.bf16.mxu0 %v13238_v31 }
 0x924   : > { %v12260_v13 = vadd.f32 %v12259_v19, %v22192_v38  ;;  %v12613_v39 = vadd.f32 %v12612_v41, %v22192_v38  ;;  %v12261_v48 = vpop.f32.mrb[79].mxu1  ;;  %v12614_v14 = vpop.f32.mrb[143].mxu0  ;;  %14366 = vmatpush1.bf16.msra.mxu1 %v13235_v60  ;;  %15072 = vmatpush1.bf16.msra.mxu0 %v13237_v18  ;;  %v12903_v42 = vmax.f32 %v12256_v7, 0.0  ;;  %v12905_v27 = vmax.f32 %v12609_v12, 0.0 }
 0x925   : > { %v12262_v21 = vadd.f32 %v12261_v48, %v22192_v38  ;;  %v12615_v28 = vadd.f32 %v12614_v14, %v22192_v38  ;;  %v12904_v30 = vmax.f32 %v12258_v0, 0.0  ;;  %v12906_v23 = vmax.f32 %v12611_v37, 0.0 }
 0x926   : > { %v12907_v34 = vmax.f32 %v12260_v13, 0.0  ;;  %v12909_v8 = vmax.f32 %v12613_v39, 0.0 }
 0x927   : > { %v12908_v33 = vmax.f32 %v12262_v21, 0.0  ;;  %v12910_v57 = vmax.f32 %v12615_v28, 0.0 }
 0x928   : > { %v13239_v6 = vpack.c.bf16 %v12907_v34, %v12903_v42  ;;  %v13241_v43 = vpack.c.bf16 %v12909_v8, %v12905_v27 }
 0x929   : > { %v12265_v16 = vpop.f32.mrb[80].mxu1  ;;  %v12618_v4 = vpop.f32.mrb[144].mxu0  ;;  %v13240_v44 = vpack.c.bf16 %v12908_v33, %v12904_v30  ;;  %v13242_v52 = vpack.c.bf16 %v12910_v57, %v12906_v23 }
 0x92a   : > { %v12267_v49 = vpop.f32.mrb[81].mxu1  ;;  %v12266_v50 = vadd.f32 %v12265_v16, %v22198_v15  ;;  %v12619_v36 = vadd.f32 %v12618_v4, %v22198_v15  ;;  %v12620_v38 = vpop.f32.mrb[145].mxu0 }
 0x92b   : > { %v12268_v53 = vadd.f32 %v12267_v49, %v22198_v15  ;;  %v12621_v5 = vadd.f32 %v12620_v38, %v22198_v15  ;;  %v12269_v54 = vpop.f32.mrb[82].mxu1  ;;  %v12622_v56 = vpop.f32.mrb[146].mxu0  ;;  %14367 = vmatprep.subr.bf16.mxu1 %v13240_v44  ;;  %15073 = vmatprep.subr.bf16.mxu0 %v13242_v52 }
 0x92c   : > { %v12270_v47 = vadd.f32 %v12269_v54, %v22221_v40  ;;  %v12623_v32 = vadd.f32 %v12622_v56, %v22221_v40  ;;  %v12271_v26 = vpop.f32.mrb[83].mxu1  ;;  %v12624_v45 = vpop.f32.mrb[147].mxu0  ;;  %14368 = vmatpush1.bf16.msra.mxu1 %v13239_v6  ;;  %15074 = vmatpush1.bf16.msra.mxu0 %v13241_v43  ;;  %v12911_v61 = vmax.f32 %v12266_v50, 0.0  ;;  %v12913_v62 = vmax.f32 %v12619_v36, 0.0 }
 0x92d   : > { %v12272_v51 = vadd.f32 %v12271_v26, %v22221_v40  ;;  %v12625_v58 = vadd.f32 %v12624_v45, %v22221_v40  ;;  %v12912_v25 = vmax.f32 %v12268_v53, 0.0  ;;  %v12914_v59 = vmax.f32 %v12621_v5, 0.0  ;;  %v11666_v44 = vpop.permute.xlu1 %11665 }
 0x92e   : > { %v12915_v63 = vmax.f32 %v12270_v47, 0.0  ;;  %v12917_v15 = vmax.f32 %v12623_v32, 0.0 }
 0x92f   : > { %v12916_v22 = vmax.f32 %v12272_v51, 0.0  ;;  %v12918_v9 = vmax.f32 %v12625_v58, 0.0 }
 0x930   : > { %v13243_v3 = vpack.c.bf16 %v12915_v63, %v12911_v61  ;;  %v13245_v60 = vpack.c.bf16 %v12917_v15, %v12913_v62 }
 0x931   : > { %v12275_v18 = vpop.f32.mrb[84].mxu1  ;;  %v12628_v20 = vpop.f32.mrb[148].mxu0  ;;  %v13244_v35 = vpack.c.bf16 %v12916_v22, %v12912_v25  ;;  %v13246_v24 = vpack.c.bf16 %v12918_v9, %v12914_v59 }
 0x932   : > { %v12277_v31 = vpop.f32.mrb[85].mxu1  ;;  %v12276_v2 = vadd.f32 %v12275_v18, %v22224_v29  ;;  %v12629_v7 = vadd.f32 %v12628_v20, %v22224_v29  ;;  %v12630_v40 = vpop.f32.mrb[149].mxu0 }
 0x933   : > { %v12278_v12 = vadd.f32 %v12277_v31, %v22224_v29  ;;  %v12631_v1 = vadd.f32 %v12630_v40, %v22224_v29  ;;  %v12279_v0 = vpop.f32.mrb[86].mxu1  ;;  %v12632_v37 = vpop.f32.mrb[150].mxu0  ;;  %14369 = vmatprep.subr.bf16.mxu1 %v13244_v35  ;;  %15075 = vmatprep.subr.bf16.mxu0 %v13246_v24 }
 0x934   : > { %v12280_v19 = vadd.f32 %v12279_v0, %v22245_v46  ;;  %v12633_v41 = vadd.f32 %v12632_v37, %v22245_v46  ;;  %v12281_v13 = vpop.f32.mrb[87].mxu1  ;;  %v12634_v39 = vpop.f32.mrb[151].mxu0  ;;  %14370 = vmatpush1.bf16.msra.mxu1 %v13243_v3  ;;  %15076 = vmatpush1.bf16.msra.mxu0 %v13245_v60  ;;  %v12919_v21 = vmax.f32 %v12276_v2, 0.0  ;;  %v12921_v28 = vmax.f32 %v12629_v7, 0.0  ;;  %v20273_v0 = vld [vmem:[#allocation16] ss:$16 sps:$4 sm:$0xff]  }
 0x935   : > { %v12282_v48 = vadd.f32 %v12281_v13, %v22245_v46  ;;  %v12635_v14 = vadd.f32 %v12634_v39, %v22245_v46  ;;  %v12920_v27 = vmax.f32 %v12278_v12, 0.0  ;;  %v12922_v34 = vmax.f32 %v12631_v1, 0.0  ;;  %v11671_v3 = vpop.permute.xlu0 %11670  ;;  %v11676_v35 = vpop.permute.xlu1 %11675  ;;  %v20276_v39 = vld [vmem:[#allocation16 + $0x24] ss:$16 sps:$4 sm:$0xff]  }
 0x936   : > { %v12923_v42 = vmax.f32 %v12280_v19, 0.0  ;;  %v12925_v29 = vmax.f32 %v12633_v41, 0.0 }
 0x937   : > { %v12924_v8 = vmax.f32 %v12282_v48, 0.0  ;;  %v12926_v30 = vmax.f32 %v12635_v14, 0.0 }
 0x938   : > { %v13247_v23 = vpack.c.bf16 %v12923_v42, %v12919_v21  ;;  %v13249_v33 = vpack.c.bf16 %v12925_v29, %v12921_v28 }
 0x939   : > { %v12285_v57 = vpop.f32.mrb[88].mxu1  ;;  %v12638_v6 = vpop.f32.mrb[152].mxu0  ;;  %v13248_v43 = vpack.c.bf16 %v12924_v8, %v12920_v27  ;;  %v13250_v16 = vpack.c.bf16 %v12926_v30, %v12922_v34 }
 0x93a   : > { %v12287_v4 = vpop.f32.mrb[89].mxu1  ;;  %v12286_v52 = vadd.f32 %v12285_v57, %v22248_v55  ;;  %v12639_v46 = vadd.f32 %v12638_v6, %v22248_v55  ;;  %v12640_v49 = vpop.f32.mrb[153].mxu0 }
 0x93b   : > { %v12288_v50 = vadd.f32 %v12287_v4, %v22248_v55  ;;  %v12641_v36 = vadd.f32 %v12640_v49, %v22248_v55  ;;  %v12289_v38 = vpop.f32.mrb[90].mxu1  ;;  %v12642_v53 = vpop.f32.mrb[154].mxu0  ;;  %14371 = vmatprep.subr.bf16.mxu1 %v13248_v43  ;;  %15077 = vmatprep.subr.bf16.mxu0 %v13250_v16 }
 0x93c   : > { %v12290_v5 = vadd.f32 %v12289_v38, %v11666_v44  ;;  %v12643_v54 = vadd.f32 %v12642_v53, %v11666_v44  ;;  %v12291_v56 = vpop.f32.mrb[91].mxu1  ;;  %v12644_v47 = vpop.f32.mrb[155].mxu0  ;;  %14372 = vmatpush1.bf16.msra.mxu1 %v13247_v23  ;;  %15078 = vmatpush1.bf16.msra.mxu0 %v13249_v33  ;;  %v12927_v45 = vmax.f32 %v12286_v52, 0.0  ;;  %v12929_v51 = vmax.f32 %v12639_v46, 0.0 }
 0x93d   : > { %v12292_v32 = vadd.f32 %v12291_v56, %v11666_v44  ;;  %v12645_v26 = vadd.f32 %v12644_v47, %v11666_v44  ;;  %v12928_v62 = vmax.f32 %v12288_v50, 0.0  ;;  %v12930_v63 = vmax.f32 %v12641_v36, 0.0  ;;  %v11681_v43 = vpop.permute.xlu0 %11680  ;;  %v11686_v52 = vpop.permute.xlu1 %11685 }
 0x93e   : > { %v12931_v58 = vmax.f32 %v12290_v5, 0.0  ;;  %v12933_v61 = vmax.f32 %v12643_v54, 0.0  ;;  %v20278_v54 = vld [vmem:[#allocation16 + $0x20] ss:$16 sps:$4 sm:$0xff]  }
 0x93f   : > { %v12932_v15 = vmax.f32 %v12292_v32, 0.0  ;;  %v12934_v55 = vmax.f32 %v12645_v26, 0.0 }
 0x940   : > { %v13251_v25 = vpack.c.bf16 %v12931_v58, %v12927_v45  ;;  %v13253_v59 = vpack.c.bf16 %v12933_v61, %v12929_v51  ;;  %v20279_v45 = vld [vmem:[#allocation16 + $0x44] ss:$16 sps:$4 sm:$0xff]  }
 0x941   : > { %v12295_v22 = vpop.f32.mrb[92].mxu1  ;;  %v12648_v9 = vpop.f32.mrb[156].mxu0  ;;  %v13252_v60 = vpack.c.bf16 %v12932_v15, %v12928_v62  ;;  %v13254_v18 = vpack.c.bf16 %v12934_v55, %v12930_v63 }
 0x942   : > { %v12297_v20 = vpop.f32.mrb[93].mxu1  ;;  %v12296_v24 = vadd.f32 %v12295_v22, %v11671_v3  ;;  %v12649_v31 = vadd.f32 %v12648_v9, %v11671_v3  ;;  %v12650_v2 = vpop.f32.mrb[157].mxu0 }
 0x943   : > { %v12298_v7 = vadd.f32 %v12297_v20, %v11671_v3  ;;  %v12651_v40 = vadd.f32 %v12650_v2, %v11671_v3  ;;  %v12299_v12 = vpop.f32.mrb[94].mxu1  ;;  %v12652_v1 = vpop.f32.mrb[158].mxu0  ;;  %14373 = vmatprep.subr.bf16.mxu1 %v13252_v60  ;;  %15079 = vmatprep.subr.bf16.mxu0 %v13254_v18 }
 0x944   : > { %v12300_v37 = vadd.f32 %v12299_v12, %v11676_v35  ;;  %v12653_v19 = vadd.f32 %v12652_v1, %v11676_v35  ;;  %v12301_v41 = vpop.f32.mrb[95].mxu1  ;;  %v12654_v13 = vpop.f32.mrb[159].mxu0  ;;  %14374 = vmatpush1.bf16.msra.mxu1 %v13251_v25  ;;  %15080 = vmatpush1.bf16.msra.mxu0 %v13253_v59  ;;  %v12935_v21 = vmax.f32 %v12296_v24, 0.0  ;;  %v12937_v28 = vmax.f32 %v12649_v31, 0.0 }
 0x945   : > { %v12302_v48 = vadd.f32 %v12301_v41, %v11676_v35  ;;  %v12655_v14 = vadd.f32 %v12654_v13, %v11676_v35  ;;  %v12936_v27 = vmax.f32 %v12298_v7, 0.0  ;;  %v12938_v34 = vmax.f32 %v12651_v40, 0.0  ;;  %v11691_v20 = vpop.permute.xlu0 %11690  ;;  %v11696_v2 = vpop.permute.xlu1 %11695  ;;  %v20281_v41 = vld [vmem:[#allocation16 + $0x40] ss:$16 sps:$4 sm:$0xff]  }
 0x946   : > { %v12939_v42 = vmax.f32 %v12300_v37, 0.0  ;;  %v12941_v29 = vmax.f32 %v12653_v19, 0.0 }
 0x947   : > { %v12940_v8 = vmax.f32 %v12302_v48, 0.0  ;;  %v12942_v30 = vmax.f32 %v12655_v14, 0.0  ;;  %14376 = vmatmul.mubr.bf16.vlgmr.msra.gmra.mrb[156].mxu1 %v20273_v0  ;;  %15082 = vmatmul.mubr.bf16.vlgmr.msra.gmra.mrb[220].mxu0 %v20273_v0 }
 0x948   : > { %v13255_v23 = vpack.c.bf16 %v12939_v42, %v12935_v21  ;;  %v13257_v33 = vpack.c.bf16 %v12941_v29, %v12937_v28  ;;  %14385 = vmatprep.mubr.bf16.mxu1 %v20276_v39  ;;  %15091 = vmatprep.mubr.bf16.mxu0 %v20276_v39  ;;  %v20282_v21 = vld [vmem:[#allocation16 + $0x64] ss:$16 sps:$4 sm:$0xff]  }
 0x949   : > { %v12305_v57 = vpop.f32.mrb[96].mxu1  ;;  %v12658_v6 = vpop.f32.mrb[160].mxu0  ;;  %v13256_v16 = vpack.c.bf16 %v12940_v8, %v12936_v27  ;;  %v13258_v4 = vpack.c.bf16 %v12942_v30, %v12938_v34 }
 0x94a   : > { %v12307_v44 = vpop.f32.mrb[97].mxu1  ;;  %v12306_v46 = vadd.f32 %v12305_v57, %v11681_v43  ;;  %v12659_v49 = vadd.f32 %v12658_v6, %v11681_v43  ;;  %v12660_v50 = vpop.f32.mrb[161].mxu0 }
 0x94b   : > { %v12308_v36 = vadd.f32 %v12307_v44, %v11681_v43  ;;  %v12661_v38 = vadd.f32 %v12660_v50, %v11681_v43  ;;  %v12309_v53 = vpop.f32.mrb[98].mxu1  ;;  %v12662_v5 = vpop.f32.mrb[162].mxu0  ;;  %14696 = vmatprep.subr.bf16.mxu1 %v13256_v16  ;;  %15402 = vmatprep.subr.bf16.mxu0 %v13258_v4 }
 0x94c   : > { %v12310_v56 = vadd.f32 %v12309_v53, %v11686_v52  ;;  %v12663_v47 = vadd.f32 %v12662_v5, %v11686_v52  ;;  %v12311_v32 = vpop.f32.mrb[99].mxu1  ;;  %v12664_v26 = vpop.f32.mrb[163].mxu0  ;;  %14697 = vmatpush1.bf16.msra.mxu1 %v13255_v23  ;;  %15403 = vmatpush1.bf16.msra.mxu0 %v13257_v33  ;;  %v12943_v61 = vmax.f32 %v12306_v46, 0.0  ;;  %v12945_v62 = vmax.f32 %v12659_v49, 0.0 }
 0x94d   : > { %v12312_v51 = vadd.f32 %v12311_v32, %v11686_v52  ;;  %v12665_v58 = vadd.f32 %v12664_v26, %v11686_v52  ;;  %v12944_v55 = vmax.f32 %v12308_v36, 0.0  ;;  %v12946_v25 = vmax.f32 %v12661_v38, 0.0  ;;  %v11701_v44 = vpop.permute.xlu0 %11700  ;;  %v11706_v50 = vpop.permute.xlu1 %11705  ;;  %v20284_v32 = vld [vmem:[#allocation16 + $0x60] ss:$16 sps:$4 sm:$0xff]  }
 0x94e   : > { %v12947_v63 = vmax.f32 %v12310_v56, 0.0  ;;  %v12949_v15 = vmax.f32 %v12663_v47, 0.0 }
 0x94f   : > { %v12948_v59 = vmax.f32 %v12312_v51, 0.0  ;;  %v12950_v22 = vmax.f32 %v12665_v58, 0.0  ;;  %14386 = vmatmul.mubr.bf16.gmra.mrb[160].mxu1 %v20278_v54  ;;  %15092 = vmatmul.mubr.bf16.gmra.mrb[224].mxu0 %v20278_v54 }
 0x950   : > { %v13259_v9 = vpack.c.bf16 %v12947_v63, %v12943_v61  ;;  %v13261_v3 = vpack.c.bf16 %v12949_v15, %v12945_v62  ;;  %14395 = vmatprep.mubr.bf16.mxu1 %v20279_v45  ;;  %15101 = vmatprep.mubr.bf16.mxu0 %v20279_v45  ;;  %v20285_v61 = vld [vmem:[#allocation16 + $0x84] ss:$16 sps:$4 sm:$0xff]  }
 0x951   : > { %v12315_v60 = vpop.f32.mrb[100].mxu1  ;;  %v12668_v18 = vpop.f32.mrb[164].mxu0  ;;  %v13260_v35 = vpack.c.bf16 %v12948_v59, %v12944_v55  ;;  %v13262_v24 = vpack.c.bf16 %v12950_v22, %v12946_v25 }
 0x952   : > { %v12317_v31 = vpop.f32.mrb[101].mxu1  ;;  %v12316_v7 = vadd.f32 %v12315_v60, %v11691_v20  ;;  %v12669_v40 = vadd.f32 %v12668_v18, %v11691_v20  ;;  %v12670_v12 = vpop.f32.mrb[165].mxu0 }
 0x953   : > { %v12318_v1 = vadd.f32 %v12317_v31, %v11691_v20  ;;  %v12671_v0 = vadd.f32 %v12670_v12, %v11691_v20  ;;  %v12319_v37 = vpop.f32.mrb[102].mxu1  ;;  %v12672_v19 = vpop.f32.mrb[166].mxu0  ;;  %14698 = vmatprep.subr.bf16.mxu1 %v13260_v35  ;;  %15404 = vmatprep.subr.bf16.mxu0 %v13262_v24 }
 0x954   : > { %v12320_v13 = vadd.f32 %v12319_v37, %v11696_v2  ;;  %v12673_v39 = vadd.f32 %v12672_v19, %v11696_v2  ;;  %v12321_v48 = vpop.f32.mrb[103].mxu1  ;;  %v12674_v14 = vpop.f32.mrb[167].mxu0  ;;  %14699 = vmatpush1.bf16.msra.mxu1 %v13259_v9  ;;  %15405 = vmatpush1.bf16.msra.mxu0 %v13261_v3  ;;  %v12951_v29 = vmax.f32 %v12316_v7, 0.0  ;;  %v12953_v27 = vmax.f32 %v12669_v40, 0.0 }
 0x955   : > { %v12322_v28 = vadd.f32 %v12321_v48, %v11696_v2  ;;  %v12675_v42 = vadd.f32 %v12674_v14, %v11696_v2  ;;  %v12952_v30 = vmax.f32 %v12318_v1, 0.0  ;;  %v12954_v23 = vmax.f32 %v12671_v0, 0.0  ;;  %v11711_v31 = vpop.permute.xlu0 %11710  ;;  %v11716_v12 = vpop.permute.xlu1 %11715  ;;  %v20287_v48 = vld [vmem:[#allocation16 + $0x80] ss:$16 sps:$4 sm:$0xff]  }
 0x956   : > { %v12955_v34 = vmax.f32 %v12320_v13, 0.0  ;;  %v12957_v8 = vmax.f32 %v12673_v39, 0.0 }
 0x957   : > { %v12956_v33 = vmax.f32 %v12322_v28, 0.0  ;;  %v12958_v57 = vmax.f32 %v12675_v42, 0.0  ;;  %14396 = vmatmul.mubr.bf16.gmra.mrb[164].mxu1 %v20281_v41  ;;  %15102 = vmatmul.mubr.bf16.gmra.mrb[228].mxu0 %v20281_v41 }
 0x958   : > { %v13263_v6 = vpack.c.bf16 %v12955_v34, %v12951_v29  ;;  %v13265_v43 = vpack.c.bf16 %v12957_v8, %v12953_v27  ;;  %14405 = vmatprep.mubr.bf16.mxu1 %v20282_v21  ;;  %15111 = vmatprep.mubr.bf16.mxu0 %v20282_v21  ;;  %v20288_v29 = vld [vmem:[#allocation16 + $0xa4] ss:$16 sps:$4 sm:$0xff]  }
 0x959   : > { %v12325_v16 = vpop.f32.mrb[104].mxu1  ;;  %v12678_v4 = vpop.f32.mrb[168].mxu0  ;;  %v13264_v52 = vpack.c.bf16 %v12956_v33, %v12952_v30  ;;  %v13266_v46 = vpack.c.bf16 %v12958_v57, %v12954_v23 }
 0x95a   : > { %v12327_v49 = vpop.f32.mrb[105].mxu1  ;;  %v12326_v36 = vadd.f32 %v12325_v16, %v11701_v44  ;;  %v12679_v38 = vadd.f32 %v12678_v4, %v11701_v44  ;;  %v12680_v53 = vpop.f32.mrb[169].mxu0 }
 0x95b   : > { %v12328_v5 = vadd.f32 %v12327_v49, %v11701_v44  ;;  %v12681_v54 = vadd.f32 %v12680_v53, %v11701_v44  ;;  %v12329_v56 = vpop.f32.mrb[106].mxu1  ;;  %v12682_v47 = vpop.f32.mrb[170].mxu0  ;;  %14700 = vmatprep.subr.bf16.mxu1 %v13264_v52  ;;  %15406 = vmatprep.subr.bf16.mxu0 %v13266_v46 }
 0x95c   : > { %v12330_v26 = vadd.f32 %v12329_v56, %v11706_v50  ;;  %v12683_v45 = vadd.f32 %v12682_v47, %v11706_v50  ;;  %v12331_v51 = vpop.f32.mrb[107].mxu1  ;;  %v12684_v58 = vpop.f32.mrb[171].mxu0  ;;  %14701 = vmatpush1.bf16.msra.mxu1 %v13263_v6  ;;  %15407 = vmatpush1.bf16.msra.mxu0 %v13265_v43  ;;  %v12959_v15 = vmax.f32 %v12326_v36, 0.0  ;;  %v12961_v55 = vmax.f32 %v12679_v38, 0.0 }
 0x95d   : > { %v12332_v62 = vadd.f32 %v12331_v51, %v11706_v50  ;;  %v12685_v63 = vadd.f32 %v12684_v58, %v11706_v50  ;;  %v12960_v22 = vmax.f32 %v12328_v5, 0.0  ;;  %v12962_v9 = vmax.f32 %v12681_v54, 0.0  ;;  %v11721_v49 = vpop.permute.xlu0 %11720  ;;  %v11726_v53 = vpop.permute.xlu1 %11725  ;;  %v20290_v51 = vld [vmem:[#allocation16 + $0xa0] ss:$16 sps:$4 sm:$0xff]  }
 0x95e   : > { %v12963_v25 = vmax.f32 %v12330_v26, 0.0  ;;  %v12965_v59 = vmax.f32 %v12683_v45, 0.0 }
 0x95f   : > { %v12964_v3 = vmax.f32 %v12332_v62, 0.0  ;;  %v12966_v60 = vmax.f32 %v12685_v63, 0.0  ;;  %14406 = vmatmul.mubr.bf16.gmra.mrb[168].mxu1 %v20284_v32  ;;  %15112 = vmatmul.mubr.bf16.gmra.mrb[232].mxu0 %v20284_v32 }
 0x960   : > { %v13267_v18 = vpack.c.bf16 %v12963_v25, %v12959_v15  ;;  %v13269_v20 = vpack.c.bf16 %v12965_v59, %v12961_v55  ;;  %14415 = vmatprep.mubr.bf16.mxu1 %v20285_v61  ;;  %15121 = vmatprep.mubr.bf16.mxu0 %v20285_v61  ;;  %v20291_v15 = vld [vmem:[#allocation16 + $0xc4] ss:$16 sps:$4 sm:$0xff]  }
 0x961   : > { %v12335_v35 = vpop.f32.mrb[108].mxu1  ;;  %v12688_v24 = vpop.f32.mrb[172].mxu0  ;;  %v13268_v2 = vpack.c.bf16 %v12964_v3, %v12960_v22  ;;  %v13270_v7 = vpack.c.bf16 %v12966_v60, %v12962_v9 }
 0x962   : > { %v12337_v40 = vpop.f32.mrb[109].mxu1  ;;  %v12336_v1 = vadd.f32 %v12335_v35, %v11711_v31  ;;  %v12689_v0 = vadd.f32 %v12688_v24, %v11711_v31  ;;  %v12690_v37 = vpop.f32.mrb[173].mxu0 }
 0x963   : > { %v12338_v19 = vadd.f32 %v12337_v40, %v11711_v31  ;;  %v12691_v41 = vadd.f32 %v12690_v37, %v11711_v31  ;;  %v12339_v13 = vpop.f32.mrb[110].mxu1  ;;  %v12692_v39 = vpop.f32.mrb[174].mxu0  ;;  %14702 = vmatprep.subr.bf16.mxu1 %v13268_v2  ;;  %15408 = vmatprep.subr.bf16.mxu0 %v13270_v7 }
 0x964   : > { %v12340_v14 = vadd.f32 %v12339_v13, %v11716_v12  ;;  %v12693_v21 = vadd.f32 %v12692_v39, %v11716_v12  ;;  %v12341_v28 = vpop.f32.mrb[111].mxu1  ;;  %v12694_v42 = vpop.f32.mrb[175].mxu0  ;;  %14703 = vmatpush1.bf16.msra.mxu1 %v13267_v18  ;;  %15409 = vmatpush1.bf16.msra.mxu0 %v13269_v20  ;;  %v12967_v8 = vmax.f32 %v12336_v1, 0.0  ;;  %v12969_v30 = vmax.f32 %v12689_v0, 0.0 }
 0x965   : > { %v12342_v27 = vadd.f32 %v12341_v28, %v11716_v12  ;;  %v12695_v34 = vadd.f32 %v12694_v42, %v11716_v12  ;;  %v12968_v57 = vmax.f32 %v12338_v19, 0.0  ;;  %v12970_v6 = vmax.f32 %v12691_v41, 0.0  ;;  %v11731_v60 = vpop.permute.xlu0 %11730  ;;  %v11736_v12 = vpop.permute.xlu1 %11735  ;;  %v20293_v28 = vld [vmem:[#allocation16 + $0xc0] ss:$16 sps:$4 sm:$0xff]  }
 0x966   : > { %v12971_v23 = vmax.f32 %v12340_v14, 0.0  ;;  %v12973_v33 = vmax.f32 %v12693_v21, 0.0 }
 0x967   : > { %v12972_v43 = vmax.f32 %v12342_v27, 0.0  ;;  %v12974_v16 = vmax.f32 %v12695_v34, 0.0  ;;  %14416 = vmatmul.mubr.bf16.gmra.mrb[172].mxu1 %v20287_v48  ;;  %15122 = vmatmul.mubr.bf16.gmra.mrb[236].mxu0 %v20287_v48 }
 0x968   : > { %v13271_v4 = vpack.c.bf16 %v12971_v23, %v12967_v8  ;;  %v13273_v44 = vpack.c.bf16 %v12973_v33, %v12969_v30  ;;  %14425 = vmatprep.mubr.bf16.mxu1 %v20288_v29  ;;  %15131 = vmatprep.mubr.bf16.mxu0 %v20288_v29  ;;  %v20294_v8 = vld [vmem:[#allocation16 + $0xe4] ss:$16 sps:$4 sm:$0xff]  }
 0x969   : > { %v12345_v52 = vpop.f32.mrb[112].mxu1  ;;  %v12698_v46 = vpop.f32.mrb[176].mxu0  ;;  %v13272_v50 = vpack.c.bf16 %v12972_v43, %v12968_v57  ;;  %v13274_v36 = vpack.c.bf16 %v12974_v16, %v12970_v6 }
 0x96a   : > { %v12347_v38 = vpop.f32.mrb[113].mxu1  ;;  %v12346_v5 = vadd.f32 %v12345_v52, %v11721_v49  ;;  %v12699_v54 = vadd.f32 %v12698_v46, %v11721_v49  ;;  %v12700_v56 = vpop.f32.mrb[177].mxu0 }
 0x96b   : > { %v12348_v47 = vadd.f32 %v12347_v38, %v11721_v49  ;;  %v12701_v32 = vadd.f32 %v12700_v56, %v11721_v49  ;;  %v12349_v26 = vpop.f32.mrb[114].mxu1  ;;  %v12702_v45 = vpop.f32.mrb[178].mxu0  ;;  %14704 = vmatprep.subr.bf16.mxu1 %v13272_v50  ;;  %15410 = vmatprep.subr.bf16.mxu0 %v13274_v36 }
 0x96c   : > { %v12350_v58 = vadd.f32 %v12349_v26, %v11726_v53  ;;  %v12703_v61 = vadd.f32 %v12702_v45, %v11726_v53  ;;  %v12351_v62 = vpop.f32.mrb[115].mxu1  ;;  %v12704_v63 = vpop.f32.mrb[179].mxu0  ;;  %14705 = vmatpush1.bf16.msra.mxu1 %v13271_v4  ;;  %15411 = vmatpush1.bf16.msra.mxu0 %v13273_v44  ;;  %v12975_v59 = vmax.f32 %v12346_v5, 0.0  ;;  %v12977_v22 = vmax.f32 %v12699_v54, 0.0 }
 0x96d   : > { %v12352_v55 = vadd.f32 %v12351_v62, %v11726_v53  ;;  %v12705_v25 = vadd.f32 %v12704_v63, %v11726_v53  ;;  %v12976_v18 = vmax.f32 %v12348_v47, 0.0  ;;  %v12978_v20 = vmax.f32 %v12701_v32, 0.0  ;;  %v11741_v16 = vpop.permute.xlu0 %11740  ;;  %v11746_v4 = vpop.permute.xlu1 %11745 }
 0x96e   : > { %v12979_v9 = vmax.f32 %v12350_v58, 0.0  ;;  %v12981_v3 = vmax.f32 %v12703_v61, 0.0 }
 0x96f   : > { %v12980_v35 = vmax.f32 %v12352_v55, 0.0  ;;  %v12982_v24 = vmax.f32 %v12705_v25, 0.0  ;;  %14426 = vmatmul.mubr.bf16.gmra.mrb[176].mxu1 %v20290_v51  ;;  %15132 = vmatmul.mubr.bf16.gmra.mrb[240].mxu0 %v20290_v51  ;;  %v20296_v25 = vld [vmem:[#allocation16 + $0xe0] ss:$16 sps:$4 sm:$0xff]  }
 0x970   : > { %v13275_v31 = vpack.c.bf16 %v12979_v9, %v12975_v59  ;;  %v13277_v2 = vpack.c.bf16 %v12981_v3, %v12977_v22  ;;  %14435 = vmatprep.mubr.bf16.mxu1 %v20291_v15  ;;  %15141 = vmatprep.mubr.bf16.mxu0 %v20291_v15  ;;  %v20297_v9 = vld [vmem:[#allocation16 + $0x104] ss:$16 sps:$4 sm:$0xff]  }
 0x971   : > { %v12355_v7 = vpop.f32.mrb[116].mxu1  ;;  %v12708_v40 = vpop.f32.mrb[180].mxu0  ;;  %v13276_v1 = vpack.c.bf16 %v12980_v35, %v12976_v18  ;;  %v13278_v0 = vpack.c.bf16 %v12982_v24, %v12978_v20 }
 0x972   : > { %v12357_v37 = vpop.f32.mrb[117].mxu1  ;;  %v12356_v19 = vadd.f32 %v12355_v7, %v11731_v60  ;;  %v12709_v41 = vadd.f32 %v12708_v40, %v11731_v60  ;;  %v12710_v13 = vpop.f32.mrb[181].mxu0 }
 0x973   : > { %v12358_v39 = vadd.f32 %v12357_v37, %v11731_v60  ;;  %v12711_v48 = vadd.f32 %v12710_v13, %v11731_v60  ;;  %v12359_v14 = vpop.f32.mrb[118].mxu1  ;;  %v12712_v21 = vpop.f32.mrb[182].mxu0  ;;  %14706 = vmatprep.subr.bf16.mxu1 %v13276_v1  ;;  %15412 = vmatprep.subr.bf16.mxu0 %v13278_v0 }
 0x974   : > { %v12360_v42 = vadd.f32 %v12359_v14, %v11736_v12  ;;  %v12713_v29 = vadd.f32 %v12712_v21, %v11736_v12  ;;  %v12361_v27 = vpop.f32.mrb[119].mxu1  ;;  %v12714_v34 = vpop.f32.mrb[183].mxu0  ;;  %14707 = vmatpush1.bf16.msra.mxu1 %v13275_v31  ;;  %15413 = vmatpush1.bf16.msra.mxu0 %v13277_v2  ;;  %v12983_v33 = vmax.f32 %v12356_v19, 0.0  ;;  %v12985_v57 = vmax.f32 %v12709_v41, 0.0 }
 0x975   : > { %v12362_v30 = vadd.f32 %v12361_v27, %v11736_v12  ;;  %v12715_v23 = vadd.f32 %v12714_v34, %v11736_v12  ;;  %v12984_v44 = vmax.f32 %v12358_v39, 0.0  ;;  %v12986_v52 = vmax.f32 %v12711_v48, 0.0  ;;  %v11751_v7 = vpop.permute.xlu0 %11750  ;;  %v11756_v40 = vpop.permute.xlu1 %11755 }
 0x976   : > { %v12987_v6 = vmax.f32 %v12360_v42, 0.0  ;;  %v12989_v43 = vmax.f32 %v12713_v29, 0.0 }
 0x977   : > { %v12988_v46 = vmax.f32 %v12362_v30, 0.0  ;;  %v12990_v49 = vmax.f32 %v12715_v23, 0.0  ;;  %14436 = vmatmul.mubr.bf16.gmra.mrb[180].mxu1 %v20293_v28  ;;  %15142 = vmatmul.mubr.bf16.gmra.mrb[244].mxu0 %v20293_v28  ;;  %v20299_v23 = vld [vmem:[#allocation16 + $0x100] ss:$16 sps:$4 sm:$0xff]  }
 0x978   : > { %v13279_v50 = vpack.c.bf16 %v12987_v6, %v12983_v33  ;;  %v13281_v36 = vpack.c.bf16 %v12989_v43, %v12985_v57  ;;  %14445 = vmatprep.mubr.bf16.mxu1 %v20294_v8  ;;  %15151 = vmatprep.mubr.bf16.mxu0 %v20294_v8  ;;  %v20300_v6 = vld [vmem:[#allocation16 + $0x124] ss:$16 sps:$4 sm:$0xff]  }
 0x979   : > { %v12365_v38 = vpop.f32.mrb[120].mxu1  ;;  %v12718_v53 = vpop.f32.mrb[184].mxu0  ;;  %v13280_v5 = vpack.c.bf16 %v12988_v46, %v12984_v44  ;;  %v13282_v54 = vpack.c.bf16 %v12990_v49, %v12986_v52 }
 0x97a   : > { %v12366_v56 = vadd.f32 %v12365_v38, %v11741_v16  ;;  %v12719_v47 = vadd.f32 %v12718_v53, %v11741_v16  ;;  %v12367_v32 = vpop.f32.mrb[121].mxu1  ;;  %v12720_v26 = vpop.f32.mrb[185].mxu0 }
 0x97b   : > { %v12368_v45 = vadd.f32 %v12367_v32, %v11741_v16  ;;  %v12721_v51 = vadd.f32 %v12720_v26, %v11741_v16  ;;  %v12369_v58 = vpop.f32.mrb[122].mxu1  ;;  %v12722_v61 = vpop.f32.mrb[186].mxu0  ;;  %14708 = vmatprep.subr.bf16.mxu1 %v13280_v5  ;;  %15414 = vmatprep.subr.bf16.mxu0 %v13282_v54 }
 0x97c   : > { %v12370_v62 = vadd.f32 %v12369_v58, %v11746_v4  ;;  %v12723_v63 = vadd.f32 %v12722_v61, %v11746_v4  ;;  %v12371_v15 = vpop.f32.mrb[123].mxu1  ;;  %v12724_v55 = vpop.f32.mrb[187].mxu0  ;;  %14709 = vmatpush1.bf16.msra.mxu1 %v13279_v50  ;;  %15415 = vmatpush1.bf16.msra.mxu0 %v13281_v36  ;;  %v12991_v3 = vmax.f32 %v12366_v56, 0.0  ;;  %v12993_v60 = vmax.f32 %v12719_v47, 0.0 }
 0x97d   : > { %v12372_v59 = vadd.f32 %v12371_v15, %v11746_v4  ;;  %v12725_v22 = vadd.f32 %v12724_v55, %v11746_v4  ;;  %v12992_v35 = vmax.f32 %v12368_v45, 0.0  ;;  %v12994_v24 = vmax.f32 %v12721_v51, 0.0  ;;  %v11761_v36 = vpop.permute.xlu0 %11760  ;;  %v11766_v38 = vpop.permute.xlu1 %11765 }
 0x97e   : > { %v12995_v18 = vmax.f32 %v12370_v62, 0.0  ;;  %v12997_v20 = vmax.f32 %v12723_v63, 0.0 }
 0x97f   : > { %v12996_v31 = vmax.f32 %v12372_v59, 0.0  ;;  %v12998_v2 = vmax.f32 %v12725_v22, 0.0  ;;  %14446 = vmatmul.mubr.bf16.gmra.mrb[184].mxu1 %v20296_v25  ;;  %15152 = vmatmul.mubr.bf16.gmra.mrb[248].mxu0 %v20296_v25 }
 0x980   : > { %v13283_v12 = vpack.c.bf16 %v12995_v18, %v12991_v3  ;;  %v13285_v1 = vpack.c.bf16 %v12997_v20, %v12993_v60  ;;  %14455 = vmatprep.mubr.bf16.mxu1 %v20297_v9  ;;  %15161 = vmatprep.mubr.bf16.mxu0 %v20297_v9  ;;  %v20302_v9 = vld [vmem:[#allocation16 + $0x120] ss:$16 sps:$4 sm:$0xff]   ;;  %v20303_v18 = vld [vmem:[#allocation16 + $0x144] ss:$16 sps:$4 sm:$0xff]  }
 0x981   : > { %v13284_v0 = vpack.c.bf16 %v12996_v31, %v12992_v35  ;;  %v13286_v37 = vpack.c.bf16 %v12998_v2, %v12994_v24  ;;  %v12375_v19 = vpop.f32.mrb[124].mxu1  ;;  %v12728_v41 = vpop.f32.mrb[188].mxu0 }
 0x982   : > { %v12376_v13 = vadd.f32 %v12375_v19, %v11751_v7  ;;  %v12729_v39 = vadd.f32 %v12728_v41, %v11751_v7  ;;  %v12377_v48 = vpop.f32.mrb[125].mxu1  ;;  %v12730_v14 = vpop.f32.mrb[189].mxu0 }
 0x983   : > { %v12378_v21 = vadd.f32 %v12377_v48, %v11751_v7  ;;  %v12731_v28 = vadd.f32 %v12730_v14, %v11751_v7  ;;  %v12379_v42 = vpop.f32.mrb[126].mxu1  ;;  %v12732_v29 = vpop.f32.mrb[190].mxu0  ;;  %14710 = vmatprep.subr.bf16.mxu1 %v13284_v0  ;;  %15416 = vmatprep.subr.bf16.mxu0 %v13286_v37 }
 0x984   : > { %v12380_v27 = vadd.f32 %v12379_v42, %v11756_v40  ;;  %v12733_v34 = vadd.f32 %v12732_v29, %v11756_v40  ;;  %v12381_v8 = vpop.f32.mrb[127].mxu1  ;;  %v12734_v30 = vpop.f32.mrb[191].mxu0  ;;  %14711 = vmatpush1.bf16.msra.mxu1 %v13283_v12  ;;  %15417 = vmatpush1.bf16.msra.mxu0 %v13285_v1  ;;  %v12999_v43 = vmax.f32 %v12376_v13, 0.0  ;;  %v13001_v16 = vmax.f32 %v12729_v39, 0.0 }
 0x985   : > { %v12382_v33 = vadd.f32 %v12381_v8, %v11756_v40  ;;  %v12735_v57 = vadd.f32 %v12734_v30, %v11756_v40  ;;  %v13000_v52 = vmax.f32 %v12378_v21, 0.0  ;;  %v13002_v46 = vmax.f32 %v12731_v28, 0.0  ;;  %v11771_v1 = vpop.permute.xlu0 %11770  ;;  %v11776_v0 = vpop.permute.xlu1 %11775 }
 0x986   : > { %v13003_v4 = vmax.f32 %v12380_v27, 0.0  ;;  %v13005_v44 = vmax.f32 %v12733_v34, 0.0 }
 0x987   : > { %v13004_v49 = vmax.f32 %v12382_v33, 0.0  ;;  %v13006_v50 = vmax.f32 %v12735_v57, 0.0  ;;  %14456 = vmatmul.mubr.bf16.gmra.mrb[188].mxu1 %v20299_v23  ;;  %15162 = vmatmul.mubr.bf16.gmra.mrb[252].mxu0 %v20299_v23 }
 0x988   : > { %v13287_v53 = vpack.c.bf16 %v13003_v4, %v12999_v43  ;;  %v13289_v5 = vpack.c.bf16 %v13005_v44, %v13001_v16  ;;  %14465 = vmatprep.mubr.bf16.mxu1 %v20300_v6  ;;  %15171 = vmatprep.mubr.bf16.mxu0 %v20300_v6  ;;  %v20305_v6 = vld [vmem:[#allocation16 + $0x140] ss:$16 sps:$4 sm:$0xff]   ;;  %v20306_v4 = vld [vmem:[#allocation16 + $0x164] ss:$16 sps:$4 sm:$0xff]  }
 0x989   : > { %v13288_v54 = vpack.c.bf16 %v13004_v49, %v13000_v52  ;;  %v13290_v56 = vpack.c.bf16 %v13006_v50, %v13002_v46  ;;  %v12385_v47 = vpop.f32.mrb[128].mxu1  ;;  %v12738_v32 = vpop.f32.mrb[192].mxu0 }
 0x98a   : > { %v12386_v26 = vadd.f32 %v12385_v47, %v11761_v36  ;;  %v12739_v45 = vadd.f32 %v12738_v32, %v11761_v36  ;;  %v12387_v51 = vpop.f32.mrb[129].mxu1  ;;  %v12740_v58 = vpop.f32.mrb[193].mxu0 }
 0x98b   : > { %v12388_v61 = vadd.f32 %v12387_v51, %v11761_v36  ;;  %v12741_v62 = vadd.f32 %v12740_v58, %v11761_v36  ;;  %v12389_v63 = vpop.f32.mrb[130].mxu1  ;;  %v12742_v15 = vpop.f32.mrb[194].mxu0  ;;  %14712 = vmatprep.subr.bf16.mxu1 %v13288_v54  ;;  %15418 = vmatprep.subr.bf16.mxu0 %v13290_v56 }
 0x98c   : > { %v12390_v55 = vadd.f32 %v12389_v63, %v11766_v38  ;;  %v12743_v25 = vadd.f32 %v12742_v15, %v11766_v38  ;;  %v12391_v59 = vpop.f32.mrb[131].mxu1  ;;  %v12744_v22 = vpop.f32.mrb[195].mxu0  ;;  %14713 = vmatpush1.bf16.msra.mxu1 %v13287_v53  ;;  %15419 = vmatpush1.bf16.msra.mxu0 %v13289_v5  ;;  %v13007_v20 = vmax.f32 %v12386_v26, 0.0  ;;  %v13009_v35 = vmax.f32 %v12739_v45, 0.0 }
 0x98d   : > { %v12392_v3 = vadd.f32 %v12391_v59, %v11766_v38  ;;  %v12745_v60 = vadd.f32 %v12744_v22, %v11766_v38  ;;  %v13008_v2 = vmax.f32 %v12388_v61, 0.0  ;;  %v13010_v7 = vmax.f32 %v12741_v62, 0.0  ;;  %v11781_v5 = vpop.permute.xlu0 %11780  ;;  %v11786_v54 = vpop.permute.xlu1 %11785 }
 0x98e   : > { %v13011_v24 = vmax.f32 %v12390_v55, 0.0  ;;  %v13013_v31 = vmax.f32 %v12743_v25, 0.0 }
 0x98f   : > { %v13012_v40 = vmax.f32 %v12392_v3, 0.0  ;;  %v13014_v12 = vmax.f32 %v12745_v60, 0.0  ;;  %14466 = vmatmul.mubr.bf16.gmra.mrb[192].mxu1 %v20302_v9  ;;  %15172 = vmatmul.mubr.bf16.gmra.mrb[0].mxu0 %v20302_v9 }
 0x990   : > { %v13291_v37 = vpack.c.bf16 %v13011_v24, %v13007_v20  ;;  %v13293_v19 = vpack.c.bf16 %v13013_v31, %v13009_v35  ;;  %14475 = vmatprep.mubr.bf16.mxu1 %v20303_v18  ;;  %15181 = vmatprep.mubr.bf16.mxu0 %v20303_v18  ;;  %v20308_v18 = vld [vmem:[#allocation16 + $0x160] ss:$16 sps:$4 sm:$0xff]   ;;  %v20309_v24 = vld [vmem:[#allocation16 + $0x184] ss:$16 sps:$4 sm:$0xff]  }
 0x991   : > { %v13292_v41 = vpack.c.bf16 %v13012_v40, %v13008_v2  ;;  %v13294_v13 = vpack.c.bf16 %v13014_v12, %v13010_v7  ;;  %v12395_v39 = vpop.f32.mrb[132].mxu1  ;;  %v12748_v48 = vpop.f32.mrb[196].mxu0 }
 0x992   : > { %v12396_v14 = vadd.f32 %v12395_v39, %v11771_v1  ;;  %v12749_v21 = vadd.f32 %v12748_v48, %v11771_v1  ;;  %v12397_v28 = vpop.f32.mrb[133].mxu1  ;;  %v12750_v42 = vpop.f32.mrb[197].mxu0 }
 0x993   : > { %v12398_v29 = vadd.f32 %v12397_v28, %v11771_v1  ;;  %v12751_v27 = vadd.f32 %v12750_v42, %v11771_v1  ;;  %v12399_v34 = vpop.f32.mrb[134].mxu1  ;;  %v12752_v8 = vpop.f32.mrb[198].mxu0  ;;  %14714 = vmatprep.subr.bf16.mxu1 %v13292_v41  ;;  %15420 = vmatprep.subr.bf16.mxu0 %v13294_v13 }
 0x994   : > { %v12400_v30 = vadd.f32 %v12399_v34, %v11776_v0  ;;  %v12753_v23 = vadd.f32 %v12752_v8, %v11776_v0  ;;  %v12401_v33 = vpop.f32.mrb[135].mxu1  ;;  %v12754_v57 = vpop.f32.mrb[199].mxu0  ;;  %14715 = vmatpush1.bf16.msra.mxu1 %v13291_v37  ;;  %15421 = vmatpush1.bf16.msra.mxu0 %v13293_v19  ;;  %v13015_v44 = vmax.f32 %v12396_v14, 0.0  ;;  %v13017_v52 = vmax.f32 %v12749_v21, 0.0 }
 0x995   : > { %v12402_v43 = vadd.f32 %v12401_v33, %v11776_v0  ;;  %v12755_v16 = vadd.f32 %v12754_v57, %v11776_v0  ;;  %v13016_v50 = vmax.f32 %v12398_v29, 0.0  ;;  %v13018_v36 = vmax.f32 %v12751_v27, 0.0  ;;  %v11791_v19 = vpop.permute.xlu0 %11790  ;;  %v11796_v41 = vpop.permute.xlu1 %11795 }
 0x996   : > { %v13019_v46 = vmax.f32 %v12400_v30, 0.0  ;;  %v13021_v49 = vmax.f32 %v12753_v23, 0.0 }
 0x997   : > { %v13020_v38 = vmax.f32 %v12402_v43, 0.0  ;;  %v13022_v53 = vmax.f32 %v12755_v16, 0.0  ;;  %14476 = vmatmul.mubr.bf16.gmra.mrb[196].mxu1 %v20305_v6  ;;  %15182 = vmatmul.mubr.bf16.gmra.mrb[4].mxu0 %v20305_v6 }
 0x998   : > { %v13295_v56 = vpack.c.bf16 %v13019_v46, %v13015_v44  ;;  %v13297_v47 = vpack.c.bf16 %v13021_v49, %v13017_v52  ;;  %14485 = vmatprep.mubr.bf16.mxu1 %v20306_v4  ;;  %15191 = vmatprep.mubr.bf16.mxu0 %v20306_v4  ;;  %v20311_v4 = vld [vmem:[#allocation16 + $0x180] ss:$16 sps:$4 sm:$0xff]   ;;  %v20312_v46 = vld [vmem:[#allocation16 + $0x1a4] ss:$16 sps:$4 sm:$0xff]  }
 0x999   : > { %v13296_v32 = vpack.c.bf16 %v13020_v38, %v13016_v50  ;;  %v13298_v26 = vpack.c.bf16 %v13022_v53, %v13018_v36  ;;  %v12405_v45 = vpop.f32.mrb[136].mxu1  ;;  %v12758_v51 = vpop.f32.mrb[200].mxu0 }
 0x99a   : > { %v12406_v58 = vadd.f32 %v12405_v45, %v11781_v5  ;;  %v12759_v61 = vadd.f32 %v12758_v51, %v11781_v5  ;;  %v12407_v62 = vpop.f32.mrb[137].mxu1  ;;  %v12760_v63 = vpop.f32.mrb[201].mxu0 }
 0x99b   : > { %v12408_v15 = vadd.f32 %v12407_v62, %v11781_v5  ;;  %v12761_v55 = vadd.f32 %v12760_v63, %v11781_v5  ;;  %v12409_v25 = vpop.f32.mrb[138].mxu1  ;;  %v12762_v59 = vpop.f32.mrb[202].mxu0  ;;  %14716 = vmatprep.subr.bf16.mxu1 %v13296_v32  ;;  %15422 = vmatprep.subr.bf16.mxu0 %v13298_v26 }
 0x99c   : > { %v12410_v22 = vadd.f32 %v12409_v25, %v11786_v54  ;;  %v12763_v9 = vadd.f32 %v12762_v59, %v11786_v54  ;;  %v12411_v3 = vpop.f32.mrb[139].mxu1  ;;  %v12764_v60 = vpop.f32.mrb[203].mxu0  ;;  %14717 = vmatpush1.bf16.msra.mxu1 %v13295_v56  ;;  %15423 = vmatpush1.bf16.msra.mxu0 %v13297_v47  ;;  %v13023_v31 = vmax.f32 %v12406_v58, 0.0  ;;  %v13025_v2 = vmax.f32 %v12759_v61, 0.0 }
 0x99d   : > { %v12412_v20 = vadd.f32 %v12411_v3, %v11786_v54  ;;  %v12765_v35 = vadd.f32 %v12764_v60, %v11786_v54  ;;  %v13024_v12 = vmax.f32 %v12408_v15, 0.0  ;;  %v13026_v1 = vmax.f32 %v12761_v55, 0.0  ;;  %v11801_v47 = vpop.permute.xlu0 %11800  ;;  %v11806_v45 = vpop.permute.xlu1 %11805 }
 0x99e   : > { %v13027_v7 = vmax.f32 %v12410_v22, 0.0  ;;  %v13029_v40 = vmax.f32 %v12763_v9, 0.0 }
 0x99f   : > { %v13028_v0 = vmax.f32 %v12412_v20, 0.0  ;;  %v13030_v37 = vmax.f32 %v12765_v35, 0.0  ;;  %14486 = vmatmul.mubr.bf16.gmra.mrb[200].mxu1 %v20308_v18  ;;  %15192 = vmatmul.mubr.bf16.gmra.mrb[8].mxu0 %v20308_v18  ;;  %v20314_v20 = vld [vmem:[#allocation16 + $0x1a0] ss:$16 sps:$4 sm:$0xff]  }
 0x9a0   : > { %v13299_v13 = vpack.c.bf16 %v13027_v7, %v13023_v31  ;;  %v13301_v39 = vpack.c.bf16 %v13029_v40, %v13025_v2  ;;  %14495 = vmatprep.mubr.bf16.mxu1 %v20309_v24  ;;  %15201 = vmatprep.mubr.bf16.mxu0 %v20309_v24  ;;  %v20315_v2 = vld [vmem:[#allocation16 + $0x1c4] ss:$16 sps:$4 sm:$0xff]  }
 0x9a1   : > { %v13300_v48 = vpack.c.bf16 %v13028_v0, %v13024_v12  ;;  %v13302_v14 = vpack.c.bf16 %v13030_v37, %v13026_v1  ;;  %v12415_v21 = vpop.f32.mrb[140].mxu1  ;;  %v12768_v28 = vpop.f32.mrb[204].mxu0 }
 0x9a2   : > { %v12416_v42 = vadd.f32 %v12415_v21, %v11791_v19  ;;  %v12769_v29 = vadd.f32 %v12768_v28, %v11791_v19  ;;  %v12417_v27 = vpop.f32.mrb[141].mxu1  ;;  %v12770_v34 = vpop.f32.mrb[205].mxu0 }
 0x9a3   : > { %v12418_v8 = vadd.f32 %v12417_v27, %v11791_v19  ;;  %v12771_v30 = vadd.f32 %v12770_v34, %v11791_v19  ;;  %v12419_v23 = vpop.f32.mrb[142].mxu1  ;;  %v12772_v33 = vpop.f32.mrb[206].mxu0  ;;  %14718 = vmatprep.subr.bf16.mxu1 %v13300_v48  ;;  %15424 = vmatprep.subr.bf16.mxu0 %v13302_v14 }
 0x9a4   : > { %v12420_v57 = vadd.f32 %v12419_v23, %v11796_v41  ;;  %v12773_v6 = vadd.f32 %v12772_v33, %v11796_v41  ;;  %v12421_v43 = vpop.f32.mrb[143].mxu1  ;;  %v12774_v16 = vpop.f32.mrb[207].mxu0  ;;  %14719 = vmatpush1.bf16.msra.mxu1 %v13299_v13  ;;  %15425 = vmatpush1.bf16.msra.mxu0 %v13301_v39  ;;  %v13031_v49 = vmax.f32 %v12416_v42, 0.0  ;;  %v13033_v50 = vmax.f32 %v12769_v29, 0.0 }
 0x9a5   : > { %v12422_v44 = vadd.f32 %v12421_v43, %v11796_v41  ;;  %v12775_v52 = vadd.f32 %v12774_v16, %v11796_v41  ;;  %v13032_v53 = vmax.f32 %v12418_v8, 0.0  ;;  %v13034_v5 = vmax.f32 %v12771_v30, 0.0  ;;  %v11811_v41 = vpop.permute.xlu0 %11810  ;;  %v11816_v14 = vpop.permute.xlu1 %11815 }
 0x9a6   : > { %v13035_v36 = vmax.f32 %v12420_v57, 0.0  ;;  %v13037_v38 = vmax.f32 %v12773_v6, 0.0 }
 0x9a7   : > { %v13036_v54 = vmax.f32 %v12422_v44, 0.0  ;;  %v13038_v56 = vmax.f32 %v12775_v52, 0.0  ;;  %14496 = vmatmul.mubr.bf16.gmra.mrb[204].mxu1 %v20311_v4  ;;  %15202 = vmatmul.mubr.bf16.gmra.mrb[12].mxu0 %v20311_v4  ;;  %v20317_v44 = vld [vmem:[#allocation16 + $0x1c0] ss:$16 sps:$4 sm:$0xff]  }
 0x9a8   : > { %v13303_v32 = vpack.c.bf16 %v13035_v36, %v13031_v49  ;;  %v13305_v26 = vpack.c.bf16 %v13037_v38, %v13033_v50  ;;  %14505 = vmatprep.mubr.bf16.mxu1 %v20312_v46  ;;  %15211 = vmatprep.mubr.bf16.mxu0 %v20312_v46  ;;  %v20318_v50 = vld [vmem:[#allocation16 + $0x1e4] ss:$16 sps:$4 sm:$0xff]  }
 0x9a9   : > { %v13304_v51 = vpack.c.bf16 %v13036_v54, %v13032_v53  ;;  %v13306_v58 = vpack.c.bf16 %v13038_v56, %v13034_v5  ;;  %v12425_v61 = vpop.f32.mrb[144].mxu1  ;;  %v12778_v63 = vpop.f32.mrb[208].mxu0 }
 0x9aa   : > { %v12426_v62 = vadd.f32 %v12425_v61, %v11801_v47  ;;  %v12427_v15 = vpop.f32.mrb[145].mxu1  ;;  %v12779_v55 = vadd.f32 %v12778_v63, %v11801_v47  ;;  %v12780_v59 = vpop.f32.mrb[209].mxu0 }
 0x9ab   : > { %v12428_v25 = vadd.f32 %v12427_v15, %v11801_v47  ;;  %v12429_v22 = vpop.f32.mrb[146].mxu1  ;;  %14720 = vmatprep.subr.bf16.mxu1 %v13304_v51  ;;  %15426 = vmatprep.subr.bf16.mxu0 %v13306_v58  ;;  %v12781_v9 = vadd.f32 %v12780_v59, %v11801_v47  ;;  %v12782_v60 = vpop.f32.mrb[210].mxu0 }
 0x9ac   : > { %v12430_v3 = vadd.f32 %v12429_v22, %v11806_v45  ;;  %v12431_v18 = vpop.f32.mrb[147].mxu1  ;;  %14721 = vmatpush1.bf16.msra.mxu1 %v13303_v32  ;;  %15427 = vmatpush1.bf16.msra.mxu0 %v13305_v26  ;;  %v12783_v35 = vadd.f32 %v12782_v60, %v11806_v45  ;;  %v12784_v31 = vpop.f32.mrb[211].mxu0  ;;  %v13039_v7 = vmax.f32 %v12426_v62, 0.0  ;;  %v13041_v1 = vmax.f32 %v12779_v55, 0.0 }
 0x9ad   : > { %v12432_v24 = vadd.f32 %v12431_v18, %v11806_v45  ;;  %v12785_v12 = vadd.f32 %v12784_v31, %v11806_v45  ;;  %v13040_v0 = vmax.f32 %v12428_v25, 0.0  ;;  %v13042_v13 = vmax.f32 %v12781_v9, 0.0  ;;  %v11821_v32 = vpop.permute.xlu0 %11820  ;;  %v11826_v58 = vpop.permute.xlu1 %11825  ;;  %v20320_v31 = vld [vmem:[#allocation16 + $0x1e0] ss:$16 sps:$4 sm:$0xff]  }
 0x9ae   : > { %v13043_v40 = vmax.f32 %v12430_v3, 0.0  ;;  %v13045_v37 = vmax.f32 %v12783_v35, 0.0 }
 0x9af   : > { %v13044_v19 = vmax.f32 %v12432_v24, 0.0  ;;  %v13046_v48 = vmax.f32 %v12785_v12, 0.0  ;;  %14506 = vmatmul.mubr.bf16.gmra.mrb[208].mxu1 %v20314_v20  ;;  %15212 = vmatmul.mubr.bf16.gmra.mrb[16].mxu0 %v20314_v20  ;;  %v20321_v12 = vld [vmem:[#allocation16 + $0x204] ss:$16 sps:$4 sm:$0xff]  }
 0x9b0   : > { %v13307_v39 = vpack.c.bf16 %v13043_v40, %v13039_v7  ;;  %v13309_v21 = vpack.c.bf16 %v13045_v37, %v13041_v1  ;;  %14515 = vmatprep.mubr.bf16.mxu1 %v20315_v2  ;;  %15221 = vmatprep.mubr.bf16.mxu0 %v20315_v2 }
 0x9b1   : > { %v13308_v28 = vpack.c.bf16 %v13044_v19, %v13040_v0  ;;  %v12435_v42 = vpop.f32.mrb[148].mxu1  ;;  %v13310_v29 = vpack.c.bf16 %v13046_v48, %v13042_v13  ;;  %v12788_v34 = vpop.f32.mrb[212].mxu0 }
 0x9b2   : > { %v12436_v27 = vadd.f32 %v12435_v42, %v11811_v41  ;;  %v12437_v8 = vpop.f32.mrb[149].mxu1  ;;  %v12789_v30 = vadd.f32 %v12788_v34, %v11811_v41  ;;  %v12790_v33 = vpop.f32.mrb[213].mxu0  ;;  %v20324_v34 = vld [vmem:[#allocation16 + $0x224] ss:$16 sps:$4 sm:$0xff]  }
 0x9b3   : > { %v12438_v23 = vadd.f32 %v12437_v8, %v11811_v41  ;;  %v12439_v57 = vpop.f32.mrb[150].mxu1  ;;  %14722 = vmatprep.subr.bf16.mxu1 %v13308_v28  ;;  %v12791_v6 = vadd.f32 %v12790_v33, %v11811_v41  ;;  %v12792_v16 = vpop.f32.mrb[214].mxu0  ;;  %15428 = vmatprep.subr.bf16.mxu0 %v13310_v29  ;;  %v20326_v8 = vld [vmem:[#allocation16 + $0x220] ss:$16 sps:$4 sm:$0xff]   ;;  %v20330_v33 = vld [vmem:[#allocation16 + $0x264] ss:$16 sps:$4 sm:$0xff]  }
 0x9b4   : > { %v12440_v43 = vadd.f32 %v12439_v57, %v11816_v14  ;;  %v12441_v4 = vpop.f32.mrb[151].mxu1  ;;  %14723 = vmatpush1.bf16.msra.mxu1 %v13307_v39  ;;  %v12793_v52 = vadd.f32 %v12792_v16, %v11816_v14  ;;  %v12794_v49 = vpop.f32.mrb[215].mxu0  ;;  %15429 = vmatpush1.bf16.msra.mxu0 %v13309_v21  ;;  %v13047_v36 = vmax.f32 %v12436_v27, 0.0  ;;  %v13049_v5 = vmax.f32 %v12789_v30, 0.0  ;;  %v20323_v27 = vld [vmem:[#allocation16 + $0x200] ss:$16 sps:$4 sm:$0xff]  }
 0x9b5   : > { %v12442_v46 = vadd.f32 %v12441_v4, %v11816_v14  ;;  %v12795_v53 = vadd.f32 %v12794_v49, %v11816_v14  ;;  %v13048_v54 = vmax.f32 %v12438_v23, 0.0  ;;  %v13050_v26 = vmax.f32 %v12791_v6, 0.0  ;;  %v20327_v30 = vld [vmem:[#allocation16 + $0x244] ss:$16 sps:$4 sm:$0xff]   ;;  %v20329_v23 = vld [vmem:[#allocation16 + $0x240] ss:$16 sps:$4 sm:$0xff]  }
 0x9b6   : > { %v13051_v38 = vmax.f32 %v12440_v43, 0.0  ;;  %v13053_v56 = vmax.f32 %v12793_v52, 0.0  ;;  %v20332_v57 = vld [vmem:[#allocation16 + $0x260] ss:$16 sps:$4 sm:$0xff]   ;;  %v20333_v6 = vld [vmem:[#allocation16 + $0x284] ss:$16 sps:$4 sm:$0xff]  }
 0x9b7   : > { %v13052_v47 = vmax.f32 %v12442_v46, 0.0  ;;  %v13054_v51 = vmax.f32 %v12795_v53, 0.0  ;;  %14516 = vmatmul.mubr.bf16.gmra.mrb[212].mxu1 %v20317_v44  ;;  %15222 = vmatmul.mubr.bf16.gmra.mrb[20].mxu0 %v20317_v44  ;;  %v20335_v43 = vld [vmem:[#allocation16 + $0x280] ss:$16 sps:$4 sm:$0xff]   ;;  %v20336_v16 = vld [vmem:[#allocation16 + $0x2a4] ss:$16 sps:$4 sm:$0xff]  }
 0x9b8   : > { %v13311_v45 = vpack.c.bf16 %v13051_v38, %v13047_v36  ;;  %v13313_v61 = vpack.c.bf16 %v13053_v56, %v13049_v5  ;;  %14525 = vmatprep.mubr.bf16.mxu1 %v20318_v50  ;;  %15231 = vmatprep.mubr.bf16.mxu0 %v20318_v50  ;;  %v20338_v4 = vld [vmem:[#allocation16 + $0x2a0] ss:$16 sps:$4 sm:$0xff]   ;;  %v20339_v44 = vld [vmem:[#allocation16 + $0x2c4] ss:$16 sps:$4 sm:$0xff]  }
 0x9b9   : > { %v13312_v62 = vpack.c.bf16 %v13052_v47, %v13048_v54  ;;  %v12445_v63 = vpop.f32.mrb[152].mxu1  ;;  %v13314_v15 = vpack.c.bf16 %v13054_v51, %v13050_v26  ;;  %v12798_v25 = vpop.f32.mrb[216].mxu0  ;;  %v20341_v52 = vld [vmem:[#allocation16 + $0x2c0] ss:$16 sps:$4 sm:$0xff]   ;;  %v20342_v46 = vld [vmem:[#allocation16 + $0x2e4] ss:$16 sps:$4 sm:$0xff]  }
 0x9ba   : > { %v12446_v55 = vadd.f32 %v12445_v63, %v11821_v32  ;;  %v12447_v59 = vpop.f32.mrb[153].mxu1  ;;  %v12799_v22 = vadd.f32 %v12798_v25, %v11821_v32  ;;  %v12800_v3 = vpop.f32.mrb[217].mxu0  ;;  %v20344_v49 = vld [vmem:[#allocation16 + $0x2e0] ss:$16 sps:$4 sm:$0xff]   ;;  %v20345_v50 = vld [vmem:[#allocation16 + $0x304] ss:$16 sps:$4 sm:$0xff]  }
 0x9bb   : > { %v12448_v9 = vadd.f32 %v12447_v59, %v11821_v32  ;;  %v12449_v60 = vpop.f32.mrb[154].mxu1  ;;  %14724 = vmatprep.subr.bf16.mxu1 %v13312_v62  ;;  %v12801_v18 = vadd.f32 %v12800_v3, %v11821_v32  ;;  %v12802_v35 = vpop.f32.mrb[218].mxu0  ;;  %15430 = vmatprep.subr.bf16.mxu0 %v13314_v15  ;;  %v20347_v36 = vld [vmem:[#allocation16 + $0x300] ss:$16 sps:$4 sm:$0xff]   ;;  %v20350_v38 = vld [vmem:[#allocation16 + $0x324] ss:$16 sps:$4 sm:$0xff]  }
 0x9bc   : > { %v12450_v20 = vadd.f32 %v12449_v60, %v11826_v58  ;;  %v12451_v24 = vpop.f32.mrb[155].mxu1  ;;  %14725 = vmatpush1.bf16.msra.mxu1 %v13311_v45  ;;  %v12803_v2 = vadd.f32 %v12802_v35, %v11826_v58  ;;  %v12804_v40 = vpop.f32.mrb[219].mxu0  ;;  %15431 = vmatpush1.bf16.msra.mxu0 %v13313_v61  ;;  %v13055_v1 = vmax.f32 %v12446_v55, 0.0  ;;  %v13057_v19 = vmax.f32 %v12799_v22, 0.0  ;;  %v20348_v53 = vld [vmem:[#allocation16 + $0x320] ss:$16 sps:$4 sm:$0xff]  }
 0x9bd   : > { %v12452_v7 = vadd.f32 %v12451_v24, %v11826_v58  ;;  %v12805_v37 = vadd.f32 %v12804_v40, %v11826_v58  ;;  %v13056_v41 = vmax.f32 %v12448_v9, 0.0  ;;  %v13058_v48 = vmax.f32 %v12801_v18, 0.0  ;;  %v20353_v5 = vld [vmem:[#allocation16 + $0x344] ss:$16 sps:$4 sm:$0xff]   ;;  %v20351_v54 = vld [vmem:[#allocation16 + $0x340] ss:$16 sps:$4 sm:$0xff]  }
 0x9be   : > { %v13059_v0 = vmax.f32 %v12450_v20, 0.0  ;;  %v13061_v13 = vmax.f32 %v12803_v2, 0.0  ;;  %v20356_v56 = vld [vmem:[#allocation16 + $0x364] ss:$16 sps:$4 sm:$0xff]   ;;  %v20354_v47 = vld [vmem:[#allocation16 + $0x360] ss:$16 sps:$4 sm:$0xff]  }
 0x9bf   : > { %v13060_v39 = vmax.f32 %v12452_v7, 0.0  ;;  %v13062_v21 = vmax.f32 %v12805_v37, 0.0  ;;  %14526 = vmatmul.mubr.bf16.gmra.mrb[216].mxu1 %v20320_v31  ;;  %15232 = vmatmul.mubr.bf16.gmra.mrb[24].mxu0 %v20320_v31  ;;  %v20359_v32 = vld [vmem:[#allocation16 + $0x384] ss:$16 sps:$4 sm:$0xff]   ;;  %v20357_v26 = vld [vmem:[#allocation16 + $0x380] ss:$16 sps:$4 sm:$0xff]  }
 0x9c0   : > { %v13315_v14 = vpack.c.bf16 %v13059_v0, %v13055_v1  ;;  %v13317_v28 = vpack.c.bf16 %v13061_v13, %v13057_v19  ;;  %14535 = vmatprep.mubr.bf16.mxu1 %v20321_v12  ;;  %15241 = vmatprep.mubr.bf16.mxu0 %v20321_v12  ;;  %v20362_v45 = vld [vmem:[#allocation16 + $0x3a4] ss:$16 sps:$4 sm:$0xff]   ;;  %v20360_v51 = vld [vmem:[#allocation16 + $0x3a0] ss:$16 sps:$4 sm:$0xff]   ;;  %v20371_v15 = vld [vmem:[#allocation16 + $0xc] ss:$16 sps:$4 sm:$0xff]  }
 0x9c1   : > { %v13316_v42 = vpack.c.bf16 %v13060_v39, %v13056_v41  ;;  %v13318_v29 = vpack.c.bf16 %v13062_v21, %v13058_v48  ;;  %v20365_v58 = vld [vmem:[#allocation16 + $0x3c4] ss:$16 sps:$4 sm:$0xff]   ;;  %v20363_v61 = vld [vmem:[#allocation16 + $0x3c0] ss:$16 sps:$4 sm:$0xff]   ;;  %v20369_v55 = vld [vmem:[#allocation16 + $0x8] ss:$16 sps:$4 sm:$0xff]  }
 0x9c2   : > { %v20368_v62 = vld [vmem:[#allocation16 + $0x3e4] ss:$16 sps:$4 sm:$0xff]   ;;  %v20366_v63 = vld [vmem:[#allocation16 + $0x3e0] ss:$16 sps:$4 sm:$0xff]   ;;  %v20372_v25 = vld [vmem:[#allocation16 + $0x2c] ss:$16 sps:$4 sm:$0xff]  }
 0x9c3   : > { %14726 = vmatprep.subr.bf16.mxu1 %v13316_v42  ;;  %15432 = vmatprep.subr.bf16.mxu0 %v13318_v29  ;;  %v20374_v59 = vld [vmem:[#allocation16 + $0x28] ss:$16 sps:$4 sm:$0xff]   ;;  %v20375_v22 = vld [vmem:[#allocation16 + $0x4c] ss:$16 sps:$4 sm:$0xff]  }
 0x9c4   : > { %14727 = vmatpush1.bf16.msra.mxu1 %v13315_v14  ;;  %15433 = vmatpush1.bf16.msra.mxu0 %v13317_v28  ;;  %v20377_v9 = vld [vmem:[#allocation16 + $0x48] ss:$16 sps:$4 sm:$0xff]   ;;  %v20378_v3 = vld [vmem:[#allocation16 + $0x6c] ss:$16 sps:$4 sm:$0xff]  }
 0x9c5   : > { %v20380_v60 = vld [vmem:[#allocation16 + $0x68] ss:$16 sps:$4 sm:$0xff]   ;;  %v20381_v18 = vld [vmem:[#allocation16 + $0x8c] ss:$16 sps:$4 sm:$0xff]  }
 0x9c6   : > { %v20383_v20 = vld [vmem:[#allocation16 + $0x88] ss:$16 sps:$4 sm:$0xff]   ;;  %v20384_v35 = vld [vmem:[#allocation16 + $0xac] ss:$16 sps:$4 sm:$0xff]  }
 0x9c7   : > { %14536 = vmatmul.mubr.bf16.gmra.mrb[220].mxu1 %v20323_v27  ;;  %15242 = vmatmul.mubr.bf16.gmra.mrb[28].mxu0 %v20323_v27  ;;  %v20386_v24 = vld [vmem:[#allocation16 + $0xa8] ss:$16 sps:$4 sm:$0xff]   ;;  %v20387_v31 = vld [vmem:[#allocation16 + $0xcc] ss:$16 sps:$4 sm:$0xff]  }
 0x9c8   : > { %14545 = vmatprep.mubr.bf16.mxu1 %v20324_v34  ;;  %15251 = vmatprep.mubr.bf16.mxu0 %v20324_v34  ;;  %v20389_v2 = vld [vmem:[#allocation16 + $0xc8] ss:$16 sps:$4 sm:$0xff]   ;;  %v20390_v7 = vld [vmem:[#allocation16 + $0xec] ss:$16 sps:$4 sm:$0xff]  }
 0x9c9   : > { %v20392_v40 = vld [vmem:[#allocation16 + $0xe8] ss:$16 sps:$4 sm:$0xff]   ;;  %v20393_v12 = vld [vmem:[#allocation16 + $0x10c] ss:$16 sps:$4 sm:$0xff]  }
 0x9ca   : > { %v20395_v1 = vld [vmem:[#allocation16 + $0x108] ss:$16 sps:$4 sm:$0xff]   ;;  %v20396_v0 = vld [vmem:[#allocation16 + $0x12c] ss:$16 sps:$4 sm:$0xff]  }
 0x9cb   : > { %v20398_v37 = vld [vmem:[#allocation16 + $0x128] ss:$16 sps:$4 sm:$0xff]   ;;  %v20399_v19 = vld [vmem:[#allocation16 + $0x14c] ss:$16 sps:$4 sm:$0xff]  }
 0x9cc   : > { %v20401_v41 = vld [vmem:[#allocation16 + $0x148] ss:$16 sps:$4 sm:$0xff]   ;;  %v20402_v13 = vld [vmem:[#allocation16 + $0x16c] ss:$16 sps:$4 sm:$0xff]  }
 0x9cd   : > { %v20404_v39 = vld [vmem:[#allocation16 + $0x168] ss:$16 sps:$4 sm:$0xff]   ;;  %v20405_v48 = vld [vmem:[#allocation16 + $0x18c] ss:$16 sps:$4 sm:$0xff]  }
 0x9ce   : > { %v20407_v14 = vld [vmem:[#allocation16 + $0x188] ss:$16 sps:$4 sm:$0xff]   ;;  %v20408_v21 = vld [vmem:[#allocation16 + $0x1ac] ss:$16 sps:$4 sm:$0xff]  }
 0x9cf   : > { %14546 = vmatmul.mubr.bf16.gmra.mrb[224].mxu1 %v20326_v8  ;;  %15252 = vmatmul.mubr.bf16.gmra.mrb[32].mxu0 %v20326_v8  ;;  %v20410_v28 = vld [vmem:[#allocation16 + $0x1a8] ss:$16 sps:$4 sm:$0xff]   ;;  %v20411_v42 = vld [vmem:[#allocation16 + $0x1cc] ss:$16 sps:$4 sm:$0xff]  }
 0x9d0   : > { %14555 = vmatprep.mubr.bf16.mxu1 %v20327_v30  ;;  %15261 = vmatprep.mubr.bf16.mxu0 %v20327_v30  ;;  %v20413_v29 = vld [vmem:[#allocation16 + $0x1c8] ss:$16 sps:$4 sm:$0xff]   ;;  %v20414_v27 = vld [vmem:[#allocation16 + $0x1ec] ss:$16 sps:$4 sm:$0xff]  }
 0x9d1   : > { %v20416_v34 = vld [vmem:[#allocation16 + $0x1e8] ss:$16 sps:$4 sm:$0xff]   ;;  %v20417_v8 = vld [vmem:[#allocation16 + $0x20c] ss:$16 sps:$4 sm:$0xff]  }
 0x9d2   : > { %v20419_v30 = vld [vmem:[#allocation16 + $0x208] ss:$16 sps:$4 sm:$0xff]  }
 0x9d7   : > { %14556 = vmatmul.mubr.bf16.gmra.mrb[228].mxu1 %v20329_v23  ;;  %15262 = vmatmul.mubr.bf16.gmra.mrb[36].mxu0 %v20329_v23  ;;  %v20420_v23 = vld [vmem:[#allocation16 + $0x22c] ss:$16 sps:$4 sm:$0xff]  }
 0x9d8   : > { %14565 = vmatprep.mubr.bf16.mxu1 %v20330_v33  ;;  %15271 = vmatprep.mubr.bf16.mxu0 %v20330_v33  ;;  %v20422_v33 = vld [vmem:[#allocation16 + $0x228] ss:$16 sps:$4 sm:$0xff]  }
 0x9df   : > { %14566 = vmatmul.mubr.bf16.gmra.mrb[232].mxu1 %v20332_v57  ;;  %15272 = vmatmul.mubr.bf16.gmra.mrb[40].mxu0 %v20332_v57  ;;  %v20423_v57 = vld [vmem:[#allocation16 + $0x24c] ss:$16 sps:$4 sm:$0xff]  }
 0x9e0   : > { %14575 = vmatprep.mubr.bf16.mxu1 %v20333_v6  ;;  %15281 = vmatprep.mubr.bf16.mxu0 %v20333_v6  ;;  %v20425_v6 = vld [vmem:[#allocation16 + $0x248] ss:$16 sps:$4 sm:$0xff]  }
 0x9e7   : > { %14576 = vmatmul.mubr.bf16.gmra.mrb[236].mxu1 %v20335_v43  ;;  %15282 = vmatmul.mubr.bf16.gmra.mrb[44].mxu0 %v20335_v43  ;;  %v20426_v43 = vld [vmem:[#allocation16 + $0x26c] ss:$16 sps:$4 sm:$0xff]  }
 0x9e8   : > { %14585 = vmatprep.mubr.bf16.mxu1 %v20336_v16  ;;  %15291 = vmatprep.mubr.bf16.mxu0 %v20336_v16  ;;  %v20428_v16 = vld [vmem:[#allocation16 + $0x268] ss:$16 sps:$4 sm:$0xff]  }
 0x9ef   : > { %14586 = vmatmul.mubr.bf16.gmra.mrb[240].mxu1 %v20338_v4  ;;  %15292 = vmatmul.mubr.bf16.gmra.mrb[48].mxu0 %v20338_v4  ;;  %v20429_v4 = vld [vmem:[#allocation16 + $0x28c] ss:$16 sps:$4 sm:$0xff]  }
 0x9f0   : > { %14595 = vmatprep.mubr.bf16.mxu1 %v20339_v44  ;;  %15301 = vmatprep.mubr.bf16.mxu0 %v20339_v44  ;;  %v20431_v44 = vld [vmem:[#allocation16 + $0x288] ss:$16 sps:$4 sm:$0xff]  }
 0x9f7   : > { %14596 = vmatmul.mubr.bf16.gmra.mrb[244].mxu1 %v20341_v52  ;;  %15302 = vmatmul.mubr.bf16.gmra.mrb[52].mxu0 %v20341_v52  ;;  %v20432_v52 = vld [vmem:[#allocation16 + $0x2ac] ss:$16 sps:$4 sm:$0xff]  }
 0x9f8   : > { %14605 = vmatprep.mubr.bf16.mxu1 %v20342_v46  ;;  %15311 = vmatprep.mubr.bf16.mxu0 %v20342_v46  ;;  %v20434_v46 = vld [vmem:[#allocation16 + $0x2a8] ss:$16 sps:$4 sm:$0xff]  }
 0x9ff   : > { %14606 = vmatmul.mubr.bf16.gmra.mrb[248].mxu1 %v20344_v49  ;;  %15312 = vmatmul.mubr.bf16.gmra.mrb[56].mxu0 %v20344_v49  ;;  %v20435_v49 = vld [vmem:[#allocation16 + $0x2cc] ss:$16 sps:$4 sm:$0xff]  }
 0xa00   : > { %14615 = vmatprep.mubr.bf16.mxu1 %v20345_v50  ;;  %15321 = vmatprep.mubr.bf16.mxu0 %v20345_v50  ;;  %v20437_v50 = vld [vmem:[#allocation16 + $0x2c8] ss:$16 sps:$4 sm:$0xff]  }
 0xa07   : > { %14616 = vmatmul.mubr.bf16.gmra.mrb[252].mxu1 %v20347_v36  ;;  %15322 = vmatmul.mubr.bf16.gmra.mrb[60].mxu0 %v20347_v36  ;;  %v20438_v36 = vld [vmem:[#allocation16 + $0x2ec] ss:$16 sps:$4 sm:$0xff]  }
 0xa08   : > { %14625 = vmatprep.mubr.bf16.mxu1 %v20350_v38  ;;  %15331 = vmatprep.mubr.bf16.mxu0 %v20350_v38  ;;  %v20440_v38 = vld [vmem:[#allocation16 + $0x2e8] ss:$16 sps:$4 sm:$0xff]  }
 0xa0f   : > { %14626 = vmatmul.mubr.bf16.gmra.mrb[0].mxu1 %v20348_v53  ;;  %15332 = vmatmul.mubr.bf16.gmra.mrb[64].mxu0 %v20348_v53  ;;  %v20441_v53 = vld [vmem:[#allocation16 + $0x30c] ss:$16 sps:$4 sm:$0xff]  }
 0xa10   : > { %14635 = vmatprep.mubr.bf16.mxu1 %v20353_v5  ;;  %15341 = vmatprep.mubr.bf16.mxu0 %v20353_v5  ;;  %v20443_v5 = vld [vmem:[#allocation16 + $0x308] ss:$16 sps:$4 sm:$0xff]  }
 0xa17   : > { %14636 = vmatmul.mubr.bf16.gmra.mrb[4].mxu1 %v20351_v54  ;;  %15342 = vmatmul.mubr.bf16.gmra.mrb[68].mxu0 %v20351_v54  ;;  %v20446_v54 = vld [vmem:[#allocation16 + $0x32c] ss:$16 sps:$4 sm:$0xff]  }
 0xa18   : > { %14645 = vmatprep.mubr.bf16.mxu1 %v20356_v56  ;;  %15351 = vmatprep.mubr.bf16.mxu0 %v20356_v56  ;;  %v20444_v56 = vld [vmem:[#allocation16 + $0x328] ss:$16 sps:$4 sm:$0xff]  }
 0xa1f   : > { %14646 = vmatmul.mubr.bf16.gmra.mrb[8].mxu1 %v20354_v47  ;;  %15352 = vmatmul.mubr.bf16.gmra.mrb[72].mxu0 %v20354_v47  ;;  %v20449_v47 = vld [vmem:[#allocation16 + $0x34c] ss:$16 sps:$4 sm:$0xff]  }
 0xa20   : > { %14655 = vmatprep.mubr.bf16.mxu1 %v20359_v32  ;;  %15361 = vmatprep.mubr.bf16.mxu0 %v20359_v32  ;;  %v20447_v32 = vld [vmem:[#allocation16 + $0x348] ss:$16 sps:$4 sm:$0xff]  }
 0xa27   : > { %14656 = vmatmul.mubr.bf16.gmra.mrb[12].mxu1 %v20357_v26  ;;  %15362 = vmatmul.mubr.bf16.gmra.mrb[76].mxu0 %v20357_v26  ;;  %v20452_v26 = vld [vmem:[#allocation16 + $0x36c] ss:$16 sps:$4 sm:$0xff]  }
 0xa28   : > { %14665 = vmatprep.mubr.bf16.mxu1 %v20362_v45  ;;  %15371 = vmatprep.mubr.bf16.mxu0 %v20362_v45  ;;  %v13386_v45 = vpop.permute.xlu0 %13385 }
 0xa2f   : > { %14666 = vmatmul.mubr.bf16.gmra.mrb[16].mxu1 %v20360_v51  ;;  %15372 = vmatmul.mubr.bf16.gmra.mrb[80].mxu0 %v20360_v51  ;;  %v13391_v51 = vpop.permute.xlu1 %13390 }
 0xa30   : > { %14675 = vmatprep.mubr.bf16.mxu1 %v20365_v58  ;;  %15381 = vmatprep.mubr.bf16.mxu0 %v20365_v58 }
 0xa37   : > { %14676 = vmatmul.mubr.bf16.gmra.mrb[20].mxu1 %v20363_v61  ;;  %15382 = vmatmul.mubr.bf16.gmra.mrb[84].mxu0 %v20363_v61 }
 0xa38   : > { %14685 = vmatprep.mubr.bf16.mxu1 %v20368_v62  ;;  %15391 = vmatprep.mubr.bf16.mxu0 %v20368_v62 }
 0xa3f   : > { %14686 = vmatmul.mubr.bf16.gmra.mrb[24].mxu1 %v20366_v63  ;;  %15392 = vmatmul.mubr.bf16.gmra.mrb[88].mxu0 %v20366_v63 }
 0xa40   : > { %14728 = vmatprep.mubr.bf16.mxu1 %v20371_v15  ;;  %15434 = vmatprep.mubr.bf16.mxu0 %v20371_v15 }
 0xa47   : > { %14729 = vmatmul.mubr.bf16.vlgmr.msra.gmra.mrb[156].mxu1 %v20369_v55  ;;  %15435 = vmatmul.mubr.bf16.vlgmr.msra.gmra.mrb[220].mxu0 %v20369_v55 }
 0xa48   : > { %14738 = vmatprep.mubr.bf16.mxu1 %v20372_v25  ;;  %15444 = vmatprep.mubr.bf16.mxu0 %v20372_v25  ;;  %v20450_v25 = vld [vmem:[#allocation16 + $0x368] ss:$16 sps:$4 sm:$0xff]  }
 0xa4f   : > { %14739 = vmatmul.mubr.bf16.gmra.mrb[160].mxu1 %v20374_v59  ;;  %15445 = vmatmul.mubr.bf16.gmra.mrb[224].mxu0 %v20374_v59 }
 0xa50   : > { %14748 = vmatprep.mubr.bf16.mxu1 %v20375_v22  ;;  %15454 = vmatprep.mubr.bf16.mxu0 %v20375_v22 }
 0xa57   : > { %14749 = vmatmul.mubr.bf16.gmra.mrb[164].mxu1 %v20377_v9  ;;  %15455 = vmatmul.mubr.bf16.gmra.mrb[228].mxu0 %v20377_v9 }
 0xa58   : > { %14758 = vmatprep.mubr.bf16.mxu1 %v20378_v3  ;;  %15464 = vmatprep.mubr.bf16.mxu0 %v20378_v3 }
 0xa5f   : > { %14759 = vmatmul.mubr.bf16.gmra.mrb[168].mxu1 %v20380_v60  ;;  %15465 = vmatmul.mubr.bf16.gmra.mrb[232].mxu0 %v20380_v60  ;;  %v20455_v60 = vld [vmem:[#allocation16 + $0x38c] ss:$16 sps:$4 sm:$0xff]  }
 0xa60   : > { %14768 = vmatprep.mubr.bf16.mxu1 %v20381_v18  ;;  %15474 = vmatprep.mubr.bf16.mxu0 %v20381_v18 }
 0xa67   : > { %14769 = vmatmul.mubr.bf16.gmra.mrb[172].mxu1 %v20383_v20  ;;  %15475 = vmatmul.mubr.bf16.gmra.mrb[236].mxu0 %v20383_v20 }
 0xa68   : > { %14778 = vmatprep.mubr.bf16.mxu1 %v20384_v35  ;;  %15484 = vmatprep.mubr.bf16.mxu0 %v20384_v35 }
 0xa6f   : > { %14779 = vmatmul.mubr.bf16.gmra.mrb[176].mxu1 %v20386_v24  ;;  %15485 = vmatmul.mubr.bf16.gmra.mrb[240].mxu0 %v20386_v24 }
 0xa70   : > { %14788 = vmatprep.mubr.bf16.mxu1 %v20387_v31  ;;  %15494 = vmatprep.mubr.bf16.mxu0 %v20387_v31 }
 0xa77   : > { %14789 = vmatmul.mubr.bf16.gmra.mrb[180].mxu1 %v20389_v2  ;;  %15495 = vmatmul.mubr.bf16.gmra.mrb[244].mxu0 %v20389_v2 }
 0xa78   : > { %14798 = vmatprep.mubr.bf16.mxu1 %v20390_v7  ;;  %15504 = vmatprep.mubr.bf16.mxu0 %v20390_v7 }
 0xa7f   : > { %14799 = vmatmul.mubr.bf16.gmra.mrb[184].mxu1 %v20392_v40  ;;  %15505 = vmatmul.mubr.bf16.gmra.mrb[248].mxu0 %v20392_v40 }
 0xa80   : > { %14808 = vmatprep.mubr.bf16.mxu1 %v20393_v12  ;;  %15514 = vmatprep.mubr.bf16.mxu0 %v20393_v12 }
 0xa87   : > { %14809 = vmatmul.mubr.bf16.gmra.mrb[188].mxu1 %v20395_v1  ;;  %15515 = vmatmul.mubr.bf16.gmra.mrb[252].mxu0 %v20395_v1 }
 0xa88   : > { %14818 = vmatprep.mubr.bf16.mxu1 %v20396_v0  ;;  %15524 = vmatprep.mubr.bf16.mxu0 %v20396_v0 }
 0xa8f   : > { %14819 = vmatmul.mubr.bf16.gmra.mrb[192].mxu1 %v20398_v37  ;;  %15525 = vmatmul.mubr.bf16.gmra.mrb[0].mxu0 %v20398_v37 }
 0xa90   : > { %14828 = vmatprep.mubr.bf16.mxu1 %v20399_v19  ;;  %15534 = vmatprep.mubr.bf16.mxu0 %v20399_v19 }
 0xa97   : > { %14829 = vmatmul.mubr.bf16.gmra.mrb[196].mxu1 %v20401_v41  ;;  %15535 = vmatmul.mubr.bf16.gmra.mrb[4].mxu0 %v20401_v41 }
 0xa98   : > { %14838 = vmatprep.mubr.bf16.mxu1 %v20402_v13  ;;  %15544 = vmatprep.mubr.bf16.mxu0 %v20402_v13  ;;  %v13396_v13 = vpop.permute.xlu0 %13395 }
 0xa9f   : > { %14839 = vmatmul.mubr.bf16.gmra.mrb[200].mxu1 %v20404_v39  ;;  %15545 = vmatmul.mubr.bf16.gmra.mrb[8].mxu0 %v20404_v39  ;;  %v13401_v39 = vpop.permute.xlu1 %13400 }
 0xaa0   : > { %14848 = vmatprep.mubr.bf16.mxu1 %v20405_v48  ;;  %15554 = vmatprep.mubr.bf16.mxu0 %v20405_v48 }
 0xaa7   : > { %14849 = vmatmul.mubr.bf16.gmra.mrb[204].mxu1 %v20407_v14  ;;  %15555 = vmatmul.mubr.bf16.gmra.mrb[12].mxu0 %v20407_v14 }
 0xaa8   : > { %14858 = vmatprep.mubr.bf16.mxu1 %v20408_v21  ;;  %15564 = vmatprep.mubr.bf16.mxu0 %v20408_v21 }
 0xaaf   : > { %14859 = vmatmul.mubr.bf16.gmra.mrb[208].mxu1 %v20410_v28  ;;  %15565 = vmatmul.mubr.bf16.gmra.mrb[16].mxu0 %v20410_v28 }
 0xab0   : > { %14868 = vmatprep.mubr.bf16.mxu1 %v20411_v42  ;;  %15574 = vmatprep.mubr.bf16.mxu0 %v20411_v42 }
 0xab7   : > { %14869 = vmatmul.mubr.bf16.gmra.mrb[212].mxu1 %v20413_v29  ;;  %15575 = vmatmul.mubr.bf16.gmra.mrb[20].mxu0 %v20413_v29 }
 0xab8   : > { %14878 = vmatprep.mubr.bf16.mxu1 %v20414_v27  ;;  %15584 = vmatprep.mubr.bf16.mxu0 %v20414_v27 }
 0xabf   : > { %14879 = vmatmul.mubr.bf16.gmra.mrb[216].mxu1 %v20416_v34  ;;  %15585 = vmatmul.mubr.bf16.gmra.mrb[24].mxu0 %v20416_v34 }
 0xac0   : > { %14888 = vmatprep.mubr.bf16.mxu1 %v20417_v8  ;;  %15594 = vmatprep.mubr.bf16.mxu0 %v20417_v8 }
 0xac7   : > { %14889 = vmatmul.mubr.bf16.gmra.mrb[220].mxu1 %v20419_v30  ;;  %15595 = vmatmul.mubr.bf16.gmra.mrb[28].mxu0 %v20419_v30 }
 0xac8   : > { %14898 = vmatprep.mubr.bf16.mxu1 %v20420_v23  ;;  %15604 = vmatprep.mubr.bf16.mxu0 %v20420_v23  ;;  %v20453_v23 = vld [vmem:[#allocation16 + $0x388] ss:$16 sps:$4 sm:$0xff]  }
 0xacf   : > { %14899 = vmatmul.mubr.bf16.gmra.mrb[224].mxu1 %v20422_v33  ;;  %15605 = vmatmul.mubr.bf16.gmra.mrb[32].mxu0 %v20422_v33 }
 0xad0   : > { %14908 = vmatprep.mubr.bf16.mxu1 %v20423_v57  ;;  %15614 = vmatprep.mubr.bf16.mxu0 %v20423_v57 }
 0xad7   : > { %14909 = vmatmul.mubr.bf16.gmra.mrb[228].mxu1 %v20425_v6  ;;  %15615 = vmatmul.mubr.bf16.gmra.mrb[36].mxu0 %v20425_v6 }
 0xad8   : > { %14918 = vmatprep.mubr.bf16.mxu1 %v20426_v43  ;;  %15624 = vmatprep.mubr.bf16.mxu0 %v20426_v43 }
 0xadf   : > { %14919 = vmatmul.mubr.bf16.gmra.mrb[232].mxu1 %v20428_v16  ;;  %15625 = vmatmul.mubr.bf16.gmra.mrb[40].mxu0 %v20428_v16  ;;  %v20458_v16 = vld [vmem:[#allocation16 + $0x3ac] ss:$16 sps:$4 sm:$0xff]  }
 0xae0   : > { %14928 = vmatprep.mubr.bf16.mxu1 %v20429_v4  ;;  %15634 = vmatprep.mubr.bf16.mxu0 %v20429_v4 }
 0xae7   : > { %14929 = vmatmul.mubr.bf16.gmra.mrb[236].mxu1 %v20431_v44  ;;  %15635 = vmatmul.mubr.bf16.gmra.mrb[44].mxu0 %v20431_v44 }
 0xae8   : > { %14938 = vmatprep.mubr.bf16.mxu1 %v20432_v52  ;;  %15644 = vmatprep.mubr.bf16.mxu0 %v20432_v52 }
 0xaef   : > { %14939 = vmatmul.mubr.bf16.gmra.mrb[240].mxu1 %v20434_v46  ;;  %15645 = vmatmul.mubr.bf16.gmra.mrb[48].mxu0 %v20434_v46 }
 0xaf0   : > { %14948 = vmatprep.mubr.bf16.mxu1 %v20435_v49  ;;  %15654 = vmatprep.mubr.bf16.mxu0 %v20435_v49 }
 0xaf7   : > { %14949 = vmatmul.mubr.bf16.gmra.mrb[244].mxu1 %v20437_v50  ;;  %15655 = vmatmul.mubr.bf16.gmra.mrb[52].mxu0 %v20437_v50 }
 0xaf8   : > { %14958 = vmatprep.mubr.bf16.mxu1 %v20438_v36  ;;  %15664 = vmatprep.mubr.bf16.mxu0 %v20438_v36 }
 0xaff   : > { %14959 = vmatmul.mubr.bf16.gmra.mrb[248].mxu1 %v20440_v38  ;;  %15665 = vmatmul.mubr.bf16.gmra.mrb[56].mxu0 %v20440_v38 }
 0xb00   : > { %14968 = vmatprep.mubr.bf16.mxu1 %v20441_v53  ;;  %15674 = vmatprep.mubr.bf16.mxu0 %v20441_v53 }
 0xb07   : > { %14969 = vmatmul.mubr.bf16.gmra.mrb[252].mxu1 %v20443_v5  ;;  %15675 = vmatmul.mubr.bf16.gmra.mrb[60].mxu0 %v20443_v5 }
 0xb08   : > { %14978 = vmatprep.mubr.bf16.mxu1 %v20446_v54  ;;  %15684 = vmatprep.mubr.bf16.mxu0 %v20446_v54 }
 0xb0f   : > { %14979 = vmatmul.mubr.bf16.gmra.mrb[0].mxu1 %v20444_v56  ;;  %15685 = vmatmul.mubr.bf16.gmra.mrb[64].mxu0 %v20444_v56 }
 0xb10   : > { %14988 = vmatprep.mubr.bf16.mxu1 %v20449_v47  ;;  %15694 = vmatprep.mubr.bf16.mxu0 %v20449_v47 }
 0xb17   : > { %14989 = vmatmul.mubr.bf16.gmra.mrb[4].mxu1 %v20447_v32  ;;  %15695 = vmatmul.mubr.bf16.gmra.mrb[68].mxu0 %v20447_v32 }
 0xb18   : > { %14998 = vmatprep.mubr.bf16.mxu1 %v20452_v26  ;;  %15704 = vmatprep.mubr.bf16.mxu0 %v20452_v26  ;;  %v13406_v26 = vpop.permute.xlu0 %13405 }
 0xb1a   : > { %v14730_v58 = vpop.f32.mrb[156].mxu1  ;;  %v15436_v61 = vpop.f32.mrb[220].mxu0 }
 0xb1b   : > { %v18279_v62 = vadd.f32 %v14730_v58, %v13386_v45  ;;  %v18407_v63 = vadd.f32 %v15436_v61, %v13386_v45  ;;  %v14732_v15 = vpop.f32.mrb[157].mxu1  ;;  %v15438_v55 = vpop.f32.mrb[221].mxu0 }
 0xb1c   : > { %v18280_v59 = vadd.f32 %v14732_v15, %v13386_v45  ;;  %v18408_v22 = vadd.f32 %v15438_v55, %v13386_v45  ;;  %v14734_v9 = vpop.f32.mrb[158].mxu1  ;;  %v15440_v3 = vpop.f32.mrb[222].mxu0  ;;  %v20830_v55 = vmov 1983009808  }
 0xb1d   : > { %v18281_v18 = vadd.f32 %v14734_v9, %v13391_v51  ;;  %v18409_v20 = vadd.f32 %v15440_v3, %v13391_v51  ;;  %v14736_v35 = vpop.f32.mrb[159].mxu1  ;;  %v15442_v24 = vpop.f32.mrb[223].mxu0  ;;  %v15755_v7 = vmax.f32 %v18279_v62, 0.0  ;;  %v15757_v40 = vmax.f32 %v18407_v63, 0.0 }
 0xb1e   : > { %v18282_v31 = vadd.f32 %v14736_v35, %v13391_v51  ;;  %v18410_v2 = vadd.f32 %v15442_v24, %v13391_v51  ;;  %v15756_v0 = vmax.f32 %v18280_v59, 0.0  ;;  %v15758_v37 = vmax.f32 %v18408_v22, 0.0  ;;  %v13411_v45 = vpop.permute.xlu1 %13410 }
 0xb1f   : > { %v15759_v12 = vmax.f32 %v18281_v18, 0.0  ;;  %v15761_v1 = vmax.f32 %v18409_v20, 0.0  ;;  %14999 = vmatmul.mubr.bf16.gmra.mrb[8].mxu1 %v20450_v25  ;;  %15705 = vmatmul.mubr.bf16.gmra.mrb[72].mxu0 %v20450_v25  ;;  %v16149_v25 = vunpack.c.l.s4 %v20830_v55 }
 0xb20   : > { %v15760_v19 = vmax.f32 %v18282_v31, 0.0  ;;  %v15762_v41 = vmax.f32 %v18410_v2, 0.0  ;;  %15008 = vmatprep.mubr.bf16.mxu1 %v20455_v60  ;;  %15714 = vmatprep.mubr.bf16.mxu0 %v20455_v60  ;;  %v20456_v60 = vld [vmem:[#allocation16 + $0x3a8] ss:$16 sps:$4 sm:$0xff]   ;;  %v20461_v31 = vld [vmem:[#allocation16 + $0x3cc] ss:$16 sps:$4 sm:$0xff]  }
 0xb21   : > { %v16012_v48 = vpack.c.bf16 %v15759_v12, %v15755_v7  ;;  %v22325_v14 = vpack.c.bf16 %v15761_v1, %v15757_v40 }
 0xb22   : > { %v16013_v21 = vpack.c.bf16 %v15760_v19, %v15756_v0  ;;  %v22327_v28 = vpack.c.bf16 %v15762_v41, %v15758_v37  ;;  %v14740_v42 = vpop.f32.mrb[160].mxu1  ;;  %v15446_v29 = vpop.f32.mrb[224].mxu0  ;;  %v16150_v37 = vunpack.c.0.s8 %v16149_v25 }
 0xb23   : > { %v18283_v27 = vadd.f32 %v14740_v42, %v13396_v13  ;;  %v18411_v34 = vadd.f32 %v15446_v29, %v13396_v13  ;;  %v14742_v8 = vpop.f32.mrb[161].mxu1  ;;  %v15448_v30 = vpop.f32.mrb[225].mxu0 }
 0xb24   : > { %v18284_v33 = vadd.f32 %v14742_v8, %v13396_v13  ;;  %v18412_v57 = vadd.f32 %v15448_v30, %v13396_v13  ;;  %v14744_v6 = vpop.f32.mrb[162].mxu1  ;;  %v15450_v43 = vpop.f32.mrb[226].mxu0  ;;  %16168 = vmatprep.subr.bf16.mxu1 %v16013_v21 }
 0xb25   : > { %v18285_v4 = vadd.f32 %v14744_v6, %v13401_v39  ;;  %v18413_v44 = vadd.f32 %v15450_v43, %v13401_v39  ;;  %v14746_v52 = vpop.f32.mrb[163].mxu1  ;;  %v15452_v46 = vpop.f32.mrb[227].mxu0  ;;  %16169 = vmatpush1.bf16.msra.mxu1 %v16012_v48  ;;  %v15763_v36 = vmax.f32 %v18283_v27, 0.0  ;;  %v15765_v38 = vmax.f32 %v18411_v34, 0.0 }
 0xb26   : > { %v18286_v49 = vadd.f32 %v14746_v52, %v13401_v39  ;;  %v18414_v50 = vadd.f32 %v15452_v46, %v13401_v39  ;;  %v15764_v54 = vmax.f32 %v18284_v33, 0.0  ;;  %v15766_v56 = vmax.f32 %v18412_v57, 0.0  ;;  %v13416_v27 = vpop.permute.xlu0 %13415  ;;  %v13421_v34 = vpop.permute.xlu1 %13420  ;;  %v20459_v46 = vld [vmem:[#allocation16 + $0x3c8] ss:$16 sps:$4 sm:$0xff]  }
 0xb27   : > { %v15767_v53 = vmax.f32 %v18285_v4, 0.0  ;;  %v15769_v5 = vmax.f32 %v18413_v44, 0.0  ;;  %15009 = vmatmul.mubr.bf16.gmra.mrb[12].mxu1 %v20453_v23  ;;  %15715 = vmatmul.mubr.bf16.gmra.mrb[76].mxu0 %v20453_v23  ;;  %v22338_v43 = vsub.s32 %v16150_v37, %v21254_v17 }
 0xb28   : > { %v15768_v47 = vmax.f32 %v18286_v49, 0.0  ;;  %v15770_v32 = vmax.f32 %v18414_v50, 0.0  ;;  %15018 = vmatprep.mubr.bf16.mxu1 %v20458_v16  ;;  %15724 = vmatprep.mubr.bf16.mxu0 %v20458_v16  ;;  %v22340_v49 = vld [vmem:[#allocation17] sm:$0xff] }
 0xb29   : > { %v16016_v51 = vpack.c.bf16 %v15767_v53, %v15763_v36  ;;  %v22329_v58 = vpack.c.bf16 %v15769_v5, %v15765_v38  ;;  %v20464_v5 = vld [vmem:[#allocation16 + $0x3ec] ss:$16 sps:$4 sm:$0xff]  }
 0xb2a   : > { %v16017_v61 = vpack.c.bf16 %v15768_v47, %v15764_v54  ;;  %v22331_v62 = vpack.c.bf16 %v15770_v32, %v15766_v56  ;;  %v14750_v63 = vpop.f32.mrb[164].mxu1  ;;  %v15456_v15 = vpop.f32.mrb[228].mxu0 }
 0xb2b   : > { %v18287_v59 = vadd.f32 %v14750_v63, %v13406_v26  ;;  %v18415_v22 = vadd.f32 %v15456_v15, %v13406_v26  ;;  %v14752_v9 = vpop.f32.mrb[165].mxu1  ;;  %v15458_v3 = vpop.f32.mrb[229].mxu0 }
 0xb2c   : > { %v18288_v18 = vadd.f32 %v14752_v9, %v13406_v26  ;;  %v18416_v20 = vadd.f32 %v15458_v3, %v13406_v26  ;;  %v14754_v35 = vpop.f32.mrb[166].mxu1  ;;  %v15460_v24 = vpop.f32.mrb[230].mxu0  ;;  %16170 = vmatprep.subr.bf16.mxu1 %v16017_v61 }
 0xb2d   : > { %v18289_v2 = vadd.f32 %v14754_v35, %v13411_v45  ;;  %v18417_v7 = vadd.f32 %v15460_v24, %v13411_v45  ;;  %v14756_v40 = vpop.f32.mrb[167].mxu1  ;;  %v15462_v12 = vpop.f32.mrb[231].mxu0  ;;  %16171 = vmatpush1.bf16.msra.mxu1 %v16016_v51  ;;  %v15771_v19 = vmax.f32 %v18287_v59, 0.0  ;;  %v15773_v41 = vmax.f32 %v18415_v22, 0.0 }
 0xb2e   : > { %v18290_v1 = vadd.f32 %v14756_v40, %v13411_v45  ;;  %v18418_v0 = vadd.f32 %v15462_v12, %v13411_v45  ;;  %v15772_v48 = vmax.f32 %v18288_v18, 0.0  ;;  %v15774_v21 = vmax.f32 %v18416_v20, 0.0  ;;  %v13426_v9 = vpop.permute.xlu0 %13425  ;;  %v13431_v3 = vpop.permute.xlu1 %13430 }
 0xb2f   : > { %v15775_v13 = vmax.f32 %v18289_v2, 0.0  ;;  %v15777_v39 = vmax.f32 %v18417_v7, 0.0  ;;  %15019 = vmatmul.mubr.bf16.gmra.mrb[16].mxu1 %v20456_v60  ;;  %15725 = vmatmul.mubr.bf16.gmra.mrb[80].mxu0 %v20456_v60  ;;  %v22344_v45 = vrot.slane %v22340_v49, %v22338_v43 }
 0xb30   : > { %v15776_v42 = vmax.f32 %v18290_v1, 0.0  ;;  %v15778_v29 = vmax.f32 %v18418_v0, 0.0  ;;  %15028 = vmatprep.mubr.bf16.mxu1 %v20461_v31  ;;  %15734 = vmatprep.mubr.bf16.mxu0 %v20461_v31  ;;  %v20462_v1 = vld [vmem:[#allocation16 + $0x3e8] ss:$16 sps:$4 sm:$0xff]  }
 0xb31   : > { %v16020_v8 = vpack.c.bf16 %v15775_v13, %v15771_v19  ;;  %v22333_v30 = vpack.c.bf16 %v15777_v39, %v15773_v41  ;;  %v22352_v13 = vcombine.high %v22344_v45, %v22344_v45 }
 0xb32   : > { %v16021_v23 = vpack.c.bf16 %v15776_v42, %v15772_v48  ;;  %v22335_v33 = vpack.c.bf16 %v15778_v29, %v15774_v21  ;;  %v14760_v57 = vpop.f32.mrb[168].mxu1  ;;  %v15466_v6 = vpop.f32.mrb[232].mxu0 }
 0xb33   : > { %v18291_v16 = vadd.f32 %v14760_v57, %v13416_v27  ;;  %v18419_v4 = vadd.f32 %v15466_v6, %v13416_v27  ;;  %v14762_v44 = vpop.f32.mrb[169].mxu1  ;;  %v15468_v52 = vpop.f32.mrb[233].mxu0 }
 0xb34   : > { %v18292_v50 = vadd.f32 %v14762_v44, %v13416_v27  ;;  %v18420_v36 = vadd.f32 %v15468_v52, %v13416_v27  ;;  %v14764_v38 = vpop.f32.mrb[170].mxu1  ;;  %v15470_v53 = vpop.f32.mrb[234].mxu0  ;;  %16172 = vmatprep.subr.bf16.mxu1 %v16021_v23 }
 0xb35   : > { %v18293_v54 = vadd.f32 %v14764_v38, %v13421_v34  ;;  %v18421_v56 = vadd.f32 %v15470_v53, %v13421_v34  ;;  %v14766_v47 = vpop.f32.mrb[171].mxu1  ;;  %v15472_v32 = vpop.f32.mrb[235].mxu0  ;;  %16173 = vmatpush1.bf16.msra.mxu1 %v16020_v8  ;;  %v15779_v51 = vmax.f32 %v18291_v16, 0.0  ;;  %v15781_v61 = vmax.f32 %v18419_v4, 0.0 }
 0xb36   : > { %v18294_v17 = vadd.f32 %v14766_v47, %v13421_v34  ;;  %v18422_v26 = vadd.f32 %v15472_v32, %v13421_v34  ;;  %v15780_v55 = vmax.f32 %v18292_v50, 0.0  ;;  %v15782_v25 = vmax.f32 %v18420_v36, 0.0  ;;  %v13436_v52 = vpop.permute.xlu0 %13435 }
 0xb37   : > { %v15783_v63 = vmax.f32 %v18293_v54, 0.0  ;;  %v15785_v15 = vmax.f32 %v18421_v56, 0.0  ;;  %15029 = vmatmul.mubr.bf16.gmra.mrb[20].mxu1 %v20459_v46  ;;  %15735 = vmatmul.mubr.bf16.gmra.mrb[84].mxu0 %v20459_v46  ;;  %v13441_v46 = vpop.permute.xlu1 %13440 }
 0xb38   : > { %v15784_v59 = vmax.f32 %v18294_v17, 0.0  ;;  %v15786_v22 = vmax.f32 %v18422_v26, 0.0  ;;  %15038 = vmatprep.mubr.bf16.mxu1 %v20464_v5  ;;  %15744 = vmatprep.mubr.bf16.mxu0 %v20464_v5 }
 0xb39   : > { %v16024_v60 = vpack.c.bf16 %v15783_v63, %v15779_v51  ;;  %v22346_v18 = vpack.c.bf16 %v15785_v15, %v15781_v61 }
 0xb3a   : > { %v16025_v20 = vpack.c.bf16 %v15784_v59, %v15780_v55  ;;  %v22348_v35 = vpack.c.bf16 %v15786_v22, %v15782_v25  ;;  %v14770_v24 = vpop.f32.mrb[172].mxu1  ;;  %v15476_v31 = vpop.f32.mrb[236].mxu0 }
 0xb3b   : > { %v18295_v2 = vadd.f32 %v14770_v24, %v13426_v9  ;;  %v18423_v7 = vadd.f32 %v15476_v31, %v13426_v9  ;;  %v14772_v40 = vpop.f32.mrb[173].mxu1  ;;  %v15478_v12 = vpop.f32.mrb[237].mxu0 }
 0xb3c   : > { %v18296_v0 = vadd.f32 %v14772_v40, %v13426_v9  ;;  %v18424_v37 = vadd.f32 %v15478_v12, %v13426_v9  ;;  %v14774_v19 = vpop.f32.mrb[174].mxu1  ;;  %v15480_v41 = vpop.f32.mrb[238].mxu0  ;;  %16174 = vmatprep.subr.bf16.mxu1 %v16025_v20 }
 0xb3d   : > { %v18297_v39 = vadd.f32 %v14774_v19, %v13431_v3  ;;  %v18425_v48 = vadd.f32 %v15480_v41, %v13431_v3  ;;  %v14776_v21 = vpop.f32.mrb[175].mxu1  ;;  %v15482_v42 = vpop.f32.mrb[239].mxu0  ;;  %16175 = vmatpush1.bf16.msra.mxu1 %v16024_v60  ;;  %v15787_v34 = vmax.f32 %v18295_v2, 0.0  ;;  %v15789_v8 = vmax.f32 %v18423_v7, 0.0 }
 0xb3e   : > { %v18298_v29 = vadd.f32 %v14776_v21, %v13431_v3  ;;  %v18426_v27 = vadd.f32 %v15482_v42, %v13431_v3  ;;  %v15788_v6 = vmax.f32 %v18296_v0, 0.0  ;;  %v15790_v16 = vmax.f32 %v18424_v37, 0.0  ;;  %v13446_v12 = vpop.permute.xlu0 %13445 }
 0xb3f   : > { %v15791_v23 = vmax.f32 %v18297_v39, 0.0  ;;  %v15793_v57 = vmax.f32 %v18425_v48, 0.0  ;;  %15039 = vmatmul.mubr.bf16.gmra.mrb[24].mxu1 %v20462_v1  ;;  %15745 = vmatmul.mubr.bf16.gmra.mrb[88].mxu0 %v20462_v1  ;;  %v13451_v1 = vpop.permute.xlu1 %13450 }
 0xb40   : > { %v15792_v4 = vmax.f32 %v18298_v29, 0.0  ;;  %v15794_v44 = vmax.f32 %v18426_v27, 0.0  ;;  %16200 = vmatprep.mubr.bf16.mxu1 %v22352_v13 }
 0xb41   : > { %v16028_v50 = vpack.c.bf16 %v15791_v23, %v15787_v34  ;;  %v22355_v36 = vpack.c.bf16 %v15793_v57, %v15789_v8 }
 0xb42   : > { %v16029_v38 = vpack.c.bf16 %v15792_v4, %v15788_v6  ;;  %v22357_v53 = vpack.c.bf16 %v15794_v44, %v15790_v16  ;;  %v14780_v5 = vpop.f32.mrb[176].mxu1  ;;  %v15486_v54 = vpop.f32.mrb[240].mxu0 }
 0xb43   : > { %v18299_v56 = vadd.f32 %v14780_v5, %v13436_v52  ;;  %v18427_v47 = vadd.f32 %v15486_v54, %v13436_v52  ;;  %v14782_v32 = vpop.f32.mrb[177].mxu1  ;;  %v15488_v17 = vpop.f32.mrb[241].mxu0 }
 0xb44   : > { %v18300_v26 = vadd.f32 %v14782_v32, %v13436_v52  ;;  %v18428_v51 = vadd.f32 %v15488_v17, %v13436_v52  ;;  %v14784_v61 = vpop.f32.mrb[178].mxu1  ;;  %v15490_v63 = vpop.f32.mrb[242].mxu0  ;;  %16176 = vmatprep.subr.bf16.mxu1 %v16029_v38 }
 0xb45   : > { %v18301_v15 = vadd.f32 %v14784_v61, %v13441_v46  ;;  %v18429_v55 = vadd.f32 %v15490_v63, %v13441_v46  ;;  %v14786_v25 = vpop.f32.mrb[179].mxu1  ;;  %v15492_v59 = vpop.f32.mrb[243].mxu0  ;;  %16177 = vmatpush1.bf16.msra.mxu1 %v16028_v50  ;;  %v15795_v3 = vmax.f32 %v18299_v56, 0.0  ;;  %v15797_v60 = vmax.f32 %v18427_v47, 0.0 }
 0xb46   : > { %v18302_v22 = vadd.f32 %v14786_v25, %v13441_v46  ;;  %v18430_v9 = vadd.f32 %v15492_v59, %v13441_v46  ;;  %v15796_v31 = vmax.f32 %v18300_v26, 0.0  ;;  %v15798_v2 = vmax.f32 %v18428_v51, 0.0  ;;  %v13456_v26 = vpop.permute.xlu0 %13455  ;;  %v13461_v51 = vpop.permute.xlu1 %13460 }
 0xb47   : > { %v15799_v20 = vmax.f32 %v18301_v15, 0.0  ;;  %v15801_v24 = vmax.f32 %v18429_v55, 0.0 }
 0xb48   : > { %v15800_v7 = vmax.f32 %v18302_v22, 0.0  ;;  %v15802_v40 = vmax.f32 %v18430_v9, 0.0 }
 0xb49   : > { %v16032_v0 = vpack.c.bf16 %v15799_v20, %v15795_v3  ;;  %v22359_v37 = vpack.c.bf16 %v15801_v24, %v15797_v60 }
 0xb4a   : > { %v16033_v19 = vpack.c.bf16 %v15800_v7, %v15796_v31  ;;  %v22361_v41 = vpack.c.bf16 %v15802_v40, %v15798_v2  ;;  %v14790_v39 = vpop.f32.mrb[180].mxu1  ;;  %v15496_v48 = vpop.f32.mrb[244].mxu0 }
 0xb4b   : > { %v18303_v21 = vadd.f32 %v14790_v39, %v13446_v12  ;;  %v18431_v42 = vadd.f32 %v15496_v48, %v13446_v12  ;;  %v14792_v29 = vpop.f32.mrb[181].mxu1  ;;  %v15498_v27 = vpop.f32.mrb[245].mxu0 }
 0xb4c   : > { %v18304_v34 = vadd.f32 %v14792_v29, %v13446_v12  ;;  %v18432_v8 = vadd.f32 %v15498_v27, %v13446_v12  ;;  %v14794_v23 = vpop.f32.mrb[182].mxu1  ;;  %v15500_v57 = vpop.f32.mrb[246].mxu0  ;;  %16178 = vmatprep.subr.bf16.mxu1 %v16033_v19 }
 0xb4d   : > { %v18305_v6 = vadd.f32 %v14794_v23, %v13451_v1  ;;  %v18433_v16 = vadd.f32 %v15500_v57, %v13451_v1  ;;  %v14796_v4 = vpop.f32.mrb[183].mxu1  ;;  %v15502_v44 = vpop.f32.mrb[247].mxu0  ;;  %16179 = vmatpush1.bf16.msra.mxu1 %v16032_v0  ;;  %v15803_v50 = vmax.f32 %v18303_v21, 0.0  ;;  %v15805_v38 = vmax.f32 %v18431_v42, 0.0 }
 0xb4e   : > { %v18306_v52 = vadd.f32 %v14796_v4, %v13451_v1  ;;  %v18434_v46 = vadd.f32 %v15502_v44, %v13451_v1  ;;  %v15804_v56 = vmax.f32 %v18304_v34, 0.0  ;;  %v15806_v47 = vmax.f32 %v18432_v8, 0.0  ;;  %v13466_v23 = vpop.permute.xlu0 %13465  ;;  %v13471_v57 = vpop.permute.xlu1 %13470 }
 0xb4f   : > { %v15807_v5 = vmax.f32 %v18305_v6, 0.0  ;;  %v15809_v54 = vmax.f32 %v18433_v16, 0.0 }
 0xb50   : > { %v15808_v32 = vmax.f32 %v18306_v52, 0.0  ;;  %v15810_v17 = vmax.f32 %v18434_v46, 0.0 }
 0xb51   : > { %v16036_v61 = vpack.c.bf16 %v15807_v5, %v15803_v50  ;;  %v22363_v63 = vpack.c.bf16 %v15809_v54, %v15805_v38 }
 0xb52   : > { %v16037_v15 = vpack.c.bf16 %v15808_v32, %v15804_v56  ;;  %v22365_v55 = vpack.c.bf16 %v15810_v17, %v15806_v47  ;;  %v14800_v25 = vpop.f32.mrb[184].mxu1  ;;  %v15506_v59 = vpop.f32.mrb[248].mxu0 }
 0xb53   : > { %v18307_v22 = vadd.f32 %v14800_v25, %v13456_v26  ;;  %v18435_v9 = vadd.f32 %v15506_v59, %v13456_v26  ;;  %v14802_v3 = vpop.f32.mrb[185].mxu1  ;;  %v15508_v60 = vpop.f32.mrb[249].mxu0 }
 0xb54   : > { %v18308_v20 = vadd.f32 %v14802_v3, %v13456_v26  ;;  %v18436_v24 = vadd.f32 %v15508_v60, %v13456_v26  ;;  %v14804_v31 = vpop.f32.mrb[186].mxu1  ;;  %v15510_v2 = vpop.f32.mrb[250].mxu0  ;;  %16180 = vmatprep.subr.bf16.mxu1 %v16037_v15 }
 0xb55   : > { %v18309_v7 = vadd.f32 %v14804_v31, %v13461_v51  ;;  %v18437_v40 = vadd.f32 %v15510_v2, %v13461_v51  ;;  %v14806_v12 = vpop.f32.mrb[187].mxu1  ;;  %v15512_v1 = vpop.f32.mrb[251].mxu0  ;;  %16181 = vmatpush1.bf16.msra.mxu1 %v16036_v61  ;;  %v15811_v39 = vmax.f32 %v18307_v22, 0.0  ;;  %v15813_v48 = vmax.f32 %v18435_v9, 0.0 }
 0xb56   : > { %v18310_v0 = vadd.f32 %v14806_v12, %v13461_v51  ;;  %v18438_v19 = vadd.f32 %v15512_v1, %v13461_v51  ;;  %v15812_v29 = vmax.f32 %v18308_v20, 0.0  ;;  %v15814_v27 = vmax.f32 %v18436_v24, 0.0 }
 0xb57   : > { %v15815_v21 = vmax.f32 %v18309_v7, 0.0  ;;  %v15817_v42 = vmax.f32 %v18437_v40, 0.0  ;;  %v13476_v7 = vpop.permute.xlu0 %13475  ;;  %v13481_v40 = vpop.permute.xlu1 %13480 }
 0xb58   : > { %v15816_v34 = vmax.f32 %v18310_v0, 0.0  ;;  %v15818_v8 = vmax.f32 %v18438_v19, 0.0 }
 0xb59   : > { %v16040_v6 = vpack.c.bf16 %v15815_v21, %v15811_v39  ;;  %v22367_v16 = vpack.c.bf16 %v15817_v42, %v15813_v48 }
 0xb5a   : > { %v16041_v4 = vpack.c.bf16 %v15816_v34, %v15812_v29  ;;  %v22369_v44 = vpack.c.bf16 %v15818_v8, %v15814_v27  ;;  %v14810_v52 = vpop.f32.mrb[188].mxu1  ;;  %v15516_v46 = vpop.f32.mrb[252].mxu0 }
 0xb5b   : > { %v18311_v50 = vadd.f32 %v14810_v52, %v13466_v23  ;;  %v18439_v38 = vadd.f32 %v15516_v46, %v13466_v23  ;;  %v14812_v5 = vpop.f32.mrb[189].mxu1  ;;  %v15518_v54 = vpop.f32.mrb[253].mxu0 }
 0xb5c   : > { %v18312_v56 = vadd.f32 %v14812_v5, %v13466_v23  ;;  %v18440_v47 = vadd.f32 %v15518_v54, %v13466_v23  ;;  %v14814_v32 = vpop.f32.mrb[190].mxu1  ;;  %v15520_v17 = vpop.f32.mrb[254].mxu0  ;;  %16182 = vmatprep.subr.bf16.mxu1 %v16041_v4 }
 0xb5d   : > { %v18313_v26 = vadd.f32 %v14814_v32, %v13471_v57  ;;  %v18441_v51 = vadd.f32 %v15520_v17, %v13471_v57  ;;  %v14816_v61 = vpop.f32.mrb[191].mxu1  ;;  %v15522_v15 = vpop.f32.mrb[255].mxu0  ;;  %16183 = vmatpush1.bf16.msra.mxu1 %v16040_v6  ;;  %v15819_v22 = vmax.f32 %v18311_v50, 0.0  ;;  %v15821_v9 = vmax.f32 %v18439_v38, 0.0 }
 0xb5e   : > { %v18314_v25 = vadd.f32 %v14816_v61, %v13471_v57  ;;  %v18442_v59 = vadd.f32 %v15522_v15, %v13471_v57  ;;  %v15820_v20 = vmax.f32 %v18312_v56, 0.0  ;;  %v15822_v24 = vmax.f32 %v18440_v47, 0.0  ;;  %v13486_v61 = vpop.permute.xlu0 %13485  ;;  %v13491_v15 = vpop.permute.xlu1 %13490 }
 0xb5f   : > { %v15823_v3 = vmax.f32 %v18313_v26, 0.0  ;;  %v15825_v60 = vmax.f32 %v18441_v51, 0.0 }
 0xb60   : > { %v15824_v31 = vmax.f32 %v18314_v25, 0.0  ;;  %v15826_v2 = vmax.f32 %v18442_v59, 0.0 }
 0xb61   : > { %v16044_v12 = vpack.c.bf16 %v15823_v3, %v15819_v22  ;;  %v22371_v1 = vpack.c.bf16 %v15825_v60, %v15821_v9 }
 0xb62   : > { %v16045_v0 = vpack.c.bf16 %v15824_v31, %v15820_v20  ;;  %v22373_v19 = vpack.c.bf16 %v15826_v2, %v15822_v24  ;;  %v14820_v39 = vpop.f32.mrb[192].mxu1  ;;  %v15526_v48 = vpop.f32.mrb[0].mxu0 }
 0xb63   : > { %v18315_v21 = vadd.f32 %v14820_v39, %v13476_v7  ;;  %v18443_v42 = vadd.f32 %v15526_v48, %v13476_v7  ;;  %v14822_v29 = vpop.f32.mrb[193].mxu1  ;;  %v15528_v27 = vpop.f32.mrb[1].mxu0 }
 0xb64   : > { %v18316_v34 = vadd.f32 %v14822_v29, %v13476_v7  ;;  %v18444_v8 = vadd.f32 %v15528_v27, %v13476_v7  ;;  %v14824_v23 = vpop.f32.mrb[194].mxu1  ;;  %v15530_v57 = vpop.f32.mrb[2].mxu0  ;;  %16184 = vmatprep.subr.bf16.mxu1 %v16045_v0 }
 0xb65   : > { %v18317_v6 = vadd.f32 %v14824_v23, %v13481_v40  ;;  %v18445_v4 = vadd.f32 %v15530_v57, %v13481_v40  ;;  %v14826_v52 = vpop.f32.mrb[195].mxu1  ;;  %v15532_v46 = vpop.f32.mrb[3].mxu0  ;;  %16185 = vmatpush1.bf16.msra.mxu1 %v16044_v12  ;;  %v15827_v5 = vmax.f32 %v18315_v21, 0.0  ;;  %v15829_v54 = vmax.f32 %v18443_v42, 0.0 }
 0xb66   : > { %v18318_v50 = vadd.f32 %v14826_v52, %v13481_v40  ;;  %v18446_v38 = vadd.f32 %v15532_v46, %v13481_v40  ;;  %v15828_v32 = vmax.f32 %v18316_v34, 0.0  ;;  %v15830_v17 = vmax.f32 %v18444_v8, 0.0 }
 0xb67   : > { %v15831_v56 = vmax.f32 %v18317_v6, 0.0  ;;  %v15833_v47 = vmax.f32 %v18445_v4, 0.0 }
 0xb68   : > { %v15832_v26 = vmax.f32 %v18318_v50, 0.0  ;;  %v15834_v51 = vmax.f32 %v18446_v38, 0.0  ;;  %v13496_v50 = vpop.permute.xlu0 %13495  ;;  %v13501_v38 = vpop.permute.xlu1 %13500 }
 0xb69   : > { %v16048_v25 = vpack.c.bf16 %v15831_v56, %v15827_v5  ;;  %v22375_v59 = vpack.c.bf16 %v15833_v47, %v15829_v54 }
 0xb6a   : > { %v16049_v22 = vpack.c.bf16 %v15832_v26, %v15828_v32  ;;  %v22377_v9 = vpack.c.bf16 %v15834_v51, %v15830_v17  ;;  %v14830_v3 = vpop.f32.mrb[196].mxu1  ;;  %v15536_v60 = vpop.f32.mrb[4].mxu0 }
 0xb6b   : > { %v18319_v20 = vadd.f32 %v14830_v3, %v13486_v61  ;;  %v18447_v24 = vadd.f32 %v15536_v60, %v13486_v61  ;;  %v14832_v31 = vpop.f32.mrb[197].mxu1  ;;  %v15538_v2 = vpop.f32.mrb[5].mxu0 }
 0xb6c   : > { %v18320_v7 = vadd.f32 %v14832_v31, %v13486_v61  ;;  %v18448_v40 = vadd.f32 %v15538_v2, %v13486_v61  ;;  %v14834_v12 = vpop.f32.mrb[198].mxu1  ;;  %v15540_v0 = vpop.f32.mrb[6].mxu0  ;;  %16186 = vmatprep.subr.bf16.mxu1 %v16049_v22 }
 0xb6d   : > { %v18321_v39 = vadd.f32 %v14834_v12, %v13491_v15  ;;  %v18449_v48 = vadd.f32 %v15540_v0, %v13491_v15  ;;  %v14836_v21 = vpop.f32.mrb[199].mxu1  ;;  %v15542_v42 = vpop.f32.mrb[7].mxu0  ;;  %16187 = vmatpush1.bf16.msra.mxu1 %v16048_v25  ;;  %v15835_v34 = vmax.f32 %v18319_v20, 0.0  ;;  %v15837_v8 = vmax.f32 %v18447_v24, 0.0 }
 0xb6e   : > { %v18322_v29 = vadd.f32 %v14836_v21, %v13491_v15  ;;  %v18450_v27 = vadd.f32 %v15542_v42, %v13491_v15  ;;  %v15836_v6 = vmax.f32 %v18320_v7, 0.0  ;;  %v15838_v4 = vmax.f32 %v18448_v40, 0.0 }
 0xb6f   : > { %v15839_v23 = vmax.f32 %v18321_v39, 0.0  ;;  %v15841_v57 = vmax.f32 %v18449_v48, 0.0 }
 0xb70   : > { %v15840_v52 = vmax.f32 %v18322_v29, 0.0  ;;  %v15842_v46 = vmax.f32 %v18450_v27, 0.0 }
 0xb71   : > { %v16052_v5 = vpack.c.bf16 %v15839_v23, %v15835_v34  ;;  %v22379_v54 = vpack.c.bf16 %v15841_v57, %v15837_v8  ;;  %v13506_v34 = vpop.permute.xlu0 %13505  ;;  %v13511_v8 = vpop.permute.xlu1 %13510 }
 0xb72   : > { %v16053_v56 = vpack.c.bf16 %v15840_v52, %v15836_v6  ;;  %v22381_v47 = vpack.c.bf16 %v15842_v46, %v15838_v4  ;;  %v14840_v32 = vpop.f32.mrb[200].mxu1  ;;  %v15546_v17 = vpop.f32.mrb[8].mxu0 }
 0xb73   : > { %v18323_v26 = vadd.f32 %v14840_v32, %v13496_v50  ;;  %v18451_v51 = vadd.f32 %v15546_v17, %v13496_v50  ;;  %v14842_v61 = vpop.f32.mrb[201].mxu1  ;;  %v15548_v15 = vpop.f32.mrb[9].mxu0 }
 0xb74   : > { %v18324_v25 = vadd.f32 %v14842_v61, %v13496_v50  ;;  %v18452_v22 = vadd.f32 %v15548_v15, %v13496_v50  ;;  %v14844_v3 = vpop.f32.mrb[202].mxu1  ;;  %v15550_v60 = vpop.f32.mrb[10].mxu0  ;;  %16188 = vmatprep.subr.bf16.mxu1 %v16053_v56 }
 0xb75   : > { %v18325_v20 = vadd.f32 %v14844_v3, %v13501_v38  ;;  %v18453_v24 = vadd.f32 %v15550_v60, %v13501_v38  ;;  %v14846_v31 = vpop.f32.mrb[203].mxu1  ;;  %v15552_v2 = vpop.f32.mrb[11].mxu0  ;;  %16189 = vmatpush1.bf16.msra.mxu1 %v16052_v5  ;;  %v15843_v12 = vmax.f32 %v18323_v26, 0.0  ;;  %v15845_v0 = vmax.f32 %v18451_v51, 0.0 }
 0xb76   : > { %v18326_v7 = vadd.f32 %v14846_v31, %v13501_v38  ;;  %v18454_v40 = vadd.f32 %v15552_v2, %v13501_v38  ;;  %v15844_v21 = vmax.f32 %v18324_v25, 0.0  ;;  %v15846_v42 = vmax.f32 %v18452_v22, 0.0 }
 0xb77   : > { %v15847_v39 = vmax.f32 %v18325_v20, 0.0  ;;  %v15849_v48 = vmax.f32 %v18453_v24, 0.0 }
 0xb78   : > { %v15848_v29 = vmax.f32 %v18326_v7, 0.0  ;;  %v15850_v27 = vmax.f32 %v18454_v40, 0.0 }
 0xb79   : > { %v16056_v23 = vpack.c.bf16 %v15847_v39, %v15843_v12  ;;  %v22383_v57 = vpack.c.bf16 %v15849_v48, %v15845_v0  ;;  %v13516_v39 = vpop.permute.xlu0 %13515  ;;  %v13521_v48 = vpop.permute.xlu1 %13520 }
 0xb7a   : > { %v16057_v6 = vpack.c.bf16 %v15848_v29, %v15844_v21  ;;  %v22385_v4 = vpack.c.bf16 %v15850_v27, %v15846_v42  ;;  %v14850_v52 = vpop.f32.mrb[204].mxu1  ;;  %v15556_v46 = vpop.f32.mrb[12].mxu0 }
 0xb7b   : > { %v18327_v50 = vadd.f32 %v14850_v52, %v13506_v34  ;;  %v18455_v38 = vadd.f32 %v15556_v46, %v13506_v34  ;;  %v14852_v5 = vpop.f32.mrb[205].mxu1  ;;  %v15558_v56 = vpop.f32.mrb[13].mxu0 }
 0xb7c   : > { %v18328_v32 = vadd.f32 %v14852_v5, %v13506_v34  ;;  %v18456_v17 = vadd.f32 %v15558_v56, %v13506_v34  ;;  %v14854_v26 = vpop.f32.mrb[206].mxu1  ;;  %v15560_v51 = vpop.f32.mrb[14].mxu0  ;;  %16190 = vmatprep.subr.bf16.mxu1 %v16057_v6 }
 0xb7d   : > { %v18329_v61 = vadd.f32 %v14854_v26, %v13511_v8  ;;  %v18457_v15 = vadd.f32 %v15560_v51, %v13511_v8  ;;  %v14856_v25 = vpop.f32.mrb[207].mxu1  ;;  %v15562_v22 = vpop.f32.mrb[15].mxu0  ;;  %16191 = vmatpush1.bf16.msra.mxu1 %v16056_v23  ;;  %v15851_v20 = vmax.f32 %v18327_v50, 0.0  ;;  %v15853_v24 = vmax.f32 %v18455_v38, 0.0 }
 0xb7e   : > { %v18330_v3 = vadd.f32 %v14856_v25, %v13511_v8  ;;  %v18458_v60 = vadd.f32 %v15562_v22, %v13511_v8  ;;  %v15852_v7 = vmax.f32 %v18328_v32, 0.0  ;;  %v15854_v40 = vmax.f32 %v18456_v17, 0.0 }
 0xb7f   : > { %v15855_v31 = vmax.f32 %v18329_v61, 0.0  ;;  %v15857_v2 = vmax.f32 %v18457_v15, 0.0 }
 0xb80   : > { %v15856_v12 = vmax.f32 %v18330_v3, 0.0  ;;  %v15858_v0 = vmax.f32 %v18458_v60, 0.0 }
 0xb81   : > { %v16060_v21 = vpack.c.bf16 %v15855_v31, %v15851_v20  ;;  %v22387_v42 = vpack.c.bf16 %v15857_v2, %v15853_v24 }
 0xb82   : > { %v16061_v29 = vpack.c.bf16 %v15856_v12, %v15852_v7  ;;  %v22389_v27 = vpack.c.bf16 %v15858_v0, %v15854_v40  ;;  %v14860_v34 = vpop.f32.mrb[208].mxu1  ;;  %v15566_v23 = vpop.f32.mrb[16].mxu0 }
 0xb83   : > { %v18331_v6 = vadd.f32 %v14860_v34, %v13516_v39  ;;  %v18459_v8 = vadd.f32 %v15566_v23, %v13516_v39  ;;  %v14862_v52 = vpop.f32.mrb[209].mxu1  ;;  %v15568_v46 = vpop.f32.mrb[17].mxu0 }
 0xb84   : > { %v18332_v50 = vadd.f32 %v14862_v52, %v13516_v39  ;;  %v18460_v38 = vadd.f32 %v15568_v46, %v13516_v39  ;;  %v14864_v5 = vpop.f32.mrb[210].mxu1  ;;  %v15570_v56 = vpop.f32.mrb[18].mxu0  ;;  %16192 = vmatprep.subr.bf16.mxu1 %v16061_v29 }
 0xb85   : > { %v18333_v32 = vadd.f32 %v14864_v5, %v13521_v48  ;;  %v18461_v17 = vadd.f32 %v15570_v56, %v13521_v48  ;;  %v14866_v26 = vpop.f32.mrb[211].mxu1  ;;  %v15572_v51 = vpop.f32.mrb[19].mxu0  ;;  %16193 = vmatpush1.bf16.msra.mxu1 %v16060_v21  ;;  %v15859_v25 = vmax.f32 %v18331_v6, 0.0  ;;  %v15861_v22 = vmax.f32 %v18459_v8, 0.0 }
 0xb86   : > { %v18334_v61 = vadd.f32 %v14866_v26, %v13521_v48  ;;  %v18462_v15 = vadd.f32 %v15572_v51, %v13521_v48  ;;  %v15860_v20 = vmax.f32 %v18332_v50, 0.0  ;;  %v15862_v24 = vmax.f32 %v18460_v38, 0.0  ;;  %v13526_v7 = vpop.permute.xlu0 %13525  ;;  %v13531_v40 = vpop.permute.xlu1 %13530 }
 0xb87   : > { %v15863_v3 = vmax.f32 %v18333_v32, 0.0  ;;  %v15865_v60 = vmax.f32 %v18461_v17, 0.0 }
 0xb88   : > { %v15864_v31 = vmax.f32 %v18334_v61, 0.0  ;;  %v15866_v2 = vmax.f32 %v18462_v15, 0.0 }
 0xb89   : > { %v16064_v12 = vpack.c.bf16 %v15863_v3, %v15859_v25  ;;  %v22391_v0 = vpack.c.bf16 %v15865_v60, %v15861_v22 }
 0xb8a   : > { %v16065_v39 = vpack.c.bf16 %v15864_v31, %v15860_v20  ;;  %v22393_v29 = vpack.c.bf16 %v15866_v2, %v15862_v24  ;;  %v14870_v34 = vpop.f32.mrb[212].mxu1  ;;  %v15576_v21 = vpop.f32.mrb[20].mxu0 }
 0xb8b   : > { %v18335_v23 = vadd.f32 %v14870_v34, %v13526_v7  ;;  %v18463_v48 = vadd.f32 %v15576_v21, %v13526_v7  ;;  %v14872_v6 = vpop.f32.mrb[213].mxu1  ;;  %v15578_v8 = vpop.f32.mrb[21].mxu0 }
 0xb8c   : > { %v18336_v52 = vadd.f32 %v14872_v6, %v13526_v7  ;;  %v18464_v46 = vadd.f32 %v15578_v8, %v13526_v7  ;;  %v14874_v50 = vpop.f32.mrb[214].mxu1  ;;  %v15580_v38 = vpop.f32.mrb[22].mxu0  ;;  %16194 = vmatprep.subr.bf16.mxu1 %v16065_v39 }
 0xb8d   : > { %v18337_v5 = vadd.f32 %v14874_v50, %v13531_v40  ;;  %v18465_v56 = vadd.f32 %v15580_v38, %v13531_v40  ;;  %v14876_v32 = vpop.f32.mrb[215].mxu1  ;;  %v15582_v17 = vpop.f32.mrb[23].mxu0  ;;  %16195 = vmatpush1.bf16.msra.mxu1 %v16064_v12  ;;  %v15867_v61 = vmax.f32 %v18335_v23, 0.0  ;;  %v15869_v15 = vmax.f32 %v18463_v48, 0.0 }
 0xb8e   : > { %v18338_v26 = vadd.f32 %v14876_v32, %v13531_v40  ;;  %v18466_v51 = vadd.f32 %v15582_v17, %v13531_v40  ;;  %v15868_v3 = vmax.f32 %v18336_v52, 0.0  ;;  %v15870_v60 = vmax.f32 %v18464_v46, 0.0  ;;  %v13536_v31 = vpop.permute.xlu0 %13535  ;;  %v13541_v2 = vpop.permute.xlu1 %13540 }
 0xb8f   : > { %v15871_v25 = vmax.f32 %v18337_v5, 0.0  ;;  %v15873_v22 = vmax.f32 %v18465_v56, 0.0 }
 0xb90   : > { %v15872_v20 = vmax.f32 %v18338_v26, 0.0  ;;  %v15874_v24 = vmax.f32 %v18466_v51, 0.0 }
 0xb91   : > { %v16068_v7 = vpack.c.bf16 %v15871_v25, %v15867_v61  ;;  %v22395_v34 = vpack.c.bf16 %v15873_v22, %v15869_v15 }
 0xb92   : > { %v16069_v39 = vpack.c.bf16 %v15872_v20, %v15868_v3  ;;  %v22397_v21 = vpack.c.bf16 %v15874_v24, %v15870_v60  ;;  %v14880_v6 = vpop.f32.mrb[216].mxu1  ;;  %v15586_v12 = vpop.f32.mrb[24].mxu0 }
 0xb93   : > { %v18339_v8 = vadd.f32 %v14880_v6, %v13536_v31  ;;  %v18467_v40 = vadd.f32 %v15586_v12, %v13536_v31  ;;  %v14882_v23 = vpop.f32.mrb[217].mxu1  ;;  %v15588_v48 = vpop.f32.mrb[25].mxu0 }
 0xb94   : > { %v18340_v50 = vadd.f32 %v14882_v23, %v13536_v31  ;;  %v18468_v38 = vadd.f32 %v15588_v48, %v13536_v31  ;;  %v14884_v52 = vpop.f32.mrb[218].mxu1  ;;  %v15590_v46 = vpop.f32.mrb[26].mxu0  ;;  %16196 = vmatprep.subr.bf16.mxu1 %v16069_v39  ;;  %v16147_v39 = vcombine.high %v22340_v49, %v22340_v49 }
 0xb95   : > { %v18341_v5 = vadd.f32 %v14884_v52, %v13541_v2  ;;  %v18469_v56 = vadd.f32 %v15590_v46, %v13541_v2  ;;  %v14886_v32 = vpop.f32.mrb[219].mxu1  ;;  %v15592_v17 = vpop.f32.mrb[27].mxu0  ;;  %16197 = vmatpush1.bf16.msra.mxu1 %v16068_v7  ;;  %v15875_v61 = vmax.f32 %v18339_v8, 0.0  ;;  %v15877_v15 = vmax.f32 %v18467_v40, 0.0 }
 0xb96   : > { %v18342_v26 = vadd.f32 %v14886_v32, %v13541_v2  ;;  %v18470_v51 = vadd.f32 %v15592_v17, %v13541_v2  ;;  %v15876_v3 = vmax.f32 %v18340_v50, 0.0  ;;  %v15878_v60 = vmax.f32 %v18468_v38, 0.0  ;;  %v13546_v6 = vpop.permute.xlu0 %13545  ;;  %v13551_v31 = vpop.permute.xlu1 %13550 }
 0xb97   : > { %v15879_v25 = vmax.f32 %v18341_v5, 0.0  ;;  %v15881_v22 = vmax.f32 %v18469_v56, 0.0  ;;  %v22406_v38 = vrot.slane %v16147_v39, %v22338_v43 }
 0xb98   : > { %v15880_v20 = vmax.f32 %v18342_v26, 0.0  ;;  %v15882_v24 = vmax.f32 %v18470_v51, 0.0 }
 0xb99   : > { %v16072_v12 = vpack.c.bf16 %v15879_v25, %v15875_v61  ;;  %v22399_v23 = vpack.c.bf16 %v15881_v22, %v15877_v15  ;;  %v16163_v43 = vcombine.high %v22406_v38, %v22406_v38 }
 0xb9a   : > { %v16073_v48 = vpack.c.bf16 %v15880_v20, %v15876_v3  ;;  %v22403_v7 = vpack.c.bf16 %v15882_v24, %v15878_v60  ;;  %v14890_v2 = vpop.f32.mrb[220].mxu1  ;;  %v15596_v8 = vpop.f32.mrb[28].mxu0 }
 0xb9b   : > { %v18343_v40 = vadd.f32 %v14890_v2, %v13546_v6  ;;  %v18471_v52 = vadd.f32 %v15596_v8, %v13546_v6  ;;  %v14892_v46 = vpop.f32.mrb[221].mxu1  ;;  %v15598_v50 = vpop.f32.mrb[29].mxu0  ;;  %16323 = vmatprep.mubr.bf16.mxu0 %v16163_v43 }
 0xb9c   : > { %v18344_v5 = vadd.f32 %v14892_v46, %v13546_v6  ;;  %v18472_v56 = vadd.f32 %v15598_v50, %v13546_v6  ;;  %v14894_v32 = vpop.f32.mrb[222].mxu1  ;;  %v15600_v17 = vpop.f32.mrb[30].mxu0  ;;  %16198 = vmatprep.subr.bf16.mxu1 %v16073_v48 }
 0xb9d   : > { %v18345_v26 = vadd.f32 %v14894_v32, %v13551_v31  ;;  %v18473_v51 = vadd.f32 %v15600_v17, %v13551_v31  ;;  %v14896_v49 = vpop.f32.mrb[223].mxu1  ;;  %v15602_v61 = vpop.f32.mrb[31].mxu0  ;;  %16199 = vmatpush1.bf16.msra.mxu1 %v16072_v12  ;;  %v15883_v15 = vmax.f32 %v18343_v40, 0.0  ;;  %v15885_v3 = vmax.f32 %v18471_v52, 0.0 }
 0xb9e   : > { %v18346_v25 = vadd.f32 %v14896_v49, %v13551_v31  ;;  %v18474_v22 = vadd.f32 %v15602_v61, %v13551_v31  ;;  %v15884_v24 = vmax.f32 %v18344_v5, 0.0  ;;  %v15886_v39 = vmax.f32 %v18472_v56, 0.0  ;;  %v13556_v48 = vpop.permute.xlu0 %13555  ;;  %v13561_v8 = vpop.permute.xlu1 %13560 }
 0xb9f   : > { %v15887_v60 = vmax.f32 %v18345_v26, 0.0  ;;  %v15889_v20 = vmax.f32 %v18473_v51, 0.0 }
 0xba0   : > { %v15888_v6 = vmax.f32 %v18346_v25, 0.0  ;;  %v15890_v2 = vmax.f32 %v18474_v22, 0.0  ;;  %16201 = vmatmul.mubr.bf16.vlgmr.msra.gmra.mrb[28].mxu1 %v22344_v45 }
 0xba1   : > { %v16076_v46 = vpack.c.bf16 %v15887_v60, %v15883_v15  ;;  %v16078_v50 = vpack.c.bf16 %v15889_v20, %v15885_v3  ;;  %16241 = vmatprep.mubr.bf16.mxu1 %v16163_v43 }
 0xba2   : > { %v16077_v12 = vpack.c.bf16 %v15888_v6, %v15884_v24  ;;  %v16079_v31 = vpack.c.bf16 %v15890_v2, %v15886_v39  ;;  %v14900_v40 = vpop.f32.mrb[224].mxu1  ;;  %v15606_v52 = vpop.f32.mrb[32].mxu0 }
 0xba3   : > { %v18347_v32 = vadd.f32 %v14900_v40, %v13556_v48  ;;  %v18475_v17 = vadd.f32 %v15606_v52, %v13556_v48  ;;  %v14902_v26 = vpop.f32.mrb[225].mxu1  ;;  %v15608_v51 = vpop.f32.mrb[33].mxu0 }
 0xba4   : > { %v18348_v5 = vadd.f32 %v14902_v26, %v13556_v48  ;;  %v18476_v56 = vadd.f32 %v15608_v51, %v13556_v48  ;;  %v14904_v49 = vpop.f32.mrb[226].mxu1  ;;  %v15610_v61 = vpop.f32.mrb[34].mxu0  ;;  %16209 = vmatprep.subr.bf16.mxu1 %v16077_v12  ;;  %16291 = vmatprep.subr.bf16.mxu0 %v16079_v31 }
 0xba5   : > { %v18349_v25 = vadd.f32 %v14904_v49, %v13561_v8  ;;  %v18477_v22 = vadd.f32 %v15610_v61, %v13561_v8  ;;  %v14906_v15 = vpop.f32.mrb[227].mxu1  ;;  %v15612_v3 = vpop.f32.mrb[35].mxu0  ;;  %16210 = vmatpush1.bf16.msra.mxu1 %v16076_v46  ;;  %16292 = vmatpush1.bf16.msra.mxu0 %v16078_v50  ;;  %v15891_v43 = vmax.f32 %v18347_v32, 0.0  ;;  %v15893_v24 = vmax.f32 %v18475_v17, 0.0 }
 0xba6   : > { %v18350_v60 = vadd.f32 %v14906_v15, %v13561_v8  ;;  %v18478_v20 = vadd.f32 %v15612_v3, %v13561_v8  ;;  %v15892_v2 = vmax.f32 %v18348_v5, 0.0  ;;  %v15894_v40 = vmax.f32 %v18476_v56, 0.0  ;;  %v13566_v26 = vpop.permute.xlu0 %13565  ;;  %v13571_v51 = vpop.permute.xlu1 %13570 }
 0xba7   : > { %v15895_v39 = vmax.f32 %v18349_v25, 0.0  ;;  %v15897_v6 = vmax.f32 %v18477_v22, 0.0 }
 0xba8   : > { %v15896_v52 = vmax.f32 %v18350_v60, 0.0  ;;  %v15898_v48 = vmax.f32 %v18478_v20, 0.0 }
 0xba9   : > { %v16080_v12 = vpack.c.bf16 %v15895_v39, %v15891_v43  ;;  %v16082_v31 = vpack.c.bf16 %v15897_v6, %v15893_v24 }
 0xbaa   : > { %v16081_v49 = vpack.c.bf16 %v15896_v52, %v15892_v2  ;;  %v16083_v61 = vpack.c.bf16 %v15898_v48, %v15894_v40  ;;  %v14910_v11 = vpop.f32.mrb[228].mxu1  ;;  %v15616_v10 = vpop.f32.mrb[36].mxu0 }
 0xbab   : > { %v18351_v46 = vadd.f32 %v14910_v11, %v13566_v26  ;;  %v18479_v50 = vadd.f32 %v15616_v10, %v13566_v26  ;;  %v14912_v15 = vpop.f32.mrb[229].mxu1  ;;  %v15618_v8 = vpop.f32.mrb[37].mxu0 }
 0xbac   : > { %v18352_v32 = vadd.f32 %v14912_v15, %v13566_v26  ;;  %v18480_v17 = vadd.f32 %v15618_v8, %v13566_v26  ;;  %v14914_v25 = vpop.f32.mrb[230].mxu1  ;;  %v15620_v22 = vpop.f32.mrb[38].mxu0  ;;  %16211 = vmatprep.subr.bf16.mxu1 %v16081_v49  ;;  %16293 = vmatprep.subr.bf16.mxu0 %v16083_v61 }
 0xbad   : > { %v18353_v5 = vadd.f32 %v14914_v25, %v13571_v51  ;;  %v18481_v56 = vadd.f32 %v15620_v22, %v13571_v51  ;;  %v14916_v3 = vpop.f32.mrb[231].mxu1  ;;  %v15622_v60 = vpop.f32.mrb[39].mxu0  ;;  %16212 = vmatpush1.bf16.msra.mxu1 %v16080_v12  ;;  %16294 = vmatpush1.bf16.msra.mxu0 %v16082_v31  ;;  %v15899_v24 = vmax.f32 %v18351_v46, 0.0  ;;  %v15901_v39 = vmax.f32 %v18479_v50, 0.0 }
 0xbae   : > { %v18354_v20 = vadd.f32 %v14916_v3, %v13571_v51  ;;  %v18482_v43 = vadd.f32 %v15622_v60, %v13571_v51  ;;  %v15900_v6 = vmax.f32 %v18352_v32, 0.0  ;;  %v15902_v2 = vmax.f32 %v18480_v17, 0.0  ;;  %v13576_v48 = vpop.permute.xlu0 %13575  ;;  %v13581_v26 = vpop.permute.xlu1 %13580 }
 0xbaf   : > { %v15903_v11 = vmax.f32 %v18353_v5, 0.0  ;;  %v15905_v10 = vmax.f32 %v18481_v56, 0.0 }
 0xbb0   : > { %v15904_v40 = vmax.f32 %v18354_v20, 0.0  ;;  %v15906_v52 = vmax.f32 %v18482_v43, 0.0 }
 0xbb1   : > { %v16084_v49 = vpack.c.bf16 %v15903_v11, %v15899_v24  ;;  %v16086_v61 = vpack.c.bf16 %v15905_v10, %v15901_v39 }
 0xbb2   : > { %v16085_v15 = vpack.c.bf16 %v15904_v40, %v15900_v6  ;;  %v16087_v8 = vpack.c.bf16 %v15906_v52, %v15902_v2  ;;  %v14920_v25 = vpop.f32.mrb[232].mxu1  ;;  %v15626_v22 = vpop.f32.mrb[40].mxu0 }
 0xbb3   : > { %v18355_v12 = vadd.f32 %v14920_v25, %v13576_v48  ;;  %v18483_v31 = vadd.f32 %v15626_v22, %v13576_v48  ;;  %v14922_v3 = vpop.f32.mrb[233].mxu1  ;;  %v15628_v51 = vpop.f32.mrb[41].mxu0 }
 0xbb4   : > { %v18356_v46 = vadd.f32 %v14922_v3, %v13576_v48  ;;  %v18484_v50 = vadd.f32 %v15628_v51, %v13576_v48  ;;  %v14924_v5 = vpop.f32.mrb[234].mxu1  ;;  %v15630_v56 = vpop.f32.mrb[42].mxu0  ;;  %16213 = vmatprep.subr.bf16.mxu1 %v16085_v15  ;;  %16295 = vmatprep.subr.bf16.mxu0 %v16087_v8 }
 0xbb5   : > { %v18357_v32 = vadd.f32 %v14924_v5, %v13581_v26  ;;  %v18485_v17 = vadd.f32 %v15630_v56, %v13581_v26  ;;  %v14926_v60 = vpop.f32.mrb[235].mxu1  ;;  %v15632_v20 = vpop.f32.mrb[43].mxu0  ;;  %16214 = vmatpush1.bf16.msra.mxu1 %v16084_v49  ;;  %16296 = vmatpush1.bf16.msra.mxu0 %v16086_v61  ;;  %v15907_v39 = vmax.f32 %v18355_v12, 0.0  ;;  %v15909_v11 = vmax.f32 %v18483_v31, 0.0 }
 0xbb6   : > { %v18358_v43 = vadd.f32 %v14926_v60, %v13581_v26  ;;  %v18486_v24 = vadd.f32 %v15632_v20, %v13581_v26  ;;  %v15908_v2 = vmax.f32 %v18356_v46, 0.0  ;;  %v15910_v40 = vmax.f32 %v18484_v50, 0.0  ;;  %v13586_v25 = vpop.permute.xlu0 %13585  ;;  %v13591_v22 = vpop.permute.xlu1 %13590 }
 0xbb7   : > { %v15911_v10 = vmax.f32 %v18357_v32, 0.0  ;;  %v15913_v6 = vmax.f32 %v18485_v17, 0.0 }
 0xbb8   : > { %v15912_v52 = vmax.f32 %v18358_v43, 0.0  ;;  %v15914_v48 = vmax.f32 %v18486_v24, 0.0 }
 0xbb9   : > { %v16088_v15 = vpack.c.bf16 %v15911_v10, %v15907_v39  ;;  %v16090_v8 = vpack.c.bf16 %v15913_v6, %v15909_v11 }
 0xbba   : > { %v16089_v3 = vpack.c.bf16 %v15912_v52, %v15908_v2  ;;  %v16091_v51 = vpack.c.bf16 %v15914_v48, %v15910_v40  ;;  %v14930_v5 = vpop.f32.mrb[236].mxu1  ;;  %v15636_v56 = vpop.f32.mrb[44].mxu0 }
 0xbbb   : > { %v18359_v49 = vadd.f32 %v14930_v5, %v13586_v25  ;;  %v18487_v61 = vadd.f32 %v15636_v56, %v13586_v25  ;;  %v14932_v60 = vpop.f32.mrb[237].mxu1  ;;  %v15638_v26 = vpop.f32.mrb[45].mxu0 }
 0xbbc   : > { %v18360_v12 = vadd.f32 %v14932_v60, %v13586_v25  ;;  %v18488_v31 = vadd.f32 %v15638_v26, %v13586_v25  ;;  %v14934_v32 = vpop.f32.mrb[238].mxu1  ;;  %v15640_v17 = vpop.f32.mrb[46].mxu0  ;;  %16215 = vmatprep.subr.bf16.mxu1 %v16089_v3  ;;  %16297 = vmatprep.subr.bf16.mxu0 %v16091_v51 }
 0xbbd   : > { %v18361_v46 = vadd.f32 %v14934_v32, %v13591_v22  ;;  %v18489_v50 = vadd.f32 %v15640_v17, %v13591_v22  ;;  %v14936_v20 = vpop.f32.mrb[239].mxu1  ;;  %v15642_v43 = vpop.f32.mrb[47].mxu0  ;;  %16216 = vmatpush1.bf16.msra.mxu1 %v16088_v15  ;;  %16298 = vmatpush1.bf16.msra.mxu0 %v16090_v8  ;;  %v15915_v11 = vmax.f32 %v18359_v49, 0.0  ;;  %v15917_v10 = vmax.f32 %v18487_v61, 0.0 }
 0xbbe   : > { %v18362_v24 = vadd.f32 %v14936_v20, %v13591_v22  ;;  %v18490_v39 = vadd.f32 %v15642_v43, %v13591_v22  ;;  %v15916_v40 = vmax.f32 %v18360_v12, 0.0  ;;  %v15918_v52 = vmax.f32 %v18488_v31, 0.0  ;;  %v13596_v5 = vpop.permute.xlu0 %13595  ;;  %v13601_v56 = vpop.permute.xlu1 %13600 }
 0xbbf   : > { %v15919_v6 = vmax.f32 %v18361_v46, 0.0  ;;  %v15921_v2 = vmax.f32 %v18489_v50, 0.0 }
 0xbc0   : > { %v15920_v48 = vmax.f32 %v18362_v24, 0.0  ;;  %v15922_v25 = vmax.f32 %v18490_v39, 0.0 }
 0xbc1   : > { %v16092_v3 = vpack.c.bf16 %v15919_v6, %v15915_v11  ;;  %v16094_v51 = vpack.c.bf16 %v15921_v2, %v15917_v10 }
 0xbc2   : > { %v16093_v60 = vpack.c.bf16 %v15920_v48, %v15916_v40  ;;  %v16095_v26 = vpack.c.bf16 %v15922_v25, %v15918_v52  ;;  %v14940_v32 = vpop.f32.mrb[240].mxu1  ;;  %v15646_v17 = vpop.f32.mrb[48].mxu0 }
 0xbc3   : > { %v18363_v15 = vadd.f32 %v14940_v32, %v13596_v5  ;;  %v18491_v8 = vadd.f32 %v15646_v17, %v13596_v5  ;;  %v14942_v20 = vpop.f32.mrb[241].mxu1  ;;  %v15648_v22 = vpop.f32.mrb[49].mxu0 }
 0xbc4   : > { %v18364_v49 = vadd.f32 %v14942_v20, %v13596_v5  ;;  %v18492_v61 = vadd.f32 %v15648_v22, %v13596_v5  ;;  %v14944_v46 = vpop.f32.mrb[242].mxu1  ;;  %v15650_v50 = vpop.f32.mrb[50].mxu0  ;;  %16217 = vmatprep.subr.bf16.mxu1 %v16093_v60  ;;  %16299 = vmatprep.subr.bf16.mxu0 %v16095_v26 }
 0xbc5   : > { %v18365_v12 = vadd.f32 %v14944_v46, %v13601_v56  ;;  %v18493_v31 = vadd.f32 %v15650_v50, %v13601_v56  ;;  %v14946_v43 = vpop.f32.mrb[243].mxu1  ;;  %v15652_v24 = vpop.f32.mrb[51].mxu0  ;;  %16218 = vmatpush1.bf16.msra.mxu1 %v16092_v3  ;;  %16300 = vmatpush1.bf16.msra.mxu0 %v16094_v51  ;;  %v15923_v10 = vmax.f32 %v18363_v15, 0.0  ;;  %v15925_v6 = vmax.f32 %v18491_v8, 0.0 }
 0xbc6   : > { %v18366_v39 = vadd.f32 %v14946_v43, %v13601_v56  ;;  %v18494_v11 = vadd.f32 %v15652_v24, %v13601_v56  ;;  %v15924_v52 = vmax.f32 %v18364_v49, 0.0  ;;  %v15926_v48 = vmax.f32 %v18492_v61, 0.0  ;;  %v13606_v32 = vpop.permute.xlu0 %13605  ;;  %v13611_v17 = vpop.permute.xlu1 %13610 }
 0xbc7   : > { %v15927_v2 = vmax.f32 %v18365_v12, 0.0  ;;  %v15929_v40 = vmax.f32 %v18493_v31, 0.0 }
 0xbc8   : > { %v15928_v25 = vmax.f32 %v18366_v39, 0.0  ;;  %v15930_v5 = vmax.f32 %v18494_v11, 0.0 }
 0xbc9   : > { %v16096_v60 = vpack.c.bf16 %v15927_v2, %v15923_v10  ;;  %v16098_v26 = vpack.c.bf16 %v15929_v40, %v15925_v6 }
 0xbca   : > { %v16097_v20 = vpack.c.bf16 %v15928_v25, %v15924_v52  ;;  %v16099_v22 = vpack.c.bf16 %v15930_v5, %v15926_v48  ;;  %v14950_v46 = vpop.f32.mrb[244].mxu1  ;;  %v15656_v50 = vpop.f32.mrb[52].mxu0 }
 0xbcb   : > { %v18367_v3 = vadd.f32 %v14950_v46, %v13606_v32  ;;  %v18495_v51 = vadd.f32 %v15656_v50, %v13606_v32  ;;  %v14952_v43 = vpop.f32.mrb[245].mxu1  ;;  %v15658_v56 = vpop.f32.mrb[53].mxu0 }
 0xbcc   : > { %v18368_v15 = vadd.f32 %v14952_v43, %v13606_v32  ;;  %v18496_v8 = vadd.f32 %v15658_v56, %v13606_v32  ;;  %v14954_v12 = vpop.f32.mrb[246].mxu1  ;;  %v15660_v31 = vpop.f32.mrb[54].mxu0  ;;  %16219 = vmatprep.subr.bf16.mxu1 %v16097_v20  ;;  %16301 = vmatprep.subr.bf16.mxu0 %v16099_v22 }
 0xbcd   : > { %v18369_v49 = vadd.f32 %v14954_v12, %v13611_v17  ;;  %v18497_v61 = vadd.f32 %v15660_v31, %v13611_v17  ;;  %v14956_v24 = vpop.f32.mrb[247].mxu1  ;;  %v15662_v39 = vpop.f32.mrb[55].mxu0  ;;  %16220 = vmatpush1.bf16.msra.mxu1 %v16096_v60  ;;  %16302 = vmatpush1.bf16.msra.mxu0 %v16098_v26  ;;  %v15931_v6 = vmax.f32 %v18367_v3, 0.0  ;;  %v15933_v2 = vmax.f32 %v18495_v51, 0.0 }
 0xbce   : > { %v18370_v11 = vadd.f32 %v14956_v24, %v13611_v17  ;;  %v18498_v10 = vadd.f32 %v15662_v39, %v13611_v17  ;;  %v15932_v48 = vmax.f32 %v18368_v15, 0.0  ;;  %v15934_v25 = vmax.f32 %v18496_v8, 0.0  ;;  %v13616_v46 = vpop.permute.xlu0 %13615  ;;  %v13621_v50 = vpop.permute.xlu1 %13620 }
 0xbcf   : > { %v15935_v40 = vmax.f32 %v18369_v49, 0.0  ;;  %v15937_v52 = vmax.f32 %v18497_v61, 0.0 }
 0xbd0   : > { %v15936_v5 = vmax.f32 %v18370_v11, 0.0  ;;  %v15938_v32 = vmax.f32 %v18498_v10, 0.0 }
 0xbd1   : > { %v16100_v20 = vpack.c.bf16 %v15935_v40, %v15931_v6  ;;  %v16102_v22 = vpack.c.bf16 %v15937_v52, %v15933_v2 }
 0xbd2   : > { %v16101_v43 = vpack.c.bf16 %v15936_v5, %v15932_v48  ;;  %v16103_v56 = vpack.c.bf16 %v15938_v32, %v15934_v25  ;;  %v14960_v12 = vpop.f32.mrb[248].mxu1  ;;  %v15666_v31 = vpop.f32.mrb[56].mxu0 }
 0xbd3   : > { %v18371_v60 = vadd.f32 %v14960_v12, %v13616_v46  ;;  %v18499_v26 = vadd.f32 %v15666_v31, %v13616_v46  ;;  %v14962_v24 = vpop.f32.mrb[249].mxu1  ;;  %v15668_v17 = vpop.f32.mrb[57].mxu0 }
 0xbd4   : > { %v18372_v3 = vadd.f32 %v14962_v24, %v13616_v46  ;;  %v18500_v51 = vadd.f32 %v15668_v17, %v13616_v46  ;;  %v14964_v49 = vpop.f32.mrb[250].mxu1  ;;  %v15670_v61 = vpop.f32.mrb[58].mxu0  ;;  %16221 = vmatprep.subr.bf16.mxu1 %v16101_v43  ;;  %16303 = vmatprep.subr.bf16.mxu0 %v16103_v56 }
 0xbd5   : > { %v18373_v15 = vadd.f32 %v14964_v49, %v13621_v50  ;;  %v18501_v8 = vadd.f32 %v15670_v61, %v13621_v50  ;;  %v14966_v39 = vpop.f32.mrb[251].mxu1  ;;  %v15672_v11 = vpop.f32.mrb[59].mxu0  ;;  %16222 = vmatpush1.bf16.msra.mxu1 %v16100_v20  ;;  %16304 = vmatpush1.bf16.msra.mxu0 %v16102_v22  ;;  %v15939_v2 = vmax.f32 %v18371_v60, 0.0  ;;  %v15941_v40 = vmax.f32 %v18499_v26, 0.0 }
 0xbd6   : > { %v18374_v10 = vadd.f32 %v14966_v39, %v13621_v50  ;;  %v18502_v6 = vadd.f32 %v15672_v11, %v13621_v50  ;;  %v15940_v25 = vmax.f32 %v18372_v3, 0.0  ;;  %v15942_v5 = vmax.f32 %v18500_v51, 0.0  ;;  %v13626_v12 = vpop.permute.xlu0 %13625  ;;  %v13631_v31 = vpop.permute.xlu1 %13630 }
 0xbd7   : > { %v15943_v52 = vmax.f32 %v18373_v15, 0.0  ;;  %v15945_v48 = vmax.f32 %v18501_v8, 0.0 }
 0xbd8   : > { %v15944_v32 = vmax.f32 %v18374_v10, 0.0  ;;  %v15946_v46 = vmax.f32 %v18502_v6, 0.0 }
 0xbd9   : > { %v16104_v43 = vpack.c.bf16 %v15943_v52, %v15939_v2  ;;  %v16106_v56 = vpack.c.bf16 %v15945_v48, %v15941_v40 }
 0xbda   : > { %v16105_v24 = vpack.c.bf16 %v15944_v32, %v15940_v25  ;;  %v16107_v17 = vpack.c.bf16 %v15946_v46, %v15942_v5  ;;  %v14970_v49 = vpop.f32.mrb[252].mxu1  ;;  %v15676_v61 = vpop.f32.mrb[60].mxu0 }
 0xbdb   : > { %v18375_v20 = vadd.f32 %v14970_v49, %v13626_v12  ;;  %v18503_v22 = vadd.f32 %v15676_v61, %v13626_v12  ;;  %v14972_v39 = vpop.f32.mrb[253].mxu1  ;;  %v15678_v50 = vpop.f32.mrb[61].mxu0 }
 0xbdc   : > { %v18376_v60 = vadd.f32 %v14972_v39, %v13626_v12  ;;  %v18504_v26 = vadd.f32 %v15678_v50, %v13626_v12  ;;  %v14974_v15 = vpop.f32.mrb[254].mxu1  ;;  %v15680_v8 = vpop.f32.mrb[62].mxu0  ;;  %16223 = vmatprep.subr.bf16.mxu1 %v16105_v24  ;;  %16305 = vmatprep.subr.bf16.mxu0 %v16107_v17 }
 0xbdd   : > { %v18377_v3 = vadd.f32 %v14974_v15, %v13631_v31  ;;  %v18505_v51 = vadd.f32 %v15680_v8, %v13631_v31  ;;  %v14976_v11 = vpop.f32.mrb[255].mxu1  ;;  %v15682_v10 = vpop.f32.mrb[63].mxu0  ;;  %16224 = vmatpush1.bf16.msra.mxu1 %v16104_v43  ;;  %16306 = vmatpush1.bf16.msra.mxu0 %v16106_v56  ;;  %v15947_v40 = vmax.f32 %v18375_v20, 0.0  ;;  %v15949_v52 = vmax.f32 %v18503_v22, 0.0 }
 0xbde   : > { %v18378_v6 = vadd.f32 %v14976_v11, %v13631_v31  ;;  %v18506_v2 = vadd.f32 %v15682_v10, %v13631_v31  ;;  %v15948_v5 = vmax.f32 %v18376_v60, 0.0  ;;  %v15950_v32 = vmax.f32 %v18504_v26, 0.0  ;;  %v13636_v49 = vpop.permute.xlu0 %13635  ;;  %v13641_v61 = vpop.permute.xlu1 %13640 }
 0xbdf   : > { %v15951_v48 = vmax.f32 %v18377_v3, 0.0  ;;  %v15953_v25 = vmax.f32 %v18505_v51, 0.0 }
 0xbe0   : > { %v15952_v46 = vmax.f32 %v18378_v6, 0.0  ;;  %v15954_v12 = vmax.f32 %v18506_v2, 0.0 }
 0xbe1   : > { %v16108_v24 = vpack.c.bf16 %v15951_v48, %v15947_v40  ;;  %v16110_v17 = vpack.c.bf16 %v15953_v25, %v15949_v52 }
 0xbe2   : > { %v16109_v39 = vpack.c.bf16 %v15952_v46, %v15948_v5  ;;  %v16111_v50 = vpack.c.bf16 %v15954_v12, %v15950_v32  ;;  %v14980_v15 = vpop.f32.mrb[0].mxu1  ;;  %v15686_v8 = vpop.f32.mrb[64].mxu0 }
 0xbe3   : > { %v18379_v43 = vadd.f32 %v14980_v15, %v13636_v49  ;;  %v18507_v56 = vadd.f32 %v15686_v8, %v13636_v49  ;;  %v14982_v11 = vpop.f32.mrb[1].mxu1  ;;  %v15688_v31 = vpop.f32.mrb[65].mxu0 }
 0xbe4   : > { %v18380_v20 = vadd.f32 %v14982_v11, %v13636_v49  ;;  %v18508_v22 = vadd.f32 %v15688_v31, %v13636_v49  ;;  %v14984_v3 = vpop.f32.mrb[2].mxu1  ;;  %v15690_v51 = vpop.f32.mrb[66].mxu0  ;;  %16225 = vmatprep.subr.bf16.mxu1 %v16109_v39  ;;  %16307 = vmatprep.subr.bf16.mxu0 %v16111_v50 }
 0xbe5   : > { %v18381_v60 = vadd.f32 %v14984_v3, %v13641_v61  ;;  %v18509_v26 = vadd.f32 %v15690_v51, %v13641_v61  ;;  %v14986_v10 = vpop.f32.mrb[3].mxu1  ;;  %v15692_v6 = vpop.f32.mrb[67].mxu0  ;;  %16226 = vmatpush1.bf16.msra.mxu1 %v16108_v24  ;;  %16308 = vmatpush1.bf16.msra.mxu0 %v16110_v17  ;;  %v15955_v52 = vmax.f32 %v18379_v43, 0.0  ;;  %v15957_v48 = vmax.f32 %v18507_v56, 0.0 }
 0xbe6   : > { %v18382_v2 = vadd.f32 %v14986_v10, %v13641_v61  ;;  %v18510_v40 = vadd.f32 %v15692_v6, %v13641_v61  ;;  %v15956_v32 = vmax.f32 %v18380_v20, 0.0  ;;  %v15958_v46 = vmax.f32 %v18508_v22, 0.0  ;;  %v13646_v15 = vpop.permute.xlu0 %13645  ;;  %v13651_v8 = vpop.permute.xlu1 %13650 }
 0xbe7   : > { %v15959_v25 = vmax.f32 %v18381_v60, 0.0  ;;  %v15961_v5 = vmax.f32 %v18509_v26, 0.0 }
 0xbe8   : > { %v15960_v12 = vmax.f32 %v18382_v2, 0.0  ;;  %v15962_v49 = vmax.f32 %v18510_v40, 0.0 }
 0xbe9   : > { %v16112_v39 = vpack.c.bf16 %v15959_v25, %v15955_v52  ;;  %v16114_v50 = vpack.c.bf16 %v15961_v5, %v15957_v48 }
 0xbea   : > { %v16113_v11 = vpack.c.bf16 %v15960_v12, %v15956_v32  ;;  %v16115_v31 = vpack.c.bf16 %v15962_v49, %v15958_v46  ;;  %v14990_v3 = vpop.f32.mrb[4].mxu1  ;;  %v15696_v51 = vpop.f32.mrb[68].mxu0 }
 0xbeb   : > { %v18383_v24 = vadd.f32 %v14990_v3, %v13646_v15  ;;  %v18511_v17 = vadd.f32 %v15696_v51, %v13646_v15  ;;  %v14992_v10 = vpop.f32.mrb[5].mxu1  ;;  %v15698_v61 = vpop.f32.mrb[69].mxu0 }
 0xbec   : > { %v18384_v43 = vadd.f32 %v14992_v10, %v13646_v15  ;;  %v18512_v56 = vadd.f32 %v15698_v61, %v13646_v15  ;;  %v14994_v60 = vpop.f32.mrb[6].mxu1  ;;  %v15700_v26 = vpop.f32.mrb[70].mxu0  ;;  %16227 = vmatprep.subr.bf16.mxu1 %v16113_v11  ;;  %16309 = vmatprep.subr.bf16.mxu0 %v16115_v31 }
 0xbed   : > { %v18385_v20 = vadd.f32 %v14994_v60, %v13651_v8  ;;  %v18513_v22 = vadd.f32 %v15700_v26, %v13651_v8  ;;  %v14996_v6 = vpop.f32.mrb[7].mxu1  ;;  %v15702_v2 = vpop.f32.mrb[71].mxu0  ;;  %16228 = vmatpush1.bf16.msra.mxu1 %v16112_v39  ;;  %16310 = vmatpush1.bf16.msra.mxu0 %v16114_v50  ;;  %v15963_v48 = vmax.f32 %v18383_v24, 0.0  ;;  %v15965_v25 = vmax.f32 %v18511_v17, 0.0 }
 0xbee   : > { %v18386_v40 = vadd.f32 %v14996_v6, %v13651_v8  ;;  %v18514_v52 = vadd.f32 %v15702_v2, %v13651_v8  ;;  %v15964_v46 = vmax.f32 %v18384_v43, 0.0  ;;  %v15966_v12 = vmax.f32 %v18512_v56, 0.0  ;;  %v13656_v3 = vpop.permute.xlu0 %13655  ;;  %v13661_v51 = vpop.permute.xlu1 %13660 }
 0xbef   : > { %v15967_v5 = vmax.f32 %v18385_v20, 0.0  ;;  %v15969_v32 = vmax.f32 %v18513_v22, 0.0 }
 0xbf0   : > { %v15968_v49 = vmax.f32 %v18386_v40, 0.0  ;;  %v15970_v15 = vmax.f32 %v18514_v52, 0.0 }
 0xbf1   : > { %v16116_v11 = vpack.c.bf16 %v15967_v5, %v15963_v48  ;;  %v16118_v31 = vpack.c.bf16 %v15969_v32, %v15965_v25 }
 0xbf2   : > { %v16117_v10 = vpack.c.bf16 %v15968_v49, %v15964_v46  ;;  %v16119_v61 = vpack.c.bf16 %v15970_v15, %v15966_v12  ;;  %v15000_v60 = vpop.f32.mrb[8].mxu1  ;;  %v15706_v26 = vpop.f32.mrb[72].mxu0 }
 0xbf3   : > { %v18387_v39 = vadd.f32 %v15000_v60, %v13656_v3  ;;  %v18515_v50 = vadd.f32 %v15706_v26, %v13656_v3  ;;  %v15002_v6 = vpop.f32.mrb[9].mxu1  ;;  %v15708_v8 = vpop.f32.mrb[73].mxu0 }
 0xbf4   : > { %v18388_v24 = vadd.f32 %v15002_v6, %v13656_v3  ;;  %v18516_v17 = vadd.f32 %v15708_v8, %v13656_v3  ;;  %v15004_v20 = vpop.f32.mrb[10].mxu1  ;;  %v15710_v22 = vpop.f32.mrb[74].mxu0  ;;  %16229 = vmatprep.subr.bf16.mxu1 %v16117_v10  ;;  %16311 = vmatprep.subr.bf16.mxu0 %v16119_v61 }
 0xbf5   : > { %v18389_v43 = vadd.f32 %v15004_v20, %v13661_v51  ;;  %v18517_v56 = vadd.f32 %v15710_v22, %v13661_v51  ;;  %v15006_v2 = vpop.f32.mrb[11].mxu1  ;;  %v15712_v40 = vpop.f32.mrb[75].mxu0  ;;  %16230 = vmatpush1.bf16.msra.mxu1 %v16116_v11  ;;  %16312 = vmatpush1.bf16.msra.mxu0 %v16118_v31  ;;  %v15971_v25 = vmax.f32 %v18387_v39, 0.0  ;;  %v15973_v5 = vmax.f32 %v18515_v50, 0.0 }
 0xbf6   : > { %v18390_v52 = vadd.f32 %v15006_v2, %v13661_v51  ;;  %v18518_v48 = vadd.f32 %v15712_v40, %v13661_v51  ;;  %v15972_v12 = vmax.f32 %v18388_v24, 0.0  ;;  %v15974_v49 = vmax.f32 %v18516_v17, 0.0  ;;  %v13666_v60 = vpop.permute.xlu0 %13665  ;;  %v13671_v26 = vpop.permute.xlu1 %13670 }
 0xbf7   : > { %v15975_v32 = vmax.f32 %v18389_v43, 0.0  ;;  %v15977_v46 = vmax.f32 %v18517_v56, 0.0 }
 0xbf8   : > { %v15976_v15 = vmax.f32 %v18390_v52, 0.0  ;;  %v15978_v3 = vmax.f32 %v18518_v48, 0.0 }
 0xbf9   : > { %v16120_v10 = vpack.c.bf16 %v15975_v32, %v15971_v25  ;;  %v16122_v61 = vpack.c.bf16 %v15977_v46, %v15973_v5 }
 0xbfa   : > { %v16121_v6 = vpack.c.bf16 %v15976_v15, %v15972_v12  ;;  %v16123_v8 = vpack.c.bf16 %v15978_v3, %v15974_v49  ;;  %v15010_v20 = vpop.f32.mrb[12].mxu1  ;;  %v15716_v22 = vpop.f32.mrb[76].mxu0 }
 0xbfb   : > { %v18391_v11 = vadd.f32 %v15010_v20, %v13666_v60  ;;  %v18519_v31 = vadd.f32 %v15716_v22, %v13666_v60  ;;  %v15012_v2 = vpop.f32.mrb[13].mxu1  ;;  %v15718_v51 = vpop.f32.mrb[77].mxu0 }
 0xbfc   : > { %v18392_v39 = vadd.f32 %v15012_v2, %v13666_v60  ;;  %v18520_v50 = vadd.f32 %v15718_v51, %v13666_v60  ;;  %v15014_v43 = vpop.f32.mrb[14].mxu1  ;;  %v15720_v56 = vpop.f32.mrb[78].mxu0  ;;  %16231 = vmatprep.subr.bf16.mxu1 %v16121_v6  ;;  %16313 = vmatprep.subr.bf16.mxu0 %v16123_v8 }
 0xbfd   : > { %v18393_v24 = vadd.f32 %v15014_v43, %v13671_v26  ;;  %v18521_v17 = vadd.f32 %v15720_v56, %v13671_v26  ;;  %v15016_v40 = vpop.f32.mrb[15].mxu1  ;;  %v15722_v52 = vpop.f32.mrb[79].mxu0  ;;  %16232 = vmatpush1.bf16.msra.mxu1 %v16120_v10  ;;  %16314 = vmatpush1.bf16.msra.mxu0 %v16122_v61  ;;  %v15979_v5 = vmax.f32 %v18391_v11, 0.0  ;;  %v15981_v32 = vmax.f32 %v18519_v31, 0.0 }
 0xbfe   : > { %v18394_v48 = vadd.f32 %v15016_v40, %v13671_v26  ;;  %v18522_v25 = vadd.f32 %v15722_v52, %v13671_v26  ;;  %v15980_v49 = vmax.f32 %v18392_v39, 0.0  ;;  %v15982_v15 = vmax.f32 %v18520_v50, 0.0  ;;  %v13676_v20 = vpop.permute.xlu0 %13675  ;;  %v13681_v22 = vpop.permute.xlu1 %13680 }
 0xbff   : > { %v15983_v46 = vmax.f32 %v18393_v24, 0.0  ;;  %v15985_v12 = vmax.f32 %v18521_v17, 0.0 }
 0xc00   : > { %v15984_v3 = vmax.f32 %v18394_v48, 0.0  ;;  %v15986_v60 = vmax.f32 %v18522_v25, 0.0 }
 0xc01   : > { %v16124_v6 = vpack.c.bf16 %v15983_v46, %v15979_v5  ;;  %v16126_v8 = vpack.c.bf16 %v15985_v12, %v15981_v32 }
 0xc02   : > { %v16125_v2 = vpack.c.bf16 %v15984_v3, %v15980_v49  ;;  %v16127_v51 = vpack.c.bf16 %v15986_v60, %v15982_v15  ;;  %v15020_v43 = vpop.f32.mrb[16].mxu1  ;;  %v15726_v56 = vpop.f32.mrb[80].mxu0 }
 0xc03   : > { %v18395_v10 = vadd.f32 %v15020_v43, %v13676_v20  ;;  %v18523_v61 = vadd.f32 %v15726_v56, %v13676_v20  ;;  %v15022_v40 = vpop.f32.mrb[17].mxu1  ;;  %v15728_v26 = vpop.f32.mrb[81].mxu0 }
 0xc04   : > { %v18396_v11 = vadd.f32 %v15022_v40, %v13676_v20  ;;  %v18524_v31 = vadd.f32 %v15728_v26, %v13676_v20  ;;  %v15024_v24 = vpop.f32.mrb[18].mxu1  ;;  %v15730_v17 = vpop.f32.mrb[82].mxu0  ;;  %16233 = vmatprep.subr.bf16.mxu1 %v16125_v2  ;;  %16315 = vmatprep.subr.bf16.mxu0 %v16127_v51 }
 0xc05   : > { %v18397_v39 = vadd.f32 %v15024_v24, %v13681_v22  ;;  %v18525_v50 = vadd.f32 %v15730_v17, %v13681_v22  ;;  %v15026_v52 = vpop.f32.mrb[19].mxu1  ;;  %v15732_v48 = vpop.f32.mrb[83].mxu0  ;;  %16234 = vmatpush1.bf16.msra.mxu1 %v16124_v6  ;;  %16316 = vmatpush1.bf16.msra.mxu0 %v16126_v8  ;;  %v15987_v32 = vmax.f32 %v18395_v10, 0.0  ;;  %v15989_v46 = vmax.f32 %v18523_v61, 0.0 }
 0xc06   : > { %v18398_v25 = vadd.f32 %v15026_v52, %v13681_v22  ;;  %v18526_v5 = vadd.f32 %v15732_v48, %v13681_v22  ;;  %v15988_v15 = vmax.f32 %v18396_v11, 0.0  ;;  %v15990_v3 = vmax.f32 %v18524_v31, 0.0  ;;  %v13686_v43 = vpop.permute.xlu0 %13685  ;;  %v13691_v56 = vpop.permute.xlu1 %13690 }
 0xc07   : > { %v15991_v12 = vmax.f32 %v18397_v39, 0.0  ;;  %v15993_v49 = vmax.f32 %v18525_v50, 0.0 }
 0xc08   : > { %v15992_v60 = vmax.f32 %v18398_v25, 0.0  ;;  %v15994_v20 = vmax.f32 %v18526_v5, 0.0 }
 0xc09   : > { %v16128_v2 = vpack.c.bf16 %v15991_v12, %v15987_v32  ;;  %v16130_v51 = vpack.c.bf16 %v15993_v49, %v15989_v46 }
 0xc0a   : > { %v16129_v40 = vpack.c.bf16 %v15992_v60, %v15988_v15  ;;  %v16131_v26 = vpack.c.bf16 %v15994_v20, %v15990_v3  ;;  %v15030_v24 = vpop.f32.mrb[20].mxu1  ;;  %v15736_v17 = vpop.f32.mrb[84].mxu0 }
 0xc0b   : > { %v18399_v6 = vadd.f32 %v15030_v24, %v13686_v43  ;;  %v18527_v8 = vadd.f32 %v15736_v17, %v13686_v43  ;;  %v15032_v52 = vpop.f32.mrb[21].mxu1  ;;  %v15738_v22 = vpop.f32.mrb[85].mxu0 }
 0xc0c   : > { %v18400_v10 = vadd.f32 %v15032_v52, %v13686_v43  ;;  %v18528_v61 = vadd.f32 %v15738_v22, %v13686_v43  ;;  %v15034_v39 = vpop.f32.mrb[22].mxu1  ;;  %v15740_v50 = vpop.f32.mrb[86].mxu0  ;;  %16235 = vmatprep.subr.bf16.mxu1 %v16129_v40  ;;  %16317 = vmatprep.subr.bf16.mxu0 %v16131_v26 }
 0xc0d   : > { %v18401_v11 = vadd.f32 %v15034_v39, %v13691_v56  ;;  %v18529_v31 = vadd.f32 %v15740_v50, %v13691_v56  ;;  %v15036_v48 = vpop.f32.mrb[23].mxu1  ;;  %v15742_v25 = vpop.f32.mrb[87].mxu0  ;;  %16236 = vmatpush1.bf16.msra.mxu1 %v16128_v2  ;;  %16318 = vmatpush1.bf16.msra.mxu0 %v16130_v51  ;;  %v15995_v46 = vmax.f32 %v18399_v6, 0.0  ;;  %v15997_v12 = vmax.f32 %v18527_v8, 0.0 }
 0xc0e   : > { %v18402_v5 = vadd.f32 %v15036_v48, %v13691_v56  ;;  %v18530_v32 = vadd.f32 %v15742_v25, %v13691_v56  ;;  %v15996_v3 = vmax.f32 %v18400_v10, 0.0  ;;  %v15998_v60 = vmax.f32 %v18528_v61, 0.0  ;;  %v13696_v24 = vpop.permute.xlu0 %13695  ;;  %v13701_v17 = vpop.permute.xlu1 %13700 }
 0xc0f   : > { %v15999_v49 = vmax.f32 %v18401_v11, 0.0  ;;  %v16001_v15 = vmax.f32 %v18529_v31, 0.0 }
 0xc10   : > { %v16000_v20 = vmax.f32 %v18402_v5, 0.0  ;;  %v16002_v43 = vmax.f32 %v18530_v32, 0.0 }
 0xc11   : > { %v16132_v40 = vpack.c.bf16 %v15999_v49, %v15995_v46  ;;  %v16134_v26 = vpack.c.bf16 %v16001_v15, %v15997_v12 }
 0xc12   : > { %v16133_v52 = vpack.c.bf16 %v16000_v20, %v15996_v3  ;;  %v16135_v22 = vpack.c.bf16 %v16002_v43, %v15998_v60  ;;  %v15040_v39 = vpop.f32.mrb[24].mxu1  ;;  %v15746_v50 = vpop.f32.mrb[88].mxu0 }
 0xc13   : > { %v18403_v2 = vadd.f32 %v15040_v39, %v13696_v24  ;;  %v18531_v51 = vadd.f32 %v15746_v50, %v13696_v24  ;;  %v15042_v48 = vpop.f32.mrb[25].mxu1  ;;  %v15748_v56 = vpop.f32.mrb[89].mxu0 }
 0xc14   : > { %v18404_v6 = vadd.f32 %v15042_v48, %v13696_v24  ;;  %v18532_v8 = vadd.f32 %v15748_v56, %v13696_v24  ;;  %v15044_v11 = vpop.f32.mrb[26].mxu1  ;;  %v15750_v31 = vpop.f32.mrb[90].mxu0  ;;  %16237 = vmatprep.subr.bf16.mxu1 %v16133_v52  ;;  %16319 = vmatprep.subr.bf16.mxu0 %v16135_v22 }
 0xc15   : > { %v18405_v10 = vadd.f32 %v15044_v11, %v13701_v17  ;;  %v18533_v61 = vadd.f32 %v15750_v31, %v13701_v17  ;;  %v15046_v25 = vpop.f32.mrb[27].mxu1  ;;  %v15752_v5 = vpop.f32.mrb[91].mxu0  ;;  %16238 = vmatpush1.bf16.msra.mxu1 %v16132_v40  ;;  %16320 = vmatpush1.bf16.msra.mxu0 %v16134_v26  ;;  %v16003_v12 = vmax.f32 %v18403_v2, 0.0  ;;  %v16005_v49 = vmax.f32 %v18531_v51, 0.0 }
 0xc16   : > { %v18406_v32 = vadd.f32 %v15046_v25, %v13701_v17  ;;  %v18534_v46 = vadd.f32 %v15752_v5, %v13701_v17  ;;  %v16004_v60 = vmax.f32 %v18404_v6, 0.0  ;;  %v16006_v20 = vmax.f32 %v18532_v8, 0.0 }
 0xc17   : > { %v16007_v15 = vmax.f32 %v18405_v10, 0.0  ;;  %v16009_v3 = vmax.f32 %v18533_v61, 0.0 }
 0xc18   : > { %v16008_v43 = vmax.f32 %v18406_v32, 0.0  ;;  %v16010_v24 = vmax.f32 %v18534_v46, 0.0 }
 0xc19   : > { %v16136_v39 = vpack.c.bf16 %v16007_v15, %v16003_v12  ;;  %v16138_v50 = vpack.c.bf16 %v16009_v3, %v16005_v49 }
 0xc1a   : > { %v16137_v52 = vpack.c.bf16 %v16008_v43, %v16004_v60  ;;  %v16139_v22 = vpack.c.bf16 %v16010_v24, %v16006_v20 }
 0xc1c   : > { %16239 = vmatprep.subr.bf16.mxu1 %v16137_v52  ;;  %16321 = vmatprep.subr.bf16.mxu0 %v16139_v22 }
 0xc1d   : > { %16240 = vmatpush1.bf16.msra.mxu1 %v16136_v39  ;;  %16322 = vmatpush1.bf16.msra.mxu0 %v16138_v50 }
 0xc1e   : > { %16250 = vmatprep.subr.bf16.mxu1 %v22327_v28 }
 0xc20   : > { %16242 = vmatmul.mubr.bf16.vlgmr.msra.gmra.mrb[32].mxu1 %v22406_v38  ;;  %16324 = vmatmul.mubr.bf16.vlgmr.msra.gmra.mrb[92].mxu0 %v22406_v38 }
 0xc21   : > { %16251 = vmatpush1.bf16.msra.mxu1 %v22325_v14  ;;  %16282 = vmatprep.mubr.bf16.mxu1 %v22352_v13 }
 0xc22   : > { %16252 = vmatprep.subr.bf16.mxu1 %v22331_v62 }
 0xc25   : > { %16253 = vmatpush1.bf16.msra.mxu1 %v22329_v58 }
 0xc26   : > { %16254 = vmatprep.subr.bf16.mxu1 %v22335_v33 }
 0xc29   : > { %16255 = vmatpush1.bf16.msra.mxu1 %v22333_v30  ;;  %v16144_v30 = vpop.permute.xlu0 %16143 }
 0xc2a   : > { %16256 = vmatprep.subr.bf16.mxu1 %v22348_v35 }
 0xc2d   : > { %16257 = vmatpush1.bf16.msra.mxu1 %v22346_v18 }
 0xc2e   : > { %16258 = vmatprep.subr.bf16.mxu1 %v22357_v53 }
 0xc31   : > { %16259 = vmatpush1.bf16.msra.mxu1 %v22355_v36 }
 0xc32   : > { %16260 = vmatprep.subr.bf16.mxu1 %v22361_v41 }
 0xc35   : > { %16261 = vmatpush1.bf16.msra.mxu1 %v22359_v37 }
 0xc36   : > { %16262 = vmatprep.subr.bf16.mxu1 %v22365_v55 }
 0xc39   : > { %16263 = vmatpush1.bf16.msra.mxu1 %v22363_v63 }
 0xc3a   : > { %16264 = vmatprep.subr.bf16.mxu1 %v22369_v44 }
 0xc3d   : > { %16265 = vmatpush1.bf16.msra.mxu1 %v22367_v16  ;;  %v20469_v16 = vld [vmem:[#allocation2] sm:$0x77] }
 0xc3e   : > { %16266 = vmatprep.subr.bf16.mxu1 %v22373_v19  ;;  %v22524_v19 = vld [vmem:[#allocation26_spill] sm:$0xff] }
 0xc41   : > { %16267 = vmatpush1.bf16.msra.mxu1 %v22371_v1 }
 0xc42   : > { %16268 = vmatprep.subr.bf16.mxu1 %v22377_v9 }
 0xc45   : > { %16269 = vmatpush1.bf16.msra.mxu1 %v22375_v59 }
 0xc46   : > { %16270 = vmatprep.subr.bf16.mxu1 %v22381_v47 }
 0xc49   : > { %16271 = vmatpush1.bf16.msra.mxu1 %v22379_v54 }
 0xc4a   : > { %16272 = vmatprep.subr.bf16.mxu1 %v22385_v4 }
 0xc4d   : > { %16273 = vmatpush1.bf16.msra.mxu1 %v22383_v57 }
 0xc4e   : > { %16274 = vmatprep.subr.bf16.mxu1 %v22389_v27 }
 0xc51   : > { %16275 = vmatpush1.bf16.msra.mxu1 %v22387_v42 }
 0xc52   : > { %16276 = vmatprep.subr.bf16.mxu1 %v22393_v29 }
 0xc55   : > { %16277 = vmatpush1.bf16.msra.mxu1 %v22391_v0 }
 0xc56   : > { %16278 = vmatprep.subr.bf16.mxu1 %v22397_v21 }
 0xc59   : > { %16279 = vmatpush1.bf16.msra.mxu1 %v22395_v34  ;;  %v20470_v34 = vld [vmem:[#allocation2 + $0x8] sm:$0x77] }
 0xc5a   : > { %16280 = vmatprep.subr.bf16.mxu1 %v22403_v7 }
 0xc5d   : > { %16281 = vmatpush1.bf16.msra.mxu1 %v22399_v23  ;;  %v22526_v23 = vld [vmem:[#allocation27_spill] sm:$0xff] }
 0xc60   : > { %16283 = vmatmul.mubr.bf16.vlgmr.msra.gmra.mrb[36].mxu1 %v22344_v45 }
 0xc73   : > { %v16202_v14 = vpop.f32.mrb[28].mxu1 }
 0xc74   : > { %v16204_v28 = vpop.f32.mrb[29].mxu1  ;;  %v16203_v33 = vadd.f32 %v16202_v14, %v16144_v30 }
 0xc75   : > { %v16206_v58 = vpop.f32.mrb[30].mxu1  ;;  %v16205_v18 = vadd.f32 %v16204_v28, %v16144_v30 }
 0xc76   : > { %v16207_v62 = vpop.f32.mrb[31].mxu1 }
 0xcf3   : > { %v16243_v35 = vpop.f32.mrb[32].mxu1  ;;  %v16325_v13 = vpop.f32.mrb[92].mxu0 }
 0xcf4   : > { %v16244_v36 = vadd.f32 %v16243_v35, %v16203_v33  ;;  %v16245_v53 = vpop.f32.mrb[33].mxu1  ;;  %v16327_v37 = vpop.f32.mrb[93].mxu0 }
 0xcf5   : > { %v16246_v41 = vadd.f32 %v16245_v53, %v16205_v18  ;;  %v16247_v63 = vpop.f32.mrb[34].mxu1  ;;  %v16329_v55 = vpop.f32.mrb[94].mxu0 }
 0xcf6   : > { %v16332_v44 = vadd.f32 %v20469_v16, %v16244_v36  ;;  %v16248_v1 = vpop.f32.mrb[35].mxu1  ;;  %v16330_v45 = vpop.f32.mrb[95].mxu0 }
 0xcf7   : > { %v16333_v59 = vadd.f32 %v16246_v41, %v22524_v19 }
 0xcf9   : > { %v16340_v9 = vcombine.low %v16332_v44, %v16333_v59 }
 0xcfb   : > { %16344 = vst [vmem:[%s651_s29] sm:$0x77] %v16340_v9 }
 0xd33   : > { %v16284_v54 = vpop.f32.mrb[36].mxu1 }
 0xd34   : > { %v16285_v47 = vadd.f32 %v16284_v54, %v16144_v30  ;;  %v16286_v57 = vpop.f32.mrb[37].mxu1 }
 0xd35   : > { %v16287_v4 = vadd.f32 %v16286_v57, %v16144_v30  ;;  %v16288_v42 = vpop.f32.mrb[38].mxu1 }
 0xd36   : > { %v16326_v27 = vadd.f32 %v16325_v13, %v16285_v47  ;;  %v16289_v0 = vpop.f32.mrb[39].mxu1 }
 0xd37   : > { %v16328_v29 = vadd.f32 %v16327_v37, %v16287_v4 }
 0xd38   : > { %v16334_v21 = vadd.f32 %v20470_v34, %v16326_v27 }
 0xd39   : > { %v16335_v7 = vadd.f32 %v16328_v29, %v22526_v23 }
 0xd3b   : > { %v16341_v38 = vcombine.low %v16334_v21, %v16335_v7 }
 0xd3d   : > { %16345 = vst [vmem:[%s651_s29 + $0x8] sm:$0x77] %v16341_v38 }
 0xd3e PF: > { %p30_p7 = scmp.ge.s32.totalorder %s21153_s26, 4   ;;  %s22527_s18 = smov %s20799_s19 }
 0xd3f   : > { %s22528_s19 = smov %s20803_s20  ;;  %s22529_s20 = smov %s21164_s23 }
 0xd40   : > { %s22530_s21 = smov %s21153_s26  ;;  %32 = sbr.rel (!%p30_p7) target bundleno = 15 (0xf), region = 161 }
 0xd47   :  { %16367 = vsyncpa [#allocation4], 1 }
 0xd48   :  { %16369 = vsyncpa [#allocation4 + $0x1], 1 }
 0xd49   :  { %16370 = vsyncpa [#allocation6], 1 }
 0xd4a   :  { %16371 = vsyncpa [#allocation9], 1 }
 0xd4b   :  { %16372 = vsyncpa [#allocation12], 1 }
 0xd4c   :  { %16373 = vsyncpa [#allocation15], 1 }
 0xd4d   :  { %16374 = vsyncpa [#allocation18], 1 }

</bundles_post_ra>
